<compile_context>
chip_gen: v7x
topology: tpu7x:2x2x1
jax: 0.10.0
libtpu: 0.0.40
codegen_flags: <defaults>
</compile_context>

<pallas_src>
from collections import OrderedDict

import jax
import jax.numpy as jnp
from jax.experimental import pallas as pl
from jax.experimental.pallas import tpu as pltpu

# ----------------------------------------------------------------------------
# Network configuration (synthetic backbone + FPN)
# ----------------------------------------------------------------------------
BODY_CHANNELS = [3, 8, 16, 32]          # in -> stage1 -> stage2 -> stage3
IN_CHANNELS_LIST = [8, 16, 32]          # channels of returned intermediate layers
OUT_CHANNELS = 16                       # FPN out_channels
IMG_HW = 16                             # input spatial size
FEAT_HW = [8, 4, 2]                     # per-level feature map sizes

# Padded-input scratch geometry (shared by all 3x3 convs).  Interior columns start
# at _COL0 + 1 = 8 so interior stores are sublane-aligned; column _COL0 is the left halo.
_PAD_H = 18                             # >= max(H) + 2 (per image)
_PAD_W = 32                             # >= _COL0 + max(W) + 2
_PAD_C = 16                             # >= max Cin over all 3x3 convs
_COL0 = 7
_WSLAB_COLS = 32                        # max Cout over all convs


# ----------------------------------------------------------------------------
# Packed-weight layout (single source of truth for wrapper packing + kernel slicing)
# ----------------------------------------------------------------------------
def _pack_layout():
    convs = []
    for i in range(3):
        convs.append((f"body{i}", 3, BODY_CHANNELS[i], BODY_CHANNELS[i + 1]))
    for i in range(3):
        convs.append((f"inner{i}", 1, IN_CHANNELS_LIST[i], OUT_CHANNELS))
    for i in range(3):
        convs.append((f"layer{i}", 3, OUT_CHANNELS, OUT_CHANNELS))
    layout = {}
    off = 0
    for bidx, (name, k, cin, cout) in enumerate(convs):
        rows = k * k * cin              # im2col K for 3x3, Cin for 1x1
        layout[name] = dict(off=off, rows=rows, cin=cin, cout=cout, bidx=bidx)
        off = ((off + rows + 7) // 8) * 8   # keep every block's start 8-row aligned
    return layout, off


_PARAM_KEYS = {
    "body0": ("body_w0", "body_b0"), "body1": ("body_w1", "body_b1"),
    "body2": ("body_w2", "body_b2"),
    "inner0": ("fpn_inner_w0", "fpn_inner_b0"), "inner1": ("fpn_inner_w1", "fpn_inner_b1"),
    "inner2": ("fpn_inner_w2", "fpn_inner_b2"),
    "layer0": ("fpn_layer_w0", "fpn_layer_b0"), "layer1": ("fpn_layer_w1", "fpn_layer_b1"),
    "layer2": ("fpn_layer_w2", "fpn_layer_b2"),
}


def _pack_params(params):
    """Pack all conv weights (im2col rows) and biases into two slabs."""
    layout, total_rows = _pack_layout()
    w_slab = jnp.zeros((total_rows, _WSLAB_COLS), jnp.float32)
    b_slab = jnp.zeros((len(layout), _WSLAB_COLS), jnp.float32)
    for name, info in layout.items():
        wkey, bkey = _PARAM_KEYS[name]
        w = jnp.asarray(params[wkey], jnp.float32).reshape(info["rows"], info["cout"])
        b = jnp.asarray(params[bkey], jnp.float32).reshape(info["cout"])
        w_slab = w_slab.at[info["off"]:info["off"] + info["rows"], :info["cout"]].set(w)
        b_slab = b_slab.at[info["bidx"], :info["cout"]].set(b)
    return w_slab, b_slab


# ----------------------------------------------------------------------------
# Fused Pallas kernel: whole BackboneWithFPN forward for the whole batch
# ----------------------------------------------------------------------------
def _make_fused_kernel(N, layout):
    H0, H1, H2 = FEAT_HW
    C = OUT_CHANNELS

    def kernel(x_ref, w_ref, b_ref, o_ref, pad_ref):
        def read_w(name):
            info = layout[name]
            return w_ref[pl.ds(info["off"], info["rows"]), pl.ds(0, info["cout"])]

        def read_b(name):
            info = layout[name]
            return b_ref[pl.ds(info["bidx"], 1), pl.ds(0, info["cout"])]

        def conv3x3(xs, name, stride, relu):
            """xs: list of N per-image (Hin, Win, cin) values -> (N*Hout*Wout, cout)."""
            info = layout[name]
            cin, cout = info["cin"], info["cout"]
            Hin, Win, _ = xs[0].shape
            Hout = (Hin + 2 - 3) // stride + 1
            Wout = (Win + 2 - 3) // stride + 1
            M = Hout * Wout
            zrow = jnp.zeros((1, Win + 2, cin), jnp.float32)
            zcol = jnp.zeros((Hin, 1, cin), jnp.float32)
            cols = []
            for n in range(N):
                rb = n * _PAD_H
                # Zero ONLY the 1-px halo ring (channels < cin).  The interior is fully
                # overwritten below; nothing outside ring+interior is ever read.
                pad_ref[pl.ds(rb, 1), pl.ds(_COL0, Win + 2), pl.ds(0, cin)] = zrow
                pad_ref[pl.ds(rb + Hin + 1, 1), pl.ds(_COL0, Win + 2), pl.ds(0, cin)] = zrow
                pad_ref[pl.ds(rb + 1, Hin), pl.ds(_COL0, 1), pl.ds(0, cin)] = zcol
                pad_ref[pl.ds(rb + 1, Hin), pl.ds(_COL0 + Win + 1, 1), pl.ds(0, cin)] = zcol
                pad_ref[pl.ds(rb + 1, Hin), pl.ds(_COL0 + 1, Win), pl.ds(0, cin)] = xs[n]
                # im2col: 9 taps concatenated along lanes -> (M, 9*cin)
                taps = []
                for t in range(9):
                    i, j = t // 3, t % 3
                    if stride == 1:
                        tap = pad_ref[pl.ds(rb + i, Hout),
                                      pl.ds(_COL0 + j, Wout),
                                      pl.ds(0, cin)]
                    else:
                        tap = pad_ref[pl.ds(rb + i, Hout, stride),
                                      pl.ds(_COL0 + j, Wout, stride),
                                      pl.ds(0, cin)]
                    taps.append(tap.reshape(M, cin))
                cols.append(jnp.concatenate(taps, axis=-1))
            col = cols[0] if N == 1 else jnp.concatenate(cols, axis=0)   # (N*M, 9*cin)
            acc = jnp.dot(col, read_w(name),
                          preferred_element_type=jnp.float32) + read_b(name)
            if relu:
                acc = jnp.maximum(acc, 0.0)
            return acc                                                    # (N*M, cout)

        def conv1x1(x2, name):
            return (jnp.dot(x2, read_w(name),
                            preferred_element_type=jnp.float32) + read_b(name))

        def split(x2, h, c):
            # (N*h*h, c) batch-folded value -> list of N per-image (h, h, c) values.
            m = h * h
            return [x2[n * m:(n + 1) * m, :].reshape(h, h, c) for n in range(N)]

        def up2x(x3):
            # Nearest-neighbor 2x upsample (== F.interpolate(mode='nearest') at exact 2x).
            h, w, c = x3.shape
            y = jnp.broadcast_to(x3[:, None], (h, 2, w, c)).reshape(2 * h * w, c)
            z = jnp.broadcast_to(y[:, None, :], (2 * h * w, 2, c)).reshape(4 * h * w, c)
            return z.reshape(2 * h, 2 * w, c)

        # ---- backbone body (IntermediateLayerGetter over synthetic backbone) ----
        xs = [x_ref[n] for n in range(N)]                                   # (H, W, 3)
        f0 = conv3x3(xs, "body0", 2, True)                                  # (N*64, 8)
        f1 = conv3x3(split(f0, H0, BODY_CHANNELS[1]), "body1", 2, True)     # (N*16, 16)
        f2 = conv3x3(split(f1, H1, BODY_CHANNELS[2]), "body2", 2, True)     # (N*4, 32)

        # ---- FPN lateral 1x1 convs (batch-folded single dots) ----
        i0 = conv1x1(f0, "inner0")                                          # (N*64, C)
        i1 = conv1x1(f1, "inner1")                                          # (N*16, C)
        i2 = conv1x1(f2, "inner2")                                          # (N*4,  C)

        # ---- FPN top-down path: nearest upsample + lateral add + 3x3 layer conv ----
        last = split(i2, H2, C)
        r2 = conv3x3(last, "layer2", 1, False)                              # (N*4, C)

        i1s = split(i1, H1, C)
        last = [i1s[n] + up2x(last[n]) for n in range(N)]
        r1 = conv3x3(last, "layer1", 1, False)                              # (N*16, C)

        i0s = split(i0, H0, C)
        last = [i0s[n] + up2x(last[n]) for n in range(N)]
        r0 = conv3x3(last, "layer0", 1, False)                              # (N*64, C)

        # ---- lane-dense packed output: (C, N*64 | N*16 | N*4), transposed levels ----
        w0, w1, w2 = N * H0 * H0, N * H1 * H1, N * H2 * H2
        o_ref[:, pl.ds(0, w0)] = r0.T
        o_ref[:, pl.ds(w0, w1)] = r1.T
        o_ref[:, pl.ds(w0 + w1, w2)] = r2.T

    return kernel


# ----------------------------------------------------------------------------
# Host-side wrapper (mirrors BackboneWithFPN.forward: body -> fpn -> OrderedDict, NCHW)
# ----------------------------------------------------------------------------
def backbone_with_fpn_forward(params, x_nchw):
    x = jnp.transpose(x_nchw, (0, 2, 3, 1)).astype(jnp.float32)   # NCHW -> NHWC
    N, H, W, Cin = x.shape
    layout, _ = _pack_layout()
    w_slab, b_slab = _pack_params(params)

    widths = [N * h * h for h in FEAT_HW]
    out_cols = sum(widths)
    kernel = _make_fused_kernel(N, layout)

    out = pl.pallas_call(
        kernel,
        out_shape=jax.ShapeDtypeStruct((OUT_CHANNELS, out_cols), jnp.float32),
        grid=(1,),
        in_specs=[
            pl.BlockSpec((N, H, W, Cin), lambda i: (0, 0, 0, 0)),
            pl.BlockSpec(w_slab.shape, lambda i: (0, 0)),
            pl.BlockSpec(b_slab.shape, lambda i: (0, 0)),
        ],
        out_specs=pl.BlockSpec((OUT_CHANNELS, out_cols), lambda i: (0, 0)),
        scratch_shapes=[pltpu.VMEM((N * _PAD_H, _PAD_W, _PAD_C), jnp.float32)],
        compiler_params=pltpu.CompilerParams(dimension_semantics=("arbitrary",)),
        # TODO(synk): at real resolutions re-tile (H strips, 128-chunk C) and set
        # vmem_limit_bytes explicitly against v7x's 64 MiB VMEM.
    )(x, w_slab, b_slab)

    # Undo the in-kernel transpose while producing the NCHW OrderedDict the
    # PyTorch module returns (columns of each block are ordered (n, oh, ow)).
    result = OrderedDict()
    off = 0
    for lvl, (h, wd) in enumerate(zip(FEAT_HW, widths)):
        blk = out[:, off:off + wd]                                   # (C, N*h*h)
        result[str(lvl)] = jnp.transpose(blk.reshape(OUT_CHANNELS, N, h, h),
                                         (1, 0, 2, 3))               # (N, C, h, h)
        off += wd
    return result


# ----------------------------------------------------------------------------
# Deterministic synthetic parameters
# ----------------------------------------------------------------------------
def init_params(key):
    params = {}

    def conv_init(k, kh, kw, cin, cout):
        kw_, kb_ = jax.random.split(k)
        fan_in = kh * kw * cin
        w = jax.random.normal(kw_, (kh, kw, cin, cout), jnp.float32) * (2.0 / fan_in) ** 0.5
        b = jax.random.normal(kb_, (cout,), jnp.float32) * 0.01
        return w, b

    keys = jax.random.split(key, 16)
    ki = 0
    for i in range(3):
        w, b = conv_init(keys[ki], 3, 3, BODY_CHANNELS[i], BODY_CHANNELS[i + 1]); ki += 1
        params[f"body_w{i}"], params[f"body_b{i}"] = w, b
    for i, cin in enumerate(IN_CHANNELS_LIST):
        w, b = conv_init(keys[ki], 1, 1, cin, OUT_CHANNELS); ki += 1
        params[f"fpn_inner_w{i}"], params[f"fpn_inner_b{i}"] = w, b
        w, b = conv_init(keys[ki], 3, 3, OUT_CHANNELS, OUT_CHANNELS); ki += 1
        params[f"fpn_layer_w{i}"], params[f"fpn_layer_b{i}"] = w, b
    return params


# ----------------------------------------------------------------------------
# Pure-JAX reference (correctness cross-check)
# ----------------------------------------------------------------------------
def _reference_forward(params, x_nchw):
    def conv(x, w, b, stride, padding, relu):
        y = jax.lax.conv_general_dilated(
            x, jnp.asarray(w, jnp.float32), (stride, stride),
            [(padding, padding), (padding, padding)],
            dimension_numbers=("NHWC", "HWIO", "NHWC"),
            precision=jax.lax.Precision.HIGHEST)
        y = y + b.reshape(1, 1, 1, -1)
        return jnp.maximum(y, 0.0) if relu else y

    x = jnp.transpose(x_nchw, (0, 2, 3, 1)).astype(jnp.float32)
    feats = []
    h = x
    for i in range(3):
        h = conv(h, params[f"body_w{i}"], params[f"body_b{i}"], 2, 1, True)
        feats.append(h)
    inner = [conv(f, params[f"fpn_inner_w{i}"], params[f"fpn_inner_b{i}"], 1, 0, False)
             for i, f in enumerate(feats)]
    last = inner[-1]
    results = [conv(last, params["fpn_layer_w2"], params["fpn_layer_b2"], 1, 1, False)]
    for idx in (1, 0):
        up = jnp.repeat(jnp.repeat(last, 2, axis=1), 2, axis=2)
        last = inner[idx] + up
        results.insert(0, conv(last, params[f"fpn_layer_w{idx}"],
                               params[f"fpn_layer_b{idx}"], 1, 1, False))
    return OrderedDict((str(i), jnp.transpose(r, (0, 3, 1, 2)))
                       for i, r in enumerate(results))


# ----------------------------------------------------------------------------
if __name__ == "__main__":
    key = jax.random.PRNGKey(0)
    pkey, xkey = jax.random.split(key)
    params = init_params(pkey)

    x = jax.random.normal(xkey, (2, 3, IMG_HW, IMG_HW), jnp.float32)   # NCHW like PyTorch

    fwd = jax.jit(backbone_with_fpn_forward)
    out = jax.block_until_ready(fwd(params, x))

    expected = {"0": (2, OUT_CHANNELS, 8, 8),
                "1": (2, OUT_CHANNELS, 4, 4),
                "2": (2, OUT_CHANNELS, 2, 2)}
    ref = _reference_forward(params, x)
    for k, v in out.items():
        assert v.shape == expected[k], (k, v.shape, expected[k])
        assert bool(jnp.all(jnp.isfinite(v))), k
        # Tolerance covers MXU default-precision f32 matmuls vs the HIGHEST-precision
        # XLA reference; tighten only if the kernel dots are forced to HIGHEST too.
        err = float(jnp.max(jnp.abs(v - ref[k])))
        assert err < 5e-2, (k, err)

    print("KERNEL_OK")
</pallas_src>

<mosaic_0001>
module attributes {stable_mosaic.version = 11 : i64} {
  func.func @kernel(%arg0: i32, %arg1: memref<2x16x16x3xf32, #tpu.memory_space<vmem>>, %arg2: memref<736x32xf32, #tpu.memory_space<vmem>>, %arg3: memref<9x32xf32, #tpu.memory_space<vmem>>, %arg4: memref<16x168xf32, #tpu.memory_space<vmem>>, %arg5: memref<36x32x16xf32, #tpu.memory_space<vmem>>) attributes {dimension_semantics = [#tpu.dimension_semantics<arbitrary>], iteration_bounds = array<i64: 1>, scalar_prefetch = 0 : i64, scratch_operands = 1 : i64, tpu.core_type = #tpu.core_type<tc>, window_params = [{pipeline_mode = #tpu.pipeline_mode<synchronous>, transform_indices = @transform_0, window_bounds = array<i64: 2, 16, 16, 3>}, {pipeline_mode = #tpu.pipeline_mode<synchronous>, transform_indices = @transform_1, window_bounds = array<i64: 736, 32>}, {pipeline_mode = #tpu.pipeline_mode<synchronous>, transform_indices = @transform_2, window_bounds = array<i64: 9, 32>}, {pipeline_mode = #tpu.pipeline_mode<synchronous>, transform_indices = @transform_3, window_bounds = array<i64: 16, 168>}]} {
    %c0 = arith.constant 0 : index
    %c0_0 = arith.constant 0 : index
    %c0_1 = arith.constant 0 : index
    %c0_2 = arith.constant 0 : index
    %0 = vector.load %arg1[%c0, %c0_0, %c0_1, %c0_2] : memref<2x16x16x3xf32, #tpu.memory_space<vmem>>, vector<1x16x16x3xf32>
    %1 = vector.shape_cast %0 : vector<1x16x16x3xf32> to vector<16x16x3xf32>
    %c1 = arith.constant 1 : index
    %c0_3 = arith.constant 0 : index
    %c0_4 = arith.constant 0 : index
    %c0_5 = arith.constant 0 : index
    %2 = vector.load %arg1[%c1, %c0_3, %c0_4, %c0_5] : memref<2x16x16x3xf32, #tpu.memory_space<vmem>>, vector<1x16x16x3xf32>
    %3 = vector.shape_cast %2 : vector<1x16x16x3xf32> to vector<16x16x3xf32>
    %cst = arith.constant 0.000000e+00 : f32
    %4 = vector.broadcast %cst : f32 to vector<1x18x3xf32>
    %cst_6 = arith.constant 0.000000e+00 : f32
    %5 = vector.broadcast %cst_6 : f32 to vector<16x1x3xf32>
    %c0_7 = arith.constant 0 : index
    %c7 = arith.constant 7 : index
    %c0_8 = arith.constant 0 : index
    %6 = vector.load %arg5[%c0_7, %c7, %c0_8] : memref<36x32x16xf32, #tpu.memory_space<vmem>>, vector<1x18x3xf32>
    tpu.vector_store %arg5[%c0_7, %c7, %c0_8], %4 {strides = array<i32>} : memref<36x32x16xf32, #tpu.memory_space<vmem>>, vector<1x18x3xf32>,
    %c17 = arith.constant 17 : index
    %c7_9 = arith.constant 7 : index
    %c0_10 = arith.constant 0 : index
    %7 = vector.load %arg5[%c17, %c7_9, %c0_10] : memref<36x32x16xf32, #tpu.memory_space<vmem>>, vector<1x18x3xf32>
    tpu.vector_store %arg5[%c17, %c7_9, %c0_10], %4 {strides = array<i32>} : memref<36x32x16xf32, #tpu.memory_space<vmem>>, vector<1x18x3xf32>,
    %c1_11 = arith.constant 1 : index
    %c7_12 = arith.constant 7 : index
    %c0_13 = arith.constant 0 : index
    %8 = vector.load %arg5[%c1_11, %c7_12, %c0_13] : memref<36x32x16xf32, #tpu.memory_space<vmem>>, vector<16x1x3xf32>
    tpu.vector_store %arg5[%c1_11, %c7_12, %c0_13], %5 {strides = array<i32>} : memref<36x32x16xf32, #tpu.memory_space<vmem>>, vector<16x1x3xf32>,
    %c1_14 = arith.constant 1 : index
    %c24 = arith.constant 24 : index
    %c0_15 = arith.constant 0 : index
    %9 = vector.load %arg5[%c1_14, %c24, %c0_15] : memref<36x32x16xf32, #tpu.memory_space<vmem>>, vector<16x1x3xf32>
    tpu.vector_store %arg5[%c1_14, %c24, %c0_15], %5 {strides = array<i32>} : memref<36x32x16xf32, #tpu.memory_space<vmem>>, vector<16x1x3xf32>,
    %c1_16 = arith.constant 1 : index
    %c8 = arith.constant 8 : index
    %c0_17 = arith.constant 0 : index
    %10 = vector.load %arg5[%c1_16, %c8, %c0_17] : memref<36x32x16xf32, #tpu.memory_space<vmem>>, vector<16x16x3xf32>
    tpu.vector_store %arg5[%c1_16, %c8, %c0_17], %1 {strides = array<i32>} : memref<36x32x16xf32, #tpu.memory_space<vmem>>, vector<16x16x3xf32>,
    %c0_18 = arith.constant 0 : index
    %c7_19 = arith.constant 7 : index
    %c0_20 = arith.constant 0 : index
    %11 = tpu.strided_load %arg5[%c0_18, %c7_19, %c0_20] {strides = array<i32: 2, 2, 1>} : memref<36x32x16xf32, #tpu.memory_space<vmem>>, vector<8x8x3xf32>
    %12 = vector.shape_cast %11 : vector<8x8x3xf32> to vector<64x3xf32>
    %c0_21 = arith.constant 0 : index
    %c8_22 = arith.constant 8 : index
    %c0_23 = arith.constant 0 : index
    %13 = tpu.strided_load %arg5[%c0_21, %c8_22, %c0_23] {strides = array<i32: 2, 2, 1>} : memref<36x32x16xf32, #tpu.memory_space<vmem>>, vector<8x8x3xf32>
    %14 = vector.shape_cast %13 : vector<8x8x3xf32> to vector<64x3xf32>
    %c0_24 = arith.constant 0 : index
    %c9 = arith.constant 9 : index
    %c0_25 = arith.constant 0 : index
    %15 = tpu.strided_load %arg5[%c0_24, %c9, %c0_25] {strides = array<i32: 2, 2, 1>} : memref<36x32x16xf32, #tpu.memory_space<vmem>>, vector<8x8x3xf32>
    %16 = vector.shape_cast %15 : vector<8x8x3xf32> to vector<64x3xf32>
    %c1_26 = arith.constant 1 : index
    %c7_27 = arith.constant 7 : index
    %c0_28 = arith.constant 0 : index
    %17 = tpu.strided_load %arg5[%c1_26, %c7_27, %c0_28] {strides = array<i32: 2, 2, 1>} : memref<36x32x16xf32, #tpu.memory_space<vmem>>, vector<8x8x3xf32>
    %18 = vector.shape_cast %17 : vector<8x8x3xf32> to vector<64x3xf32>
    %c1_29 = arith.constant 1 : index
    %c8_30 = arith.constant 8 : index
    %c0_31 = arith.constant 0 : index
    %19 = tpu.strided_load %arg5[%c1_29, %c8_30, %c0_31] {strides = array<i32: 2, 2, 1>} : memref<36x32x16xf32, #tpu.memory_space<vmem>>, vector<8x8x3xf32>
    %20 = vector.shape_cast %19 : vector<8x8x3xf32> to vector<64x3xf32>
    %c1_32 = arith.constant 1 : index
    %c9_33 = arith.constant 9 : index
    %c0_34 = arith.constant 0 : index
    %21 = tpu.strided_load %arg5[%c1_32, %c9_33, %c0_34] {strides = array<i32: 2, 2, 1>} : memref<36x32x16xf32, #tpu.memory_space<vmem>>, vector<8x8x3xf32>
    %22 = vector.shape_cast %21 : vector<8x8x3xf32> to vector<64x3xf32>
    %c2 = arith.constant 2 : index
    %c7_35 = arith.constant 7 : index
    %c0_36 = arith.constant 0 : index
    %23 = tpu.strided_load %arg5[%c2, %c7_35, %c0_36] {strides = array<i32: 2, 2, 1>} : memref<36x32x16xf32, #tpu.memory_space<vmem>>, vector<8x8x3xf32>
    %24 = vector.shape_cast %23 : vector<8x8x3xf32> to vector<64x3xf32>
    %c2_37 = arith.constant 2 : index
    %c8_38 = arith.constant 8 : index
    %c0_39 = arith.constant 0 : index
    %25 = tpu.strided_load %arg5[%c2_37, %c8_38, %c0_39] {strides = array<i32: 2, 2, 1>} : memref<36x32x16xf32, #tpu.memory_space<vmem>>, vector<8x8x3xf32>
    %26 = vector.shape_cast %25 : vector<8x8x3xf32> to vector<64x3xf32>
    %c2_40 = arith.constant 2 : index
    %c9_41 = arith.constant 9 : index
    %c0_42 = arith.constant 0 : index
    %27 = tpu.strided_load %arg5[%c2_40, %c9_41, %c0_42] {strides = array<i32: 2, 2, 1>} : memref<36x32x16xf32, #tpu.memory_space<vmem>>, vector<8x8x3xf32>
    %28 = vector.shape_cast %27 : vector<8x8x3xf32> to vector<64x3xf32>
    %29 = tpu.concatenate %12, %14, %16, %18, %20, %22, %24, %26, %28 in 1 : vector<64x3xf32>, vector<64x3xf32>, vector<64x3xf32>, vector<64x3xf32>, vector<64x3xf32>, vector<64x3xf32>, vector<64x3xf32>, vector<64x3xf32>, vector<64x3xf32> -> vector<64x27xf32>
    %c18 = arith.constant 18 : index
    %c7_43 = arith.constant 7 : index
    %c0_44 = arith.constant 0 : index
    %30 = vector.load %arg5[%c18, %c7_43, %c0_44] : memref<36x32x16xf32, #tpu.memory_space<vmem>>, vector<1x18x3xf32>
    tpu.vector_store %arg5[%c18, %c7_43, %c0_44], %4 {strides = array<i32>} : memref<36x32x16xf32, #tpu.memory_space<vmem>>, vector<1x18x3xf32>,
    %c35 = arith.constant 35 : index
    %c7_45 = arith.constant 7 : index
    %c0_46 = arith.constant 0 : index
    %31 = vector.load %arg5[%c35, %c7_45, %c0_46] : memref<36x32x16xf32, #tpu.memory_space<vmem>>, vector<1x18x3xf32>
    tpu.vector_store %arg5[%c35, %c7_45, %c0_46], %4 {strides = array<i32>} : memref<36x32x16xf32, #tpu.memory_space<vmem>>, vector<1x18x3xf32>,
    %c19 = arith.constant 19 : index
    %c7_47 = arith.constant 7 : index
    %c0_48 = arith.constant 0 : index
    %32 = vector.load %arg5[%c19, %c7_47, %c0_48] : memref<36x32x16xf32, #tpu.memory_space<vmem>>, vector<16x1x3xf32>
    tpu.vector_store %arg5[%c19, %c7_47, %c0_48], %5 {strides = array<i32>} : memref<36x32x16xf32, #tpu.memory_space<vmem>>, vector<16x1x3xf32>,
    %c19_49 = arith.constant 19 : index
    %c24_50 = arith.constant 24 : index
    %c0_51 = arith.constant 0 : index
    %33 = vector.load %arg5[%c19_49, %c24_50, %c0_51] : memref<36x32x16xf32, #tpu.memory_space<vmem>>, vector<16x1x3xf32>
    tpu.vector_store %arg5[%c19_49, %c24_50, %c0_51], %5 {strides = array<i32>} : memref<36x32x16xf32, #tpu.memory_space<vmem>>, vector<16x1x3xf32>,
    %c19_52 = arith.constant 19 : index
    %c8_53 = arith.constant 8 : index
    %c0_54 = arith.constant 0 : index
    %34 = vector.load %arg5[%c19_52, %c8_53, %c0_54] : memref<36x32x16xf32, #tpu.memory_space<vmem>>, vector<16x16x3xf32>
    tpu.vector_store %arg5[%c19_52, %c8_53, %c0_54], %3 {strides = array<i32>} : memref<36x32x16xf32, #tpu.memory_space<vmem>>, vector<16x16x3xf32>,
    %c18_55 = arith.constant 18 : index
    %c7_56 = arith.constant 7 : index
    %c0_57 = arith.constant 0 : index
    %35 = tpu.strided_load %arg5[%c18_55, %c7_56, %c0_57] {strides = array<i32: 2, 2, 1>} : memref<36x32x16xf32, #tpu.memory_space<vmem>>, vector<8x8x3xf32>
    %36 = vector.shape_cast %35 : vector<8x8x3xf32> to vector<64x3xf32>
    %c18_58 = arith.constant 18 : index
    %c8_59 = arith.constant 8 : index
    %c0_60 = arith.constant 0 : index
    %37 = tpu.strided_load %arg5[%c18_58, %c8_59, %c0_60] {strides = array<i32: 2, 2, 1>} : memref<36x32x16xf32, #tpu.memory_space<vmem>>, vector<8x8x3xf32>
    %38 = vector.shape_cast %37 : vector<8x8x3xf32> to vector<64x3xf32>
    %c18_61 = arith.constant 18 : index
    %c9_62 = arith.constant 9 : index
    %c0_63 = arith.constant 0 : index
    %39 = tpu.strided_load %arg5[%c18_61, %c9_62, %c0_63] {strides = array<i32: 2, 2, 1>} : memref<36x32x16xf32, #tpu.memory_space<vmem>>, vector<8x8x3xf32>
    %40 = vector.shape_cast %39 : vector<8x8x3xf32> to vector<64x3xf32>
    %c19_64 = arith.constant 19 : index
    %c7_65 = arith.constant 7 : index
    %c0_66 = arith.constant 0 : index
    %41 = tpu.strided_load %arg5[%c19_64, %c7_65, %c0_66] {strides = array<i32: 2, 2, 1>} : memref<36x32x16xf32, #tpu.memory_space<vmem>>, vector<8x8x3xf32>
    %42 = vector.shape_cast %41 : vector<8x8x3xf32> to vector<64x3xf32>
    %c19_67 = arith.constant 19 : index
    %c8_68 = arith.constant 8 : index
    %c0_69 = arith.constant 0 : index
    %43 = tpu.strided_load %arg5[%c19_67, %c8_68, %c0_69] {strides = array<i32: 2, 2, 1>} : memref<36x32x16xf32, #tpu.memory_space<vmem>>, vector<8x8x3xf32>
    %44 = vector.shape_cast %43 : vector<8x8x3xf32> to vector<64x3xf32>
    %c19_70 = arith.constant 19 : index
    %c9_71 = arith.constant 9 : index
    %c0_72 = arith.constant 0 : index
    %45 = tpu.strided_load %arg5[%c19_70, %c9_71, %c0_72] {strides = array<i32: 2, 2, 1>} : memref<36x32x16xf32, #tpu.memory_space<vmem>>, vector<8x8x3xf32>
    %46 = vector.shape_cast %45 : vector<8x8x3xf32> to vector<64x3xf32>
    %c20 = arith.constant 20 : index
    %c7_73 = arith.constant 7 : index
    %c0_74 = arith.constant 0 : index
    %47 = tpu.strided_load %arg5[%c20, %c7_73, %c0_74] {strides = array<i32: 2, 2, 1>} : memref<36x32x16xf32, #tpu.memory_space<vmem>>, vector<8x8x3xf32>
    %48 = vector.shape_cast %47 : vector<8x8x3xf32> to vector<64x3xf32>
    %c20_75 = arith.constant 20 : index
    %c8_76 = arith.constant 8 : index
    %c0_77 = arith.constant 0 : index
    %49 = tpu.strided_load %arg5[%c20_75, %c8_76, %c0_77] {strides = array<i32: 2, 2, 1>} : memref<36x32x16xf32, #tpu.memory_space<vmem>>, vector<8x8x3xf32>
    %50 = vector.shape_cast %49 : vector<8x8x3xf32> to vector<64x3xf32>
    %c20_78 = arith.constant 20 : index
    %c9_79 = arith.constant 9 : index
    %c0_80 = arith.constant 0 : index
    %51 = tpu.strided_load %arg5[%c20_78, %c9_79, %c0_80] {strides = array<i32: 2, 2, 1>} : memref<36x32x16xf32, #tpu.memory_space<vmem>>, vector<8x8x3xf32>
    %52 = vector.shape_cast %51 : vector<8x8x3xf32> to vector<64x3xf32>
    %53 = tpu.concatenate %36, %38, %40, %42, %44, %46, %48, %50, %52 in 1 : vector<64x3xf32>, vector<64x3xf32>, vector<64x3xf32>, vector<64x3xf32>, vector<64x3xf32>, vector<64x3xf32>, vector<64x3xf32>, vector<64x3xf32>, vector<64x3xf32> -> vector<64x27xf32>
    %54 = tpu.concatenate %29, %53 in 0 : vector<64x27xf32>, vector<64x27xf32> -> vector<128x27xf32>
    %c0_81 = arith.constant 0 : index
    %c0_82 = arith.constant 0 : index
    %55 = vector.load %arg2[%c0_81, %c0_82] : memref<736x32xf32, #tpu.memory_space<vmem>>, vector<27x8xf32>
    %cst_83 = arith.constant dense<0.000000e+00> : vector<128x8xf32>
    %56 = tpu.matmul %54, %55, %cst_83 {dimension_numbers = #tpu.dot_dimension_numbers<[1], [0], [0], [1], [0, 0, 1, 1], [], []>} : vector<128x27xf32>, vector<27x8xf32>, vector<128x8xf32> -> vector<128x8xf32>
    %c0_84 = arith.constant 0 : index
    %c0_85 = arith.constant 0 : index
    %57 = vector.load %arg3[%c0_84, %c0_85] : memref<9x32xf32, #tpu.memory_space<vmem>>, vector<1x8xf32>
    %58 = vector.broadcast %57 : vector<1x8xf32> to vector<128x8xf32>
    %59 = arith.addf %56, %58 : vector<128x8xf32>
    %cst_86 = arith.constant 0.000000e+00 : f32
    %60 = vector.broadcast %cst_86 : f32 to vector<128x8xf32>
    %61 = arith.maximumf %59, %60 : vector<128x8xf32>
    %62 = vector.extract_strided_slice %61 {offsets = [0, 0], sizes = [64, 8], strides = [1, 1]} : vector<128x8xf32> to vector<64x8xf32>
    %63 = vector.shape_cast %62 : vector<64x8xf32> to vector<8x8x8xf32>
    %64 = vector.extract_strided_slice %61 {offsets = [64, 0], sizes = [64, 8], strides = [1, 1]} : vector<128x8xf32> to vector<64x8xf32>
    %65 = vector.shape_cast %64 : vector<64x8xf32> to vector<8x8x8xf32>
    %cst_87 = arith.constant 0.000000e+00 : f32
    %66 = vector.broadcast %cst_87 : f32 to vector<1x10x8xf32>
    %cst_88 = arith.constant 0.000000e+00 : f32
    %67 = vector.broadcast %cst_88 : f32 to vector<8x1x8xf32>
    %c0_89 = arith.constant 0 : index
    %c7_90 = arith.constant 7 : index
    %c0_91 = arith.constant 0 : index
    %68 = vector.load %arg5[%c0_89, %c7_90, %c0_91] : memref<36x32x16xf32, #tpu.memory_space<vmem>>, vector<1x10x8xf32>
    tpu.vector_store %arg5[%c0_89, %c7_90, %c0_91], %66 {strides = array<i32>} : memref<36x32x16xf32, #tpu.memory_space<vmem>>, vector<1x10x8xf32>,
    %c9_92 = arith.constant 9 : index
    %c7_93 = arith.constant 7 : index
    %c0_94 = arith.constant 0 : index
    %69 = vector.load %arg5[%c9_92, %c7_93, %c0_94] : memref<36x32x16xf32, #tpu.memory_space<vmem>>, vector<1x10x8xf32>
    tpu.vector_store %arg5[%c9_92, %c7_93, %c0_94], %66 {strides = array<i32>} : memref<36x32x16xf32, #tpu.memory_space<vmem>>, vector<1x10x8xf32>,
    %c1_95 = arith.constant 1 : index
    %c7_96 = arith.constant 7 : index
    %c0_97 = arith.constant 0 : index
    %70 = vector.load %arg5[%c1_95, %c7_96, %c0_97] : memref<36x32x16xf32, #tpu.memory_space<vmem>>, vector<8x1x8xf32>
    tpu.vector_store %arg5[%c1_95, %c7_96, %c0_97], %67 {strides = array<i32>} : memref<36x32x16xf32, #tpu.memory_space<vmem>>, vector<8x1x8xf32>,
    %c1_98 = arith.constant 1 : index
    %c16 = arith.constant 16 : index
    %c0_99 = arith.constant 0 : index
    %71 = vector.load %arg5[%c1_98, %c16, %c0_99] : memref<36x32x16xf32, #tpu.memory_space<vmem>>, vector<8x1x8xf32>
    tpu.vector_store %arg5[%c1_98, %c16, %c0_99], %67 {strides = array<i32>} : memref<36x32x16xf32, #tpu.memory_space<vmem>>, vector<8x1x8xf32>,
    %c1_100 = arith.constant 1 : index
    %c8_101 = arith.constant 8 : index
    %c0_102 = arith.constant 0 : index
    %72 = vector.load %arg5[%c1_100, %c8_101, %c0_102] : memref<36x32x16xf32, #tpu.memory_space<vmem>>, vector<8x8x8xf32>
    tpu.vector_store %arg5[%c1_100, %c8_101, %c0_102], %63 {strides = array<i32>} : memref<36x32x16xf32, #tpu.memory_space<vmem>>, vector<8x8x8xf32>,
    %c0_103 = arith.constant 0 : index
    %c7_104 = arith.constant 7 : index
    %c0_105 = arith.constant 0 : index
    %73 = tpu.strided_load %arg5[%c0_103, %c7_104, %c0_105] {strides = array<i32: 2, 2, 1>} : memref<36x32x16xf32, #tpu.memory_space<vmem>>, vector<4x4x8xf32>
    %74 = vector.shape_cast %73 : vector<4x4x8xf32> to vector<16x8xf32>
    %c0_106 = arith.constant 0 : index
    %c8_107 = arith.constant 8 : index
    %c0_108 = arith.constant 0 : index
    %75 = tpu.strided_load %arg5[%c0_106, %c8_107, %c0_108] {strides = array<i32: 2, 2, 1>} : memref<36x32x16xf32, #tpu.memory_space<vmem>>, vector<4x4x8xf32>
    %76 = vector.shape_cast %75 : vector<4x4x8xf32> to vector<16x8xf32>
    %c0_109 = arith.constant 0 : index
    %c9_110 = arith.constant 9 : index
    %c0_111 = arith.constant 0 : index
    %77 = tpu.strided_load %arg5[%c0_109, %c9_110, %c0_111] {strides = array<i32: 2, 2, 1>} : memref<36x32x16xf32, #tpu.memory_space<vmem>>, vector<4x4x8xf32>
    %78 = vector.shape_cast %77 : vector<4x4x8xf32> to vector<16x8xf32>
    %c1_112 = arith.constant 1 : index
    %c7_113 = arith.constant 7 : index
    %c0_114 = arith.constant 0 : index
    %79 = tpu.strided_load %arg5[%c1_112, %c7_113, %c0_114] {strides = array<i32: 2, 2, 1>} : memref<36x32x16xf32, #tpu.memory_space<vmem>>, vector<4x4x8xf32>
    %80 = vector.shape_cast %79 : vector<4x4x8xf32> to vector<16x8xf32>
    %c1_115 = arith.constant 1 : index
    %c8_116 = arith.constant 8 : index
    %c0_117 = arith.constant 0 : index
    %81 = tpu.strided_load %arg5[%c1_115, %c8_116, %c0_117] {strides = array<i32: 2, 2, 1>} : memref<36x32x16xf32, #tpu.memory_space<vmem>>, vector<4x4x8xf32>
    %82 = vector.shape_cast %81 : vector<4x4x8xf32> to vector<16x8xf32>
    %c1_118 = arith.constant 1 : index
    %c9_119 = arith.constant 9 : index
    %c0_120 = arith.constant 0 : index
    %83 = tpu.strided_load %arg5[%c1_118, %c9_119, %c0_120] {strides = array<i32: 2, 2, 1>} : memref<36x32x16xf32, #tpu.memory_space<vmem>>, vector<4x4x8xf32>
    %84 = vector.shape_cast %83 : vector<4x4x8xf32> to vector<16x8xf32>
    %c2_121 = arith.constant 2 : index
    %c7_122 = arith.constant 7 : index
    %c0_123 = arith.constant 0 : index
    %85 = tpu.strided_load %arg5[%c2_121, %c7_122, %c0_123] {strides = array<i32: 2, 2, 1>} : memref<36x32x16xf32, #tpu.memory_space<vmem>>, vector<4x4x8xf32>
    %86 = vector.shape_cast %85 : vector<4x4x8xf32> to vector<16x8xf32>
    %c2_124 = arith.constant 2 : index
    %c8_125 = arith.constant 8 : index
    %c0_126 = arith.constant 0 : index
    %87 = tpu.strided_load %arg5[%c2_124, %c8_125, %c0_126] {strides = array<i32: 2, 2, 1>} : memref<36x32x16xf32, #tpu.memory_space<vmem>>, vector<4x4x8xf32>
    %88 = vector.shape_cast %87 : vector<4x4x8xf32> to vector<16x8xf32>
    %c2_127 = arith.constant 2 : index
    %c9_128 = arith.constant 9 : index
    %c0_129 = arith.constant 0 : index
    %89 = tpu.strided_load %arg5[%c2_127, %c9_128, %c0_129] {strides = array<i32: 2, 2, 1>} : memref<36x32x16xf32, #tpu.memory_space<vmem>>, vector<4x4x8xf32>
    %90 = vector.shape_cast %89 : vector<4x4x8xf32> to vector<16x8xf32>
    %91 = tpu.concatenate %74, %76, %78, %80, %82, %84, %86, %88, %90 in 1 : vector<16x8xf32>, vector<16x8xf32>, vector<16x8xf32>, vector<16x8xf32>, vector<16x8xf32>, vector<16x8xf32>, vector<16x8xf32>, vector<16x8xf32>, vector<16x8xf32> -> vector<16x72xf32>
    %c18_130 = arith.constant 18 : index
    %c7_131 = arith.constant 7 : index
    %c0_132 = arith.constant 0 : index
    %92 = vector.load %arg5[%c18_130, %c7_131, %c0_132] : memref<36x32x16xf32, #tpu.memory_space<vmem>>, vector<1x10x8xf32>
    tpu.vector_store %arg5[%c18_130, %c7_131, %c0_132], %66 {strides = array<i32>} : memref<36x32x16xf32, #tpu.memory_space<vmem>>, vector<1x10x8xf32>,
    %c27 = arith.constant 27 : index
    %c7_133 = arith.constant 7 : index
    %c0_134 = arith.constant 0 : index
    %93 = vector.load %arg5[%c27, %c7_133, %c0_134] : memref<36x32x16xf32, #tpu.memory_space<vmem>>, vector<1x10x8xf32>
    tpu.vector_store %arg5[%c27, %c7_133, %c0_134], %66 {strides = array<i32>} : memref<36x32x16xf32, #tpu.memory_space<vmem>>, vector<1x10x8xf32>,
    %c19_135 = arith.constant 19 : index
    %c7_136 = arith.constant 7 : index
    %c0_137 = arith.constant 0 : index
    %94 = vector.load %arg5[%c19_135, %c7_136, %c0_137] : memref<36x32x16xf32, #tpu.memory_space<vmem>>, vector<8x1x8xf32>
    tpu.vector_store %arg5[%c19_135, %c7_136, %c0_137], %67 {strides = array<i32>} : memref<36x32x16xf32, #tpu.memory_space<vmem>>, vector<8x1x8xf32>,
    %c19_138 = arith.constant 19 : index
    %c16_139 = arith.constant 16 : index
    %c0_140 = arith.constant 0 : index
    %95 = vector.load %arg5[%c19_138, %c16_139, %c0_140] : memref<36x32x16xf32, #tpu.memory_space<vmem>>, vector<8x1x8xf32>
    tpu.vector_store %arg5[%c19_138, %c16_139, %c0_140], %67 {strides = array<i32>} : memref<36x32x16xf32, #tpu.memory_space<vmem>>, vector<8x1x8xf32>,
    %c19_141 = arith.constant 19 : index
    %c8_142 = arith.constant 8 : index
    %c0_143 = arith.constant 0 : index
    %96 = vector.load %arg5[%c19_141, %c8_142, %c0_143] : memref<36x32x16xf32, #tpu.memory_space<vmem>>, vector<8x8x8xf32>
    tpu.vector_store %arg5[%c19_141, %c8_142, %c0_143], %65 {strides = array<i32>} : memref<36x32x16xf32, #tpu.memory_space<vmem>>, vector<8x8x8xf32>,
    %c18_144 = arith.constant 18 : index
    %c7_145 = arith.constant 7 : index
    %c0_146 = arith.constant 0 : index
    %97 = tpu.strided_load %arg5[%c18_144, %c7_145, %c0_146] {strides = array<i32: 2, 2, 1>} : memref<36x32x16xf32, #tpu.memory_space<vmem>>, vector<4x4x8xf32>
    %98 = vector.shape_cast %97 : vector<4x4x8xf32> to vector<16x8xf32>
    %c18_147 = arith.constant 18 : index
    %c8_148 = arith.constant 8 : index
    %c0_149 = arith.constant 0 : index
    %99 = tpu.strided_load %arg5[%c18_147, %c8_148, %c0_149] {strides = array<i32: 2, 2, 1>} : memref<36x32x16xf32, #tpu.memory_space<vmem>>, vector<4x4x8xf32>
    %100 = vector.shape_cast %99 : vector<4x4x8xf32> to vector<16x8xf32>
    %c18_150 = arith.constant 18 : index
    %c9_151 = arith.constant 9 : index
    %c0_152 = arith.constant 0 : index
    %101 = tpu.strided_load %arg5[%c18_150, %c9_151, %c0_152] {strides = array<i32: 2, 2, 1>} : memref<36x32x16xf32, #tpu.memory_space<vmem>>, vector<4x4x8xf32>
    %102 = vector.shape_cast %101 : vector<4x4x8xf32> to vector<16x8xf32>
    %c19_153 = arith.constant 19 : index
    %c7_154 = arith.constant 7 : index
    %c0_155 = arith.constant 0 : index
    %103 = tpu.strided_load %arg5[%c19_153, %c7_154, %c0_155] {strides = array<i32: 2, 2, 1>} : memref<36x32x16xf32, #tpu.memory_space<vmem>>, vector<4x4x8xf32>
    %104 = vector.shape_cast %103 : vector<4x4x8xf32> to vector<16x8xf32>
    %c19_156 = arith.constant 19 : index
    %c8_157 = arith.constant 8 : index
    %c0_158 = arith.constant 0 : index
    %105 = tpu.strided_load %arg5[%c19_156, %c8_157, %c0_158] {strides = array<i32: 2, 2, 1>} : memref<36x32x16xf32, #tpu.memory_space<vmem>>, vector<4x4x8xf32>
    %106 = vector.shape_cast %105 : vector<4x4x8xf32> to vector<16x8xf32>
    %c19_159 = arith.constant 19 : index
    %c9_160 = arith.constant 9 : index
    %c0_161 = arith.constant 0 : index
    %107 = tpu.strided_load %arg5[%c19_159, %c9_160, %c0_161] {strides = array<i32: 2, 2, 1>} : memref<36x32x16xf32, #tpu.memory_space<vmem>>, vector<4x4x8xf32>
    %108 = vector.shape_cast %107 : vector<4x4x8xf32> to vector<16x8xf32>
    %c20_162 = arith.constant 20 : index
    %c7_163 = arith.constant 7 : index
    %c0_164 = arith.constant 0 : index
    %109 = tpu.strided_load %arg5[%c20_162, %c7_163, %c0_164] {strides = array<i32: 2, 2, 1>} : memref<36x32x16xf32, #tpu.memory_space<vmem>>, vector<4x4x8xf32>
    %110 = vector.shape_cast %109 : vector<4x4x8xf32> to vector<16x8xf32>
    %c20_165 = arith.constant 20 : index
    %c8_166 = arith.constant 8 : index
    %c0_167 = arith.constant 0 : index
    %111 = tpu.strided_load %arg5[%c20_165, %c8_166, %c0_167] {strides = array<i32: 2, 2, 1>} : memref<36x32x16xf32, #tpu.memory_space<vmem>>, vector<4x4x8xf32>
    %112 = vector.shape_cast %111 : vector<4x4x8xf32> to vector<16x8xf32>
    %c20_168 = arith.constant 20 : index
    %c9_169 = arith.constant 9 : index
    %c0_170 = arith.constant 0 : index
    %113 = tpu.strided_load %arg5[%c20_168, %c9_169, %c0_170] {strides = array<i32: 2, 2, 1>} : memref<36x32x16xf32, #tpu.memory_space<vmem>>, vector<4x4x8xf32>
    %114 = vector.shape_cast %113 : vector<4x4x8xf32> to vector<16x8xf32>
    %115 = tpu.concatenate %98, %100, %102, %104, %106, %108, %110, %112, %114 in 1 : vector<16x8xf32>, vector<16x8xf32>, vector<16x8xf32>, vector<16x8xf32>, vector<16x8xf32>, vector<16x8xf32>, vector<16x8xf32>, vector<16x8xf32>, vector<16x8xf32> -> vector<16x72xf32>
    %116 = tpu.concatenate %91, %115 in 0 : vector<16x72xf32>, vector<16x72xf32> -> vector<32x72xf32>
    %c32 = arith.constant 32 : index
    %c0_171 = arith.constant 0 : index
    %117 = vector.load %arg2[%c32, %c0_171] : memref<736x32xf32, #tpu.memory_space<vmem>>, vector<72x16xf32>
    %cst_172 = arith.constant dense<0.000000e+00> : vector<32x16xf32>
    %118 = tpu.matmul %116, %117, %cst_172 {dimension_numbers = #tpu.dot_dimension_numbers<[1], [0], [0], [1], [0, 0, 1, 1], [], []>} : vector<32x72xf32>, vector<72x16xf32>, vector<32x16xf32> -> vector<32x16xf32>
    %c1_173 = arith.constant 1 : index
    %c0_174 = arith.constant 0 : index
    %119 = vector.load %arg3[%c1_173, %c0_174] : memref<9x32xf32, #tpu.memory_space<vmem>>, vector<1x16xf32>
    %120 = vector.broadcast %119 : vector<1x16xf32> to vector<32x16xf32>
    %121 = arith.addf %118, %120 : vector<32x16xf32>
    %cst_175 = arith.constant 0.000000e+00 : f32
    %122 = vector.broadcast %cst_175 : f32 to vector<32x16xf32>
    %123 = arith.maximumf %121, %122 : vector<32x16xf32>
    %124 = vector.extract_strided_slice %123 {offsets = [0, 0], sizes = [16, 16], strides = [1, 1]} : vector<32x16xf32> to vector<16x16xf32>
    %125 = vector.shape_cast %124 : vector<16x16xf32> to vector<4x4x16xf32>
    %126 = vector.extract_strided_slice %123 {offsets = [16, 0], sizes = [16, 16], strides = [1, 1]} : vector<32x16xf32> to vector<16x16xf32>
    %127 = vector.shape_cast %126 : vector<16x16xf32> to vector<4x4x16xf32>
    %cst_176 = arith.constant 0.000000e+00 : f32
    %128 = vector.broadcast %cst_176 : f32 to vector<1x6x16xf32>
    %cst_177 = arith.constant 0.000000e+00 : f32
    %129 = vector.broadcast %cst_177 : f32 to vector<4x1x16xf32>
    %c0_178 = arith.constant 0 : index
    %c7_179 = arith.constant 7 : index
    %c0_180 = arith.constant 0 : index
    %130 = vector.load %arg5[%c0_178, %c7_179, %c0_180] : memref<36x32x16xf32, #tpu.memory_space<vmem>>, vector<1x6x16xf32>
    tpu.vector_store %arg5[%c0_178, %c7_179, %c0_180], %128 {strides = array<i32>} : memref<36x32x16xf32, #tpu.memory_space<vmem>>, vector<1x6x16xf32>,
    %c5 = arith.constant 5 : index
    %c7_181 = arith.constant 7 : index
    %c0_182 = arith.constant 0 : index
    %131 = vector.load %arg5[%c5, %c7_181, %c0_182] : memref<36x32x16xf32, #tpu.memory_space<vmem>>, vector<1x6x16xf32>
    tpu.vector_store %arg5[%c5, %c7_181, %c0_182], %128 {strides = array<i32>} : memref<36x32x16xf32, #tpu.memory_space<vmem>>, vector<1x6x16xf32>,
    %c1_183 = arith.constant 1 : index
    %c7_184 = arith.constant 7 : index
    %c0_185 = arith.constant 0 : index
    %132 = vector.load %arg5[%c1_183, %c7_184, %c0_185] : memref<36x32x16xf32, #tpu.memory_space<vmem>>, vector<4x1x16xf32>
    tpu.vector_store %arg5[%c1_183, %c7_184, %c0_185], %129 {strides = array<i32>} : memref<36x32x16xf32, #tpu.memory_space<vmem>>, vector<4x1x16xf32>,
    %c1_186 = arith.constant 1 : index
    %c12 = arith.constant 12 : index
    %c0_187 = arith.constant 0 : index
    %133 = vector.load %arg5[%c1_186, %c12, %c0_187] : memref<36x32x16xf32, #tpu.memory_space<vmem>>, vector<4x1x16xf32>
    tpu.vector_store %arg5[%c1_186, %c12, %c0_187], %129 {strides = array<i32>} : memref<36x32x16xf32, #tpu.memory_space<vmem>>, vector<4x1x16xf32>,
    %c1_188 = arith.constant 1 : index
    %c8_189 = arith.constant 8 : index
    %c0_190 = arith.constant 0 : index
    %134 = vector.load %arg5[%c1_188, %c8_189, %c0_190] : memref<36x32x16xf32, #tpu.memory_space<vmem>>, vector<4x4x16xf32>
    tpu.vector_store %arg5[%c1_188, %c8_189, %c0_190], %125 {strides = array<i32>} : memref<36x32x16xf32, #tpu.memory_space<vmem>>, vector<4x4x16xf32>,
    %c0_191 = arith.constant 0 : index
    %c7_192 = arith.constant 7 : index
    %c0_193 = arith.constant 0 : index
    %135 = tpu.strided_load %arg5[%c0_191, %c7_192, %c0_193] {strides = array<i32: 2, 2, 1>} : memref<36x32x16xf32, #tpu.memory_space<vmem>>, vector<2x2x16xf32>
    %136 = vector.shape_cast %135 : vector<2x2x16xf32> to vector<4x16xf32>
    %c0_194 = arith.constant 0 : index
    %c8_195 = arith.constant 8 : index
    %c0_196 = arith.constant 0 : index
    %137 = tpu.strided_load %arg5[%c0_194, %c8_195, %c0_196] {strides = array<i32: 2, 2, 1>} : memref<36x32x16xf32, #tpu.memory_space<vmem>>, vector<2x2x16xf32>
    %138 = vector.shape_cast %137 : vector<2x2x16xf32> to vector<4x16xf32>
    %c0_197 = arith.constant 0 : index
    %c9_198 = arith.constant 9 : index
    %c0_199 = arith.constant 0 : index
    %139 = tpu.strided_load %arg5[%c0_197, %c9_198, %c0_199] {strides = array<i32: 2, 2, 1>} : memref<36x32x16xf32, #tpu.memory_space<vmem>>, vector<2x2x16xf32>
    %140 = vector.shape_cast %139 : vector<2x2x16xf32> to vector<4x16xf32>
    %c1_200 = arith.constant 1 : index
    %c7_201 = arith.constant 7 : index
    %c0_202 = arith.constant 0 : index
    %141 = tpu.strided_load %arg5[%c1_200, %c7_201, %c0_202] {strides = array<i32: 2, 2, 1>} : memref<36x32x16xf32, #tpu.memory_space<vmem>>, vector<2x2x16xf32>
    %142 = vector.shape_cast %141 : vector<2x2x16xf32> to vector<4x16xf32>
    %c1_203 = arith.constant 1 : index
    %c8_204 = arith.constant 8 : index
    %c0_205 = arith.constant 0 : index
    %143 = tpu.strided_load %arg5[%c1_203, %c8_204, %c0_205] {strides = array<i32: 2, 2, 1>} : memref<36x32x16xf32, #tpu.memory_space<vmem>>, vector<2x2x16xf32>
    %144 = vector.shape_cast %143 : vector<2x2x16xf32> to vector<4x16xf32>
    %c1_206 = arith.constant 1 : index
    %c9_207 = arith.constant 9 : index
    %c0_208 = arith.constant 0 : index
    %145 = tpu.strided_load %arg5[%c1_206, %c9_207, %c0_208] {strides = array<i32: 2, 2, 1>} : memref<36x32x16xf32, #tpu.memory_space<vmem>>, vector<2x2x16xf32>
    %146 = vector.shape_cast %145 : vector<2x2x16xf32> to vector<4x16xf32>
    %c2_209 = arith.constant 2 : index
    %c7_210 = arith.constant 7 : index
    %c0_211 = arith.constant 0 : index
    %147 = tpu.strided_load %arg5[%c2_209, %c7_210, %c0_211] {strides = array<i32: 2, 2, 1>} : memref<36x32x16xf32, #tpu.memory_space<vmem>>, vector<2x2x16xf32>
    %148 = vector.shape_cast %147 : vector<2x2x16xf32> to vector<4x16xf32>
    %c2_212 = arith.constant 2 : index
    %c8_213 = arith.constant 8 : index
    %c0_214 = arith.constant 0 : index
    %149 = tpu.strided_load %arg5[%c2_212, %c8_213, %c0_214] {strides = array<i32: 2, 2, 1>} : memref<36x32x16xf32, #tpu.memory_space<vmem>>, vector<2x2x16xf32>
    %150 = vector.shape_cast %149 : vector<2x2x16xf32> to vector<4x16xf32>
    %c2_215 = arith.constant 2 : index
    %c9_216 = arith.constant 9 : index
    %c0_217 = arith.constant 0 : index
    %151 = tpu.strided_load %arg5[%c2_215, %c9_216, %c0_217] {strides = array<i32: 2, 2, 1>} : memref<36x32x16xf32, #tpu.memory_space<vmem>>, vector<2x2x16xf32>
    %152 = vector.shape_cast %151 : vector<2x2x16xf32> to vector<4x16xf32>
    %153 = tpu.concatenate %136, %138, %140, %142, %144, %146, %148, %150, %152 in 1 : vector<4x16xf32>, vector<4x16xf32>, vector<4x16xf32>, vector<4x16xf32>, vector<4x16xf32>, vector<4x16xf32>, vector<4x16xf32>, vector<4x16xf32>, vector<4x16xf32> -> vector<4x144xf32>
    %c18_218 = arith.constant 18 : index
    %c7_219 = arith.constant 7 : index
    %c0_220 = arith.constant 0 : index
    %154 = vector.load %arg5[%c18_218, %c7_219, %c0_220] : memref<36x32x16xf32, #tpu.memory_space<vmem>>, vector<1x6x16xf32>
    tpu.vector_store %arg5[%c18_218, %c7_219, %c0_220], %128 {strides = array<i32>} : memref<36x32x16xf32, #tpu.memory_space<vmem>>, vector<1x6x16xf32>,
    %c23 = arith.constant 23 : index
    %c7_221 = arith.constant 7 : index
    %c0_222 = arith.constant 0 : index
    %155 = vector.load %arg5[%c23, %c7_221, %c0_222] : memref<36x32x16xf32, #tpu.memory_space<vmem>>, vector<1x6x16xf32>
    tpu.vector_store %arg5[%c23, %c7_221, %c0_222], %128 {strides = array<i32>} : memref<36x32x16xf32, #tpu.memory_space<vmem>>, vector<1x6x16xf32>,
    %c19_223 = arith.constant 19 : index
    %c7_224 = arith.constant 7 : index
    %c0_225 = arith.constant 0 : index
    %156 = vector.load %arg5[%c19_223, %c7_224, %c0_225] : memref<36x32x16xf32, #tpu.memory_space<vmem>>, vector<4x1x16xf32>
    tpu.vector_store %arg5[%c19_223, %c7_224, %c0_225], %129 {strides = array<i32>} : memref<36x32x16xf32, #tpu.memory_space<vmem>>, vector<4x1x16xf32>,
    %c19_226 = arith.constant 19 : index
    %c12_227 = arith.constant 12 : index
    %c0_228 = arith.constant 0 : index
    %157 = vector.load %arg5[%c19_226, %c12_227, %c0_228] : memref<36x32x16xf32, #tpu.memory_space<vmem>>, vector<4x1x16xf32>
    tpu.vector_store %arg5[%c19_226, %c12_227, %c0_228], %129 {strides = array<i32>} : memref<36x32x16xf32, #tpu.memory_space<vmem>>, vector<4x1x16xf32>,
    %c19_229 = arith.constant 19 : index
    %c8_230 = arith.constant 8 : index
    %c0_231 = arith.constant 0 : index
    %158 = vector.load %arg5[%c19_229, %c8_230, %c0_231] : memref<36x32x16xf32, #tpu.memory_space<vmem>>, vector<4x4x16xf32>
    tpu.vector_store %arg5[%c19_229, %c8_230, %c0_231], %127 {strides = array<i32>} : memref<36x32x16xf32, #tpu.memory_space<vmem>>, vector<4x4x16xf32>,
    %c18_232 = arith.constant 18 : index
    %c7_233 = arith.constant 7 : index
    %c0_234 = arith.constant 0 : index
    %159 = tpu.strided_load %arg5[%c18_232, %c7_233, %c0_234] {strides = array<i32: 2, 2, 1>} : memref<36x32x16xf32, #tpu.memory_space<vmem>>, vector<2x2x16xf32>
    %160 = vector.shape_cast %159 : vector<2x2x16xf32> to vector<4x16xf32>
    %c18_235 = arith.constant 18 : index
    %c8_236 = arith.constant 8 : index
    %c0_237 = arith.constant 0 : index
    %161 = tpu.strided_load %arg5[%c18_235, %c8_236, %c0_237] {strides = array<i32: 2, 2, 1>} : memref<36x32x16xf32, #tpu.memory_space<vmem>>, vector<2x2x16xf32>
    %162 = vector.shape_cast %161 : vector<2x2x16xf32> to vector<4x16xf32>
    %c18_238 = arith.constant 18 : index
    %c9_239 = arith.constant 9 : index
    %c0_240 = arith.constant 0 : index
    %163 = tpu.strided_load %arg5[%c18_238, %c9_239, %c0_240] {strides = array<i32: 2, 2, 1>} : memref<36x32x16xf32, #tpu.memory_space<vmem>>, vector<2x2x16xf32>
    %164 = vector.shape_cast %163 : vector<2x2x16xf32> to vector<4x16xf32>
    %c19_241 = arith.constant 19 : index
    %c7_242 = arith.constant 7 : index
    %c0_243 = arith.constant 0 : index
    %165 = tpu.strided_load %arg5[%c19_241, %c7_242, %c0_243] {strides = array<i32: 2, 2, 1>} : memref<36x32x16xf32, #tpu.memory_space<vmem>>, vector<2x2x16xf32>
    %166 = vector.shape_cast %165 : vector<2x2x16xf32> to vector<4x16xf32>
    %c19_244 = arith.constant 19 : index
    %c8_245 = arith.constant 8 : index
    %c0_246 = arith.constant 0 : index
    %167 = tpu.strided_load %arg5[%c19_244, %c8_245, %c0_246] {strides = array<i32: 2, 2, 1>} : memref<36x32x16xf32, #tpu.memory_space<vmem>>, vector<2x2x16xf32>
    %168 = vector.shape_cast %167 : vector<2x2x16xf32> to vector<4x16xf32>
    %c19_247 = arith.constant 19 : index
    %c9_248 = arith.constant 9 : index
    %c0_249 = arith.constant 0 : index
    %169 = tpu.strided_load %arg5[%c19_247, %c9_248, %c0_249] {strides = array<i32: 2, 2, 1>} : memref<36x32x16xf32, #tpu.memory_space<vmem>>, vector<2x2x16xf32>
    %170 = vector.shape_cast %169 : vector<2x2x16xf32> to vector<4x16xf32>
    %c20_250 = arith.constant 20 : index
    %c7_251 = arith.constant 7 : index
    %c0_252 = arith.constant 0 : index
    %171 = tpu.strided_load %arg5[%c20_250, %c7_251, %c0_252] {strides = array<i32: 2, 2, 1>} : memref<36x32x16xf32, #tpu.memory_space<vmem>>, vector<2x2x16xf32>
    %172 = vector.shape_cast %171 : vector<2x2x16xf32> to vector<4x16xf32>
    %c20_253 = arith.constant 20 : index
    %c8_254 = arith.constant 8 : index
    %c0_255 = arith.constant 0 : index
    %173 = tpu.strided_load %arg5[%c20_253, %c8_254, %c0_255] {strides = array<i32: 2, 2, 1>} : memref<36x32x16xf32, #tpu.memory_space<vmem>>, vector<2x2x16xf32>
    %174 = vector.shape_cast %173 : vector<2x2x16xf32> to vector<4x16xf32>
    %c20_256 = arith.constant 20 : index
    %c9_257 = arith.constant 9 : index
    %c0_258 = arith.constant 0 : index
    %175 = tpu.strided_load %arg5[%c20_256, %c9_257, %c0_258] {strides = array<i32: 2, 2, 1>} : memref<36x32x16xf32, #tpu.memory_space<vmem>>, vector<2x2x16xf32>
    %176 = vector.shape_cast %175 : vector<2x2x16xf32> to vector<4x16xf32>
    %177 = tpu.concatenate %160, %162, %164, %166, %168, %170, %172, %174, %176 in 1 : vector<4x16xf32>, vector<4x16xf32>, vector<4x16xf32>, vector<4x16xf32>, vector<4x16xf32>, vector<4x16xf32>, vector<4x16xf32>, vector<4x16xf32>, vector<4x16xf32> -> vector<4x144xf32>
    %178 = tpu.concatenate %153, %177 in 0 : vector<4x144xf32>, vector<4x144xf32> -> vector<8x144xf32>
    %c104 = arith.constant 104 : index
    %c0_259 = arith.constant 0 : index
    %179 = vector.load %arg2[%c104, %c0_259] : memref<736x32xf32, #tpu.memory_space<vmem>>, vector<144x32xf32>
    %cst_260 = arith.constant dense<0.000000e+00> : vector<8x32xf32>
    %180 = tpu.matmul %178, %179, %cst_260 {dimension_numbers = #tpu.dot_dimension_numbers<[1], [0], [0], [1], [0, 0, 1, 1], [], []>} : vector<8x144xf32>, vector<144x32xf32>, vector<8x32xf32> -> vector<8x32xf32>
    %c2_261 = arith.constant 2 : index
    %c0_262 = arith.constant 0 : index
    %181 = vector.load %arg3[%c2_261, %c0_262] : memref<9x32xf32, #tpu.memory_space<vmem>>, vector<1x32xf32>
    %182 = vector.broadcast %181 : vector<1x32xf32> to vector<8x32xf32>
    %183 = arith.addf %180, %182 : vector<8x32xf32>
    %cst_263 = arith.constant 0.000000e+00 : f32
    %184 = vector.broadcast %cst_263 : f32 to vector<8x32xf32>
    %185 = arith.maximumf %183, %184 : vector<8x32xf32>
    %c248 = arith.constant 248 : index
    %c0_264 = arith.constant 0 : index
    %186 = vector.load %arg2[%c248, %c0_264] : memref<736x32xf32, #tpu.memory_space<vmem>>, vector<8x16xf32>
    %cst_265 = arith.constant dense<0.000000e+00> : vector<128x16xf32>
    %187 = tpu.matmul %61, %186, %cst_265 {dimension_numbers = #tpu.dot_dimension_numbers<[1], [0], [0], [1], [0, 0, 1, 1], [], []>} : vector<128x8xf32>, vector<8x16xf32>, vector<128x16xf32> -> vector<128x16xf32>
    %c3 = arith.constant 3 : index
    %c0_266 = arith.constant 0 : index
    %188 = vector.load %arg3[%c3, %c0_266] : memref<9x32xf32, #tpu.memory_space<vmem>>, vector<1x16xf32>
    %189 = vector.broadcast %188 : vector<1x16xf32> to vector<128x16xf32>
    %190 = arith.addf %187, %189 : vector<128x16xf32>
    %c256 = arith.constant 256 : index
    %c0_267 = arith.constant 0 : index
    %191 = vector.load %arg2[%c256, %c0_267] : memref<736x32xf32, #tpu.memory_space<vmem>>, vector<16x16xf32>
    %cst_268 = arith.constant dense<0.000000e+00> : vector<32x16xf32>
    %192 = tpu.matmul %123, %191, %cst_268 {dimension_numbers = #tpu.dot_dimension_numbers<[1], [0], [0], [1], [0, 0, 1, 1], [], []>} : vector<32x16xf32>, vector<16x16xf32>, vector<32x16xf32> -> vector<32x16xf32>
    %c4 = arith.constant 4 : index
    %c0_269 = arith.constant 0 : index
    %193 = vector.load %arg3[%c4, %c0_269] : memref<9x32xf32, #tpu.memory_space<vmem>>, vector<1x16xf32>
    %194 = vector.broadcast %193 : vector<1x16xf32> to vector<32x16xf32>
    %195 = arith.addf %192, %194 : vector<32x16xf32>
    %c272 = arith.constant 272 : index
    %c0_270 = arith.constant 0 : index
    %196 = vector.load %arg2[%c272, %c0_270] : memref<736x32xf32, #tpu.memory_space<vmem>>, vector<32x16xf32>
    %cst_271 = arith.constant dense<0.000000e+00> : vector<8x16xf32>
    %197 = tpu.matmul %185, %196, %cst_271 {dimension_numbers = #tpu.dot_dimension_numbers<[1], [0], [0], [1], [0, 0, 1, 1], [], []>} : vector<8x32xf32>, vector<32x16xf32>, vector<8x16xf32> -> vector<8x16xf32>
    %c5_272 = arith.constant 5 : index
    %c0_273 = arith.constant 0 : index
    %198 = vector.load %arg3[%c5_272, %c0_273] : memref<9x32xf32, #tpu.memory_space<vmem>>, vector<1x16xf32>
    %199 = vector.broadcast %198 : vector<1x16xf32> to vector<8x16xf32>
    %200 = arith.addf %197, %199 : vector<8x16xf32>
    %201 = vector.extract_strided_slice %200 {offsets = [0, 0], sizes = [4, 16], strides = [1, 1]} : vector<8x16xf32> to vector<4x16xf32>
    %202 = vector.shape_cast %201 : vector<4x16xf32> to vector<2x2x16xf32>
    %203 = vector.extract_strided_slice %200 {offsets = [4, 0], sizes = [4, 16], strides = [1, 1]} : vector<8x16xf32> to vector<4x16xf32>
    %204 = vector.shape_cast %203 : vector<4x16xf32> to vector<2x2x16xf32>
    %cst_274 = arith.constant 0.000000e+00 : f32
    %205 = vector.broadcast %cst_274 : f32 to vector<1x4x16xf32>
    %cst_275 = arith.constant 0.000000e+00 : f32
    %206 = vector.broadcast %cst_275 : f32 to vector<2x1x16xf32>
    %c0_276 = arith.constant 0 : index
    %c7_277 = arith.constant 7 : index
    %c0_278 = arith.constant 0 : index
    %207 = vector.load %arg5[%c0_276, %c7_277, %c0_278] : memref<36x32x16xf32, #tpu.memory_space<vmem>>, vector<1x4x16xf32>
    tpu.vector_store %arg5[%c0_276, %c7_277, %c0_278], %205 {strides = array<i32>} : memref<36x32x16xf32, #tpu.memory_space<vmem>>, vector<1x4x16xf32>,
    %c3_279 = arith.constant 3 : index
    %c7_280 = arith.constant 7 : index
    %c0_281 = arith.constant 0 : index
    %208 = vector.load %arg5[%c3_279, %c7_280, %c0_281] : memref<36x32x16xf32, #tpu.memory_space<vmem>>, vector<1x4x16xf32>
    tpu.vector_store %arg5[%c3_279, %c7_280, %c0_281], %205 {strides = array<i32>} : memref<36x32x16xf32, #tpu.memory_space<vmem>>, vector<1x4x16xf32>,
    %c1_282 = arith.constant 1 : index
    %c7_283 = arith.constant 7 : index
    %c0_284 = arith.constant 0 : index
    %209 = vector.load %arg5[%c1_282, %c7_283, %c0_284] : memref<36x32x16xf32, #tpu.memory_space<vmem>>, vector<2x1x16xf32>
    tpu.vector_store %arg5[%c1_282, %c7_283, %c0_284], %206 {strides = array<i32>} : memref<36x32x16xf32, #tpu.memory_space<vmem>>, vector<2x1x16xf32>,
    %c1_285 = arith.constant 1 : index
    %c10 = arith.constant 10 : index
    %c0_286 = arith.constant 0 : index
    %210 = vector.load %arg5[%c1_285, %c10, %c0_286] : memref<36x32x16xf32, #tpu.memory_space<vmem>>, vector<2x1x16xf32>
    tpu.vector_store %arg5[%c1_285, %c10, %c0_286], %206 {strides = array<i32>} : memref<36x32x16xf32, #tpu.memory_space<vmem>>, vector<2x1x16xf32>,
    %c1_287 = arith.constant 1 : index
    %c8_288 = arith.constant 8 : index
    %c0_289 = arith.constant 0 : index
    %211 = vector.load %arg5[%c1_287, %c8_288, %c0_289] : memref<36x32x16xf32, #tpu.memory_space<vmem>>, vector<2x2x16xf32>
    tpu.vector_store %arg5[%c1_287, %c8_288, %c0_289], %202 {strides = array<i32>} : memref<36x32x16xf32, #tpu.memory_space<vmem>>, vector<2x2x16xf32>,
    %c0_290 = arith.constant 0 : index
    %c7_291 = arith.constant 7 : index
    %c0_292 = arith.constant 0 : index
    %212 = vector.load %arg5[%c0_290, %c7_291, %c0_292] : memref<36x32x16xf32, #tpu.memory_space<vmem>>, vector<2x2x16xf32>
    %213 = vector.shape_cast %212 : vector<2x2x16xf32> to vector<4x16xf32>
    %c0_293 = arith.constant 0 : index
    %c8_294 = arith.constant 8 : index
    %c0_295 = arith.constant 0 : index
    %214 = vector.load %arg5[%c0_293, %c8_294, %c0_295] : memref<36x32x16xf32, #tpu.memory_space<vmem>>, vector<2x2x16xf32>
    %215 = vector.shape_cast %214 : vector<2x2x16xf32> to vector<4x16xf32>
    %c0_296 = arith.constant 0 : index
    %c9_297 = arith.constant 9 : index
    %c0_298 = arith.constant 0 : index
    %216 = vector.load %arg5[%c0_296, %c9_297, %c0_298] : memref<36x32x16xf32, #tpu.memory_space<vmem>>, vector<2x2x16xf32>
    %217 = vector.shape_cast %216 : vector<2x2x16xf32> to vector<4x16xf32>
    %c1_299 = arith.constant 1 : index
    %c7_300 = arith.constant 7 : index
    %c0_301 = arith.constant 0 : index
    %218 = vector.load %arg5[%c1_299, %c7_300, %c0_301] : memref<36x32x16xf32, #tpu.memory_space<vmem>>, vector<2x2x16xf32>
    %219 = vector.shape_cast %218 : vector<2x2x16xf32> to vector<4x16xf32>
    %c1_302 = arith.constant 1 : index
    %c8_303 = arith.constant 8 : index
    %c0_304 = arith.constant 0 : index
    %220 = vector.load %arg5[%c1_302, %c8_303, %c0_304] : memref<36x32x16xf32, #tpu.memory_space<vmem>>, vector<2x2x16xf32>
    %221 = vector.shape_cast %220 : vector<2x2x16xf32> to vector<4x16xf32>
    %c1_305 = arith.constant 1 : index
    %c9_306 = arith.constant 9 : index
    %c0_307 = arith.constant 0 : index
    %222 = vector.load %arg5[%c1_305, %c9_306, %c0_307] : memref<36x32x16xf32, #tpu.memory_space<vmem>>, vector<2x2x16xf32>
    %223 = vector.shape_cast %222 : vector<2x2x16xf32> to vector<4x16xf32>
    %c2_308 = arith.constant 2 : index
    %c7_309 = arith.constant 7 : index
    %c0_310 = arith.constant 0 : index
    %224 = vector.load %arg5[%c2_308, %c7_309, %c0_310] : memref<36x32x16xf32, #tpu.memory_space<vmem>>, vector<2x2x16xf32>
    %225 = vector.shape_cast %224 : vector<2x2x16xf32> to vector<4x16xf32>
    %c2_311 = arith.constant 2 : index
    %c8_312 = arith.constant 8 : index
    %c0_313 = arith.constant 0 : index
    %226 = vector.load %arg5[%c2_311, %c8_312, %c0_313] : memref<36x32x16xf32, #tpu.memory_space<vmem>>, vector<2x2x16xf32>
    %227 = vector.shape_cast %226 : vector<2x2x16xf32> to vector<4x16xf32>
    %c2_314 = arith.constant 2 : index
    %c9_315 = arith.constant 9 : index
    %c0_316 = arith.constant 0 : index
    %228 = vector.load %arg5[%c2_314, %c9_315, %c0_316] : memref<36x32x16xf32, #tpu.memory_space<vmem>>, vector<2x2x16xf32>
    %229 = vector.shape_cast %228 : vector<2x2x16xf32> to vector<4x16xf32>
    %230 = tpu.concatenate %213, %215, %217, %219, %221, %223, %225, %227, %229 in 1 : vector<4x16xf32>, vector<4x16xf32>, vector<4x16xf32>, vector<4x16xf32>, vector<4x16xf32>, vector<4x16xf32>, vector<4x16xf32>, vector<4x16xf32>, vector<4x16xf32> -> vector<4x144xf32>
    %c18_317 = arith.constant 18 : index
    %c7_318 = arith.constant 7 : index
    %c0_319 = arith.constant 0 : index
    %231 = vector.load %arg5[%c18_317, %c7_318, %c0_319] : memref<36x32x16xf32, #tpu.memory_space<vmem>>, vector<1x4x16xf32>
    tpu.vector_store %arg5[%c18_317, %c7_318, %c0_319], %205 {strides = array<i32>} : memref<36x32x16xf32, #tpu.memory_space<vmem>>, vector<1x4x16xf32>,
    %c21 = arith.constant 21 : index
    %c7_320 = arith.constant 7 : index
    %c0_321 = arith.constant 0 : index
    %232 = vector.load %arg5[%c21, %c7_320, %c0_321] : memref<36x32x16xf32, #tpu.memory_space<vmem>>, vector<1x4x16xf32>
    tpu.vector_store %arg5[%c21, %c7_320, %c0_321], %205 {strides = array<i32>} : memref<36x32x16xf32, #tpu.memory_space<vmem>>, vector<1x4x16xf32>,
    %c19_322 = arith.constant 19 : index
    %c7_323 = arith.constant 7 : index
    %c0_324 = arith.constant 0 : index
    %233 = vector.load %arg5[%c19_322, %c7_323, %c0_324] : memref<36x32x16xf32, #tpu.memory_space<vmem>>, vector<2x1x16xf32>
    tpu.vector_store %arg5[%c19_322, %c7_323, %c0_324], %206 {strides = array<i32>} : memref<36x32x16xf32, #tpu.memory_space<vmem>>, vector<2x1x16xf32>,
    %c19_325 = arith.constant 19 : index
    %c10_326 = arith.constant 10 : index
    %c0_327 = arith.constant 0 : index
    %234 = vector.load %arg5[%c19_325, %c10_326, %c0_327] : memref<36x32x16xf32, #tpu.memory_space<vmem>>, vector<2x1x16xf32>
    tpu.vector_store %arg5[%c19_325, %c10_326, %c0_327], %206 {strides = array<i32>} : memref<36x32x16xf32, #tpu.memory_space<vmem>>, vector<2x1x16xf32>,
    %c19_328 = arith.constant 19 : index
    %c8_329 = arith.constant 8 : index
    %c0_330 = arith.constant 0 : index
    %235 = vector.load %arg5[%c19_328, %c8_329, %c0_330] : memref<36x32x16xf32, #tpu.memory_space<vmem>>, vector<2x2x16xf32>
    tpu.vector_store %arg5[%c19_328, %c8_329, %c0_330], %204 {strides = array<i32>} : memref<36x32x16xf32, #tpu.memory_space<vmem>>, vector<2x2x16xf32>,
    %c18_331 = arith.constant 18 : index
    %c7_332 = arith.constant 7 : index
    %c0_333 = arith.constant 0 : index
    %236 = vector.load %arg5[%c18_331, %c7_332, %c0_333] : memref<36x32x16xf32, #tpu.memory_space<vmem>>, vector<2x2x16xf32>
    %237 = vector.shape_cast %236 : vector<2x2x16xf32> to vector<4x16xf32>
    %c18_334 = arith.constant 18 : index
    %c8_335 = arith.constant 8 : index
    %c0_336 = arith.constant 0 : index
    %238 = vector.load %arg5[%c18_334, %c8_335, %c0_336] : memref<36x32x16xf32, #tpu.memory_space<vmem>>, vector<2x2x16xf32>
    %239 = vector.shape_cast %238 : vector<2x2x16xf32> to vector<4x16xf32>
    %c18_337 = arith.constant 18 : index
    %c9_338 = arith.constant 9 : index
    %c0_339 = arith.constant 0 : index
    %240 = vector.load %arg5[%c18_337, %c9_338, %c0_339] : memref<36x32x16xf32, #tpu.memory_space<vmem>>, vector<2x2x16xf32>
    %241 = vector.shape_cast %240 : vector<2x2x16xf32> to vector<4x16xf32>
    %c19_340 = arith.constant 19 : index
    %c7_341 = arith.constant 7 : index
    %c0_342 = arith.constant 0 : index
    %242 = vector.load %arg5[%c19_340, %c7_341, %c0_342] : memref<36x32x16xf32, #tpu.memory_space<vmem>>, vector<2x2x16xf32>
    %243 = vector.shape_cast %242 : vector<2x2x16xf32> to vector<4x16xf32>
    %c19_343 = arith.constant 19 : index
    %c8_344 = arith.constant 8 : index
    %c0_345 = arith.constant 0 : index
    %244 = vector.load %arg5[%c19_343, %c8_344, %c0_345] : memref<36x32x16xf32, #tpu.memory_space<vmem>>, vector<2x2x16xf32>
    %245 = vector.shape_cast %244 : vector<2x2x16xf32> to vector<4x16xf32>
    %c19_346 = arith.constant 19 : index
    %c9_347 = arith.constant 9 : index
    %c0_348 = arith.constant 0 : index
    %246 = vector.load %arg5[%c19_346, %c9_347, %c0_348] : memref<36x32x16xf32, #tpu.memory_space<vmem>>, vector<2x2x16xf32>
    %247 = vector.shape_cast %246 : vector<2x2x16xf32> to vector<4x16xf32>
    %c20_349 = arith.constant 20 : index
    %c7_350 = arith.constant 7 : index
    %c0_351 = arith.constant 0 : index
    %248 = vector.load %arg5[%c20_349, %c7_350, %c0_351] : memref<36x32x16xf32, #tpu.memory_space<vmem>>, vector<2x2x16xf32>
    %249 = vector.shape_cast %248 : vector<2x2x16xf32> to vector<4x16xf32>
    %c20_352 = arith.constant 20 : index
    %c8_353 = arith.constant 8 : index
    %c0_354 = arith.constant 0 : index
    %250 = vector.load %arg5[%c20_352, %c8_353, %c0_354] : memref<36x32x16xf32, #tpu.memory_space<vmem>>, vector<2x2x16xf32>
    %251 = vector.shape_cast %250 : vector<2x2x16xf32> to vector<4x16xf32>
    %c20_355 = arith.constant 20 : index
    %c9_356 = arith.constant 9 : index
    %c0_357 = arith.constant 0 : index
    %252 = vector.load %arg5[%c20_355, %c9_356, %c0_357] : memref<36x32x16xf32, #tpu.memory_space<vmem>>, vector<2x2x16xf32>
    %253 = vector.shape_cast %252 : vector<2x2x16xf32> to vector<4x16xf32>
    %254 = tpu.concatenate %237, %239, %241, %243, %245, %247, %249, %251, %253 in 1 : vector<4x16xf32>, vector<4x16xf32>, vector<4x16xf32>, vector<4x16xf32>, vector<4x16xf32>, vector<4x16xf32>, vector<4x16xf32>, vector<4x16xf32>, vector<4x16xf32> -> vector<4x144xf32>
    %255 = tpu.concatenate %230, %254 in 0 : vector<4x144xf32>, vector<4x144xf32> -> vector<8x144xf32>
    %c592 = arith.constant 592 : index
    %c0_358 = arith.constant 0 : index
    %256 = vector.load %arg2[%c592, %c0_358] : memref<736x32xf32, #tpu.memory_space<vmem>>, vector<144x16xf32>
    %cst_359 = arith.constant dense<0.000000e+00> : vector<8x16xf32>
    %257 = tpu.matmul %255, %256, %cst_359 {dimension_numbers = #tpu.dot_dimension_numbers<[1], [0], [0], [1], [0, 0, 1, 1], [], []>} : vector<8x144xf32>, vector<144x16xf32>, vector<8x16xf32> -> vector<8x16xf32>
    %c8_360 = arith.constant 8 : index
    %c0_361 = arith.constant 0 : index
    %258 = vector.load %arg3[%c8_360, %c0_361] : memref<9x32xf32, #tpu.memory_space<vmem>>, vector<1x16xf32>
    %259 = vector.broadcast %258 : vector<1x16xf32> to vector<8x16xf32>
    %260 = arith.addf %257, %259 : vector<8x16xf32>
    %261 = vector.extract_strided_slice %195 {offsets = [0, 0], sizes = [16, 16], strides = [1, 1]} : vector<32x16xf32> to vector<16x16xf32>
    %262 = vector.shape_cast %261 : vector<16x16xf32> to vector<4x4x16xf32>
    %263 = vector.extract_strided_slice %195 {offsets = [16, 0], sizes = [16, 16], strides = [1, 1]} : vector<32x16xf32> to vector<16x16xf32>
    %264 = vector.shape_cast %263 : vector<16x16xf32> to vector<4x4x16xf32>
    %265 = vector.shape_cast %202 : vector<2x2x16xf32> to vector<2x1x2x16xf32>
    %266 = vector.shape_cast %265 : vector<2x1x2x16xf32> to vector<2x1x2x16xf32>
    %267 = vector.broadcast %266 : vector<2x1x2x16xf32> to vector<2x2x2x16xf32>
    %268 = vector.shape_cast %267 : vector<2x2x2x16xf32> to vector<8x16xf32>
    %269 = vector.shape_cast %268 : vector<8x16xf32> to vector<8x1x16xf32>
    %270 = vector.shape_cast %269 : vector<8x1x16xf32> to vector<8x1x16xf32>
    %271 = vector.broadcast %270 : vector<8x1x16xf32> to vector<8x2x16xf32>
    %272 = vector.shape_cast %271 : vector<8x2x16xf32> to vector<16x16xf32>
    %273 = vector.shape_cast %272 : vector<16x16xf32> to vector<4x4x16xf32>
    %274 = arith.addf %262, %273 : vector<4x4x16xf32>
    %275 = vector.shape_cast %204 : vector<2x2x16xf32> to vector<2x1x2x16xf32>
    %276 = vector.shape_cast %275 : vector<2x1x2x16xf32> to vector<2x1x2x16xf32>
    %277 = vector.broadcast %276 : vector<2x1x2x16xf32> to vector<2x2x2x16xf32>
    %278 = vector.shape_cast %277 : vector<2x2x2x16xf32> to vector<8x16xf32>
    %279 = vector.shape_cast %278 : vector<8x16xf32> to vector<8x1x16xf32>
    %280 = vector.shape_cast %279 : vector<8x1x16xf32> to vector<8x1x16xf32>
    %281 = vector.broadcast %280 : vector<8x1x16xf32> to vector<8x2x16xf32>
    %282 = vector.shape_cast %281 : vector<8x2x16xf32> to vector<16x16xf32>
    %283 = vector.shape_cast %282 : vector<16x16xf32> to vector<4x4x16xf32>
    %284 = arith.addf %264, %283 : vector<4x4x16xf32>
    %cst_362 = arith.constant 0.000000e+00 : f32
    %285 = vector.broadcast %cst_362 : f32 to vector<1x6x16xf32>
    %cst_363 = arith.constant 0.000000e+00 : f32
    %286 = vector.broadcast %cst_363 : f32 to vector<4x1x16xf32>
    %c0_364 = arith.constant 0 : index
    %c7_365 = arith.constant 7 : index
    %c0_366 = arith.constant 0 : index
    %287 = vector.load %arg5[%c0_364, %c7_365, %c0_366] : memref<36x32x16xf32, #tpu.memory_space<vmem>>, vector<1x6x16xf32>
    tpu.vector_store %arg5[%c0_364, %c7_365, %c0_366], %285 {strides = array<i32>} : memref<36x32x16xf32, #tpu.memory_space<vmem>>, vector<1x6x16xf32>,
    %c5_367 = arith.constant 5 : index
    %c7_368 = arith.constant 7 : index
    %c0_369 = arith.constant 0 : index
    %288 = vector.load %arg5[%c5_367, %c7_368, %c0_369] : memref<36x32x16xf32, #tpu.memory_space<vmem>>, vector<1x6x16xf32>
    tpu.vector_store %arg5[%c5_367, %c7_368, %c0_369], %285 {strides = array<i32>} : memref<36x32x16xf32, #tpu.memory_space<vmem>>, vector<1x6x16xf32>,
    %c1_370 = arith.constant 1 : index
    %c7_371 = arith.constant 7 : index
    %c0_372 = arith.constant 0 : index
    %289 = vector.load %arg5[%c1_370, %c7_371, %c0_372] : memref<36x32x16xf32, #tpu.memory_space<vmem>>, vector<4x1x16xf32>
    tpu.vector_store %arg5[%c1_370, %c7_371, %c0_372], %286 {strides = array<i32>} : memref<36x32x16xf32, #tpu.memory_space<vmem>>, vector<4x1x16xf32>,
    %c1_373 = arith.constant 1 : index
    %c12_374 = arith.constant 12 : index
    %c0_375 = arith.constant 0 : index
    %290 = vector.load %arg5[%c1_373, %c12_374, %c0_375] : memref<36x32x16xf32, #tpu.memory_space<vmem>>, vector<4x1x16xf32>
    tpu.vector_store %arg5[%c1_373, %c12_374, %c0_375], %286 {strides = array<i32>} : memref<36x32x16xf32, #tpu.memory_space<vmem>>, vector<4x1x16xf32>,
    %c1_376 = arith.constant 1 : index
    %c8_377 = arith.constant 8 : index
    %c0_378 = arith.constant 0 : index
    %291 = vector.load %arg5[%c1_376, %c8_377, %c0_378] : memref<36x32x16xf32, #tpu.memory_space<vmem>>, vector<4x4x16xf32>
    tpu.vector_store %arg5[%c1_376, %c8_377, %c0_378], %274 {strides = array<i32>} : memref<36x32x16xf32, #tpu.memory_space<vmem>>, vector<4x4x16xf32>,
    %c0_379 = arith.constant 0 : index
    %c7_380 = arith.constant 7 : index
    %c0_381 = arith.constant 0 : index
    %292 = vector.load %arg5[%c0_379, %c7_380, %c0_381] : memref<36x32x16xf32, #tpu.memory_space<vmem>>, vector<4x4x16xf32>
    %293 = vector.shape_cast %292 : vector<4x4x16xf32> to vector<16x16xf32>
    %c0_382 = arith.constant 0 : index
    %c8_383 = arith.constant 8 : index
    %c0_384 = arith.constant 0 : index
    %294 = vector.load %arg5[%c0_382, %c8_383, %c0_384] : memref<36x32x16xf32, #tpu.memory_space<vmem>>, vector<4x4x16xf32>
    %295 = vector.shape_cast %294 : vector<4x4x16xf32> to vector<16x16xf32>
    %c0_385 = arith.constant 0 : index
    %c9_386 = arith.constant 9 : index
    %c0_387 = arith.constant 0 : index
    %296 = vector.load %arg5[%c0_385, %c9_386, %c0_387] : memref<36x32x16xf32, #tpu.memory_space<vmem>>, vector<4x4x16xf32>
    %297 = vector.shape_cast %296 : vector<4x4x16xf32> to vector<16x16xf32>
    %c1_388 = arith.constant 1 : index
    %c7_389 = arith.constant 7 : index
    %c0_390 = arith.constant 0 : index
    %298 = vector.load %arg5[%c1_388, %c7_389, %c0_390] : memref<36x32x16xf32, #tpu.memory_space<vmem>>, vector<4x4x16xf32>
    %299 = vector.shape_cast %298 : vector<4x4x16xf32> to vector<16x16xf32>
    %c1_391 = arith.constant 1 : index
    %c8_392 = arith.constant 8 : index
    %c0_393 = arith.constant 0 : index
    %300 = vector.load %arg5[%c1_391, %c8_392, %c0_393] : memref<36x32x16xf32, #tpu.memory_space<vmem>>, vector<4x4x16xf32>
    %301 = vector.shape_cast %300 : vector<4x4x16xf32> to vector<16x16xf32>
    %c1_394 = arith.constant 1 : index
    %c9_395 = arith.constant 9 : index
    %c0_396 = arith.constant 0 : index
    %302 = vector.load %arg5[%c1_394, %c9_395, %c0_396] : memref<36x32x16xf32, #tpu.memory_space<vmem>>, vector<4x4x16xf32>
    %303 = vector.shape_cast %302 : vector<4x4x16xf32> to vector<16x16xf32>
    %c2_397 = arith.constant 2 : index
    %c7_398 = arith.constant 7 : index
    %c0_399 = arith.constant 0 : index
    %304 = vector.load %arg5[%c2_397, %c7_398, %c0_399] : memref<36x32x16xf32, #tpu.memory_space<vmem>>, vector<4x4x16xf32>
    %305 = vector.shape_cast %304 : vector<4x4x16xf32> to vector<16x16xf32>
    %c2_400 = arith.constant 2 : index
    %c8_401 = arith.constant 8 : index
    %c0_402 = arith.constant 0 : index
    %306 = vector.load %arg5[%c2_400, %c8_401, %c0_402] : memref<36x32x16xf32, #tpu.memory_space<vmem>>, vector<4x4x16xf32>
    %307 = vector.shape_cast %306 : vector<4x4x16xf32> to vector<16x16xf32>
    %c2_403 = arith.constant 2 : index
    %c9_404 = arith.constant 9 : index
    %c0_405 = arith.constant 0 : index
    %308 = vector.load %arg5[%c2_403, %c9_404, %c0_405] : memref<36x32x16xf32, #tpu.memory_space<vmem>>, vector<4x4x16xf32>
    %309 = vector.shape_cast %308 : vector<4x4x16xf32> to vector<16x16xf32>
    %310 = tpu.concatenate %293, %295, %297, %299, %301, %303, %305, %307, %309 in 1 : vector<16x16xf32>, vector<16x16xf32>, vector<16x16xf32>, vector<16x16xf32>, vector<16x16xf32>, vector<16x16xf32>, vector<16x16xf32>, vector<16x16xf32>, vector<16x16xf32> -> vector<16x144xf32>
    %c18_406 = arith.constant 18 : index
    %c7_407 = arith.constant 7 : index
    %c0_408 = arith.constant 0 : index
    %311 = vector.load %arg5[%c18_406, %c7_407, %c0_408] : memref<36x32x16xf32, #tpu.memory_space<vmem>>, vector<1x6x16xf32>
    tpu.vector_store %arg5[%c18_406, %c7_407, %c0_408], %285 {strides = array<i32>} : memref<36x32x16xf32, #tpu.memory_space<vmem>>, vector<1x6x16xf32>,
    %c23_409 = arith.constant 23 : index
    %c7_410 = arith.constant 7 : index
    %c0_411 = arith.constant 0 : index
    %312 = vector.load %arg5[%c23_409, %c7_410, %c0_411] : memref<36x32x16xf32, #tpu.memory_space<vmem>>, vector<1x6x16xf32>
    tpu.vector_store %arg5[%c23_409, %c7_410, %c0_411], %285 {strides = array<i32>} : memref<36x32x16xf32, #tpu.memory_space<vmem>>, vector<1x6x16xf32>,
    %c19_412 = arith.constant 19 : index
    %c7_413 = arith.constant 7 : index
    %c0_414 = arith.constant 0 : index
    %313 = vector.load %arg5[%c19_412, %c7_413, %c0_414] : memref<36x32x16xf32, #tpu.memory_space<vmem>>, vector<4x1x16xf32>
    tpu.vector_store %arg5[%c19_412, %c7_413, %c0_414], %286 {strides = array<i32>} : memref<36x32x16xf32, #tpu.memory_space<vmem>>, vector<4x1x16xf32>,
    %c19_415 = arith.constant 19 : index
    %c12_416 = arith.constant 12 : index
    %c0_417 = arith.constant 0 : index
    %314 = vector.load %arg5[%c19_415, %c12_416, %c0_417] : memref<36x32x16xf32, #tpu.memory_space<vmem>>, vector<4x1x16xf32>
    tpu.vector_store %arg5[%c19_415, %c12_416, %c0_417], %286 {strides = array<i32>} : memref<36x32x16xf32, #tpu.memory_space<vmem>>, vector<4x1x16xf32>,
    %c19_418 = arith.constant 19 : index
    %c8_419 = arith.constant 8 : index
    %c0_420 = arith.constant 0 : index
    %315 = vector.load %arg5[%c19_418, %c8_419, %c0_420] : memref<36x32x16xf32, #tpu.memory_space<vmem>>, vector<4x4x16xf32>
    tpu.vector_store %arg5[%c19_418, %c8_419, %c0_420], %284 {strides = array<i32>} : memref<36x32x16xf32, #tpu.memory_space<vmem>>, vector<4x4x16xf32>,
    %c18_421 = arith.constant 18 : index
    %c7_422 = arith.constant 7 : index
    %c0_423 = arith.constant 0 : index
    %316 = vector.load %arg5[%c18_421, %c7_422, %c0_423] : memref<36x32x16xf32, #tpu.memory_space<vmem>>, vector<4x4x16xf32>
    %317 = vector.shape_cast %316 : vector<4x4x16xf32> to vector<16x16xf32>
    %c18_424 = arith.constant 18 : index
    %c8_425 = arith.constant 8 : index
    %c0_426 = arith.constant 0 : index
    %318 = vector.load %arg5[%c18_424, %c8_425, %c0_426] : memref<36x32x16xf32, #tpu.memory_space<vmem>>, vector<4x4x16xf32>
    %319 = vector.shape_cast %318 : vector<4x4x16xf32> to vector<16x16xf32>
    %c18_427 = arith.constant 18 : index
    %c9_428 = arith.constant 9 : index
    %c0_429 = arith.constant 0 : index
    %320 = vector.load %arg5[%c18_427, %c9_428, %c0_429] : memref<36x32x16xf32, #tpu.memory_space<vmem>>, vector<4x4x16xf32>
    %321 = vector.shape_cast %320 : vector<4x4x16xf32> to vector<16x16xf32>
    %c19_430 = arith.constant 19 : index
    %c7_431 = arith.constant 7 : index
    %c0_432 = arith.constant 0 : index
    %322 = vector.load %arg5[%c19_430, %c7_431, %c0_432] : memref<36x32x16xf32, #tpu.memory_space<vmem>>, vector<4x4x16xf32>
    %323 = vector.shape_cast %322 : vector<4x4x16xf32> to vector<16x16xf32>
    %c19_433 = arith.constant 19 : index
    %c8_434 = arith.constant 8 : index
    %c0_435 = arith.constant 0 : index
    %324 = vector.load %arg5[%c19_433, %c8_434, %c0_435] : memref<36x32x16xf32, #tpu.memory_space<vmem>>, vector<4x4x16xf32>
    %325 = vector.shape_cast %324 : vector<4x4x16xf32> to vector<16x16xf32>
    %c19_436 = arith.constant 19 : index
    %c9_437 = arith.constant 9 : index
    %c0_438 = arith.constant 0 : index
    %326 = vector.load %arg5[%c19_436, %c9_437, %c0_438] : memref<36x32x16xf32, #tpu.memory_space<vmem>>, vector<4x4x16xf32>
    %327 = vector.shape_cast %326 : vector<4x4x16xf32> to vector<16x16xf32>
    %c20_439 = arith.constant 20 : index
    %c7_440 = arith.constant 7 : index
    %c0_441 = arith.constant 0 : index
    %328 = vector.load %arg5[%c20_439, %c7_440, %c0_441] : memref<36x32x16xf32, #tpu.memory_space<vmem>>, vector<4x4x16xf32>
    %329 = vector.shape_cast %328 : vector<4x4x16xf32> to vector<16x16xf32>
    %c20_442 = arith.constant 20 : index
    %c8_443 = arith.constant 8 : index
    %c0_444 = arith.constant 0 : index
    %330 = vector.load %arg5[%c20_442, %c8_443, %c0_444] : memref<36x32x16xf32, #tpu.memory_space<vmem>>, vector<4x4x16xf32>
    %331 = vector.shape_cast %330 : vector<4x4x16xf32> to vector<16x16xf32>
    %c20_445 = arith.constant 20 : index
    %c9_446 = arith.constant 9 : index
    %c0_447 = arith.constant 0 : index
    %332 = vector.load %arg5[%c20_445, %c9_446, %c0_447] : memref<36x32x16xf32, #tpu.memory_space<vmem>>, vector<4x4x16xf32>
    %333 = vector.shape_cast %332 : vector<4x4x16xf32> to vector<16x16xf32>
    %334 = tpu.concatenate %317, %319, %321, %323, %325, %327, %329, %331, %333 in 1 : vector<16x16xf32>, vector<16x16xf32>, vector<16x16xf32>, vector<16x16xf32>, vector<16x16xf32>, vector<16x16xf32>, vector<16x16xf32>, vector<16x16xf32>, vector<16x16xf32> -> vector<16x144xf32>
    %335 = tpu.concatenate %310, %334 in 0 : vector<16x144xf32>, vector<16x144xf32> -> vector<32x144xf32>
    %c448 = arith.constant 448 : index
    %c0_448 = arith.constant 0 : index
    %336 = vector.load %arg2[%c448, %c0_448] : memref<736x32xf32, #tpu.memory_space<vmem>>, vector<144x16xf32>
    %cst_449 = arith.constant dense<0.000000e+00> : vector<32x16xf32>
    %337 = tpu.matmul %335, %336, %cst_449 {dimension_numbers = #tpu.dot_dimension_numbers<[1], [0], [0], [1], [0, 0, 1, 1], [], []>} : vector<32x144xf32>, vector<144x16xf32>, vector<32x16xf32> -> vector<32x16xf32>
    %c7_450 = arith.constant 7 : index
    %c0_451 = arith.constant 0 : index
    %338 = vector.load %arg3[%c7_450, %c0_451] : memref<9x32xf32, #tpu.memory_space<vmem>>, vector<1x16xf32>
    %339 = vector.broadcast %338 : vector<1x16xf32> to vector<32x16xf32>
    %340 = arith.addf %337, %339 : vector<32x16xf32>
    %341 = vector.extract_strided_slice %190 {offsets = [0, 0], sizes = [64, 16], strides = [1, 1]} : vector<128x16xf32> to vector<64x16xf32>
    %342 = vector.shape_cast %341 : vector<64x16xf32> to vector<8x8x16xf32>
    %343 = vector.extract_strided_slice %190 {offsets = [64, 0], sizes = [64, 16], strides = [1, 1]} : vector<128x16xf32> to vector<64x16xf32>
    %344 = vector.shape_cast %343 : vector<64x16xf32> to vector<8x8x16xf32>
    %345 = vector.shape_cast %274 : vector<4x4x16xf32> to vector<4x1x4x16xf32>
    %346 = vector.shape_cast %345 : vector<4x1x4x16xf32> to vector<4x1x4x16xf32>
    %347 = vector.broadcast %346 : vector<4x1x4x16xf32> to vector<4x2x4x16xf32>
    %348 = vector.shape_cast %347 : vector<4x2x4x16xf32> to vector<32x16xf32>
    %349 = vector.shape_cast %348 : vector<32x16xf32> to vector<32x1x16xf32>
    %350 = vector.shape_cast %349 : vector<32x1x16xf32> to vector<32x1x16xf32>
    %351 = vector.broadcast %350 : vector<32x1x16xf32> to vector<32x2x16xf32>
    %352 = vector.shape_cast %351 : vector<32x2x16xf32> to vector<64x16xf32>
    %353 = vector.shape_cast %352 : vector<64x16xf32> to vector<8x8x16xf32>
    %354 = arith.addf %342, %353 : vector<8x8x16xf32>
    %355 = vector.shape_cast %284 : vector<4x4x16xf32> to vector<4x1x4x16xf32>
    %356 = vector.shape_cast %355 : vector<4x1x4x16xf32> to vector<4x1x4x16xf32>
    %357 = vector.broadcast %356 : vector<4x1x4x16xf32> to vector<4x2x4x16xf32>
    %358 = vector.shape_cast %357 : vector<4x2x4x16xf32> to vector<32x16xf32>
    %359 = vector.shape_cast %358 : vector<32x16xf32> to vector<32x1x16xf32>
    %360 = vector.shape_cast %359 : vector<32x1x16xf32> to vector<32x1x16xf32>
    %361 = vector.broadcast %360 : vector<32x1x16xf32> to vector<32x2x16xf32>
    %362 = vector.shape_cast %361 : vector<32x2x16xf32> to vector<64x16xf32>
    %363 = vector.shape_cast %362 : vector<64x16xf32> to vector<8x8x16xf32>
    %364 = arith.addf %344, %363 : vector<8x8x16xf32>
    %cst_452 = arith.constant 0.000000e+00 : f32
    %365 = vector.broadcast %cst_452 : f32 to vector<1x10x16xf32>
    %cst_453 = arith.constant 0.000000e+00 : f32
    %366 = vector.broadcast %cst_453 : f32 to vector<8x1x16xf32>
    %c0_454 = arith.constant 0 : index
    %c7_455 = arith.constant 7 : index
    %c0_456 = arith.constant 0 : index
    %367 = vector.load %arg5[%c0_454, %c7_455, %c0_456] : memref<36x32x16xf32, #tpu.memory_space<vmem>>, vector<1x10x16xf32>
    tpu.vector_store %arg5[%c0_454, %c7_455, %c0_456], %365 {strides = array<i32>} : memref<36x32x16xf32, #tpu.memory_space<vmem>>, vector<1x10x16xf32>,
    %c9_457 = arith.constant 9 : index
    %c7_458 = arith.constant 7 : index
    %c0_459 = arith.constant 0 : index
    %368 = vector.load %arg5[%c9_457, %c7_458, %c0_459] : memref<36x32x16xf32, #tpu.memory_space<vmem>>, vector<1x10x16xf32>
    tpu.vector_store %arg5[%c9_457, %c7_458, %c0_459], %365 {strides = array<i32>} : memref<36x32x16xf32, #tpu.memory_space<vmem>>, vector<1x10x16xf32>,
    %c1_460 = arith.constant 1 : index
    %c7_461 = arith.constant 7 : index
    %c0_462 = arith.constant 0 : index
    %369 = vector.load %arg5[%c1_460, %c7_461, %c0_462] : memref<36x32x16xf32, #tpu.memory_space<vmem>>, vector<8x1x16xf32>
    tpu.vector_store %arg5[%c1_460, %c7_461, %c0_462], %366 {strides = array<i32>} : memref<36x32x16xf32, #tpu.memory_space<vmem>>, vector<8x1x16xf32>,
    %c1_463 = arith.constant 1 : index
    %c16_464 = arith.constant 16 : index
    %c0_465 = arith.constant 0 : index
    %370 = vector.load %arg5[%c1_463, %c16_464, %c0_465] : memref<36x32x16xf32, #tpu.memory_space<vmem>>, vector<8x1x16xf32>
    tpu.vector_store %arg5[%c1_463, %c16_464, %c0_465], %366 {strides = array<i32>} : memref<36x32x16xf32, #tpu.memory_space<vmem>>, vector<8x1x16xf32>,
    %c1_466 = arith.constant 1 : index
    %c8_467 = arith.constant 8 : index
    %c0_468 = arith.constant 0 : index
    %371 = vector.load %arg5[%c1_466, %c8_467, %c0_468] : memref<36x32x16xf32, #tpu.memory_space<vmem>>, vector<8x8x16xf32>
    tpu.vector_store %arg5[%c1_466, %c8_467, %c0_468], %354 {strides = array<i32>} : memref<36x32x16xf32, #tpu.memory_space<vmem>>, vector<8x8x16xf32>,
    %c0_469 = arith.constant 0 : index
    %c7_470 = arith.constant 7 : index
    %c0_471 = arith.constant 0 : index
    %372 = vector.load %arg5[%c0_469, %c7_470, %c0_471] : memref<36x32x16xf32, #tpu.memory_space<vmem>>, vector<8x8x16xf32>
    %373 = vector.shape_cast %372 : vector<8x8x16xf32> to vector<64x16xf32>
    %c0_472 = arith.constant 0 : index
    %c8_473 = arith.constant 8 : index
    %c0_474 = arith.constant 0 : index
    %374 = vector.load %arg5[%c0_472, %c8_473, %c0_474] : memref<36x32x16xf32, #tpu.memory_space<vmem>>, vector<8x8x16xf32>
    %375 = vector.shape_cast %374 : vector<8x8x16xf32> to vector<64x16xf32>
    %c0_475 = arith.constant 0 : index
    %c9_476 = arith.constant 9 : index
    %c0_477 = arith.constant 0 : index
    %376 = vector.load %arg5[%c0_475, %c9_476, %c0_477] : memref<36x32x16xf32, #tpu.memory_space<vmem>>, vector<8x8x16xf32>
    %377 = vector.shape_cast %376 : vector<8x8x16xf32> to vector<64x16xf32>
    %c1_478 = arith.constant 1 : index
    %c7_479 = arith.constant 7 : index
    %c0_480 = arith.constant 0 : index
    %378 = vector.load %arg5[%c1_478, %c7_479, %c0_480] : memref<36x32x16xf32, #tpu.memory_space<vmem>>, vector<8x8x16xf32>
    %379 = vector.shape_cast %378 : vector<8x8x16xf32> to vector<64x16xf32>
    %c1_481 = arith.constant 1 : index
    %c8_482 = arith.constant 8 : index
    %c0_483 = arith.constant 0 : index
    %380 = vector.load %arg5[%c1_481, %c8_482, %c0_483] : memref<36x32x16xf32, #tpu.memory_space<vmem>>, vector<8x8x16xf32>
    %381 = vector.shape_cast %380 : vector<8x8x16xf32> to vector<64x16xf32>
    %c1_484 = arith.constant 1 : index
    %c9_485 = arith.constant 9 : index
    %c0_486 = arith.constant 0 : index
    %382 = vector.load %arg5[%c1_484, %c9_485, %c0_486] : memref<36x32x16xf32, #tpu.memory_space<vmem>>, vector<8x8x16xf32>
    %383 = vector.shape_cast %382 : vector<8x8x16xf32> to vector<64x16xf32>
    %c2_487 = arith.constant 2 : index
    %c7_488 = arith.constant 7 : index
    %c0_489 = arith.constant 0 : index
    %384 = vector.load %arg5[%c2_487, %c7_488, %c0_489] : memref<36x32x16xf32, #tpu.memory_space<vmem>>, vector<8x8x16xf32>
    %385 = vector.shape_cast %384 : vector<8x8x16xf32> to vector<64x16xf32>
    %c2_490 = arith.constant 2 : index
    %c8_491 = arith.constant 8 : index
    %c0_492 = arith.constant 0 : index
    %386 = vector.load %arg5[%c2_490, %c8_491, %c0_492] : memref<36x32x16xf32, #tpu.memory_space<vmem>>, vector<8x8x16xf32>
    %387 = vector.shape_cast %386 : vector<8x8x16xf32> to vector<64x16xf32>
    %c2_493 = arith.constant 2 : index
    %c9_494 = arith.constant 9 : index
    %c0_495 = arith.constant 0 : index
    %388 = vector.load %arg5[%c2_493, %c9_494, %c0_495] : memref<36x32x16xf32, #tpu.memory_space<vmem>>, vector<8x8x16xf32>
    %389 = vector.shape_cast %388 : vector<8x8x16xf32> to vector<64x16xf32>
    %390 = tpu.concatenate %373, %375, %377, %379, %381, %383, %385, %387, %389 in 1 : vector<64x16xf32>, vector<64x16xf32>, vector<64x16xf32>, vector<64x16xf32>, vector<64x16xf32>, vector<64x16xf32>, vector<64x16xf32>, vector<64x16xf32>, vector<64x16xf32> -> vector<64x144xf32>
    %c18_496 = arith.constant 18 : index
    %c7_497 = arith.constant 7 : index
    %c0_498 = arith.constant 0 : index
    %391 = vector.load %arg5[%c18_496, %c7_497, %c0_498] : memref<36x32x16xf32, #tpu.memory_space<vmem>>, vector<1x10x16xf32>
    tpu.vector_store %arg5[%c18_496, %c7_497, %c0_498], %365 {strides = array<i32>} : memref<36x32x16xf32, #tpu.memory_space<vmem>>, vector<1x10x16xf32>,
    %c27_499 = arith.constant 27 : index
    %c7_500 = arith.constant 7 : index
    %c0_501 = arith.constant 0 : index
    %392 = vector.load %arg5[%c27_499, %c7_500, %c0_501] : memref<36x32x16xf32, #tpu.memory_space<vmem>>, vector<1x10x16xf32>
    tpu.vector_store %arg5[%c27_499, %c7_500, %c0_501], %365 {strides = array<i32>} : memref<36x32x16xf32, #tpu.memory_space<vmem>>, vector<1x10x16xf32>,
    %c19_502 = arith.constant 19 : index
    %c7_503 = arith.constant 7 : index
    %c0_504 = arith.constant 0 : index
    %393 = vector.load %arg5[%c19_502, %c7_503, %c0_504] : memref<36x32x16xf32, #tpu.memory_space<vmem>>, vector<8x1x16xf32>
    tpu.vector_store %arg5[%c19_502, %c7_503, %c0_504], %366 {strides = array<i32>} : memref<36x32x16xf32, #tpu.memory_space<vmem>>, vector<8x1x16xf32>,
    %c19_505 = arith.constant 19 : index
    %c16_506 = arith.constant 16 : index
    %c0_507 = arith.constant 0 : index
    %394 = vector.load %arg5[%c19_505, %c16_506, %c0_507] : memref<36x32x16xf32, #tpu.memory_space<vmem>>, vector<8x1x16xf32>
    tpu.vector_store %arg5[%c19_505, %c16_506, %c0_507], %366 {strides = array<i32>} : memref<36x32x16xf32, #tpu.memory_space<vmem>>, vector<8x1x16xf32>,
    %c19_508 = arith.constant 19 : index
    %c8_509 = arith.constant 8 : index
    %c0_510 = arith.constant 0 : index
    %395 = vector.load %arg5[%c19_508, %c8_509, %c0_510] : memref<36x32x16xf32, #tpu.memory_space<vmem>>, vector<8x8x16xf32>
    tpu.vector_store %arg5[%c19_508, %c8_509, %c0_510], %364 {strides = array<i32>} : memref<36x32x16xf32, #tpu.memory_space<vmem>>, vector<8x8x16xf32>,
    %c18_511 = arith.constant 18 : index
    %c7_512 = arith.constant 7 : index
    %c0_513 = arith.constant 0 : index
    %396 = vector.load %arg5[%c18_511, %c7_512, %c0_513] : memref<36x32x16xf32, #tpu.memory_space<vmem>>, vector<8x8x16xf32>
    %397 = vector.shape_cast %396 : vector<8x8x16xf32> to vector<64x16xf32>
    %c18_514 = arith.constant 18 : index
    %c8_515 = arith.constant 8 : index
    %c0_516 = arith.constant 0 : index
    %398 = vector.load %arg5[%c18_514, %c8_515, %c0_516] : memref<36x32x16xf32, #tpu.memory_space<vmem>>, vector<8x8x16xf32>
    %399 = vector.shape_cast %398 : vector<8x8x16xf32> to vector<64x16xf32>
    %c18_517 = arith.constant 18 : index
    %c9_518 = arith.constant 9 : index
    %c0_519 = arith.constant 0 : index
    %400 = vector.load %arg5[%c18_517, %c9_518, %c0_519] : memref<36x32x16xf32, #tpu.memory_space<vmem>>, vector<8x8x16xf32>
    %401 = vector.shape_cast %400 : vector<8x8x16xf32> to vector<64x16xf32>
    %c19_520 = arith.constant 19 : index
    %c7_521 = arith.constant 7 : index
    %c0_522 = arith.constant 0 : index
    %402 = vector.load %arg5[%c19_520, %c7_521, %c0_522] : memref<36x32x16xf32, #tpu.memory_space<vmem>>, vector<8x8x16xf32>
    %403 = vector.shape_cast %402 : vector<8x8x16xf32> to vector<64x16xf32>
    %c19_523 = arith.constant 19 : index
    %c8_524 = arith.constant 8 : index
    %c0_525 = arith.constant 0 : index
    %404 = vector.load %arg5[%c19_523, %c8_524, %c0_525] : memref<36x32x16xf32, #tpu.memory_space<vmem>>, vector<8x8x16xf32>
    %405 = vector.shape_cast %404 : vector<8x8x16xf32> to vector<64x16xf32>
    %c19_526 = arith.constant 19 : index
    %c9_527 = arith.constant 9 : index
    %c0_528 = arith.constant 0 : index
    %406 = vector.load %arg5[%c19_526, %c9_527, %c0_528] : memref<36x32x16xf32, #tpu.memory_space<vmem>>, vector<8x8x16xf32>
    %407 = vector.shape_cast %406 : vector<8x8x16xf32> to vector<64x16xf32>
    %c20_529 = arith.constant 20 : index
    %c7_530 = arith.constant 7 : index
    %c0_531 = arith.constant 0 : index
    %408 = vector.load %arg5[%c20_529, %c7_530, %c0_531] : memref<36x32x16xf32, #tpu.memory_space<vmem>>, vector<8x8x16xf32>
    %409 = vector.shape_cast %408 : vector<8x8x16xf32> to vector<64x16xf32>
    %c20_532 = arith.constant 20 : index
    %c8_533 = arith.constant 8 : index
    %c0_534 = arith.constant 0 : index
    %410 = vector.load %arg5[%c20_532, %c8_533, %c0_534] : memref<36x32x16xf32, #tpu.memory_space<vmem>>, vector<8x8x16xf32>
    %411 = vector.shape_cast %410 : vector<8x8x16xf32> to vector<64x16xf32>
    %c20_535 = arith.constant 20 : index
    %c9_536 = arith.constant 9 : index
    %c0_537 = arith.constant 0 : index
    %412 = vector.load %arg5[%c20_535, %c9_536, %c0_537] : memref<36x32x16xf32, #tpu.memory_space<vmem>>, vector<8x8x16xf32>
    %413 = vector.shape_cast %412 : vector<8x8x16xf32> to vector<64x16xf32>
    %414 = tpu.concatenate %397, %399, %401, %403, %405, %407, %409, %411, %413 in 1 : vector<64x16xf32>, vector<64x16xf32>, vector<64x16xf32>, vector<64x16xf32>, vector<64x16xf32>, vector<64x16xf32>, vector<64x16xf32>, vector<64x16xf32>, vector<64x16xf32> -> vector<64x144xf32>
    %415 = tpu.concatenate %390, %414 in 0 : vector<64x144xf32>, vector<64x144xf32> -> vector<128x144xf32>
    %c304 = arith.constant 304 : index
    %c0_538 = arith.constant 0 : index
    %416 = vector.load %arg2[%c304, %c0_538] : memref<736x32xf32, #tpu.memory_space<vmem>>, vector<144x16xf32>
    %cst_539 = arith.constant dense<0.000000e+00> : vector<128x16xf32>
    %417 = tpu.matmul %415, %416, %cst_539 {dimension_numbers = #tpu.dot_dimension_numbers<[1], [0], [0], [1], [0, 0, 1, 1], [], []>} : vector<128x144xf32>, vector<144x16xf32>, vector<128x16xf32> -> vector<128x16xf32>
    %c6 = arith.constant 6 : index
    %c0_540 = arith.constant 0 : index
    %418 = vector.load %arg3[%c6, %c0_540] : memref<9x32xf32, #tpu.memory_space<vmem>>, vector<1x16xf32>
    %419 = vector.broadcast %418 : vector<1x16xf32> to vector<128x16xf32>
    %420 = arith.addf %417, %419 : vector<128x16xf32>
    %421 = tpu.transpose %420, [1, 0] : vector<128x16xf32> -> vector<16x128xf32>
    %c0_541 = arith.constant 0 : index
    %c0_542 = arith.constant 0 : index
    %422 = vector.load %arg4[%c0_541, %c0_542] : memref<16x168xf32, #tpu.memory_space<vmem>>, vector<16x128xf32>
    tpu.vector_store %arg4[%c0_541, %c0_542], %421 {strides = array<i32>} : memref<16x168xf32, #tpu.memory_space<vmem>>, vector<16x128xf32>,
    %423 = tpu.transpose %340, [1, 0] : vector<32x16xf32> -> vector<16x32xf32>
    %c0_543 = arith.constant 0 : index
    %c128 = arith.constant 128 : index
    %424 = vector.load %arg4[%c0_543, %c128] : memref<16x168xf32, #tpu.memory_space<vmem>>, vector<16x32xf32>
    tpu.vector_store %arg4[%c0_543, %c128], %423 {strides = array<i32>} : memref<16x168xf32, #tpu.memory_space<vmem>>, vector<16x32xf32>,
    %425 = tpu.transpose %260, [1, 0] : vector<8x16xf32> -> vector<16x8xf32>
    %c0_544 = arith.constant 0 : index
    %c160 = arith.constant 160 : index
    %426 = vector.load %arg4[%c0_544, %c160] : memref<16x168xf32, #tpu.memory_space<vmem>>, vector<16x8xf32>
    tpu.vector_store %arg4[%c0_544, %c160], %425 {strides = array<i32>} : memref<16x168xf32, #tpu.memory_space<vmem>>, vector<16x8xf32>,
    return
  }
  func.func @transform_0(%arg0: i32) -> (i32, i32, i32, i32) {
    %c0_i32 = arith.constant 0 : i32
    %c0_i32_0 = arith.constant 0 : i32
    %c0_i32_1 = arith.constant 0 : i32
    %c0_i32_2 = arith.constant 0 : i32
    %c0_i32_3 = arith.constant 0 : i32
    return %c0_i32, %c0_i32_0, %c0_i32_1, %c0_i32_2 : i32, i32, i32, i32
  }
  func.func @transform_1(%arg0: i32) -> (i32, i32) {
    %c0_i32 = arith.constant 0 : i32
    %c0_i32_0 = arith.constant 0 : i32
    %c0_i32_1 = arith.constant 0 : i32
    return %c0_i32, %c0_i32_0 : i32, i32
  }
  func.func @transform_2(%arg0: i32) -> (i32, i32) {
    %c0_i32 = arith.constant 0 : i32
    %c0_i32_0 = arith.constant 0 : i32
    %c0_i32_1 = arith.constant 0 : i32
    return %c0_i32, %c0_i32_0 : i32, i32
  }
  func.func @transform_3(%arg0: i32) -> (i32, i32) {
    %c0_i32 = arith.constant 0 : i32
    %c0_i32_0 = arith.constant 0 : i32
    %c0_i32_1 = arith.constant 0 : i32
    return %c0_i32, %c0_i32_0 : i32, i32
  }
}

</mosaic_0001>

<bundles_post_ra>
// kernel: backbone_with_fpn_forward.1
= control target key start
LH: loop header
LB: loop body
LE: loop exit
PB: predicated region body
PF: predicated region fallthrough
CT: control target
= control target key end

     0   :  { %vm79_vm0 = vcmask 23552   ;;  %vm82_vm1 = vcmask 17408   ;;  %vm89_vm2 = vcmask 16384   ;;  %v9205_v0 = vmov 0.0   ;;  %s6222_s29 = smov 6   ;;  %s6223_s30 = smov 3   ;;  %s9199_s0 = inlined_call_operand.vmem [shape: f32[2,16,16,3], index: 0, kind: input, shape index: {}]   ;;  %s9200_s1 = inlined_call_operand.vmem [shape: f32[736,32], index: 1, kind: input, shape index: {}]   ;;  %s9201_s2 = inlined_call_operand.vmem [shape: f32[9,32], index: 2, kind: input, shape index: {}]   ;;  %s9202_s3 = inlined_call_operand.vmem [shape: f32[16,168], index: 3, kind: output, shape index: {}]  }
   0x1   :  { %80 = vst.msk [vmem:[#allocation2 + $0x7] sm:$0xff] %vm79_vm0, %v9205_v0  ;;  %81 = vst.msk [vmem:[#allocation2 + $0xf] sm:$0xff] %vm79_vm0, %v9205_v0  ;;  %v16_v1 = vld [vmem:[%s9199_s0 + $0x10] sm:$0xff]  ;;  %v17_v2 = vld [vmem:[%s9199_s0 + $0x18] sm:$0xff]  ;;  %vm1394_vm3 = vcmask 57344   ;;  %vm1898_vm4 = vcmask 122880  }
   0x2   :  { %83 = vst.msk [vmem:[#allocation2 + $0x17] sm:$0x3] %vm82_vm1, %v9205_v0  ;;  %629 = vst.msk [vmem:[#allocation2 + $0x257] sm:$0x3] %vm82_vm1, %v9205_v0  ;;  %v18_v3 = vld [vmem:[%s9199_s0 + $0x20] sm:$0xff]  ;;  %v19_v4 = vld [vmem:[%s9199_s0 + $0x28] sm:$0xff] }
   0x3   :  { %627 = vst.msk [vmem:[#allocation2 + $0x247] sm:$0xff] %vm79_vm0, %v9205_v0  ;;  %628 = vst.msk [vmem:[#allocation2 + $0x24f] sm:$0xff] %vm79_vm0, %v9205_v0  ;;  %v14_v5 = vld [vmem:[%s9199_s0] sm:$0xff]  ;;  %v15_v6 = vld [vmem:[%s9199_s0 + $0x8] sm:$0xff]  ;;  %s6224_s4 = smov 9   ;;  %s6225_s5 = smov 12  }
   0x4   :  { %92 = vst.msk [vmem:[#allocation2 + $0x67] sm:$0x1] %vm89_vm2, %v9205_v0  ;;  %90 = vst.msk [vmem:[#allocation2 + $0x27] sm:$0x1] %vm89_vm2, %v9205_v0  ;;  %v20_v7 = vld [vmem:[%s9199_s0 + $0x30] sm:$0xff]  ;;  %v21_v8 = vld [vmem:[%s9199_s0 + $0x38] sm:$0xff] }
   0x5   :  { %91 = vst.msk [vmem:[#allocation2 + $0x47] sm:$0x1] %vm89_vm2, %v9205_v0  ;;  %93 = vst.msk [vmem:[#allocation2 + $0x87] sm:$0x1] %vm89_vm2, %v9205_v0  ;;  %v24_v9 = vld [vmem:[%s9199_s0 + $0x50] sm:$0xff]  ;;  %v25_v10 = vld [vmem:[%s9199_s0 + $0x58] sm:$0xff] }
   0x6   :  { %94 = vst.msk [vmem:[#allocation2 + $0xa7] sm:$0x1] %vm89_vm2, %v9205_v0  ;;  %95 = vst.msk [vmem:[#allocation2 + $0xc7] sm:$0x1] %vm89_vm2, %v9205_v0  ;;  %v22_v11 = vld [vmem:[%s9199_s0 + $0x40] sm:$0xff]  ;;  %v23_v12 = vld [vmem:[%s9199_s0 + $0x48] sm:$0xff] }
   0x7   :  { %96 = vst.msk [vmem:[#allocation2 + $0xe7] sm:$0x1] %vm89_vm2, %v9205_v0  ;;  %97 = vst.msk [vmem:[#allocation2 + $0x107] sm:$0x1] %vm89_vm2, %v9205_v0  ;;  %v26_v13 = vld [vmem:[%s9199_s0 + $0x60] sm:$0xff]  ;;  %v27_v14 = vld [vmem:[%s9199_s0 + $0x68] sm:$0xff] }
   0x8   :  { %98 = vst.msk [vmem:[#allocation2 + $0x127] sm:$0x1] %vm89_vm2, %v9205_v0  ;;  %99 = vst.msk [vmem:[#allocation2 + $0x147] sm:$0x1] %vm89_vm2, %v9205_v0  ;;  %v28_v15 = vld [vmem:[%s9199_s0 + $0x70] sm:$0xff]  ;;  %v29_v16 = vld [vmem:[%s9199_s0 + $0x78] sm:$0xff] }
   0x9   :  { %100 = vst.msk [vmem:[#allocation2 + $0x167] sm:$0x1] %vm89_vm2, %v9205_v0  ;;  %101 = vst.msk [vmem:[#allocation2 + $0x187] sm:$0x1] %vm89_vm2, %v9205_v0  ;;  %v32_v17 = vld [vmem:[%s9199_s0 + $0x90] sm:$0xff]  ;;  %v33_v18 = vld [vmem:[%s9199_s0 + $0x98] sm:$0xff] }
   0xa   :  { %102 = vst.msk [vmem:[#allocation2 + $0x1a7] sm:$0x1] %vm89_vm2, %v9205_v0  ;;  %103 = vst.msk [vmem:[#allocation2 + $0x1c7] sm:$0x1] %vm89_vm2, %v9205_v0  ;;  %v30_v19 = vld [vmem:[%s9199_s0 + $0x80] sm:$0xff]  ;;  %v31_v20 = vld [vmem:[%s9199_s0 + $0x88] sm:$0xff] }
   0xb   :  { %104 = vst.msk [vmem:[#allocation2 + $0x1e7] sm:$0x1] %vm89_vm2, %v9205_v0  ;;  %105 = vst.msk [vmem:[#allocation2 + $0x207] sm:$0x1] %vm89_vm2, %v9205_v0  ;;  %v34_v21 = vld [vmem:[%s9199_s0 + $0xa0] sm:$0xff]  ;;  %v35_v24 = vld [vmem:[%s9199_s0 + $0xa8] sm:$0xff] }
   0xc   :  { %635 = vst.msk [vmem:[#allocation2 + $0x267] sm:$0x1] %vm89_vm2, %v9205_v0  ;;  %636 = vst.msk [vmem:[#allocation2 + $0x287] sm:$0x1] %vm89_vm2, %v9205_v0  ;;  %v187_v22 = vld [vmem:[#allocation2 + $0x9] ss:$2 sm:$0xff] }
   0xd   :  { %637 = vst.msk [vmem:[#allocation2 + $0x2a7] sm:$0x1] %vm89_vm2, %v9205_v0  ;;  %638 = vst.msk [vmem:[#allocation2 + $0x2c7] sm:$0x1] %vm89_vm2, %v9205_v0  ;;  %v171_v23 = vld [vmem:[#allocation2 + $0x8] ss:$2 sm:$0xff]  ;;  %339 = vrot.lane.b32.xlu1 %v187_v22, %s6222_s29 }
   0xe   :  { %639 = vst.msk [vmem:[#allocation2 + $0x2e7] sm:$0x1] %vm89_vm2, %v9205_v0  ;;  %640 = vst.msk [vmem:[#allocation2 + $0x307] sm:$0x1] %vm89_vm2, %v9205_v0  ;;  %307 = vrot.lane.b32.xlu0 %v171_v23, %s6223_s30  ;;  %v36_v44 = vld [vmem:[%s9199_s0 + $0xb0] sm:$0xff]  ;;  %v37_v45 = vld [vmem:[%s9199_s0 + $0xb8] sm:$0xff] }
   0xf   :  { %641 = vst.msk [vmem:[#allocation2 + $0x327] sm:$0x1] %vm89_vm2, %v9205_v0  ;;  %642 = vst.msk [vmem:[#allocation2 + $0x347] sm:$0x1] %vm89_vm2, %v9205_v0  ;;  %vm1387_vm5 = vcmask 64512   ;;  %vm1389_vm6 = vcmask 58368  }
  0x10   :  { %643 = vst.msk [vmem:[#allocation2 + $0x367] sm:$0x1] %vm89_vm2, %v9205_v0  ;;  %644 = vst.msk [vmem:[#allocation2 + $0x387] sm:$0x1] %vm89_vm2, %v9205_v0  ;;  %v40_v48 = vld [vmem:[%s9199_s0 + $0xd0] sm:$0xff]  ;;  %vm1561_vm7 = vcmask 130048  }
  0x11   :  { %645 = vst.msk [vmem:[#allocation2 + $0x3a7] sm:$0x1] %vm89_vm2, %v9205_v0  ;;  %646 = vst.msk [vmem:[#allocation2 + $0x3c7] sm:$0x1] %vm89_vm2, %v9205_v0  ;;  %vm2720_vm8 = vcmask 123904   ;;  %v41_v49 = vld [vmem:[%s9199_s0 + $0xd8] sm:$0xff] }
  0x12   :  { %647 = vst.msk [vmem:[#allocation2 + $0x3e7] sm:$0x1] %vm89_vm2, %v9205_v0  ;;  %648 = vst.msk [vmem:[#allocation2 + $0x407] sm:$0x1] %vm89_vm2, %v9205_v0  ;;  %v38_v50 = vld [vmem:[%s9199_s0 + $0xc0] sm:$0xff]  ;;  %v39_v51 = vld [vmem:[%s9199_s0 + $0xc8] sm:$0xff] }
  0x13   :  { %649 = vst.msk [vmem:[#allocation2 + $0x427] sm:$0x1] %vm89_vm2, %v9205_v0  ;;  %650 = vst.msk [vmem:[#allocation2 + $0x447] sm:$0x1] %vm89_vm2, %v9205_v0  ;;  %s6226_s18 = smov 15   ;;  %v42_v53 = vld [vmem:[%s9199_s0 + $0xe0] sm:$0xff] }
  0x14   :  { %124 = vst.msk [vmem:[#allocation2 + $0x48] sm:$0xff] %vm79_vm0, %v16_v1  ;;  %125 = vst.msk [vmem:[#allocation2 + $0x50] sm:$0xff] %vm79_vm0, %v17_v2  ;;  %v43_v54 = vld [vmem:[%s9199_s0 + $0xe8] sm:$0xff]  ;;  %v5371_v59 = vld [vmem:[%s9199_s0 + $0x110] sm:$0xff]  ;;  %s6227_s10 = smov 18   ;;  %vm1222_vm9 = vcmask 1042432  }
  0x15   :  { %126 = vst.msk [vmem:[#allocation2 + $0x68] sm:$0xff] %vm79_vm0, %v18_v3  ;;  %127 = vst.msk [vmem:[#allocation2 + $0x70] sm:$0xff] %vm79_vm0, %v19_v4  ;;  %v6544_v56 = vld [vmem:[#allocation2 + $0x7] ss:$2 sm:$0xff]  ;;  %v5372_v60 = vld [vmem:[%s9199_s0 + $0x118] sm:$0xff]  ;;  %s6228_s12 = smov 21  }
  0x16   :  { %122 = vst.msk [vmem:[#allocation2 + $0x28] sm:$0xff] %vm79_vm0, %v14_v5  ;;  %123 = vst.msk [vmem:[#allocation2 + $0x30] sm:$0xff] %vm79_vm0, %v15_v6  ;;  %v44_v61 = vld [vmem:[%s9199_s0 + $0xf0] sm:$0xff]  ;;  %v45_v62 = vld [vmem:[%s9199_s0 + $0xf8] sm:$0xff]  ;;  %vm6229_vm10 = vmmov 1   ;;  %s6230_s24 = smov 24  }
  0x17   :  { %128 = vst.msk [vmem:[#allocation2 + $0x88] sm:$0xff] %vm79_vm0, %v20_v7  ;;  %129 = vst.msk [vmem:[#allocation2 + $0x90] sm:$0xff] %vm79_vm0, %v21_v8  ;;  %v5369_v2 = vld [vmem:[%s9199_s0 + $0x100] sm:$0xff]  ;;  %v5370_v4 = vld [vmem:[%s9199_s0 + $0x108] sm:$0xff]  ;;  %vm563_vm12 = vcmask 48128   ;;  %vm572_vm13 = vcmask 72704  }
  0x18   :  { %132 = vst.msk [vmem:[#allocation2 + $0xc8] sm:$0xff] %vm79_vm0, %v24_v9  ;;  %133 = vst.msk [vmem:[#allocation2 + $0xd0] sm:$0xff] %vm79_vm0, %v25_v10  ;;  %v5373_v7 = vld [vmem:[%s9199_s0 + $0x120] sm:$0xff]  ;;  %v5374_v8 = vld [vmem:[%s9199_s0 + $0x128] sm:$0xff]  ;;  %vm581_vm14 = vcmask 97280   ;;  %vm590_vm15 = vcmask 121856  }
  0x19   :  { %130 = vst.msk [vmem:[#allocation2 + $0xa8] sm:$0xff] %vm79_vm0, %v22_v11  ;;  %131 = vst.msk [vmem:[#allocation2 + $0xb0] sm:$0xff] %vm79_vm0, %v23_v12  ;;  %v5375_v9 = vld [vmem:[%s9199_s0 + $0x130] sm:$0xff]  ;;  %v5376_v10 = vld [vmem:[%s9199_s0 + $0x138] sm:$0xff]  ;;  %vm599_vm1 = vcmask 146432   ;;  %vm608_vm2 = vcmask 171008  }
  0x1a   :  { %134 = vst.msk [vmem:[#allocation2 + $0xe8] sm:$0xff] %vm79_vm0, %v26_v13  ;;  %135 = vst.msk [vmem:[#allocation2 + $0xf0] sm:$0xff] %vm79_vm0, %v27_v14  ;;  %v5379_v11 = vld [vmem:[%s9199_s0 + $0x150] sm:$0xff]  ;;  %v5380_v12 = vld [vmem:[%s9199_s0 + $0x158] sm:$0xff]  ;;  %s6235_s20 = smov 32   ;;  %s6236_s21 = smov 64  }
  0x1b   :  { %136 = vst.msk [vmem:[#allocation2 + $0x108] sm:$0xff] %vm79_vm0, %v28_v15  ;;  %137 = vst.msk [vmem:[#allocation2 + $0x110] sm:$0xff] %vm79_vm0, %v29_v16  ;;  %v189_v25 = vld [vmem:[#allocation2 + $0x49] ss:$2 sm:$0xff]  ;;  %v173_v26 = vld [vmem:[#allocation2 + $0x48] ss:$2 sm:$0xff] }
  0x1c   :  { %140 = vst.msk [vmem:[#allocation2 + $0x148] sm:$0xff] %vm79_vm0, %v32_v17  ;;  %141 = vst.msk [vmem:[#allocation2 + $0x150] sm:$0xff] %vm79_vm0, %v33_v18  ;;  %v205_v27 = vld [vmem:[#allocation2 + $0x67] ss:$2 sm:$0xff]  ;;  %v6429_v30 = vld [vmem:[#allocation2 + $0x68] ss:$2 sm:$0xff]  ;;  %341 = vrot.lane.b32.xlu1 %v189_v25, %s6222_s29  ;;  %309 = vrot.lane.b32.xlu0 %v173_v26, %s6223_s30 }
  0x1d   :  { %138 = vst.msk [vmem:[#allocation2 + $0x128] sm:$0xff] %vm79_vm0, %v30_v19  ;;  %139 = vst.msk [vmem:[#allocation2 + $0x130] sm:$0xff] %vm79_vm0, %v31_v20  ;;  %v203_v28 = vld [vmem:[#allocation2 + $0x27] ss:$2 sm:$0xff]  ;;  %v219_v29 = vld [vmem:[#allocation2 + $0x28] ss:$2 sm:$0xff] }
  0x1e   :  { %142 = vst.msk [vmem:[#allocation2 + $0x168] sm:$0xff] %vm79_vm0, %v34_v21  ;;  %143 = vst.msk [vmem:[#allocation2 + $0x170] sm:$0xff] %vm79_vm0, %v35_v24  ;;  %v6445_v32 = vld [vmem:[#allocation2 + $0x48] ss:$2 sm:$0xff]  ;;  %v235_v40 = vld [vmem:[#allocation2 + $0x29] ss:$2 sm:$0xff] }
  0x1f   :  { %1395 = vst.msk [vmem:[#allocation2 + $0x27] sm:$0x1] %vm1394_vm3, %v9205_v0  ;;  %1397 = vst.msk [vmem:[#allocation2 + $0x67] sm:$0x1] %vm1394_vm3, %v9205_v0  ;;  %v175_v35 = vld [vmem:[#allocation2 + $0x88] ss:$2 sm:$0xff] }
  0x20   :  { %1403 = vst.msk [vmem:[#allocation2 + $0x30] sm:$0x1] %vm1394_vm3, %v9205_v0  ;;  %1405 = vst.msk [vmem:[#allocation2 + $0x70] sm:$0x1] %vm1394_vm3, %v9205_v0  ;;  %v6443_v31 = vld [vmem:[#allocation2 + $0xa7] ss:$2 sm:$0xff]  ;;  %373 = vrot.lane.b32.xlu1 %v205_v27, %s6224_s4  ;;  %371 = vrot.lane.b32.xlu0 %v203_v28, %s6224_s4 }
  0x21   :  { %4170 = vst.msk [vmem:[#allocation2 + $0x30] sm:$0x1] %vm1898_vm4, %v9205_v0  ;;  %4172 = vst.msk [vmem:[#allocation2 + $0x70] sm:$0x1] %vm1898_vm4, %v9205_v0  ;;  %v6453_v33 = vld [vmem:[#allocation2 + $0xa8] ss:$2 sm:$0xff] }
  0x22   :  { %1399 = vst.msk [vmem:[#allocation2 + $0xa7] sm:$0x1] %vm1394_vm3, %v9205_v0  ;;  %1404 = vst.msk [vmem:[#allocation2 + $0x50] sm:$0x1] %vm1394_vm3, %v9205_v0  ;;  %v6455_v34 = vld [vmem:[#allocation2 + $0xe7] ss:$2 sm:$0xff] }
  0x23   :  { %1407 = vst.msk [vmem:[#allocation2 + $0xb0] sm:$0x1] %vm1394_vm3, %v9205_v0  ;;  %1401 = vst.msk [vmem:[#allocation2 + $0xe7] sm:$0x1] %vm1394_vm3, %v9205_v0  ;;  %v6463_v36 = vld [vmem:[#allocation2 + $0x88] ss:$2 sm:$0xff] }
  0x24   :  { %4171 = vst.msk [vmem:[#allocation2 + $0x50] sm:$0x1] %vm1898_vm4, %v9205_v0  ;;  %v6465_v37 = vld [vmem:[#allocation2 + $0xe8] ss:$2 sm:$0xff]  ;;  %4174 = vst.msk [vmem:[#allocation2 + $0xb0] sm:$0x1] %vm1898_vm4, %v9205_v0  ;;  %311 = vrot.lane.b32.xlu1 %v175_v35, %s6223_s30  ;;  %403 = vrot.lane.b32.xlu0 %v219_v29, %s6225_s5 }
  0x25   :  { %1406 = vst.msk [vmem:[#allocation2 + $0x90] sm:$0x1] %vm1394_vm3, %v9205_v0  ;;  %1409 = vst.msk [vmem:[#allocation2 + $0xf0] sm:$0x1] %vm1394_vm3, %v9205_v0  ;;  %v177_v38 = vld [vmem:[#allocation2 + $0xc8] ss:$2 sm:$0xff] }
  0x26   :  { %4173 = vst.msk [vmem:[#allocation2 + $0x90] sm:$0x1] %vm1898_vm4, %v9205_v0  ;;  %4176 = vst.msk [vmem:[#allocation2 + $0xf0] sm:$0x1] %vm1898_vm4, %v9205_v0  ;;  %v6479_v39 = vld [vmem:[#allocation2 + $0xc8] ss:$2 sm:$0xff] }
  0x27   :  { %v6481_v41 = vld [vmem:[#allocation2 + $0x108] ss:$2 sm:$0xff]  ;;  %1408 = vst.msk [vmem:[#allocation2 + $0xd0] sm:$0x1] %vm1394_vm3, %v9205_v0  ;;  %v6489_v43 = vld [vmem:[#allocation2 + $0x127] ss:$2 sm:$0xff]  ;;  %vm6648_vm11 = vmpackc.low %vm1222_vm9, %vm6229_vm10 }
  0x28   :  { %v6485_v42 = vld [vmem:[#allocation2 + $0x108] ss:$2 sm:$0xff]  ;;  %4175 = vst.msk [vmem:[#allocation2 + $0xd0] sm:$0x1] %vm1898_vm4, %v9205_v0  ;;  %v6507_v47 = vld [vmem:[#allocation2 + $0x129] ss:$2 sm:$0xff]  ;;  %435 = vrot.lane.b32.xlu1 %v235_v40, %s6226_s18  ;;  %405 = vrot.lane.b32.xlu0 %v6429_v30, %s6225_s5 }
  0x29   :  { %1410 = vst.msk [vmem:[#allocation2 + $0x110] sm:$0x1] %vm1394_vm3, %v9205_v0  ;;  %v6501_v46 = vld [vmem:[#allocation2 + $0x128] ss:$2 sm:$0xff]  ;;  %v252_v52 = vld [vmem:[#allocation2 + $0x47] ss:$2 sm:$0xff] }
  0x2a   :  { %4177 = vst.msk [vmem:[#allocation2 + $0x110] sm:$0x1] %vm1898_vm4, %v9205_v0  ;;  %v191_v55 = vld [vmem:[#allocation2 + $0x89] ss:$2 sm:$0xff]  ;;  %v1164_v14 = vld [vmem:[%s9200_s1] sm:$0xff]  ;;  %vm1173_vm9 = vcmask 220160  }
  0x2b   :  { %144 = vst.msk [vmem:[#allocation2 + $0x188] sm:$0xff] %vm79_vm0, %v36_v44  ;;  %145 = vst.msk [vmem:[#allocation2 + $0x190] sm:$0xff] %vm79_vm0, %v37_v45  ;;  %v6546_v57 = vld [vmem:[#allocation2 + $0x47] ss:$2 sm:$0xff]  ;;  %v1167_v21 = vld [vmem:[%s9200_s1 + $0x18] sm:$0x7] }
  0x2c   :  { %1392 = vst.msk [vmem:[#allocation2 + $0x127] sm:$0xff] %vm1387_vm5, %v9205_v0  ;;  %v254_v58 = vld [vmem:[#allocation2 + $0x87] ss:$2 sm:$0xff]  ;;  %1388 = vst.msk [vmem:[#allocation2 + $0x7] sm:$0xff] %vm1387_vm5, %v9205_v0  ;;  %343 = vrot.lane.b32.xlu1 %v191_v55, %s6222_s29  ;;  %313 = vrot.lane.b32.xlu0 %v177_v38, %s6223_s30  ;;  %v5384_v44 = vld [vmem:[%s9199_s0 + $0x178] sm:$0xff]  ;;  %s6237_s22 = smov 40  }
  0x2d   :  { %1393 = vst.msk [vmem:[#allocation2 + $0x12f] sm:$0x3] %vm1389_vm6, %v9205_v0  ;;  %1390 = vst.msk [vmem:[#allocation2 + $0xf] sm:$0x3] %vm1389_vm6, %v9205_v0  ;;  %v6568_v63 = vld [vmem:[#allocation2 + $0x87] ss:$2 sm:$0xff] }
  0x2e   :  { %148 = vst.msk [vmem:[#allocation2 + $0x1c8] sm:$0xff] %vm79_vm0, %v40_v48  ;;  %149 = vst.msk [vmem:[#allocation2 + $0x1d0] sm:$0xff] %vm79_vm0, %v41_v49  ;;  %v237_v1 = vld [vmem:[#allocation2 + $0x69] ss:$2 sm:$0xff]  ;;  %v5377_v17 = vld [vmem:[%s9199_s0 + $0x140] sm:$0xff]  ;;  %vm1569_vm10 = vcmask 326656  }
  0x2f   :  { %4160 = vst.msk [vmem:[#allocation2 + $0x127] sm:$0xff] %vm1561_vm7, %v9205_v0  ;;  %v193_v3 = vld [vmem:[#allocation2 + $0xc9] ss:$2 sm:$0xff]  ;;  %v5381_v28 = vld [vmem:[%s9199_s0 + $0x160] sm:$0xff]  ;;  %v5388_v49 = vld [vmem:[%s9199_s0 + $0x198] sm:$0xff]  ;;  %s6240_s15 = smov 96  }
  0x30   :  { %4161 = vst.msk [vmem:[#allocation2 + $0x12f] sm:$0x3] %vm2720_vm8, %v9205_v0  ;;  %467 = vrot.lane.b32.xlu1 %v252_v52, %s6227_s10  ;;  %437 = vrot.lane.b32.xlu0 %v237_v1, %s6226_s18  ;;  %v6585_v5 = vld [vmem:[#allocation2 + $0xc7] ss:$2 sm:$0xff]  ;;  %s6241_s16 = smov 80   ;;  %s6242_s17 = smov 112  }
  0x31   :  { %146 = vst.msk [vmem:[#allocation2 + $0x1a8] sm:$0xff] %vm79_vm0, %v38_v50  ;;  %147 = vst.msk [vmem:[#allocation2 + $0x1b0] sm:$0xff] %vm79_vm0, %v39_v51  ;;  %v6588_v6 = vld [vmem:[#allocation2 + $0xc7] ss:$2 sm:$0xff] }
  0x32   :  { %150 = vst.msk [vmem:[#allocation2 + $0x1e8] sm:$0xff] %vm79_vm0, %v42_v53  ;;  %151 = vst.msk [vmem:[#allocation2 + $0x1f0] sm:$0xff] %vm79_vm0, %v43_v54  ;;  %v6616_v13 = vld [vmem:[#allocation2 + $0x107] ss:$2 sm:$0xff] }
  0x33   :  { %1396 = vst.msk [vmem:[#allocation2 + $0x47] sm:$0x1] %vm1394_vm3, %v9205_v0  ;;  %1398 = vst.msk [vmem:[#allocation2 + $0x87] sm:$0x1] %vm1394_vm3, %v9205_v0  ;;  %v1165_v15 = vld [vmem:[%s9200_s1 + $0x8] sm:$0xff]  ;;  %v1166_v20 = vld [vmem:[%s9200_s1 + $0x10] sm:$0xff] }
  0x34   :  { %669 = vst.msk [vmem:[#allocation2 + $0x288] sm:$0xff] %vm79_vm0, %v5371_v59  ;;  %670 = vst.msk [vmem:[#allocation2 + $0x290] sm:$0xff] %vm79_vm0, %v5372_v60  ;;  %375 = vrot.lane.b32.xlu1 %v6443_v31, %s6224_s4  ;;  %345 = vrot.lane.b32.xlu0 %v193_v3, %s6222_s29  ;;  %v5638_v16 = vpack.c.bf16 %v1165_v15, %v1164_v14  ;;  %v5378_v18 = vld [vmem:[%s9199_s0 + $0x148] sm:$0xff]  ;;  %v5642_v26 = vpack.c.bf16 %v1167_v21, %v1166_v20  ;;  %v5387_v48 = vld [vmem:[%s9199_s0 + $0x190] sm:$0xff] }
  0x35   :  { %152 = vst.msk [vmem:[#allocation2 + $0x208] sm:$0xff] %vm79_vm0, %v44_v61  ;;  %153 = vst.msk [vmem:[#allocation2 + $0x210] sm:$0xff] %vm79_vm0, %v45_v62  ;;  %v6633_v19 = vld [vmem:[#allocation2 + $0x107] ss:$2 sm:$0xff]  ;;  %v229_v3 = vld [vmem:[#allocation2 + $0x168] ss:$2 sm:$0xff] }
  0x36   :  { %667 = vst.msk [vmem:[#allocation2 + $0x268] sm:$0xff] %vm79_vm0, %v5369_v2  ;;  %668 = vst.msk [vmem:[#allocation2 + $0x270] sm:$0xff] %vm79_vm0, %v5370_v4  ;;  %5639 = vmatprep.subr.bf16.mxu0 %v5638_v16  ;;  %v5382_v29 = vld [vmem:[%s9199_s0 + $0x168] sm:$0xff]  ;;  %v5385_v52 = vld [vmem:[%s9199_s0 + $0x180] sm:$0xff] }
  0x37   :  { %1400 = vst.msk [vmem:[#allocation2 + $0xc7] sm:$0x1] %vm1394_vm3, %v9205_v0  ;;  %1402 = vst.msk [vmem:[#allocation2 + $0x107] sm:$0x1] %vm1394_vm3, %v9205_v0  ;;  %5641 = vmatpush3.bf16.msra.mxu0 %v5638_v16  ;;  %v286_v50 = vld [vmem:[#allocation2 + $0x89] ss:$2 sm:$0xff] }
  0x38   :  { %671 = vst.msk [vmem:[#allocation2 + $0x2a8] sm:$0xff] %vm79_vm0, %v5373_v7  ;;  %672 = vst.msk [vmem:[#allocation2 + $0x2b0] sm:$0xff] %vm79_vm0, %v5374_v8  ;;  %499 = vrot.lane.b32.xlu1 %v6445_v32, %s6228_s12  ;;  %469 = vrot.lane.b32.xlu0 %v254_v58, %s6227_s10  ;;  %v284_v32 = vld [vmem:[#allocation2 + $0x49] ss:$2 sm:$0xff]  ;;  %v5389_v58 = vld [vmem:[%s9199_s0 + $0x1a0] sm:$0xff] }
  0x39   :  { %673 = vst.msk [vmem:[#allocation2 + $0x2c8] sm:$0xff] %vm79_vm0, %v5375_v9  ;;  %674 = vst.msk [vmem:[#allocation2 + $0x2d0] sm:$0xff] %vm79_vm0, %v5376_v10  ;;  %5644 = vmatprep.subr.msk.bf16.mxu0 %vm6648_vm11, %v5642_v26  ;;  %v239_v51 = vld [vmem:[#allocation2 + $0xa9] ss:$2 sm:$0xff]  ;;  %v183_v4 = vld [vmem:[#allocation2 + $0x188] ss:$2 sm:$0xff] }
  0x3a   :  { %677 = vst.msk [vmem:[#allocation2 + $0x308] sm:$0xff] %vm79_vm0, %v5379_v11  ;;  %678 = vst.msk [vmem:[#allocation2 + $0x310] sm:$0xff] %vm79_vm0, %v5380_v12  ;;  %v5386_v53 = vld [vmem:[%s9199_s0 + $0x188] sm:$0xff]  ;;  %v5391_v62 = vld [vmem:[%s9199_s0 + $0x1b0] sm:$0xff] }
  0x3b   :  { %675 = vst.msk [vmem:[#allocation2 + $0x2e8] sm:$0xff] %vm79_vm0, %v5377_v17  ;;  %676 = vst.msk [vmem:[#allocation2 + $0x2f0] sm:$0xff] %vm79_vm0, %v5378_v18  ;;  %v6652_v23 = vld [vmem:[#allocation2 + $0x288] ss:$2 sm:$0xff]  ;;  %5647 = vmatpush3.bf16.msk.msra.mxu0 %vm6648_vm11, %v5642_v26  ;;  %v241_v54 = vld [vmem:[#allocation2 + $0xe9] ss:$2 sm:$0xff] }
  0x3c   :  { %v6662_v27 = vld [vmem:[#allocation2 + $0x288] ss:$2 sm:$0xff]  ;;  %679 = vst.msk [vmem:[#allocation2 + $0x328] sm:$0xff] %vm79_vm0, %v5381_v28  ;;  %680 = vst.msk [vmem:[#allocation2 + $0x330] sm:$0xff] %vm79_vm0, %v5382_v29  ;;  %407 = vrot.lane.b32.xlu1 %v6453_v33, %s6225_s5  ;;  %377 = vrot.lane.b32.xlu0 %v6455_v34, %s6224_s4  ;;  %v197_v55 = vld [vmem:[#allocation2 + $0x149] ss:$2 sm:$0xff] }
  0x3d   :  { %v6654_v24 = vld [vmem:[#allocation2 + $0x267] ss:$2 sm:$0xff]  ;;  %v6656_v25 = vld [vmem:[#allocation2 + $0x268] ss:$2 sm:$0xff]  ;;  %1595 = vst.msk [vmem:[#allocation2 + $0x290] sm:$0x1] %vm1394_vm3, %v9205_v0 }
  0x3e   :  { %1586 = vst.msk [vmem:[#allocation2 + $0x267] sm:$0x1] %vm1394_vm3, %v9205_v0  ;;  %1594 = vst.msk [vmem:[#allocation2 + $0x270] sm:$0x1] %vm1394_vm3, %v9205_v0  ;;  %v5383_v33 = vld [vmem:[%s9199_s0 + $0x170] sm:$0xff]  ;;  %v5390_v59 = vld [vmem:[%s9199_s0 + $0x1a8] sm:$0xff] }
  0x3f   :  { %4550 = vst.msk [vmem:[#allocation2 + $0x270] sm:$0x1] %vm1898_vm4, %v9205_v0  ;;  %v6682_v30 = vld [vmem:[#allocation2 + $0x2a7] ss:$2 sm:$0xff]  ;;  %v6684_v31 = vld [vmem:[#allocation2 + $0x2a8] ss:$2 sm:$0xff] }
  0x40   :  { %4551 = vst.msk [vmem:[#allocation2 + $0x290] sm:$0x1] %vm1898_vm4, %v9205_v0  ;;  %531 = vrot.lane.b32.xlu1 %v284_v32, %s6230_s24  ;;  %501 = vrot.lane.b32.xlu0 %v6463_v36, %s6228_s12  ;;  %v6707_v38 = vld [vmem:[#allocation2 + $0x2c8] ss:$2 sm:$0xff]  ;;  %v288_v1 = vld [vmem:[#allocation2 + $0xc9] ss:$2 sm:$0xff] }
  0x41   :  { %1588 = vst.msk [vmem:[#allocation2 + $0x2a7] sm:$0x1] %vm1394_vm3, %v9205_v0  ;;  %1596 = vst.msk [vmem:[#allocation2 + $0x2b0] sm:$0x1] %vm1394_vm3, %v9205_v0  ;;  %v6713_v40 = vld [vmem:[#allocation2 + $0x2c8] ss:$2 sm:$0xff] }
  0x42   :  { %4552 = vst.msk [vmem:[#allocation2 + $0x2b0] sm:$0x1] %vm1898_vm4, %v9205_v0  ;;  %v6699_v34 = vld [vmem:[#allocation2 + $0x2e7] ss:$2 sm:$0xff]  ;;  %v6701_v35 = vld [vmem:[#allocation2 + $0x2e8] ss:$2 sm:$0xff] }
  0x43   :  { %681 = vst.msk [vmem:[#allocation2 + $0x348] sm:$0xff] %vm79_vm0, %v5383_v33  ;;  %682 = vst.msk [vmem:[#allocation2 + $0x350] sm:$0xff] %vm79_vm0, %v5384_v44  ;;  %v6723_v36 = vld [vmem:[#allocation2 + $0x327] ss:$2 sm:$0xff]  ;;  %v6729_v45 = vld [vmem:[#allocation2 + $0x328] ss:$2 sm:$0xff] }
  0x44   :  { %1590 = vst.msk [vmem:[#allocation2 + $0x2e7] sm:$0x1] %vm1394_vm3, %v9205_v0  ;;  %1598 = vst.msk [vmem:[#allocation2 + $0x2f0] sm:$0x1] %vm1394_vm3, %v9205_v0  ;;  %409 = vrot.lane.b32.xlu1 %v6465_v37, %s6225_s5  ;;  %315 = vrot.lane.b32.xlu0 %v6481_v41, %s6223_s30  ;;  %v195_v37 = vld [vmem:[#allocation2 + $0x109] ss:$2 sm:$0xff] }
  0x45   :  { %4554 = vst.msk [vmem:[#allocation2 + $0x2f0] sm:$0x1] %vm1898_vm4, %v9205_v0  ;;  %v181_v41 = vld [vmem:[#allocation2 + $0x148] ss:$2 sm:$0xff]  ;;  %v290_v7 = vld [vmem:[#allocation2 + $0x109] ss:$2 sm:$0xff] }
  0x46   :  { %1597 = vst.msk [vmem:[#allocation2 + $0x2d0] sm:$0x1] %vm1394_vm3, %v9205_v0  ;;  %1592 = vst.msk [vmem:[#allocation2 + $0x327] sm:$0x1] %vm1394_vm3, %v9205_v0  ;;  %v6773_v60 = vld [vmem:[#allocation2 + $0x308] ss:$2 sm:$0xff] }
  0x47   :  { %4553 = vst.msk [vmem:[#allocation2 + $0x2d0] sm:$0x1] %vm1898_vm4, %v9205_v0  ;;  %v6775_v61 = vld [vmem:[#allocation2 + $0x308] ss:$2 sm:$0xff]  ;;  %v199_v11 = vld [vmem:[#allocation2 + $0x189] ss:$2 sm:$0xff] }
  0x48   :  { %1600 = vst.msk [vmem:[#allocation2 + $0x330] sm:$0x1] %vm1394_vm3, %v9205_v0  ;;  %533 = vrot.lane.b32.xlu1 %v286_v50, %s6230_s24  ;;  %439 = vrot.lane.b32.xlu0 %v239_v51, %s6226_s18  ;;  %1599 = vst.msk [vmem:[#allocation2 + $0x310] sm:$0x1] %vm1394_vm3, %v9205_v0  ;;  %v185_v12 = vld [vmem:[#allocation2 + $0x1c8] ss:$2 sm:$0xff] }
  0x49   :  { %4556 = vst.msk [vmem:[#allocation2 + $0x330] sm:$0x1] %vm1898_vm4, %v9205_v0  ;;  %4555 = vst.msk [vmem:[#allocation2 + $0x310] sm:$0x1] %vm1898_vm4, %v9205_v0  ;;  %v260_v14 = vld [vmem:[#allocation2 + $0x147] ss:$2 sm:$0xff] }
  0x4a   :  { %685 = vst.msk [vmem:[#allocation2 + $0x388] sm:$0xff] %vm79_vm0, %v5387_v48  ;;  %686 = vst.msk [vmem:[#allocation2 + $0x390] sm:$0xff] %vm79_vm0, %v5388_v49  ;;  %v6801_v2 = vld [vmem:[#allocation2 + $0x348] ss:$2 sm:$0xff]  ;;  %v245_v15 = vld [vmem:[#allocation2 + $0x169] ss:$2 sm:$0xff] }
  0x4b   :  { %683 = vst.msk [vmem:[#allocation2 + $0x368] sm:$0xff] %vm79_vm0, %v5385_v52  ;;  %684 = vst.msk [vmem:[#allocation2 + $0x370] sm:$0xff] %vm79_vm0, %v5386_v53  ;;  %v215_v16 = vld [vmem:[#allocation2 + $0x1a7] ss:$2 sm:$0xff]  ;;  %v276_v20 = vld [vmem:[#allocation2 + $0x148] ss:$2 sm:$0xff] }
  0x4c   :  { %347 = vrot.lane.b32.xlu1 %v195_v37, %s6222_s29  ;;  %317 = vrot.lane.b32.xlu0 %v181_v41, %s6223_s30  ;;  %687 = vst.msk [vmem:[#allocation2 + $0x3a8] sm:$0xff] %vm79_vm0, %v5389_v58  ;;  %688 = vst.msk [vmem:[#allocation2 + $0x3b0] sm:$0xff] %vm79_vm0, %v5390_v59  ;;  %v201_v17 = vld [vmem:[#allocation2 + $0x1c9] ss:$2 sm:$0xff]  ;;  %v5397_v18 = vld [vmem:[%s9199_s0 + $0x1e0] sm:$0xff]  ;;  %vm1572_vm11 = vcmask 392192  }
  0x4d   :  { %689 = vst.msk [vmem:[#allocation2 + $0x3c8] sm:$0xff] %vm79_vm0, %v5391_v62  ;;  %v262_v21 = vld [vmem:[#allocation2 + $0x187] ss:$2 sm:$0xff]  ;;  %695 = vst.msk [vmem:[#allocation2 + $0x428] sm:$0xff] %vm79_vm0, %v5397_v18  ;;  %v716_v26 = vld [vmem:[#allocation2 + $0x248] ss:$2 sm:$0xff] }
  0x4e   :  { %v5398_v22 = vld [vmem:[%s9199_s0 + $0x1e8] sm:$0xff]  ;;  %v5399_v41 = vld [vmem:[%s9199_s0 + $0x1f0] sm:$0xff]  ;;  %v5400_v52 = vld [vmem:[%s9199_s0 + $0x1f8] sm:$0xff] }
  0x4f   :  { %696 = vst.msk [vmem:[#allocation2 + $0x430] sm:$0xff] %vm79_vm0, %v5398_v22  ;;  %v732_v28 = vld [vmem:[#allocation2 + $0x249] ss:$2 sm:$0xff]  ;;  %v231_v32 = vld [vmem:[#allocation2 + $0x1a8] ss:$2 sm:$0xff]  ;;  %697 = vst.msk [vmem:[#allocation2 + $0x448] sm:$0xff] %vm79_vm0, %v5399_v41 }
  0x50   :  { %471 = vrot.lane.b32.xlu1 %v6585_v5, %s6227_s10  ;;  %441 = vrot.lane.b32.xlu0 %v241_v54, %s6226_s18  ;;  %v5396_v5 = vld [vmem:[%s9199_s0 + $0x1d8] sm:$0xff]  ;;  %v6858_v29 = vld [vmem:[#allocation2 + $0x247] ss:$2 sm:$0xff]  ;;  %v278_v48 = vld [vmem:[#allocation2 + $0x188] ss:$2 sm:$0xff]  ;;  %698 = vst.msk [vmem:[#allocation2 + $0x450] sm:$0xff] %vm79_vm0, %v5400_v52 }
  0x51   :  { %694 = vst.msk [vmem:[#allocation2 + $0x410] sm:$0xff] %vm79_vm0, %v5396_v5  ;;  %v217_v33 = vld [vmem:[#allocation2 + $0x1e7] ss:$2 sm:$0xff]  ;;  %v233_v50 = vld [vmem:[#allocation2 + $0x1e8] ss:$2 sm:$0xff] }
  0x52   :  { %v6820_v8 = vld [vmem:[#allocation2 + $0x367] ss:$2 sm:$0xff]  ;;  %v6822_v9 = vld [vmem:[#allocation2 + $0x368] ss:$2 sm:$0xff]  ;;  %1581 = vst.msk [vmem:[#allocation2 + $0x247] sm:$0xff] %vm1387_vm5, %v9205_v0 }
  0x53   :  { %v6824_v10 = vld [vmem:[#allocation2 + $0x369] ss:$2 sm:$0xff]  ;;  %1582 = vst.msk [vmem:[#allocation2 + $0x24f] sm:$0x3] %vm1389_vm6, %v9205_v0 }
  0x54   :  { %379 = vrot.lane.b32.xlu1 %v6489_v43, %s6224_s4  ;;  %349 = vrot.lane.b32.xlu0 %v197_v55, %s6222_s29  ;;  %v213_v43 = vld [vmem:[#allocation2 + $0x167] ss:$2 sm:$0xff]  ;;  %1584 = vst.msk [vmem:[#allocation2 + $0x367] sm:$0xff] %vm1387_vm5, %v9205_v0 }
  0x55   :  { %1585 = vst.msk [vmem:[#allocation2 + $0x36f] sm:$0x3] %vm1389_vm6, %v9205_v0  ;;  %v292_v44 = vld [vmem:[#allocation2 + $0x149] ss:$2 sm:$0xff]  ;;  %vm617_vm6 = vcmask 195584  }
  0x56   :  { %4540 = vst.msk [vmem:[#allocation2 + $0x367] sm:$0xff] %vm1561_vm7, %v9205_v0  ;;  %v247_v49 = vld [vmem:[#allocation2 + $0x1a9] ss:$2 sm:$0xff] }
  0x57   :  { %4541 = vst.msk [vmem:[#allocation2 + $0x36f] sm:$0x3] %vm2720_vm8, %v9205_v0  ;;  %v6868_v51 = vld [vmem:[#allocation2 + $0x287] ss:$2 sm:$0xff] }
  0x58   :  { %503 = vrot.lane.b32.xlu1 %v6479_v39, %s6228_s12  ;;  %473 = vrot.lane.b32.xlu0 %v6616_v13, %s6227_s10  ;;  %v5392_v39 = vld [vmem:[%s9199_s0 + $0x1b8] sm:$0xff]  ;;  %v5394_v13 = vld [vmem:[%s9199_s0 + $0x1c8] sm:$0xff] }
  0x59   :  { %690 = vst.msk [vmem:[#allocation2 + $0x3d0] sm:$0xff] %vm79_vm0, %v5392_v39  ;;  %692 = vst.msk [vmem:[#allocation2 + $0x3f0] sm:$0xff] %vm79_vm0, %v5394_v13  ;;  %v6870_v37 = vld [vmem:[#allocation2 + $0x287] ss:$2 sm:$0xff]  ;;  %v280_v39 = vld [vmem:[#allocation2 + $0x1c8] ss:$2 sm:$0xff] }
  0x5a   :  { %1587 = vst.msk [vmem:[#allocation2 + $0x287] sm:$0x1] %vm1394_vm3, %v9205_v0  ;;  %v294_v53 = vld [vmem:[#allocation2 + $0x189] ss:$2 sm:$0xff] }
  0x5b   :  { %v264_v54 = vld [vmem:[#allocation2 + $0x1c7] ss:$2 sm:$0xff] }
  0x5c   :  { %411 = vrot.lane.b32.xlu1 %v6501_v46, %s6225_s5  ;;  %381 = vrot.lane.b32.xlu0 %v213_v43, %s6224_s4  ;;  %v6799_v46 = vld [vmem:[#allocation2 + $0x348] ss:$2 sm:$0xff]  ;;  %v249_v55 = vld [vmem:[#allocation2 + $0x1e9] ss:$2 sm:$0xff] }
  0x5d   :  { %1601 = vst.msk [vmem:[#allocation2 + $0x350] sm:$0x1] %vm1394_vm3, %v9205_v0  ;;  %v6901_v5 = vld [vmem:[#allocation2 + $0x2c7] ss:$2 sm:$0xff] }
  0x5e   :  { %4557 = vst.msk [vmem:[#allocation2 + $0x350] sm:$0x1] %vm1898_vm4, %v9205_v0  ;;  %v6918_v18 = vld [vmem:[#allocation2 + $0x307] ss:$2 sm:$0xff] }
  0x5f   :  { %v780_v22 = vld [vmem:[#allocation2 + $0x269] ss:$2 sm:$0xff] }
  0x60   :  { %535 = vrot.lane.b32.xlu1 %v288_v1, %s6230_s24  ;;  %505 = vrot.lane.b32.xlu0 %v6485_v42, %s6228_s12  ;;  %v5395_v42 = vld [vmem:[%s9199_s0 + $0x1d0] sm:$0xff] }
  0x61   :  { %693 = vst.msk [vmem:[#allocation2 + $0x408] sm:$0xff] %vm79_vm0, %v5395_v42  ;;  %v266_v1 = vld [vmem:[#allocation2 + $0x207] ss:$2 sm:$0xff] }
  0x62   :  { %v6899_v42 = vld [vmem:[#allocation2 + $0x2c7] ss:$2 sm:$0xff] }
  0x63   :  { %1589 = vst.msk [vmem:[#allocation2 + $0x2c7] sm:$0x1] %vm1394_vm3, %v9205_v0  ;;  %v738_v41 = vld [vmem:[#allocation2 + $0x309] ss:$2 sm:$0xff] }
  0x64   :  { %413 = vrot.lane.b32.xlu1 %v229_v3, %s6225_s5  ;;  %319 = vrot.lane.b32.xlu0 %v183_v4, %s6223_s30 }
  0x68   :  { %537 = vrot.lane.b32.xlu1 %v290_v7, %s6230_s24  ;;  %443 = vrot.lane.b32.xlu0 %v6507_v47, %s6226_s18  ;;  %v5393_v47 = vld [vmem:[%s9199_s0 + $0x1c0] sm:$0xff]  ;;  %v734_v7 = vld [vmem:[#allocation2 + $0x289] ss:$2 sm:$0xff] }
  0x69   :  { %691 = vst.msk [vmem:[#allocation2 + $0x3e8] sm:$0xff] %vm79_vm0, %v5393_v47  ;;  %v282_v47 = vld [vmem:[#allocation2 + $0x208] ss:$2 sm:$0xff] }
  0x6c   :  { %351 = vrot.lane.b32.xlu1 %v199_v11, %s6222_s29  ;;  %321 = vrot.lane.b32.xlu0 %v185_v12, %s6223_s30  ;;  %v296_v12 = vld [vmem:[#allocation2 + $0x1c9] ss:$2 sm:$0xff] }
  0x70   :  { %475 = vrot.lane.b32.xlu1 %v260_v14, %s6227_s10  ;;  %445 = vrot.lane.b32.xlu0 %v245_v15, %s6226_s18 }
  0x74   :  { %383 = vrot.lane.b32.xlu1 %v215_v16, %s6224_s4  ;;  %353 = vrot.lane.b32.xlu0 %v201_v17, %s6222_s29  ;;  %v6916_v17 = vld [vmem:[#allocation2 + $0x307] ss:$2 sm:$0xff] }
  0x75   :  { %1591 = vst.msk [vmem:[#allocation2 + $0x307] sm:$0x1] %vm1394_vm3, %v9205_v0 }
  0x78   :  { %507 = vrot.lane.b32.xlu1 %v276_v20, %s6228_s12  ;;  %477 = vrot.lane.b32.xlu0 %v262_v21, %s6227_s10 }
  0x7c   :  { %415 = vrot.lane.b32.xlu1 %v231_v32, %s6225_s5  ;;  %385 = vrot.lane.b32.xlu0 %v217_v33, %s6224_s4 }
  0x7f   :  { %v340_v58 = vpop.permute.xlu1 %339 }
  0x80   :  { %539 = vrot.lane.b32.xlu1 %v292_v44, %s6230_s24  ;;  %509 = vrot.lane.b32.xlu0 %v278_v48, %s6228_s12  ;;  %v308_v59 = vpop.permute.xlu0 %307  ;;  %v782_v44 = vld [vmem:[#allocation2 + $0x2a9] ss:$2 sm:$0xff] }
  0x84   :  { %447 = vrot.lane.b32.xlu1 %v247_v49, %s6226_s18  ;;  %417 = vrot.lane.b32.xlu0 %v233_v50, %s6225_s5 }
  0x88   :  { %852 = vrot.lane.b32.xlu1 %v716_v26, %s6223_s30  ;;  %541 = vrot.lane.b32.xlu0 %v294_v53, %s6230_s24 }
  0x8c   :  { %479 = vrot.lane.b32.xlu1 %v264_v54, %s6227_s10  ;;  %449 = vrot.lane.b32.xlu0 %v249_v55, %s6226_s18 }
  0x8e   :  { %v6888_v43 = vpop.permute.xlu1 %341  ;;  %v6890_v62 = vpop.permute.xlu0 %309 }
  0x8f   :  { %v556_v52 = vsel %vm79_vm0, %v6546_v57, %v6890_v62 }
  0x90   :  { %884 = vrot.lane.b32.xlu1 %v732_v28, %s6222_s29  ;;  %854 = vrot.lane.b32.xlu0 %v6652_v23, %s6223_s30 }
  0x92   :  { %v6895_v3 = vpop.permute.xlu1 %373  ;;  %v372_v4 = vpop.permute.xlu0 %371 }
  0x94   :  { %511 = vrot.lane.b32.xlu1 %v280_v39, %s6228_s12  ;;  %481 = vrot.lane.b32.xlu0 %v266_v1, %s6227_s10  ;;  %v803_v1 = vld [vmem:[#allocation2 + $0x347] ss:$2 sm:$0xff] }
  0x96   :  { %v6905_v11 = vpop.permute.xlu1 %311  ;;  %v404_v23 = vpop.permute.xlu0 %403 }
  0x98   :  { %916 = vrot.lane.b32.xlu1 %v6654_v24, %s6224_s4  ;;  %886 = vrot.lane.b32.xlu0 %v734_v7, %s6222_s29  ;;  %v298_v24 = vld [vmem:[#allocation2 + $0x209] ss:$2 sm:$0xff] }
  0x9a   :  { %v436_v13 = vpop.permute.xlu1 %435  ;;  %v406_v14 = vpop.permute.xlu0 %405 }
  0x9c   :  { %543 = vrot.lane.b32.xlu1 %v296_v12, %s6230_s24  ;;  %513 = vrot.lane.b32.xlu0 %v282_v47, %s6228_s12 }
  0x9e   :  { %v6912_v15 = vpop.permute.xlu1 %343  ;;  %v6914_v16 = vpop.permute.xlu0 %313 }
  0xa0   :  { %948 = vrot.lane.b32.xlu1 %v6656_v25, %s6225_s5  ;;  %918 = vrot.lane.b32.xlu0 %v6682_v30, %s6224_s4  ;;  %v736_v25 = vld [vmem:[#allocation2 + $0x2c9] ss:$2 sm:$0xff]  ;;  %v555_v30 = vsel %vm79_vm0, %v6544_v56, %v308_v59 }
  0xa2   :  { %v468_v20 = vpop.permute.xlu1 %467  ;;  %v438_v21 = vpop.permute.xlu0 %437 }
  0xa4   :  { %856 = vrot.lane.b32.xlu1 %v6707_v38, %s6223_s30  ;;  %545 = vrot.lane.b32.xlu0 %v298_v24, %s6230_s24  ;;  %v564_v38 = vsel %vm563_vm12, %v555_v30, %v340_v58  ;;  %v786_v30 = vld [vmem:[#allocation2 + $0x329] ss:$2 sm:$0xff] }
  0xa6   :  { %v6929_v26 = vpop.permute.xlu1 %375  ;;  %v6931_v28 = vpop.permute.xlu0 %345 }
  0xa8   :  { %980 = vrot.lane.b32.xlu1 %v780_v22, %s6226_s18  ;;  %950 = vrot.lane.b32.xlu0 %v6684_v31, %s6225_s5  ;;  %v573_v31 = vsel %vm572_vm13, %v564_v38, %v372_v4  ;;  %v6971_v4 = vld [vmem:[#allocation2 + $0x347] ss:$2 sm:$0xff] }
  0xa9   :  { %v582_v49 = vsel %vm581_vm14, %v573_v31, %v404_v23  ;;  %1593 = vst.msk [vmem:[#allocation2 + $0x347] sm:$0x1] %vm1394_vm3, %v9205_v0  ;;  %vm1894_vm3 = vcmask 128000  }
  0xaa   :  { %v500_v32 = vpop.permute.xlu1 %499  ;;  %v470_v33 = vpop.permute.xlu0 %469  ;;  %v591_v50 = vsel %vm590_vm15, %v582_v49, %v436_v13 }
  0xac   :  { %888 = vrot.lane.b32.xlu1 %v736_v25, %s6222_s29  ;;  %858 = vrot.lane.b32.xlu0 %v6773_v60, %s6223_s30  ;;  %v600_v60 = vsel %vm599_vm1, %v591_v50, %v468_v20 }
  0xad   :  { %v609_v53 = vsel %vm608_vm2, %v600_v60, %v500_v32 }
  0xae   :  { %v6943_v48 = vpop.permute.xlu1 %407  ;;  %v6945_v56 = vpop.permute.xlu0 %377 }
  0xb0   :  { %1012 = vrot.lane.b32.xlu1 %v6868_v51, %s6227_s10  ;;  %982 = vrot.lane.b32.xlu0 %v782_v44, %s6226_s18  ;;  %v565_v51 = vsel %vm563_vm12, %v556_v52, %v6888_v43 }
  0xb1   :  { %v574_v57 = vsel %vm572_vm13, %v565_v51, %v6895_v3 }
  0xb2   :  { %v532_v54 = vpop.permute.xlu1 %531  ;;  %v502_v55 = vpop.permute.xlu0 %501  ;;  %v583_v39 = vsel %vm581_vm14, %v574_v57, %v406_v14  ;;  %v774_v57 = vld [vmem:[#allocation2 + $0x3a8] ss:$2 sm:$0xff] }
  0xb3   :  { %v618_v58 = vsel %vm617_vm6, %v609_v53, %v532_v54 }
  0xb4   :  { %920 = vrot.lane.b32.xlu1 %v6699_v34, %s6224_s4  ;;  %890 = vrot.lane.b32.xlu0 %v738_v41, %s6222_s29  ;;  %v592_v34 = vsel %vm590_vm15, %v583_v39, %v438_v21  ;;  %v740_v21 = vld [vmem:[#allocation2 + $0x349] ss:$2 sm:$0xff] }
  0xb5   :  { %5543 = vmatprep.mubr.msk.f32.mxu0 %vm1173_vm9, %v618_v58  ;;  %v601_v43 = vsel %vm599_vm1, %v592_v34, %v470_v33  ;;  %v833_v58 = vld [vmem:[#allocation2 + $0x309] ss:$2 sm:$0xff] }
  0xb6   :  { %v6966_v59 = vpop.permute.xlu1 %409  ;;  %v6968_v62 = vpop.permute.xlu0 %315  ;;  %v610_v3 = vsel %vm608_vm2, %v601_v43, %v502_v55 }
  0xb8   :  { %1044 = vrot.lane.b32.xlu1 %v6662_v27, %s6228_s12  ;;  %1014 = vrot.lane.b32.xlu0 %v6899_v42, %s6227_s10  ;;  %v829_v27 = vld [vmem:[#allocation2 + $0x289] ss:$2 sm:$0xff] }
  0xba   :  { %v534_v7 = vpop.permute.xlu1 %533  ;;  %v440_v23 = vpop.permute.xlu0 %439 }
  0xbb   :  { %v619_v12 = vsel %vm617_vm6, %v610_v3, %v534_v7  ;;  %v744_v3 = vld [vmem:[#allocation2 + $0x3c9] ss:$2 sm:$0xff] }
  0xbc   :  { %952 = vrot.lane.b32.xlu1 %v6701_v35, %s6225_s5  ;;  %922 = vrot.lane.b32.xlu0 %v6723_v36, %s6224_s4  ;;  %v831_v35 = vld [vmem:[#allocation2 + $0x2c9] ss:$2 sm:$0xff] }
  0xbd   :  { %5544 = vmatmul.mubr.msk.f32.vlgmr.msra.gmra.mrb[0].mxu0 %vm1173_vm9, %v619_v12  ;;  %v784_v36 = vld [vmem:[#allocation2 + $0x2e9] ss:$2 sm:$0xff]  ;;  %v559_v12 = vsel %vm79_vm0, %v6633_v19, %v6968_v62 }
  0xbe   :  { %v6988_v42 = vpop.permute.xlu1 %347  ;;  %v6990_v47 = vpop.permute.xlu0 %317  ;;  %v165_v62 = vld [vmem:[#allocation2 + $0x147] ss:$2 sm:$0xff] }
  0xc0   :  { %1076 = vrot.lane.b32.xlu1 %v829_v27, %s6230_s24  ;;  %1046 = vrot.lane.b32.xlu0 %v6713_v40, %s6228_s12  ;;  %v726_v40 = vld [vmem:[#allocation2 + $0x388] ss:$2 sm:$0xff]  ;;  %v568_v27 = vsel %vm563_vm12, %v559_v12, %v6988_v42 }
  0xc2   :  { %v472_v13 = vpop.permute.xlu1 %471  ;;  %v442_v14 = vpop.permute.xlu0 %441 }
  0xc4   :  { %954 = vrot.lane.b32.xlu1 %v6729_v45, %s6225_s5  ;;  %860 = vrot.lane.b32.xlu0 %v6799_v46, %s6223_s30  ;;  %v557_v45 = vsel %vm79_vm0, %v6568_v63, %v6905_v11 }
  0xc5   :  { %v566_v46 = vsel %vm563_vm12, %v557_v45, %v6912_v15  ;;  %v742_v15 = vld [vmem:[#allocation2 + $0x389] ss:$2 sm:$0xff] }
  0xc6   :  { %v6999_v24 = vpop.permute.xlu1 %379  ;;  %v7001_v20 = vpop.permute.xlu0 %349  ;;  %v575_v32 = vsel %vm572_vm13, %v566_v46, %v6929_v26 }
  0xc7   :  { %v584_v44 = vsel %vm581_vm14, %v575_v32, %v6943_v48  ;;  %v558_v48 = vsel %vm79_vm0, %v6588_v6, %v6914_v16 }
  0xc8   :  { %1078 = vrot.lane.b32.xlu1 %v831_v35, %s6230_s24  ;;  %984 = vrot.lane.b32.xlu0 %v784_v36, %s6226_s18  ;;  %v593_v63 = vsel %vm590_vm15, %v584_v44, %v440_v23  ;;  %v807_v44 = vld [vmem:[#allocation2 + $0x3c7] ss:$2 sm:$0xff] }
  0xc9   :  { %v602_v11 = vsel %vm599_vm1, %v593_v63, %v472_v13  ;;  %v805_v13 = vld [vmem:[#allocation2 + $0x387] ss:$2 sm:$0xff] }
  0xca   :  { %v504_v22 = vpop.permute.xlu1 %503  ;;  %v474_v25 = vpop.permute.xlu0 %473 }
  0xcb   :  { %v611_v31 = vsel %vm608_vm2, %v602_v11, %v504_v22  ;;  %v746_v22 = vld [vmem:[#allocation2 + $0x409] ss:$2 sm:$0xff] }
  0xcc   :  { %892 = vrot.lane.b32.xlu1 %v740_v21, %s6222_s29  ;;  %862 = vrot.lane.b32.xlu0 %v726_v40, %s6223_s30  ;;  %v760_v40 = vld [vmem:[#allocation2 + $0x3e7] ss:$2 sm:$0xff] }
  0xce   :  { %v7014_v33 = vpop.permute.xlu1 %411  ;;  %v7016_v38 = vpop.permute.xlu0 %381 }
  0xd0   :  { %1016 = vrot.lane.b32.xlu1 %v6916_v17, %s6227_s10  ;;  %986 = vrot.lane.b32.xlu0 %v786_v30, %s6226_s18  ;;  %v567_v17 = vsel %vm563_vm12, %v558_v48, %v6931_v28  ;;  %v758_v28 = vld [vmem:[#allocation2 + $0x3a7] ss:$2 sm:$0xff]  ;;  %v560_v30 = vsel %vm79_vm0, %v165_v62, %v6990_v47 }
  0xd1   :  { %v576_v60 = vsel %vm572_vm13, %v567_v17, %v6945_v56  ;;  %v569_v32 = vsel %vm563_vm12, %v560_v30, %v7001_v20 }
  0xd2   :  { %v536_v26 = vpop.permute.xlu1 %535  ;;  %v506_v49 = vpop.permute.xlu0 %505  ;;  %v585_v6 = vsel %vm581_vm14, %v576_v60, %v6966_v59  ;;  %v728_v59 = vld [vmem:[#allocation2 + $0x3c8] ss:$2 sm:$0xff]  ;;  %v578_v63 = vsel %vm572_vm13, %v569_v32, %v7016_v38  ;;  %v837_v60 = vld [vmem:[#allocation2 + $0x389] ss:$2 sm:$0xff] }
  0xd3   :  { %v620_v50 = vsel %vm617_vm6, %v611_v31, %v536_v26  ;;  %v594_v16 = vsel %vm590_vm15, %v585_v6, %v442_v14  ;;  %v790_v14 = vld [vmem:[#allocation2 + $0x3a9] ss:$2 sm:$0xff]  ;;  %v776_v26 = vld [vmem:[#allocation2 + $0x3e8] ss:$2 sm:$0xff] }
  0xd4   :  { %924 = vrot.lane.b32.xlu1 %v6820_v8, %s6224_s4  ;;  %894 = vrot.lane.b32.xlu0 %v742_v15, %s6222_s29  ;;  %v603_v8 = vsel %vm599_vm1, %v594_v16, %v474_v25 }
  0xd5   :  { %5546 = vmatprep.mubr.msk.f32.mxu0 %vm1173_vm9, %v620_v50  ;;  %v612_v53 = vsel %vm608_vm2, %v603_v8, %v506_v49  ;;  %v762_v49 = vld [vmem:[#allocation2 + $0x427] ss:$2 sm:$0xff] }
  0xd6   :  { %v7038_v41 = vpop.permute.xlu1 %413  ;;  %v7040_v52 = vpop.permute.xlu0 %319  ;;  %v792_v8 = vld [vmem:[#allocation2 + $0x3e9] ss:$2 sm:$0xff] }
  0xd7   :  { %v587_v47 = vsel %vm581_vm14, %v578_v63, %v7038_v41  ;;  %v823_v41 = vld [vmem:[#allocation2 + $0x3c8] ss:$2 sm:$0xff] }
  0xd8   :  { %1048 = vrot.lane.b32.xlu1 %v6775_v61, %s6228_s12  ;;  %1018 = vrot.lane.b32.xlu0 %v803_v1, %s6227_s10 }
  0xda   :  { %v538_v56 = vpop.permute.xlu1 %537  ;;  %v444_v54 = vpop.permute.xlu0 %443 }
  0xdb   :  { %v621_v55 = vsel %vm617_vm6, %v612_v53, %v538_v56 }
  0xdc   :  { %956 = vrot.lane.b32.xlu1 %v6822_v9, %s6225_s5  ;;  %926 = vrot.lane.b32.xlu0 %v758_v28, %s6224_s4  ;;  %v835_v9 = vld [vmem:[#allocation2 + $0x349] ss:$2 sm:$0xff]  ;;  %v778_v28 = vld [vmem:[#allocation2 + $0x428] ss:$2 sm:$0xff] }
  0xdd   :  { %5547 = vmatmul.mubr.msk.f32.gmra.mrb[2].mxu0 %vm1173_vm9, %v621_v55  ;;  %v794_v55 = vld [vmem:[#allocation2 + $0x429] ss:$2 sm:$0xff] }
  0xde   :  { %v7055_v61 = vpop.permute.xlu1 %351  ;;  %v7057_v51 = vpop.permute.xlu0 %321 }
  0xe0   :  { %1080 = vrot.lane.b32.xlu1 %v833_v58, %s6230_s24  ;;  %1050 = vrot.lane.b32.xlu0 %v6801_v2, %s6228_s12  ;;  %v730_v2 = vld [vmem:[#allocation2 + $0x408] ss:$2 sm:$0xff]  ;;  %v839_v58 = vld [vmem:[#allocation2 + $0x3c9] ss:$2 sm:$0xff] }
  0xe2   :  { %v476_v39 = vpop.permute.xlu1 %475  ;;  %v446_v1 = vpop.permute.xlu0 %445 }
  0xe3   :  { %v596_v31 = vsel %vm590_vm15, %v587_v47, %v446_v1 }
  0xe4   :  { %958 = vrot.lane.b32.xlu1 %v774_v57, %s6225_s5  ;;  %864 = vrot.lane.b32.xlu0 %v728_v59, %s6223_s30 }
  0xe6   :  { %v7064_v34 = vpop.permute.xlu1 %383  ;;  %v7066_v43 = vpop.permute.xlu0 %353 }
  0xe8   :  { %1082 = vrot.lane.b32.xlu1 %v835_v9, %s6230_s24  ;;  %988 = vrot.lane.b32.xlu0 %v6824_v10, %s6226_s18  ;;  %v577_v10 = vsel %vm572_vm13, %v568_v27, %v6999_v24  ;;  %v811_v9 = vld [vmem:[#allocation2 + $0x447] ss:$2 sm:$0xff] }
  0xe9   :  { %v586_v21 = vsel %vm581_vm14, %v577_v10, %v7014_v33  ;;  %v821_v33 = vld [vmem:[#allocation2 + $0x388] ss:$2 sm:$0xff]  ;;  %v169_v27 = vld [vmem:[#allocation2 + $0x1c7] ss:$2 sm:$0xff] }
  0xea   :  { %v508_v7 = vpop.permute.xlu1 %507  ;;  %v478_v23 = vpop.permute.xlu0 %477  ;;  %v595_v19 = vsel %vm590_vm15, %v586_v21, %v444_v54  ;;  %v167_v54 = vld [vmem:[#allocation2 + $0x187] ss:$2 sm:$0xff] }
  0xeb   :  { %v604_v42 = vsel %vm599_vm1, %v595_v19, %v476_v39  ;;  %v605_v20 = vsel %vm599_vm1, %v596_v31, %v478_v23  ;;  %v561_v39 = vsel %vm79_vm0, %v167_v54, %v7040_v52 }
  0xec   :  { %896 = vrot.lane.b32.xlu1 %v744_v3, %s6222_s29  ;;  %866 = vrot.lane.b32.xlu0 %v730_v2, %s6223_s30  ;;  %v613_v24 = vsel %vm608_vm2, %v604_v42, %v508_v7  ;;  %v570_v1 = vsel %vm563_vm12, %v561_v39, %v7055_v61  ;;  %v809_v3 = vld [vmem:[#allocation2 + $0x407] ss:$2 sm:$0xff] }
  0xed   :  { %v579_v2 = vsel %vm572_vm13, %v570_v1, %v7064_v34  ;;  %v843_v42 = vld [vmem:[#allocation2 + $0x449] ss:$2 sm:$0xff] }
  0xee   :  { %v7080_v35 = vpop.permute.xlu1 %415  ;;  %v7082_v36 = vpop.permute.xlu0 %385 }
  0xef   :  { %v588_v12 = vsel %vm581_vm14, %v579_v2, %v7080_v35  ;;  %v562_v35 = vsel %vm79_vm0, %v169_v27, %v7057_v51 }
  0xf0   :  { %1020 = vrot.lane.b32.xlu1 %v805_v13, %s6227_s10  ;;  %990 = vrot.lane.b32.xlu0 %v790_v14, %s6226_s18  ;;  %v827_v13 = vld [vmem:[#allocation2 + $0x448] ss:$2 sm:$0xff]  ;;  %v571_v62 = vsel %vm563_vm12, %v562_v35, %v7066_v43  ;;  %v2310_v43 = vld [vmem:[%s9200_s1 + $0xf8] sm:$0xff] }
  0xf1   :  { %v825_v14 = vld [vmem:[#allocation2 + $0x408] ss:$2 sm:$0xff]  ;;  %5591 = vmatprep.subr.mxu1 %v2310_v43 }
  0xf2   :  { %v540_v25 = vpop.permute.xlu1 %539  ;;  %v510_v45 = vpop.permute.xlu0 %509  ;;  %5592 = vmatpush3.msra.mxu1 %v2310_v43 }
  0xf3   :  { %v622_v46 = vsel %vm617_vm6, %v613_v24, %v540_v25  ;;  %v614_v50 = vsel %vm608_vm2, %v605_v20, %v510_v45 }
  0xf4   :  { %928 = vrot.lane.b32.xlu1 %v760_v40, %s6224_s4  ;;  %898 = vrot.lane.b32.xlu0 %v746_v22, %s6222_s29  ;;  %v841_v40 = vld [vmem:[#allocation2 + $0x409] ss:$2 sm:$0xff]  ;;  %v580_v22 = vsel %vm572_vm13, %v571_v62, %v7082_v36 }
  0xf5   :  { %5549 = vmatprep.mubr.msk.f32.mxu0 %vm1173_vm9, %v622_v46 }
  0xf6   :  { %v448_v11 = vpop.permute.xlu1 %447  ;;  %v7101_v15 = vpop.permute.xlu0 %417 }
  0xf7   :  { %v597_v52 = vsel %vm590_vm15, %v588_v12, %v448_v11  ;;  %v589_v45 = vsel %vm581_vm14, %v580_v22, %v7101_v15  ;;  %v7163_v11 = vld [vmem:[#allocation2 + $0x9] ss:$2 sm:$0xf] }
  0xf8   :  { %1052 = vrot.lane.b32.xlu1 %v821_v33, %s6228_s12  ;;  %1022 = vrot.lane.b32.xlu0 %v807_v44, %s6227_s10  ;;  %4159 = vst.msk [vmem:[#allocation2 + $0xf] sm:$0x3] %vm2720_vm8, %v9205_v0 }
  0xfa   :  { %v7110_v48 = vpop.permute.xlu1 %852  ;;  %v542_v38 = vpop.permute.xlu0 %541 }
  0xfb   :  { %v623_v17 = vsel %vm617_vm6, %v614_v50, %v542_v38 }
  0xfc   :  { %960 = vrot.lane.b32.xlu1 %v776_v26, %s6225_s5  ;;  %930 = vrot.lane.b32.xlu0 %v762_v49, %s6224_s4 }
  0xfd   :  { %5550 = vmatmul.mubr.msk.f32.gmra.mrb[4].mxu0 %vm1173_vm9, %v623_v17  ;;  %v1100_v17 = vsel %vm79_vm0, %v6858_v29, %v7110_v48 }
  0xfe   :  { %v480_v6 = vpop.permute.xlu1 %479  ;;  %v450_v16 = vpop.permute.xlu0 %449 }
  0xff   :  { %v606_v61 = vsel %vm599_vm1, %v597_v52, %v480_v6  ;;  %v598_v51 = vsel %vm590_vm15, %v589_v45, %v450_v16 }
 0x100   :  { %1084 = vrot.lane.b32.xlu1 %v837_v60, %s6230_s24  ;;  %1054 = vrot.lane.b32.xlu0 %v823_v41, %s6228_s12 }
 0x102   :  { %v7118_v53 = vpop.permute.xlu1 %884  ;;  %v7120_v56 = vpop.permute.xlu0 %854 }
 0x103   :  { %v1108_v60 = vsel %vm563_vm12, %v1100_v17, %v7118_v53  ;;  %v1101_v29 = vsel %vm79_vm0, %v6870_v37, %v7120_v56 }
 0x104   :  { %992 = vrot.lane.b32.xlu1 %v792_v8, %s6226_s18  ;;  %962 = vrot.lane.b32.xlu0 %v778_v28, %s6225_s5  ;;  %s6231_s5 = smov 8  }
 0x106   :  { %v512_v57 = vpop.permute.xlu1 %511  ;;  %v482_v59 = vpop.permute.xlu0 %481 }
 0x107   :  { %v615_v10 = vsel %vm608_vm2, %v606_v61, %v512_v57  ;;  %v607_v46 = vsel %vm599_vm1, %v598_v51, %v482_v59 }
 0x108   :  { %994 = vrot.lane.b32.xlu1 %v794_v55, %s6226_s18  ;;  %1086 = vrot.lane.b32.xlu0 %v839_v58, %s6230_s24  ;;  %s6232_s18 = smov 16  }
 0x10a   :  { %v917_v7 = vpop.permute.xlu1 %916  ;;  %v7132_v23 = vpop.permute.xlu0 %886 }
 0x10b   :  { %v1116_v41 = vsel %vm572_vm13, %v1108_v60, %v917_v7  ;;  %v1109_v48 = vsel %vm563_vm12, %v1101_v29, %v7132_v23 }
 0x10c   :  { %1026 = vrot.lane.b32.xlu1 %v811_v9, %s6227_s10  ;;  %1024 = vrot.lane.b32.xlu0 %v809_v3, %s6227_s10  ;;  %s6233_s10 = smov 48  }
 0x10e   :  { %v544_v34 = vpop.permute.xlu1 %543  ;;  %v514_v21 = vpop.permute.xlu0 %513 }
 0x10f   :  { %v624_v19 = vsel %vm617_vm6, %v615_v10, %v544_v34  ;;  %v616_v36 = vsel %vm608_vm2, %v607_v46, %v514_v21 }
 0x110   :  { %1058 = vrot.lane.b32.xlu1 %v827_v13, %s6228_s12  ;;  %1056 = vrot.lane.b32.xlu0 %v825_v14, %s6228_s12  ;;  %s6234_s12 = smov 56  }
 0x111   :  { %5552 = vmatprep.mubr.msk.f32.mxu0 %vm1173_vm9, %v624_v19 }
 0x112   :  { %v949_v24 = vpop.permute.xlu1 %948  ;;  %v919_v25 = vpop.permute.xlu0 %918 }
 0x113   :  { %v1124_v8 = vsel %vm581_vm14, %v1116_v41, %v949_v24  ;;  %v1117_v53 = vsel %vm572_vm13, %v1109_v48, %v919_v25 }
 0x114   :  { %1090 = vrot.lane.b32.xlu1 %v843_v42, %s6230_s24  ;;  %1088 = vrot.lane.b32.xlu0 %v841_v40, %s6230_s24 }
 0x116   :  { %v857_v30 = vpop.permute.xlu1 %856  ;;  %v546_v32 = vpop.permute.xlu0 %545 }
 0x117   :  { %v625_v33 = vsel %vm617_vm6, %v616_v36, %v546_v32  ;;  %v1102_v21 = vsel %vm79_vm0, %v6901_v5, %v857_v30 }
 0x118   :  { %5553 = vmatmul.mubr.msk.f32.gmra.mrb[6].mxu0 %vm1173_vm9, %v625_v33 }
 0x11a   :  { %v981_v44 = vpop.permute.xlu1 %980  ;;  %v951_v63 = vpop.permute.xlu0 %950 }
 0x11b   :  { %v1132_v28 = vsel %vm590_vm15, %v1124_v8, %v981_v44  ;;  %v1125_v9 = vsel %vm581_vm14, %v1117_v53, %v951_v63 }
 0x11e   :  { %v889_v15 = vpop.permute.xlu1 %888  ;;  %v859_v47 = vpop.permute.xlu0 %858 }
 0x11f   :  { %v1110_v19 = vsel %vm563_vm12, %v1102_v21, %v889_v15  ;;  %v1103_v5 = vsel %vm79_vm0, %v6918_v18, %v859_v47 }
 0x122   :  { %v1013_v31 = vpop.permute.xlu1 %1012  ;;  %v983_v20 = vpop.permute.xlu0 %982 }
 0x123   :  { %v1140_v54 = vsel %vm599_vm1, %v1132_v28, %v1013_v31  ;;  %v1133_v3 = vsel %vm590_vm15, %v1125_v9, %v983_v20 }
 0x126   :  { %v921_v26 = vpop.permute.xlu1 %920  ;;  %v891_v49 = vpop.permute.xlu0 %890 }
 0x127   :  { %v1118_v35 = vsel %vm572_vm13, %v1110_v19, %v921_v26  ;;  %v1111_v46 = vsel %vm563_vm12, %v1103_v5, %v891_v49 }
 0x12a   :  { %v1045_v50 = vpop.permute.xlu1 %1044  ;;  %v1015_v38 = vpop.permute.xlu0 %1014 }
 0x12b   :  { %v1148_v55 = vsel %vm608_vm2, %v1140_v54, %v1045_v50  ;;  %v1141_v2 = vsel %vm599_vm1, %v1133_v3, %v1015_v38 }
 0x12e   :  { %v953_v6 = vpop.permute.xlu1 %952  ;;  %v923_v16 = vpop.permute.xlu0 %922 }
 0x12f   :  { %v1126_v40 = vsel %vm581_vm14, %v1118_v35, %v953_v6  ;;  %v1119_v36 = vsel %vm572_vm13, %v1111_v46, %v923_v16 }
 0x132   :  { %v1077_v58 = vpop.permute.xlu1 %1076  ;;  %v1047_v57 = vpop.permute.xlu0 %1046 }
 0x133   :  { %v1156_v59 = vsel %vm617_vm6, %v1148_v55, %v1077_v58  ;;  %v1149_v7 = vsel %vm608_vm2, %v1141_v2, %v1047_v57  ;;  %v710_v57 = vld [vmem:[#allocation2 + $0x387] ss:$2 sm:$0xff] }
 0x134   :  { %5555 = vmatprep.mubr.msk.f32.mxu0 %vm1173_vm9, %v1156_v59 }
 0x136   :  { %v955_v39 = vpop.permute.xlu1 %954  ;;  %v861_v1 = vpop.permute.xlu0 %860 }
 0x137   :  { %v1127_v33 = vsel %vm581_vm14, %v1119_v36, %v955_v39  ;;  %v1104_v6 = vsel %vm79_vm0, %v6971_v4, %v861_v1 }
 0x13a   :  { %v1079_v12 = vpop.permute.xlu1 %1078  ;;  %v985_v52 = vpop.permute.xlu0 %984 }
 0x13b   :  { %v1157_v37 = vsel %vm617_vm6, %v1149_v7, %v1079_v12  ;;  %v1134_v22 = vsel %vm590_vm15, %v1126_v40, %v985_v52 }
 0x13c   :  { %5556 = vmatmul.mubr.msk.f32.gmra.mrb[8].mxu0 %vm1173_vm9, %v1157_v37 }
 0x13e   :  { %v893_v56 = vpop.permute.xlu1 %892  ;;  %v863_v23 = vpop.permute.xlu0 %862 }
 0x13f   :  { %v1112_v16 = vsel %vm563_vm12, %v1104_v6, %v893_v56  ;;  %v1105_v4 = vsel %vm79_vm0, %v710_v57, %v863_v23  ;;  %v7285_v57 = vld [vmem:[#allocation2 + $0x247] ss:$2 sm:$0xf] }
 0x142   :  { %v1017_v27 = vpop.permute.xlu1 %1016  ;;  %v987_v61 = vpop.permute.xlu0 %986 }
 0x143   :  { %v1142_v24 = vsel %vm599_vm1, %v1134_v22, %v1017_v27  ;;  %v1135_v44 = vsel %vm590_vm15, %v1127_v33, %v987_v61  ;;  %v712_v61 = vld [vmem:[#allocation2 + $0x3c7] ss:$2 sm:$0xff] }
 0x146   :  { %v925_v13 = vpop.permute.xlu1 %924  ;;  %v895_v14 = vpop.permute.xlu0 %894 }
 0x147   :  { %v1120_v8 = vsel %vm572_vm13, %v1112_v16, %v925_v13  ;;  %v1113_v1 = vsel %vm563_vm12, %v1105_v4, %v895_v14  ;;  %v714_v13 = vld [vmem:[#allocation2 + $0x407] ss:$2 sm:$0xff] }
 0x14a   :  { %v1049_v10 = vpop.permute.xlu1 %1048  ;;  %v1019_v34 = vpop.permute.xlu0 %1018 }
 0x14b   :  { %v1150_v25 = vsel %vm608_vm2, %v1142_v24, %v1049_v10  ;;  %v1143_v63 = vsel %vm599_vm1, %v1135_v44, %v1019_v34 }
 0x14e   :  { %v957_v62 = vpop.permute.xlu1 %956  ;;  %v927_v42 = vpop.permute.xlu0 %926 }
 0x14f   :  { %v1128_v55 = vsel %vm581_vm14, %v1120_v8, %v957_v62  ;;  %v1121_v9 = vsel %vm572_vm13, %v1113_v1, %v927_v42  ;;  %v1423_v62 = vld [vmem:[#allocation2 + $0x8] ss:$2 sm:$0xf] }
 0x152   :  { %v1081_v45 = vpop.permute.xlu1 %1080  ;;  %v1051_v51 = vpop.permute.xlu0 %1050 }
 0x153   :  { %v1158_v43 = vsel %vm617_vm6, %v1150_v25, %v1081_v45  ;;  %v1151_v15 = vsel %vm608_vm2, %v1143_v63, %v1051_v51  ;;  %v7236_v25 = vld [vmem:[#allocation2 + $0x7] ss:$2 sm:$0xf] }
 0x154   :  { %5558 = vmatprep.mubr.msk.f32.mxu0 %vm1173_vm9, %v1158_v43  ;;  %1895 = vst.msk [vmem:[#allocation2 + $0x7] sm:$0x3f] %vm1894_vm3, %v9205_v0 }
 0x156   :  { %v959_v30 = vpop.permute.xlu1 %958  ;;  %v865_v32 = vpop.permute.xlu0 %864 }
 0x157   :  { %v1129_v7 = vsel %vm581_vm14, %v1121_v9, %v959_v30  ;;  %v1106_v34 = vsel %vm79_vm0, %v712_v61, %v865_v32 }
 0x15a   :  { %v1083_v31 = vpop.permute.xlu1 %1082  ;;  %v989_v20 = vpop.permute.xlu0 %988 }
 0x15b   :  { %v1159_v18 = vsel %vm617_vm6, %v1151_v15, %v1083_v31  ;;  %v1136_v58 = vsel %vm590_vm15, %v1128_v55, %v989_v20  ;;  %v7255_v31 = vld [vmem:[%s9201_s2] ss:$0 sm:$0xff] }
 0x15c   :  { %5559 = vmatmul.mubr.msk.f32.gmra.mrb[10].mxu0 %vm1173_vm9, %v1159_v18 }
 0x15e   :  { %v897_v47 = vpop.permute.xlu1 %896  ;;  %v867_v26 = vpop.permute.xlu0 %866 }
 0x15f   :  { %v1107_v21 = vsel %vm79_vm0, %v714_v13, %v867_v26  ;;  %v1114_v19 = vsel %vm563_vm12, %v1106_v34, %v897_v47  ;;  %vm1566_vm0 = vcmask 261120  }
 0x162   :  { %v1021_v49 = vpop.permute.xlu1 %1020  ;;  %v991_v50 = vpop.permute.xlu0 %990 }
 0x163   :  { %v1144_v59 = vsel %vm599_vm1, %v1136_v58, %v1021_v49  ;;  %v1137_v12 = vsel %vm590_vm15, %v1129_v7, %v991_v50  ;;  %v7281_v58 = vld [vmem:[#allocation2 + $0x248] ss:$2 sm:$0xf] }
 0x166   :  { %v929_v38 = vpop.permute.xlu1 %928  ;;  %v899_v17 = vpop.permute.xlu0 %898 }
 0x167   :  { %v1115_v35 = vsel %vm563_vm12, %v1107_v21, %v899_v17  ;;  %v1122_v42 = vsel %vm572_vm13, %v1114_v19, %v929_v38  ;;  %vm1575_vm12 = vcmask 457728  }
 0x16a   :  { %v1053_v60 = vpop.permute.xlu1 %1052  ;;  %v1023_v41 = vpop.permute.xlu0 %1022 }
 0x16b   :  { %v1152_v29 = vsel %vm608_vm2, %v1144_v59, %v1053_v60  ;;  %v1145_v52 = vsel %vm599_vm1, %v1137_v12, %v1023_v41 }
 0x16e   :  { %v961_v28 = vpop.permute.xlu1 %960  ;;  %v931_v54 = vpop.permute.xlu0 %930 }
 0x16f   :  { %v1123_v40 = vsel %vm572_vm13, %v1115_v35, %v931_v54  ;;  %v1130_v45 = vsel %vm581_vm14, %v1122_v42, %v961_v28  ;;  %v7276_v54 = vld [vmem:[#allocation2 + $0x249] ss:$2 sm:$0xf]  ;;  %vm1578_vm13 = vcmask 523264  }
 0x170   :  { %4539 = vst.msk [vmem:[#allocation2 + $0x24f] sm:$0x3] %vm2720_vm8, %v9205_v0 }
 0x171   :  { %2053 = vst.msk [vmem:[#allocation2 + $0x247] sm:$0x3f] %vm1894_vm3, %v9205_v0 }
 0x172   :  { %v1085_v48 = vpop.permute.xlu1 %1084  ;;  %v1055_v53 = vpop.permute.xlu0 %1054 }
 0x173   :  { %v1160_v39 = vsel %vm617_vm6, %v1152_v29, %v1085_v48  ;;  %v1153_v37 = vsel %vm608_vm2, %v1145_v52, %v1055_v53 }
 0x174   :  { %5561 = vmatprep.mubr.msk.f32.mxu0 %vm1173_vm9, %v1160_v39 }
 0x176   :  { %v993_v3 = vpop.permute.xlu1 %992  ;;  %v963_v2 = vpop.permute.xlu0 %962 }
 0x177   :  { %v1131_v51 = vsel %vm581_vm14, %v1123_v40, %v963_v2  ;;  %v1138_v43 = vsel %vm590_vm15, %v1130_v45, %v993_v3  ;;  %vm1780_vm14 = vcmask 588800  }
 0x17a   :  { %v995_v56 = vpop.permute.xlu1 %994  ;;  %v1087_v27 = vpop.permute.xlu0 %1086 }
 0x17b   :  { %v1161_v23 = vsel %vm617_vm6, %v1153_v37, %v1087_v27  ;;  %v1139_v5 = vsel %vm590_vm15, %v1131_v51, %v995_v56  ;;  %vm1907_vm15 = vcmask 125952  }
 0x17c   :  { %5562 = vmatmul.mubr.msk.f32.gmra.mrb[12].mxu0 %vm1173_vm9, %v1161_v23 }
 0x17e   :  { %v1027_v14 = vpop.permute.xlu1 %1026  ;;  %v1025_v10 = vpop.permute.xlu0 %1024 }
 0x17f   :  { %v1147_v46 = vsel %vm599_vm1, %v1139_v5, %v1027_v14  ;;  %v1146_v36 = vsel %vm599_vm1, %v1138_v43, %v1025_v10  ;;  %vm2047_vm1 = vcmask 654336  }
 0x182   :  { %v1059_v22 = vpop.permute.xlu1 %1058  ;;  %v1057_v24 = vpop.permute.xlu0 %1056 }
 0x183   :  { %v1155_v30 = vsel %vm608_vm2, %v1147_v46, %v1059_v22  ;;  %v1154_v32 = vsel %vm608_vm2, %v1146_v36, %v1057_v24  ;;  %vm2049_vm2 = vcmask 785408  }
 0x186   :  { %v1091_v33 = vpop.permute.xlu1 %1090  ;;  %v1089_v44 = vpop.permute.xlu0 %1088 }
 0x187   :  { %v1163_v63 = vsel %vm617_vm6, %v1155_v30, %v1091_v33  ;;  %v1162_v15 = vsel %vm617_vm6, %v1154_v32, %v1089_v44 }
 0x188   :  { %5564 = vmatprep.mubr.msk.f32.mxu0 %vm1173_vm9, %v1162_v15  ;;  %v1767_v15 = vld [vmem:[%s9200_s1 + $0x28] sm:$0xff] }
 0x189   :  { %5565 = vmatmul.mubr.msk.f32.gmra.mrb[14].mxu0 %vm1173_vm9, %v1163_v63  ;;  %v1766_v63 = vld [vmem:[%s9200_s1 + $0x20] sm:$0xff]  ;;  %vm6243_vm9 = vmmov 0  }
 0x190   :  { %v5545_v20 = vpop.f32.mrb[0].mxu0 }
 0x191   :  { %v1298_v18 = vadd.f32 %v5545_v20, %v7255_v31  ;;  %v1292_v47 = vpop.f32.mrb[1].mxu0 }
 0x192   :  { %v1293_v26 = vadd.f32 %v7255_v31, %v1292_v47 }
 0x193   :  { %v1372_v49 = vmax.f32 %v1298_v18, 0.0  ;;  %v5648_v18 = vpack.c.bf16 %v1767_v15, %v1766_v63 }
 0x194   :  { %v1371_v50 = vmax.f32 %v1293_v26, 0.0  ;;  %v1768_v26 = vld [vmem:[%s9200_s1 + $0x30] sm:$0xff] }
 0x195   :  { %1412 = vst.msk [vmem:[#allocation2 + $0x48] sm:$0xff] %vm1387_vm5, %v1372_v49  ;;  %5649 = vmatprep.subr.bf16.mxu0 %v5648_v18 }
 0x196   :  { %1411 = vst.msk [vmem:[#allocation2 + $0x28] sm:$0xff] %vm1387_vm5, %v1371_v50  ;;  %5593 = vmatprep.mubr.msk.f32.mxu1 %vm1387_vm5, %v1371_v50  ;;  %5651 = vmatpush3.bf16.msra.mxu0 %v5648_v18 }
 0x197   :  { %5594 = vmatmul.mubr.msk.f32.vlgmr.msra.gmra.mrb[0].mxu1 %vm1387_vm5, %v1372_v49  ;;  %v1769_v49 = vld [vmem:[%s9200_s1 + $0x38] sm:$0xff] }
 0x19c   :  { %v1424_v38 = vld [vmem:[#allocation2 + $0x48] ss:$2 sm:$0xf]  ;;  %v1428_v60 = vld [vmem:[#allocation2 + $0x49] ss:$2 sm:$0xf] }
 0x19d   :  { %v1467_v17 = vcombine.low %v1423_v62, %v1424_v38  ;;  %v1431_v41 = vld [vmem:[#allocation2 + $0x27] ss:$2 sm:$0xf]  ;;  %v1447_v6 = vld [vmem:[#allocation2 + $0x48] ss:$2 sm:$0xf]  ;;  %v1479_v55 = vcombine.low %v7163_v11, %v1428_v60  ;;  %v5652_v38 = vpack.c.bf16 %v1769_v49, %v1768_v26 }
 0x19e   :  { %1899 = vst.msk [vmem:[#allocation2 + $0x27] sm:$0x1] %vm1898_vm4, %v9205_v0  ;;  %v1435_v16 = vld [vmem:[#allocation2 + $0x28] ss:$2 sm:$0xf] }
 0x19f   :  { %1469 = vrot.lane.b32.xlu0 %v1467_v17, %s6231_s5  ;;  %v1443_v8 = vld [vmem:[#allocation2 + $0x47] ss:$2 sm:$0xf]  ;;  %1904 = vst.msk [vmem:[#allocation2 + $0x4c] sm:$0x1] %vm1898_vm4, %v9205_v0  ;;  %5653 = vmatprep.subr.bf16.mxu0 %v5652_v38 }
 0x1a0   :  { %1903 = vst.msk [vmem:[#allocation2 + $0x2c] sm:$0x1] %vm1898_vm4, %v9205_v0  ;;  %3237 = vst.msk [vmem:[#allocation2 + $0x4c] sm:$0x1] %vm1898_vm4, %v9205_v0  ;;  %v1770_v17 = vld [vmem:[%s9200_s1 + $0x40] sm:$0xff]  ;;  %v1771_v60 = vld [vmem:[%s9200_s1 + $0x48] sm:$0xff]  ;;  %5655 = vmatpush3.bf16.msra.mxu0 %v5652_v38 }
 0x1a1   :  { %3236 = vst.msk [vmem:[#allocation2 + $0x2c] sm:$0x1] %vm1898_vm4, %v9205_v0  ;;  %v7274_v28 = vld [vmem:[#allocation2 + $0x47] ss:$2 sm:$0xf] }
 0x1a2   :  { %1900 = vst.msk [vmem:[#allocation2 + $0x47] sm:$0x1] %vm1898_vm4, %v9205_v0  ;;  %v1451_v61 = vld [vmem:[#allocation2 + $0x49] ss:$2 sm:$0xf] }
 0x1a3   :  { %1481 = vrot.lane.b32.xlu0 %v1479_v55, %s6232_s18  ;;  %v1439_v14 = vld [vmem:[#allocation2 + $0x29] ss:$2 sm:$0xf] }
 0x1b0   :  { %v5548_v59 = vpop.f32.mrb[2].mxu0 }
 0x1b1   :  { %v1308_v29 = vadd.f32 %v5548_v59, %v7255_v31  ;;  %v1302_v11 = vpop.f32.mrb[3].mxu0 }
 0x1b2   :  { %v1303_v48 = vadd.f32 %v7255_v31, %v1302_v11 }
 0x1b3   :  { %v1374_v53 = vmax.f32 %v1308_v29, 0.0 }
 0x1b4   :  { %v1373_v39 = vmax.f32 %v1303_v48, 0.0 }
 0x1b5   :  { %1414 = vst.msk [vmem:[#allocation2 + $0x88] sm:$0xff] %vm1387_vm5, %v1374_v53 }
 0x1b6   :  { %1413 = vst.msk [vmem:[#allocation2 + $0x68] sm:$0xff] %vm1387_vm5, %v1373_v39  ;;  %5596 = vmatprep.mubr.msk.f32.mxu1 %vm1387_vm5, %v1373_v39 }
 0x1b7   :  { %5597 = vmatmul.mubr.msk.f32.gmra.mrb[2].mxu1 %vm1387_vm5, %v1374_v53 }
 0x1bc   :  { %v1444_v4 = vld [vmem:[#allocation2 + $0x87] ss:$2 sm:$0xf]  ;;  %v1448_v7 = vld [vmem:[#allocation2 + $0x88] ss:$2 sm:$0xf] }
 0x1bd   :  { %v1527_v1 = vcombine.low %v1443_v8, %v1444_v4  ;;  %v1432_v9 = vld [vmem:[#allocation2 + $0x67] ss:$2 sm:$0xf]  ;;  %v1436_v3 = vld [vmem:[#allocation2 + $0x68] ss:$2 sm:$0xf]  ;;  %v1539_v37 = vcombine.low %v1447_v6, %v1448_v7 }
 0x1be   :  { %v1491_v2 = vcombine.low %v1431_v41, %v1432_v9  ;;  %1901 = vst.msk [vmem:[#allocation2 + $0x67] sm:$0x1] %vm1898_vm4, %v9205_v0  ;;  %1905 = vst.msk [vmem:[#allocation2 + $0x6c] sm:$0x1] %vm1898_vm4, %v9205_v0  ;;  %v1503_v56 = vcombine.low %v1435_v16, %v1436_v3  ;;  %v5656_v41 = vpack.c.bf16 %v1771_v60, %v1770_v17  ;;  %v1772_v6 = vld [vmem:[%s9200_s1 + $0x50] sm:$0xff]  ;;  %v1773_v16 = vld [vmem:[%s9200_s1 + $0x58] sm:$0xff] }
 0x1bf   :  { %1529 = vrot.lane.b32.xlu1 %v1527_v1, %s6233_s10  ;;  %3238 = vst.msk [vmem:[#allocation2 + $0x6c] sm:$0x1] %vm1898_vm4, %v9205_v0  ;;  %v1425_v12 = vld [vmem:[#allocation2 + $0x88] ss:$2 sm:$0xf]  ;;  %v5660_v8 = vpack.c.bf16 %v1773_v16, %v1772_v6  ;;  %v1774_v4 = vld [vmem:[%s9200_s1 + $0x60] sm:$0xff] }
 0x1c0   :  { %1493 = vrot.lane.b32.xlu0 %v1491_v2, %s6230_s24  ;;  %1906 = vst.msk [vmem:[#allocation2 + $0x8c] sm:$0x1] %vm1898_vm4, %v9205_v0  ;;  %v7306_v52 = vld [vmem:[#allocation2 + $0x87] ss:$2 sm:$0xf]  ;;  %5657 = vmatprep.subr.bf16.mxu0 %v5656_v41 }
 0x1c1   :  { %3239 = vst.msk [vmem:[#allocation2 + $0x8c] sm:$0x1] %vm1898_vm4, %v9205_v0  ;;  %1902 = vst.msk [vmem:[#allocation2 + $0x87] sm:$0x1] %vm1898_vm4, %v9205_v0  ;;  %5659 = vmatpush3.bf16.msra.mxu0 %v5656_v41 }
 0x1c2   :  { %v1452_v27 = vld [vmem:[#allocation2 + $0x89] ss:$2 sm:$0xf]  ;;  %5661 = vmatprep.subr.bf16.mxu0 %v5660_v8 }
 0x1c3   :  { %1541 = vrot.lane.b32.xlu1 %v1539_v37, %s6234_s12  ;;  %v1440_v23 = vld [vmem:[#allocation2 + $0x69] ss:$2 sm:$0xf]  ;;  %v1551_v13 = vcombine.low %v1451_v61, %v1452_v27 }
 0x1c4   :  { %1505 = vrot.lane.b32.xlu0 %v1503_v56, %s6235_s20  ;;  %v1515_v10 = vcombine.low %v1439_v14, %v1440_v23  ;;  %v1429_v24 = vld [vmem:[#allocation2 + $0x89] ss:$2 sm:$0xf] }
 0x1c5   :  { %5663 = vmatpush3.bf16.msra.mxu0 %v5660_v8 }
 0x1c6   :  { %5583 = vmatprep.subr.mxu0 %v1774_v4 }
 0x1c7   :  { %1553 = vrot.lane.b32.xlu1 %v1551_v13, %s6236_s21 }
 0x1c8   :  { %1517 = vrot.lane.b32.xlu0 %v1515_v10, %s6237_s22 }
 0x1c9   :  { %5584 = vmatpush3.msra.mxu0 %v1774_v4 }
 0x1d0   :  { %v5551_v34 = vpop.f32.mrb[4].mxu0 }
 0x1d1   :  { %v1318_v21 = vadd.f32 %v5551_v34, %v7255_v31  ;;  %v1312_v19 = vpop.f32.mrb[5].mxu0 }
 0x1d2   :  { %v1313_v35 = vadd.f32 %v7255_v31, %v1312_v19 }
 0x1d3   :  { %v1376_v62 = vmax.f32 %v1318_v21, 0.0 }
 0x1d4   :  { %v1375_v42 = vmax.f32 %v1313_v35, 0.0 }
 0x1d5   :  { %1416 = vst.msk [vmem:[#allocation2 + $0xc8] sm:$0xff] %vm1387_vm5, %v1376_v62 }
 0x1d6   :  { %1415 = vst.msk [vmem:[#allocation2 + $0xa8] sm:$0xff] %vm1387_vm5, %v1375_v42  ;;  %5599 = vmatprep.mubr.msk.f32.mxu1 %vm1387_vm5, %v1375_v42 }
 0x1d7   :  { %5600 = vmatmul.mubr.msk.f32.gmra.mrb[4].mxu1 %vm1387_vm5, %v1376_v62 }
 0x1dc   :  { %v1426_v40 = vld [vmem:[#allocation2 + $0xc8] ss:$2 sm:$0xf]  ;;  %v1430_v45 = vld [vmem:[#allocation2 + $0xc9] ss:$2 sm:$0xf] }
 0x1dd   :  { %v1468_v22 = vcombine.low %v1425_v12, %v1426_v40  ;;  %v1433_v51 = vld [vmem:[#allocation2 + $0xa7] ss:$2 sm:$0xf]  ;;  %v1437_v43 = vld [vmem:[#allocation2 + $0xa8] ss:$2 sm:$0xf]  ;;  %v1480_v30 = vcombine.low %v1429_v24, %v1430_v45 }
 0x1de   :  { %v1441_v5 = vld [vmem:[#allocation2 + $0xa9] ss:$2 sm:$0xf]  ;;  %v1449_v39 = vld [vmem:[#allocation2 + $0xc8] ss:$2 sm:$0xf] }
 0x1df   :  { %1471 = vrot.lane.b32.xlu1 %v1468_v22, %s6231_s5  ;;  %v1445_v46 = vld [vmem:[#allocation2 + $0xc7] ss:$2 sm:$0xf]  ;;  %1897 = vst.msk [vmem:[#allocation2 + $0xa7] sm:$0x3f] %vm1894_vm3, %v9205_v0 }
 0x1e0   :  { %v7325_v36 = vld [vmem:[#allocation2 + $0xc7] ss:$2 sm:$0xf]  ;;  %3231 = vst.msk [vmem:[#allocation2 + $0xa7] sm:$0x3f] %vm1894_vm3, %v9205_v0 }
 0x1e1   :  { %4167 = vst.msk [vmem:[#allocation2 + $0xc7] sm:$0x1] %vm1898_vm4, %v9205_v0  ;;  %v1453_v2 = vld [vmem:[#allocation2 + $0xc9] ss:$2 sm:$0xf] }
 0x1e3   :  { %1483 = vrot.lane.b32.xlu1 %v1480_v30, %s6232_s18 }
 0x1eb   :  { %v5554_v32 = vpop.f32.mrb[6].mxu0 }
 0x1ec   :  { %v1328_v33 = vadd.f32 %v5554_v32, %v7255_v31  ;;  %v1322_v44 = vpop.f32.mrb[7].mxu0 }
 0x1ed   :  { %v1323_v20 = vadd.f32 %v7255_v31, %v1322_v44 }
 0x1ee   :  { %v1378_v47 = vmax.f32 %v1328_v33, 0.0 }
 0x1ef   :  { %v1377_v50 = vmax.f32 %v1323_v20, 0.0 }
 0x1f0   :  { %1418 = vst.msk [vmem:[#allocation2 + $0x108] sm:$0xff] %vm1387_vm5, %v1378_v47 }
 0x1f1   :  { %1417 = vst.msk [vmem:[#allocation2 + $0xe8] sm:$0xff] %vm1387_vm5, %v1377_v50  ;;  %5602 = vmatprep.mubr.msk.f32.mxu1 %vm1387_vm5, %v1377_v50 }
 0x1f2   :  { %5603 = vmatmul.mubr.msk.f32.gmra.mrb[6].mxu1 %vm1387_vm5, %v1378_v47 }
 0x1f7   :  { %v1446_v55 = vld [vmem:[#allocation2 + $0x107] ss:$2 sm:$0xf]  ;;  %v1450_v48 = vld [vmem:[#allocation2 + $0x108] ss:$2 sm:$0xf] }
 0x1f8   :  { %v1528_v59 = vcombine.low %v1445_v46, %v1446_v55  ;;  %4169 = vst.msk [vmem:[#allocation2 + $0x107] sm:$0x1] %vm1898_vm4, %v9205_v0  ;;  %v1434_v29 = vld [vmem:[#allocation2 + $0xe7] ss:$2 sm:$0xf]  ;;  %v1540_v1 = vcombine.low %v1449_v39, %v1450_v48 }
 0x1f9   :  { %v1492_v11 = vcombine.low %v1433_v51, %v1434_v29  ;;  %4168 = vst.msk [vmem:[#allocation2 + $0xe7] sm:$0x1] %vm1898_vm4, %v9205_v0  ;;  %v1438_v53 = vld [vmem:[#allocation2 + $0xe8] ss:$2 sm:$0xf] }
 0x1fa   :  { %1531 = vrot.lane.b32.xlu0 %v1528_v59, %s6233_s10  ;;  %v1504_v9 = vcombine.low %v1437_v43, %v1438_v53  ;;  %v1454_v3 = vld [vmem:[#allocation2 + $0x109] ss:$2 sm:$0xf] }
 0x1fb   :  { %1495 = vrot.lane.b32.xlu1 %v1492_v11, %s6230_s24  ;;  %v1552_v7 = vcombine.low %v1453_v2, %v1454_v3  ;;  %v1442_v12 = vld [vmem:[#allocation2 + $0xe9] ss:$2 sm:$0xf] }
 0x1fc   :  { %v1516_v37 = vcombine.low %v1441_v5, %v1442_v12 }
 0x1fe   :  { %1543 = vrot.lane.b32.xlu0 %v1540_v1, %s6234_s12 }
 0x1ff   :  { %1507 = vrot.lane.b32.xlu1 %v1504_v9, %s6235_s20 }
 0x202   :  { %1555 = vrot.lane.b32.xlu0 %v1552_v7, %s6236_s21 }
 0x206   :  { %1519 = vrot.lane.b32.xlu0 %v1516_v37, %s6237_s22 }
 0x20f   :  { %v5557_v56 = vpop.f32.mrb[8].mxu0 }
 0x210   :  { %v1338_v27 = vadd.f32 %v5557_v56, %v7255_v31  ;;  %v1332_v23 = vpop.f32.mrb[9].mxu0 }
 0x211   :  { %v1333_v61 = vadd.f32 %v7255_v31, %v1332_v23  ;;  %v1470_v22 = vpop.permute.xlu0 %1469 }
 0x212   :  { %v1380_v13 = vmax.f32 %v1338_v27, 0.0 }
 0x213   :  { %v1379_v14 = vmax.f32 %v1333_v61, 0.0 }
 0x214   :  { %1603 = vst.msk [vmem:[#allocation2 + $0x288] sm:$0xff] %vm1387_vm5, %v1380_v13 }
 0x215   :  { %1602 = vst.msk [vmem:[#allocation2 + $0x268] sm:$0xff] %vm1387_vm5, %v1379_v14  ;;  %5605 = vmatprep.mubr.msk.f32.mxu1 %vm1387_vm5, %v1379_v14  ;;  %v1482_v24 = vpop.permute.xlu0 %1481 }
 0x216   :  { %5606 = vmatmul.mubr.msk.f32.gmra.mrb[8].mxu1 %vm1387_vm5, %v1380_v13 }
 0x21b   :  { %v1615_v10 = vld [vmem:[#allocation2 + $0x288] ss:$2 sm:$0xf]  ;;  %v1619_v21 = vld [vmem:[#allocation2 + $0x289] ss:$2 sm:$0xf] }
 0x21c   :  { %v1658_v34 = vcombine.low %v7281_v58, %v1615_v10  ;;  %v1622_v19 = vld [vmem:[#allocation2 + $0x267] ss:$2 sm:$0xf]  ;;  %v7384_v35 = vld [vmem:[#allocation2 + $0x288] ss:$2 sm:$0xf]  ;;  %v1670_v40 = vcombine.low %v7276_v54, %v1619_v21  ;;  %v1459_v54 = vcombine.low %v7236_v25, %v7274_v28 }
 0x21d   :  { %2056 = vst.msk [vmem:[#allocation2 + $0x267] sm:$0x1] %vm1898_vm4, %v9205_v0  ;;  %v7386_v62 = vld [vmem:[#allocation2 + $0x268] ss:$2 sm:$0xf] }
 0x21e   :  { %1660 = vrot.lane.b32.xlu1 %v1658_v34, %s6231_s5  ;;  %2061 = vst.msk [vmem:[#allocation2 + $0x28c] sm:$0x1] %vm1898_vm4, %v9205_v0  ;;  %2060 = vst.msk [vmem:[#allocation2 + $0x26c] sm:$0x1] %vm1898_vm4, %v9205_v0  ;;  %v1559_v63 = vsel %vm1387_vm5, %v1459_v54, %v1470_v22 }
 0x21f   :  { %v1634_v42 = vld [vmem:[#allocation2 + $0x287] ss:$2 sm:$0xf]  ;;  %3399 = vst.msk [vmem:[#allocation2 + $0x28c] sm:$0x1] %vm1898_vm4, %v9205_v0  ;;  %v1562_v20 = vsel %vm1561_vm7, %v1559_v63, %v1482_v24 }
 0x220   :  { %3398 = vst.msk [vmem:[#allocation2 + $0x26c] sm:$0x1] %vm1898_vm4, %v9205_v0  ;;  %v7397_v58 = vld [vmem:[#allocation2 + $0x287] ss:$2 sm:$0xf] }
 0x221   :  { %2057 = vst.msk [vmem:[#allocation2 + $0x287] sm:$0x1] %vm1898_vm4, %v9205_v0  ;;  %v1630_v53 = vld [vmem:[#allocation2 + $0x269] ss:$2 sm:$0xf] }
 0x222   :  { %1672 = vrot.lane.b32.xlu1 %v1670_v40, %s6232_s18  ;;  %v1642_v63 = vld [vmem:[#allocation2 + $0x289] ss:$2 sm:$0xf] }
 0x22f   :  { %v5560_v45 = vpop.f32.mrb[10].mxu0 }
 0x230   :  { %v1348_v51 = vadd.f32 %v5560_v45, %v7255_v31  ;;  %v1342_v43 = vpop.f32.mrb[11].mxu0 }
 0x231   :  { %v1530_v5 = vpop.permute.xlu1 %1529  ;;  %v1343_v46 = vadd.f32 %v7255_v31, %v1342_v43 }
 0x232   :  { %v1382_v30 = vmax.f32 %v1348_v51, 0.0  ;;  %v1494_v32 = vpop.permute.xlu0 %1493 }
 0x233   :  { %v1381_v33 = vmax.f32 %v1343_v46, 0.0  ;;  %v1564_v18 = vsel %vm617_vm6, %v1562_v20, %v1494_v32 }
 0x234   :  { %1605 = vst.msk [vmem:[#allocation2 + $0x2c8] sm:$0xff] %vm1387_vm5, %v1382_v30 }
 0x235   :  { %1604 = vst.msk [vmem:[#allocation2 + $0x2a8] sm:$0xff] %vm1387_vm5, %v1381_v33  ;;  %5608 = vmatprep.mubr.msk.f32.mxu1 %vm1387_vm5, %v1381_v33  ;;  %v1542_v15 = vpop.permute.xlu1 %1541 }
 0x236   :  { %v1506_v44 = vpop.permute.xlu0 %1505  ;;  %5609 = vmatmul.mubr.msk.f32.gmra.mrb[10].mxu1 %vm1387_vm5, %v1382_v30 }
 0x237   :  { %v1567_v47 = vsel %vm1566_vm0, %v1564_v18, %v1506_v44 }
 0x239   :  { %v1554_v60 = vpop.permute.xlu1 %1553 }
 0x23a   :  { %v1518_v25 = vpop.permute.xlu0 %1517 }
 0x23b   :  { %v1570_v28 = vsel %vm1569_vm10, %v1567_v47, %v1518_v25  ;;  %v1635_v26 = vld [vmem:[#allocation2 + $0x2c7] ss:$2 sm:$0xf]  ;;  %v1639_v16 = vld [vmem:[#allocation2 + $0x2c8] ss:$2 sm:$0xf] }
 0x23c   :  { %v1573_v49 = vsel %vm1572_vm11, %v1570_v28, %v1530_v5  ;;  %v1718_v50 = vcombine.low %v1634_v42, %v1635_v26  ;;  %v1623_v38 = vld [vmem:[#allocation2 + $0x2a7] ss:$2 sm:$0xf]  ;;  %v1627_v17 = vld [vmem:[#allocation2 + $0x2a8] ss:$2 sm:$0xf]  ;;  %v1730_v29 = vcombine.low %v7384_v35, %v1639_v16  ;;  %v1460_v26 = vcombine.low %v7306_v52, %v7325_v36 }
 0x23d   :  { %v1576_v41 = vsel %vm1575_vm12, %v1573_v49, %v1542_v15  ;;  %v1682_v6 = vcombine.low %v1622_v19, %v1623_v38  ;;  %2058 = vst.msk [vmem:[#allocation2 + $0x2a7] sm:$0x1] %vm1898_vm4, %v9205_v0  ;;  %2062 = vst.msk [vmem:[#allocation2 + $0x2ac] sm:$0x1] %vm1898_vm4, %v9205_v0  ;;  %v1694_v11 = vcombine.low %v7386_v62, %v1627_v17 }
 0x23e   :  { %v1616_v8 = vld [vmem:[#allocation2 + $0x2c8] ss:$2 sm:$0xf]  ;;  %1720 = vrot.lane.b32.xlu0 %v1718_v50, %s6233_s10  ;;  %v1579_v55 = vsel %vm1578_vm13, %v1576_v41, %v1554_v60  ;;  %3400 = vst.msk [vmem:[#allocation2 + $0x2ac] sm:$0x1] %vm1898_vm4, %v9205_v0 }
 0x23f   :  { %2063 = vst.msk [vmem:[#allocation2 + $0x2cc] sm:$0x1] %vm1898_vm4, %v9205_v0  ;;  %5585 = vmatprep.mubr.msk.f32.mxu0 %vm1780_vm14, %v1579_v55  ;;  %1684 = vrot.lane.b32.xlu1 %v1682_v6, %s6230_s24  ;;  %v7432_v59 = vld [vmem:[#allocation2 + $0x2c7] ss:$2 sm:$0xf] }
 0x240   :  { %3401 = vst.msk [vmem:[#allocation2 + $0x2cc] sm:$0x1] %vm1898_vm4, %v9205_v0  ;;  %2059 = vst.msk [vmem:[#allocation2 + $0x2c7] sm:$0x1] %vm1898_vm4, %v9205_v0 }
 0x241   :  { %v1631_v48 = vld [vmem:[#allocation2 + $0x2a9] ss:$2 sm:$0xf] }
 0x242   :  { %1732 = vrot.lane.b32.xlu0 %v1730_v29, %s6234_s12  ;;  %v1706_v39 = vcombine.low %v1630_v53, %v1631_v48  ;;  %v1620_v61 = vld [vmem:[#allocation2 + $0x2c9] ss:$2 sm:$0xf] }
 0x243   :  { %1696 = vrot.lane.b32.xlu1 %v1694_v11, %s6235_s20  ;;  %v1643_v32 = vld [vmem:[#allocation2 + $0x2c9] ss:$2 sm:$0xf] }
 0x244   :  { %v1742_v15 = vcombine.low %v1642_v63, %v1643_v32  ;;  %v7517_v32 = vld [vmem:[#allocation2 + $0x8] ss:$2 sm:$0x3] }
 0x246   :  { %1708 = vrot.lane.b32.xlu0 %v1706_v39, %s6237_s22 }
 0x24f   :  { %v5563_v4 = vpop.f32.mrb[12].mxu0 }
 0x250   :  { %v1358_v1 = vadd.f32 %v5563_v4, %v7255_v31  ;;  %v1352_v9 = vpop.f32.mrb[13].mxu0 }
 0x251   :  { %v1353_v3 = vadd.f32 %v7255_v31, %v1352_v9 }
 0x252   :  { %v1384_v2 = vmax.f32 %v1358_v1, 0.0 }
 0x253   :  { %v1383_v7 = vmax.f32 %v1353_v3, 0.0 }
 0x254   :  { %1607 = vst.msk [vmem:[#allocation2 + $0x308] sm:$0xff] %vm1387_vm5, %v1384_v2 }
 0x255   :  { %1606 = vst.msk [vmem:[#allocation2 + $0x2e8] sm:$0xff] %vm1387_vm5, %v1383_v7  ;;  %5611 = vmatprep.mubr.msk.f32.mxu1 %vm1387_vm5, %v1383_v7 }
 0x256   :  { %5612 = vmatmul.mubr.msk.f32.gmra.mrb[12].mxu1 %vm1387_vm5, %v1384_v2 }
 0x25b   :  { %v1617_v12 = vld [vmem:[#allocation2 + $0x308] ss:$2 sm:$0xf]  ;;  %v1621_v13 = vld [vmem:[#allocation2 + $0x309] ss:$2 sm:$0xf] }
 0x25c   :  { %v5566_v37 = vpop.f32.mrb[14].mxu0  ;;  %v1659_v56 = vcombine.low %v1616_v8, %v1617_v12  ;;  %v1624_v10 = vld [vmem:[#allocation2 + $0x2e7] ss:$2 sm:$0xf]  ;;  %v1671_v62 = vcombine.low %v1620_v61, %v1621_v13  ;;  %v1650_v61 = vcombine.low %v7285_v57, %v7397_v58 }
 0x25d   :  { %v1368_v27 = vadd.f32 %v5566_v37, %v7255_v31  ;;  %v1362_v23 = vpop.f32.mrb[15].mxu0  ;;  %v1628_v34 = vld [vmem:[#allocation2 + $0x2e8] ss:$2 sm:$0xf] }
 0x25e   :  { %v1363_v14 = vadd.f32 %v7255_v31, %v1362_v23  ;;  %1662 = vrot.lane.b32.xlu0 %v1659_v56, %s6231_s5  ;;  %v1632_v19 = vld [vmem:[#allocation2 + $0x2e9] ss:$2 sm:$0xf]  ;;  %v1472_v31 = vpop.permute.xlu1 %1471  ;;  %v1640_v54 = vld [vmem:[#allocation2 + $0x308] ss:$2 sm:$0xf] }
 0x25f   :  { %v1386_v21 = vmax.f32 %v1368_v27, 0.0  ;;  %2055 = vst.msk [vmem:[#allocation2 + $0x2e7] sm:$0x3f] %vm1894_vm3, %v9205_v0  ;;  %v1636_v42 = vld [vmem:[#allocation2 + $0x307] ss:$2 sm:$0xf]  ;;  %v1560_v50 = vsel %vm1387_vm5, %v1460_v26, %v1472_v31 }
 0x260   :  { %v1385_v35 = vmax.f32 %v1363_v14, 0.0  ;;  %3393 = vst.msk [vmem:[#allocation2 + $0x2e7] sm:$0x3f] %vm1894_vm3, %v9205_v0  ;;  %v7455_v40 = vld [vmem:[#allocation2 + $0x307] ss:$2 sm:$0xf] }
 0x261   :  { %1609 = vst.msk [vmem:[#allocation2 + $0x348] sm:$0xff] %vm1387_vm5, %v1386_v21  ;;  %v1644_v55 = vld [vmem:[#allocation2 + $0x309] ss:$2 sm:$0xf] }
 0x262   :  { %1608 = vst.msk [vmem:[#allocation2 + $0x328] sm:$0xff] %vm1387_vm5, %v1385_v35  ;;  %5614 = vmatprep.mubr.msk.f32.mxu1 %vm1387_vm5, %v1385_v35  ;;  %1674 = vrot.lane.b32.xlu0 %v1671_v62, %s6232_s18  ;;  %v1484_v46 = vpop.permute.xlu1 %1483 }
 0x263   :  { %4547 = vst.msk [vmem:[#allocation2 + $0x307] sm:$0x1] %vm1898_vm4, %v9205_v0  ;;  %5615 = vmatmul.mubr.msk.f32.gmra.mrb[14].mxu1 %vm1387_vm5, %v1386_v21  ;;  %v1563_v60 = vsel %vm1561_vm7, %v1560_v50, %v1484_v46 }
 0x268   :  { %v1637_v22 = vld [vmem:[#allocation2 + $0x347] ss:$2 sm:$0xf]  ;;  %v1641_v5 = vld [vmem:[#allocation2 + $0x348] ss:$2 sm:$0xf] }
 0x269   :  { %v1719_v24 = vcombine.low %v1636_v42, %v1637_v22  ;;  %4549 = vst.msk [vmem:[#allocation2 + $0x347] sm:$0x1] %vm1898_vm4, %v9205_v0  ;;  %v1625_v45 = vld [vmem:[#allocation2 + $0x327] ss:$2 sm:$0xf]  ;;  %v1731_v44 = vcombine.low %v1640_v54, %v1641_v5 }
 0x26a   :  { %v7465_v51 = vpop.f32.mrb[0].mxu1  ;;  %v1683_v43 = vcombine.low %v1624_v10, %v1625_v45  ;;  %4548 = vst.msk [vmem:[#allocation2 + $0x327] sm:$0x1] %vm1898_vm4, %v9205_v0  ;;  %v1629_v20 = vld [vmem:[#allocation2 + $0x328] ss:$2 sm:$0xf]  ;;  %v1651_v45 = vcombine.low %v7432_v59, %v7455_v40 }
 0x26b   :  { %v7469_v30 = vpop.f32.mrb[1].mxu1  ;;  %1722 = vrot.lane.b32.xlu1 %v1719_v24, %s6233_s10  ;;  %v1695_v25 = vcombine.low %v1628_v34, %v1629_v20  ;;  %v1633_v28 = vld [vmem:[#allocation2 + $0x329] ss:$2 sm:$0xf] }
 0x26c   :  { %1686 = vrot.lane.b32.xlu0 %v1683_v43, %s6230_s24  ;;  %v1532_v33 = vpop.permute.xlu0 %1531  ;;  %v1707_v17 = vcombine.low %v1632_v19, %v1633_v28  ;;  %v1645_v41 = vld [vmem:[#allocation2 + $0x349] ss:$2 sm:$0xf] }
 0x26d   :  { %v1496_v18 = vpop.permute.xlu1 %1495  ;;  %v1743_v36 = vcombine.low %v1644_v55, %v1645_v41  ;;  %v7514_v5 = vld [vmem:[#allocation2 + $0x9] ss:$2 sm:$0x3]  ;;  %v7550_v41 = vld [vmem:[%s9201_s2 + $0x1] ss:$0 sm:$0xff] }
 0x26e   :  { %v1565_v6 = vsel %vm617_vm6, %v1563_v60, %v1496_v18 }
 0x26f   :  { %1734 = vrot.lane.b32.xlu1 %v1731_v44, %s6234_s12 }
 0x270   :  { %1744 = vrot.lane.b32.xlu0 %v1742_v15, %s6236_s21  ;;  %v1544_v47 = vpop.permute.xlu0 %1543 }
 0x271   :  { %v1508_v38 = vpop.permute.xlu1 %1507 }
 0x272   :  { %v1568_v16 = vsel %vm1566_vm0, %v1565_v6, %v1508_v38 }
 0x273   :  { %1698 = vrot.lane.b32.xlu1 %v1695_v25, %s6235_s20 }
 0x274   :  { %v1556_v49 = vpop.permute.xlu0 %1555 }
 0x277   :  { %1710 = vrot.lane.b32.xlu1 %v1707_v17, %s6237_s22 }
 0x278   :  { %v1520_v8 = vpop.permute.xlu0 %1519 }
 0x279   :  { %v1571_v52 = vsel %vm1569_vm10, %v1568_v16, %v1520_v8 }
 0x27a   :  { %v1574_v29 = vsel %vm1572_vm11, %v1571_v52, %v1532_v33  ;;  %v7519_v33 = vld [vmem:[#allocation2 + $0x7] ss:$2 sm:$0x3] }
 0x27b   :  { %v1577_v11 = vsel %vm1575_vm12, %v1574_v29, %v1544_v47  ;;  %1746 = vrot.lane.b32.xlu1 %v1743_v36, %s6236_s21  ;;  %2713 = vst.msk [vmem:[#allocation2 + $0x7] sm:$0xf] %vm1907_vm15, %v9205_v0 }
 0x27c   :  { %v1580_v48 = vsel %vm1578_vm13, %v1577_v11, %v1556_v49 }
 0x27d   :  { %5586 = vmatmul.mubr.msk.f32.vlgmr.msra.gmra.mrb[16].mxu0 %vm1780_vm14, %v1580_v48  ;;  %v7567_v48 = vld [vmem:[#allocation2 + $0x249] ss:$2 sm:$0x3] }
 0x28a   :  { %v7489_v53 = vpop.f32.mrb[2].mxu1 }
 0x28b   :  { %v7491_v39 = vpop.f32.mrb[3].mxu1 }
 0x290   :  { %v1661_v7 = vpop.permute.xlu1 %1660 }
 0x291   :  { %v1750_v13 = vsel %vm1387_vm5, %v1650_v61, %v1661_v7  ;;  %v7572_v7 = vld [vmem:[#allocation2 + $0x247] ss:$2 sm:$0x3] }
 0x294   :  { %v1673_v37 = vpop.permute.xlu1 %1672 }
 0x295   :  { %v1752_v10 = vsel %vm1561_vm7, %v1750_v13, %v1673_v37 }
 0x2aa   :  { %v7493_v4 = vpop.f32.mrb[4].mxu1 }
 0x2ab   :  { %v7495_v1 = vpop.f32.mrb[5].mxu1 }
 0x2b0   :  { %v1721_v9 = vpop.permute.xlu0 %1720 }
 0x2b1   :  { %v1685_v27 = vpop.permute.xlu1 %1684 }
 0x2b2   :  { %v1754_v34 = vsel %vm617_vm6, %v1752_v10, %v1685_v27  ;;  %v9203_v10 = vmov 0.0|0.0  }
 0x2b3   :  { %5664 = vmatprep.subr.bf16.mxu0 %v9203_v10  ;;  %5701 = vmatprep.subr.bf16.mxu1 %v9203_v10 }
 0x2b4   :  { %v1733_v12 = vpop.permute.xlu0 %1732 }
 0x2b5   :  { %v1697_v14 = vpop.permute.xlu1 %1696 }
 0x2b6   :  { %v1756_v19 = vsel %vm1566_vm0, %v1754_v34, %v1697_v14  ;;  %v2213_v34 = vld [vmem:[%s9200_s1 + $0x68] sm:$0xff] }
 0x2b8   :  { %v1709_v56 = vpop.permute.xlu0 %1708 }
 0x2b9   :  { %v1758_v35 = vsel %vm1569_vm10, %v1756_v19, %v1709_v56 }
 0x2ba   :  { %v1760_v31 = vsel %vm1572_vm11, %v1758_v35, %v1721_v9  ;;  %v7570_v9 = vld [vmem:[#allocation2 + $0x248] ss:$2 sm:$0x3]  ;;  %v2215_v35 = vld [vmem:[%s9200_s1 + $0x78] sm:$0xff] }
 0x2bb   :  { %v1762_v24 = vsel %vm1575_vm12, %v1760_v31, %v1733_v12  ;;  %2861 = vst.msk [vmem:[#allocation2 + $0x247] sm:$0xf] %vm1907_vm15, %v9205_v0 }
 0x2c5   :  { %v7497_v3 = vpop.f32.mrb[6].mxu1 }
 0x2c6   :  { %v7499_v2 = vpop.f32.mrb[7].mxu1 }
 0x2d0   :  { %v1663_v23 = vpop.permute.xlu0 %1662 }
 0x2d1   :  { %v1751_v46 = vsel %vm1387_vm5, %v1651_v45, %v1663_v23  ;;  %v2219_v45 = vld [vmem:[%s9200_s1 + $0x98] sm:$0xff]  ;;  %vm2210_vm5 = vcmask 1043456  }
 0x2d4   :  { %v1675_v21 = vpop.permute.xlu0 %1674 }
 0x2d5   :  { %v1753_v54 = vsel %vm1561_vm7, %v1751_v46, %v1675_v21  ;;  %v2214_v21 = vld [vmem:[%s9200_s1 + $0x70] sm:$0xff] }
 0x2d6   :  { %v5665_v19 = vpack.c.bf16 %v2214_v21, %v2213_v34  ;;  %v2223_v34 = vld [vmem:[%s9200_s1 + $0xb8] sm:$0xff]  ;;  %v2224_v21 = vld [vmem:[%s9200_s1 + $0xc0] sm:$0xff] }
 0x2d8   :  { %5666 = vmatpush1.bf16.msra.mxu0 %v5665_v19  ;;  %v5680_v19 = vpack.c.bf16 %v2224_v21, %v2223_v34 }
 0x2d9   :  { %5667 = vmatprep.subr.bf16.mxu0 %v9203_v10 }
 0x2dd   :  { %v1723_v62 = vpop.permute.xlu1 %1722 }
 0x2de   :  { %v1687_v42 = vpop.permute.xlu0 %1686 }
 0x2df   :  { %v1755_v44 = vsel %vm617_vm6, %v1753_v54, %v1687_v42  ;;  %v2221_v54 = vld [vmem:[%s9200_s1 + $0xa8] sm:$0xff]  ;;  %vm2051_vm6 = vcmask 916480  }
 0x2e1   :  { %v1735_v22 = vpop.permute.xlu1 %1734 }
 0x2e2   :  { %v1745_v57 = vpop.permute.xlu0 %1744 }
 0x2e3   :  { %v1764_v58 = vsel %vm1578_vm13, %v1762_v24, %v1745_v57  ;;  %v2217_v24 = vld [vmem:[%s9200_s1 + $0x88] sm:$0xff]  ;;  %v2218_v57 = vld [vmem:[%s9200_s1 + $0x90] sm:$0xff] }
 0x2e4   :  { %5588 = vmatprep.mubr.msk.f32.mxu0 %vm1780_vm14, %v1764_v58  ;;  %v5671_v58 = vpack.c.bf16 %v2218_v57, %v2217_v24 }
 0x2e5   :  { %v1699_v43 = vpop.permute.xlu1 %1698 }
 0x2e6   :  { %v1757_v59 = vsel %vm1566_vm0, %v1755_v44, %v1699_v43  ;;  %v2220_v43 = vld [vmem:[%s9200_s1 + $0xa0] sm:$0xff]  ;;  %v2222_v44 = vld [vmem:[%s9200_s1 + $0xb0] sm:$0xff] }
 0x2e7   :  { %v5674_v46 = vpack.c.bf16 %v2220_v43, %v2219_v45 }
 0x2e9   :  { %v7526_v40 = vpop.f32.mrb[8].mxu1  ;;  %v1711_v63 = vpop.permute.xlu1 %1710 }
 0x2ea   :  { %v1759_v15 = vsel %vm1569_vm10, %v1757_v59, %v1711_v63  ;;  %v7529_v20 = vpop.f32.mrb[9].mxu1  ;;  %v5677_v59 = vpack.c.bf16 %v2222_v44, %v2221_v54 }
 0x2eb   :  { %v1761_v18 = vsel %vm1572_vm11, %v1759_v15, %v1723_v62  ;;  %v2216_v62 = vld [vmem:[%s9200_s1 + $0x80] sm:$0xff] }
 0x2ec   :  { %v1763_v47 = vsel %vm1575_vm12, %v1761_v18, %v1735_v22  ;;  %v5668_v31 = vpack.c.bf16 %v2216_v62, %v2215_v35 }
 0x2ed   :  { %v1747_v25 = vpop.permute.xlu1 %1746 }
 0x2ee   :  { %v1765_v28 = vsel %vm1578_vm13, %v1763_v47, %v1747_v25  ;;  %5669 = vmatpush1.bf16.msra.mxu0 %v5668_v31  ;;  %v6239_v25 = vmov 1983009808  }
 0x2ef   :  { %5589 = vmatmul.mubr.msk.f32.gmra.mrb[18].mxu0 %vm1780_vm14, %v1765_v28  ;;  %5670 = vmatprep.subr.bf16.mxu0 %v9203_v10  ;;  %v1934_v28 = vunpack.c.l.s4 %v6239_v25 }
 0x2f2   :  { %5672 = vmatpush1.bf16.msra.mxu0 %v5671_v58 }
 0x2f3   :  { %5673 = vmatprep.subr.bf16.mxu0 %v9203_v10 }
 0x2f6   :  { %5675 = vmatpush1.bf16.msra.mxu0 %v5674_v46 }
 0x2f7   :  { %5676 = vmatprep.subr.bf16.mxu0 %v9203_v10 }
 0x2fa   :  { %5678 = vmatpush1.bf16.msra.mxu0 %v5677_v59 }
 0x2fb   :  { %5679 = vmatprep.subr.bf16.mxu0 %v9203_v10 }
 0x2fe   :  { %5681 = vmatpush1.bf16.msra.mxu0 %v5680_v19 }
 0x2ff   :  { %5682 = vmatprep.subr.bf16.mxu0 %v9203_v10 }
 0x309   :  { %v7535_v26 = vpop.f32.mrb[10].mxu1 }
 0x30a   :  { %v7537_v49 = vpop.f32.mrb[11].mxu1 }
 0x329   :  { %v7539_v50 = vpop.f32.mrb[12].mxu1 }
 0x32a   :  { %v7541_v38 = vpop.f32.mrb[13].mxu1 }
 0x336   :  { %v7543_v17 = vpop.f32.mrb[14].mxu1 }
 0x337   :  { %v7545_v60 = vpop.f32.mrb[15].mxu1 }
 0x350   :  { %v5587_v6 = vpop.f32.mrb[16].mxu0 }
 0x351   :  { %v1865_v16 = vadd.f32 %v5587_v6, %v7550_v41  ;;  %v1859_v8 = vpop.f32.mrb[17].mxu0  ;;  %v1936_v6 = vlaneseq }
 0x352   :  { %v1860_v55 = vadd.f32 %v7550_v41, %v1859_v8 }
 0x353   :  { %v7554_v52 = vmax.f32 %v1865_v16, 0.0 }
 0x354   :  { %v7556_v36 = vmax.f32 %v1860_v55, 0.0 }
 0x355   :  { %v1885_v29 = vcombine.high %v7554_v52, %v7554_v52  ;;  %1910 = vst.msk [vmem:[#allocation2 + $0x68] sm:$0xf] %vm1907_vm15, %v7554_v52 }
 0x356   :  { %v1884_v11 = vcombine.high %v7556_v36, %v7556_v36  ;;  %1908 = vst.msk [vmem:[#allocation2 + $0x28] sm:$0xf] %vm1907_vm15, %v7556_v36 }
 0x357   :  { %1911 = vst.msk [vmem:[#allocation2 + $0x88] sm:$0xf] %vm1907_vm15, %v1885_v29 }
 0x358   :  { %1909 = vst.msk [vmem:[#allocation2 + $0x48] sm:$0xf] %vm1907_vm15, %v1884_v11  ;;  %v7659_v11 = vshrl.u32 %v1936_v6, 7 }
 0x35c   :  { %v7588_v27 = vld [vmem:[#allocation2 + $0x68] ss:$2 sm:$0x3]  ;;  %v7590_v23 = vld [vmem:[#allocation2 + $0x67] ss:$2 sm:$0x3] }
 0x35d   :  { %v7576_v12 = vld [vmem:[#allocation2 + $0x28] ss:$2 sm:$0x3]  ;;  %v7578_v37 = vld [vmem:[#allocation2 + $0x27] ss:$2 sm:$0x3] }
 0x35e   :  { %2718 = vst.msk [vmem:[#allocation2 + $0x2a] sm:$0x1] %vm1898_vm4, %v9205_v0  ;;  %2716 = vst.msk [vmem:[#allocation2 + $0x27] sm:$0x1] %vm1898_vm4, %v9205_v0  ;;  %v1982_v62 = vcombine.low %v7576_v12, %v7588_v27  ;;  %v1969_v24 = vcombine.low %v7578_v37, %v7590_v23 }
 0x35f   :  { %v7584_v56 = vld [vmem:[#allocation2 + $0x87] ss:$2 sm:$0x3]  ;;  %v7592_v61 = vld [vmem:[#allocation2 + $0x48] ss:$2 sm:$0x3] }
 0x360   :  { %3235 = vst.msk [vmem:[#allocation2 + $0x87] sm:$0x1] %vm1898_vm4, %v9205_v0  ;;  %v7594_v13 = vld [vmem:[#allocation2 + $0x69] ss:$2 sm:$0x3]  ;;  %v1943_v25 = vcombine.low %v7517_v32, %v7592_v61 }
 0x361   :  { %2715 = vst.msk [vmem:[#allocation2 + $0x67] sm:$0xf] %vm1907_vm15, %v9205_v0  ;;  %v7598_v14 = vld [vmem:[#allocation2 + $0x48] ss:$2 sm:$0x3] }
 0x362   :  { %2719 = vst.msk [vmem:[#allocation2 + $0x4a] sm:$0x1] %vm1898_vm4, %v9205_v0  ;;  %v7616_v42 = vld [vmem:[#allocation2 + $0x47] ss:$2 sm:$0x3] }
 0x363   :  { %v7618_v22 = vld [vmem:[#allocation2 + $0x47] ss:$2 sm:$0x3] }
 0x364   :  { %2717 = vst.msk [vmem:[#allocation2 + $0x47] sm:$0x1] %vm1898_vm4, %v9205_v0  ;;  %v1929_v31 = vld [vmem:[#allocation2 + $0x89] ss:$2 sm:$0x3] }
 0x365   :  { %v1928_v57 = vld [vmem:[#allocation2 + $0x49] ss:$2 sm:$0x3] }
 0x366   :  { %v1917_v58 = vld [vmem:[#allocation2 + $0x49] ss:$2 sm:$0x3] }
 0x3c2   :  { %v5590_v63 = vpop.f32.mrb[18].mxu0 }
 0x3c3   :  { %v1875_v15 = vadd.f32 %v5590_v63, %v7550_v41  ;;  %v1869_v18 = vpop.f32.mrb[19].mxu0  ;;  %v2034_v63 = vcombine.low %v1928_v57, %v1929_v31 }
 0x3c4   :  { %v1870_v47 = vadd.f32 %v7550_v41, %v1869_v18  ;;  %v1935_v41 = vunpack.c.0.s8 %v1934_v28  ;;  %v1956_v18 = vcombine.low %v7514_v5, %v1917_v58  ;;  %v1922_v28 = vld [vmem:[#allocation2 + $0x29] ss:$2 sm:$0x3]  ;;  %v2008_v5 = vcombine.low %v7616_v42, %v7584_v56 }
 0x3c5   :  { %v7647_v16 = vmax.f32 %v1875_v15, 0.0 }
 0x3c6   :  { %v7649_v8 = vmax.f32 %v1870_v47, 0.0  ;;  %v7670_v35 = vsub.s32 %v1935_v41, %v7659_v11 }
 0x3c7   :  { %v1891_v55 = vcombine.high %v7647_v16, %v7647_v16  ;;  %2066 = vst.msk [vmem:[#allocation2 + $0x2a8] sm:$0xf] %vm1907_vm15, %v7647_v16 }
 0x3c8   :  { %v1890_v29 = vcombine.high %v7649_v8, %v7649_v8  ;;  %2064 = vst.msk [vmem:[#allocation2 + $0x268] sm:$0xf] %vm1907_vm15, %v7649_v8  ;;  %v1989_v44 = vrot.slane %v1982_v62, %v7670_v35  ;;  %v1976_v23 = vrot.slane %v1969_v24, %v7670_v35 }
 0x3c9   :  { %2067 = vst.msk [vmem:[#allocation2 + $0x2c8] sm:$0xf] %vm1907_vm15, %v1891_v55 }
 0x3ca   :  { %2065 = vst.msk [vmem:[#allocation2 + $0x288] sm:$0xf] %vm1907_vm15, %v1890_v29 }
 0x3ce   :  { %v2077_v45 = vld [vmem:[#allocation2 + $0x2a8] ss:$2 sm:$0x3]  ;;  %v2075_v43 = vld [vmem:[#allocation2 + $0x2a7] ss:$2 sm:$0x3] }
 0x3cf   :  { %v2076_v46 = vld [vmem:[#allocation2 + $0x268] ss:$2 sm:$0x3]  ;;  %v2074_v54 = vld [vmem:[#allocation2 + $0x267] ss:$2 sm:$0x3] }
 0x3d0   :  { %v2138_v59 = vcombine.low %v2076_v46, %v2077_v45  ;;  %2866 = vst.msk [vmem:[#allocation2 + $0x26a] sm:$0x1] %vm1898_vm4, %v9205_v0  ;;  %v2125_v12 = vcombine.low %v2074_v54, %v2075_v43  ;;  %2864 = vst.msk [vmem:[#allocation2 + $0x267] sm:$0x1] %vm1898_vm4, %v9205_v0  ;;  %v2041_v45 = vrot.slane %v2034_v63, %v7670_v35  ;;  %v2225_v46 = vld [vmem:[%s9200_s1 + $0xc8] sm:$0xff]  ;;  %v2226_v54 = vld [vmem:[%s9200_s1 + $0xd0] sm:$0xff] }
 0x3d1   :  { %v2085_v37 = vld [vmem:[#allocation2 + $0x2c9] ss:$2 sm:$0x3]  ;;  %v2071_v34 = vld [vmem:[#allocation2 + $0x288] ss:$2 sm:$0x3] }
 0x3d2   :  { %v2081_v27 = vld [vmem:[#allocation2 + $0x2c7] ss:$2 sm:$0x3]  ;;  %v2145_v6 = vrot.slane %v2138_v59, %v7670_v35  ;;  %v2132_v55 = vrot.slane %v2125_v12, %v7670_v35  ;;  %v2099_v19 = vcombine.low %v7570_v9, %v2071_v34  ;;  %v1963_v9 = vrot.slane %v1956_v18, %v7670_v35 }
 0x3d3   :  { %v2084_v15 = vld [vmem:[#allocation2 + $0x289] ss:$2 sm:$0x3]  ;;  %3397 = vst.msk [vmem:[#allocation2 + $0x2c7] sm:$0x1] %vm1898_vm4, %v9205_v0  ;;  %v1950_v59 = vrot.slane %v1943_v25, %v7670_v35  ;;  %v1995_v12 = vcombine.low %v1922_v28, %v7594_v13 }
 0x3d4   :  { %v2073_v47 = vld [vmem:[#allocation2 + $0x289] ss:$2 sm:$0x3]  ;;  %v2190_v29 = vcombine.low %v2084_v15, %v2085_v37  ;;  %v5811_v31 = vpack.i.bf16 %v1989_v44, %v2145_v6  ;;  %v5806_v24 = vpack.i.bf16 %v1976_v23, %v2132_v55  ;;  %v2106_v43 = vrot.slane %v2099_v19, %v7670_v35  ;;  %v2228_v23 = vld [vmem:[%s9200_s1 + $0xe0] sm:$0xff] }
 0x3d5   :  { %v2112_v41 = vcombine.low %v7567_v48, %v2073_v47  ;;  %v2080_v21 = vld [vmem:[#allocation2 + $0x287] ss:$2 sm:$0x3]  ;;  %v2082_v48 = vld [vmem:[#allocation2 + $0x288] ss:$2 sm:$0x3]  ;;  %v5683_v37 = vpack.c.bf16 %v2226_v54, %v2225_v46  ;;  %v2002_v34 = vrot.slane %v1995_v12, %v7670_v35 }
 0x3d6   :  { %v2164_v62 = vcombine.low %v2080_v21, %v2081_v27  ;;  %v2078_v32 = vld [vmem:[#allocation2 + $0x269] ss:$2 sm:$0x3]  ;;  %v2197_v57 = vrot.slane %v2190_v29, %v7670_v35  ;;  %2867 = vst.msk [vmem:[#allocation2 + $0x28a] sm:$0x1] %vm1898_vm4, %v9205_v0  ;;  %5812 = vrot.lane.b32.xlu1 %v5811_v31, %s6236_s21  ;;  %5807 = vrot.lane.b32.xlu0 %v5806_v24, %s6233_s10  ;;  %v2227_v27 = vld [vmem:[%s9200_s1 + $0xd8] sm:$0xff] }
 0x3d7   :  { %v2079_v61 = vld [vmem:[#allocation2 + $0x2a9] ss:$2 sm:$0x3]  ;;  %v2119_v58 = vrot.slane %v2112_v41, %v7670_v35  ;;  %v5816_v47 = vpack.i.bf16 %v1950_v59, %v2106_v43  ;;  %v1927_v25 = vld [vmem:[#allocation2 + $0x88] ss:$2 sm:$0x3]  ;;  %5684 = vmatpush1.bf16.msra.mxu0 %v5683_v37  ;;  %v5686_v28 = vpack.c.bf16 %v2228_v23, %v2227_v27  ;;  %v2015_v41 = vrot.slane %v2008_v5, %v7670_v35 }
 0x3d8   :  { %2863 = vst.msk [vmem:[#allocation2 + $0x2a7] sm:$0xf] %vm1907_vm15, %v9205_v0  ;;  %v2151_v56 = vcombine.low %v2078_v32, %v2079_v61  ;;  %v2069_v42 = vld [vmem:[#allocation2 + $0x287] ss:$2 sm:$0x3]  ;;  %v2207_v44 = vrot.slane %v2197_v57, 4  ;;  %v2171_v15 = vrot.slane %v2164_v62, %v7670_v35  ;;  %5685 = vmatprep.subr.bf16.mxu0 %v9203_v10  ;;  %v2021_v62 = vcombine.low %v7598_v14, %v1927_v25 }
 0x3d9   :  { %2865 = vst.msk [vmem:[#allocation2 + $0x287] sm:$0x1] %vm1898_vm4, %v9205_v0  ;;  %v5826_v63 = vpack.i.bf16 %v1963_v9, %v2119_v58  ;;  %v2083_v6 = vld [vmem:[#allocation2 + $0x2c8] ss:$2 sm:$0x3]  ;;  %v2230_v29 = vld [vmem:[%s9200_s1 + $0xf0] sm:$0xff]  ;;  %v2088_v9 = vcombine.low %v7572_v7, %v2069_v42 }
 0x3da   :  { %v2212_v18 = vsel %vm2210_vm5, %v2041_v45, %v2207_v44  ;;  %v2158_v13 = vrot.slane %v2151_v56, %v7670_v35  ;;  %v2229_v55 = vld [vmem:[%s9200_s1 + $0xe8] sm:$0xff]  ;;  %5817 = vrot.lane.b32.xlu0 %v5816_v47, %s6232_s18  ;;  %v2509_v21 = vld [vmem:[%s9200_s1 + $0x100] sm:$0xff]  ;;  %v5831_v32 = vpack.i.bf16 %v2015_v41, %v2171_v15  ;;  %v2177_v31 = vcombine.low %v2082_v48, %v2083_v6 }
 0x3db   :  { %5425 = vmatprep.mubr.msk.f32.mxu0 %vm1561_vm7, %v2212_v18  ;;  %5827 = vrot.lane.b32.xlu1 %v5826_v63, %s6235_s20  ;;  %v2510_v19 = vld [vmem:[%s9200_s1 + $0x108] sm:$0xff]  ;;  %v5689_v24 = vpack.c.bf16 %v2230_v29, %v2229_v55  ;;  %v2028_v57 = vrot.slane %v2021_v62, %v7670_v35  ;;  %v1932_v45 = vcombine.low %v7519_v33, %v7618_v22 }
 0x3dc   :  { %v5821_v61 = vpack.i.bf16 %v2002_v34, %v2158_v13  ;;  %5687 = vmatpush1.bf16.msra.mxu0 %v5686_v28  ;;  %v5691_v5 = vpack.c.bf16 %v2510_v19, %v2509_v21  ;;  %v2184_v58 = vrot.slane %v2177_v31, %v7670_v35  ;;  %v2095_v54 = vrot.slane %v2088_v9, %v7670_v35 }
 0x3dd   :  { %5688 = vmatprep.subr.bf16.mxu0 %v9203_v10  ;;  %v1939_v56 = vrot.slane %v1932_v45, %v7670_v35 }
 0x3de   :  { %5822 = vrot.lane.b32.xlu0 %v5821_v61, %s6241_s16 }
 0x3df   :  { %5832 = vrot.lane.b32.xlu1 %v5831_v32, %s6240_s15 }
 0x3e0   :  { %5690 = vmatpush1.bf16.msra.mxu0 %v5689_v24 }
 0x3e1   :  { %5692 = vmatprep.subr.bf16.mxu0 %v5691_v5 }
 0x3e2   :  { %2185 = vrot.lane.b32.xlu0 %v2184_v58, %s6242_s17 }
 0x3e3   :  { %2029 = vrot.lane.b32.xlu1 %v2028_v57, %s6242_s17 }
 0x448   :  { %v5813_v14 = vpop.permute.xlu1 %5812  ;;  %v5808_v48 = vpop.permute.xlu0 %5807 }
 0x449   :  { %v5815_v27 = vunpack.i.h.bf16 %v5813_v14  ;;  %v5814_v23 = vunpack.i.l.bf16 %v5813_v14  ;;  %v5810_v33 = vunpack.i.h.bf16 %v5808_v48  ;;  %v5809_v22 = vunpack.i.l.bf16 %v5808_v48  ;;  %v2609_v14 = vld [vmem:[%s9200_s1 + $0x110] sm:$0xff]  ;;  %v2610_v48 = vld [vmem:[%s9200_s1 + $0x118] sm:$0xff] }
 0x44a   :  { %v5696_v9 = vpack.c.bf16 %v2610_v48, %v2609_v14 }
 0x44c   :  { %v5818_v46 = vpop.permute.xlu0 %5817 }
 0x44d   :  { %v5828_v43 = vpop.permute.xlu1 %5827  ;;  %v5820_v12 = vunpack.i.h.bf16 %v5818_v46  ;;  %v5819_v37 = vunpack.i.l.bf16 %v5818_v46 }
 0x44e   :  { %v5830_v44 = vunpack.i.h.bf16 %v5828_v43  ;;  %v5829_v59 = vunpack.i.l.bf16 %v5828_v43 }
 0x44f   :  { %v2043_v63 = vsel %vm1561_vm7, %v1939_v56, %v5820_v12  ;;  %v2198_v15 = vsel %vm1561_vm7, %v2095_v54, %v5819_v37  ;;  %v7804_v37 = vld [vmem:[#allocation2 + $0x7] sm:$0x3] }
 0x450   :  { %v2044_v7 = vsel %vm1566_vm0, %v2043_v63, %v5830_v44  ;;  %v2199_v42 = vsel %vm1566_vm0, %v2198_v15, %v5829_v59  ;;  %v5823_v47 = vpop.permute.xlu0 %5822  ;;  %9252 = vst [vmem:[#allocation3_spill] sm:$0xff] %v7804_v37  ;;  %v7812_v63 = vld [vmem:[#allocation2 + $0x247] sm:$0x3]  ;;  %v7814_v15 = vld [vmem:[#allocation2 + $0x249] sm:$0x3] }
 0x451   :  { %v5833_v18 = vpop.permute.xlu1 %5832  ;;  %v5825_v28 = vunpack.i.h.bf16 %v5823_v47  ;;  %v5824_v6 = vunpack.i.l.bf16 %v5823_v47  ;;  %v2045_v55 = vsel %vm1572_vm11, %v2044_v7, %v5810_v33  ;;  %v2200_v29 = vsel %vm1572_vm11, %v2199_v42, %v5809_v22  ;;  %9253 = vst [vmem:[#allocation4_spill] sm:$0xff] %v7812_v63  ;;  %v7816_v33 = vld [vmem:[#allocation2 + $0x248] sm:$0x3] }
 0x452   :  { %v5835_v13 = vunpack.i.h.bf16 %v5833_v18  ;;  %v5834_v25 = vunpack.i.l.bf16 %v5833_v18  ;;  %v2046_v41 = vsel %vm1578_vm13, %v2045_v55, %v5815_v27  ;;  %v2201_v34 = vsel %vm1578_vm13, %v2200_v29, %v5814_v23  ;;  %v7806_v27 = vld [vmem:[#allocation2 + $0x9] sm:$0x3]  ;;  %3392 = vst.msk [vmem:[#allocation2 + $0x247] sm:$0x3f] %vm1894_vm3, %v9205_v0  ;;  %v7820_v22 = vld [vmem:[#allocation2 + $0x67] sm:$0x3] }
 0x453   :  { %v2048_v21 = vsel %vm2047_vm1, %v2046_v41, %v5825_v28  ;;  %v2202_v62 = vsel %vm2047_vm1, %v2201_v34, %v5824_v6  ;;  %v7808_v23 = vld [vmem:[#allocation2 + $0x8] sm:$0x3]  ;;  %9254 = vst [vmem:[#allocation5_spill] sm:$0xff] %v7820_v22  ;;  %3234 = vst.msk [vmem:[#allocation2 + $0x67] sm:$0x1] %vm1898_vm4, %v9205_v0 }
 0x454   :  { %v2186_v19 = vpop.permute.xlu0 %2185  ;;  %v2050_v61 = vsel %vm2049_vm2, %v2048_v21, %v5835_v13  ;;  %v2203_v31 = vsel %vm2049_vm2, %v2202_v62, %v5834_v25  ;;  %3230 = vst.msk [vmem:[#allocation2 + $0x7] sm:$0x3f] %vm1894_vm3, %v9205_v0  ;;  %v7840_v28 = vld [vmem:[#allocation2 + $0x2a7] sm:$0x3]  ;;  %v6244_v29 = vmov 1966171168  }
 0x455   :  { %v2030_v32 = vpop.permute.xlu1 %2029  ;;  %v2204_v24 = vsel %vm2051_vm6, %v2203_v31, %v2186_v19  ;;  %9261 = vst [vmem:[#allocation12_spill] sm:$0xff] %v7840_v28  ;;  %3396 = vst.msk [vmem:[#allocation2 + $0x2a7] sm:$0x1] %vm1898_vm4, %v9205_v0  ;;  %v7844_v6 = vld [vmem:[#allocation2 + $0xa7] sm:$0xf]  ;;  %v3123_v41 = vunpack.c.l.s4 %v6244_v29 }
 0x456   :  { %v2206_v57 = vrot.slane %v2204_v24, 4  ;;  %v2052_v58 = vsel %vm2051_vm6, %v2050_v61, %v2030_v32  ;;  %9262 = vst [vmem:[#allocation13_spill] sm:$0xff] %v7844_v6  ;;  %4166 = vst.msk [vmem:[#allocation2 + $0xa7] sm:$0x1] %vm1898_vm4, %v9205_v0  ;;  %v7848_v55 = vld [vmem:[#allocation2 + $0x2e7] sm:$0xf] }
 0x457   :  { %9263 = vst [vmem:[#allocation14_spill] sm:$0xff] %v7848_v55  ;;  %4546 = vst.msk [vmem:[#allocation2 + $0x2e7] sm:$0x1] %vm1898_vm4, %v9205_v0  ;;  %v3124_v34 = vunpack.c.0.s8 %v3123_v41  ;;  %v5448_v21 = vld [vmem:[%s9201_s2 + $0x5] ss:$0 sm:$0xff] }
 0x458   :  { %v2211_v45 = vsel %vm2210_vm5, %v2052_v58, %v2206_v57  ;;  %v5426_v19 = vld [vmem:[%s9201_s2 + $0x3] ss:$0 sm:$0xff] }
 0x459   :  { %2304 = vmatmul.mubr.f32.vlgmr.msra.gmra.mrb[20].mxu0 %v2211_v45  ;;  %v7830_v47 = vld [vmem:[#allocation2 + $0x247] sm:$0xf]  ;;  %v7859_v61 = vsub.s32 %v3124_v34, %v7659_v11  ;;  %v7862_v24 = vadd.f32 %v7465_v51, %v5426_v19  ;;  %v7865_v57 = vadd.f32 %v5426_v19, %v7469_v30  ;;  %v7868_v58 = vadd.f32 %v7489_v53, %v5426_v19  ;;  %v5443_v51 = vld [vmem:[%s9201_s2 + $0x4] ss:$0 sm:$0xff] }
 0x45a   :  { %5694 = vmatpush3.bf16.msra.mxu0 %v5691_v5  ;;  %5621 = vmatprep.mubr.msk.f32.mxu0 %vm1561_vm7, %v7556_v36  ;;  %v2611_v5 = vld [vmem:[%s9200_s1 + $0x120] sm:$0xff]  ;;  %v2612_v36 = vld [vmem:[%s9200_s1 + $0x128] sm:$0xff]  ;;  %9258 = vst [vmem:[#allocation9_spill] sm:$0xff] %v7830_v47  ;;  %v7871_v14 = vadd.f32 %v5426_v19, %v7491_v39  ;;  %v7874_v48 = vadd.f32 %v7493_v4, %v5426_v19 }
 0x45b   :  { %5695 = vmatprep.subr.bf16.mxu0 %v9203_v10  ;;  %v5699_v43 = vpack.c.bf16 %v2612_v36, %v2611_v5  ;;  %v7824_v7 = vld [vmem:[#allocation2 + $0x7] sm:$0xf]  ;;  %v7877_v45 = vadd.f32 %v5426_v19, %v7495_v1  ;;  %v7884_v5 = vadd.f32 %v7497_v3, %v5426_v19  ;;  %v7887_v53 = vadd.f32 %v5426_v19, %v7499_v2 }
 0x45c   :  { %9255 = vst [vmem:[#allocation6_spill] sm:$0xff] %v7824_v7  ;;  %v7826_v42 = vld [vmem:[#allocation2 + $0x8] sm:$0xf]  ;;  %v7890_v39 = vadd.f32 %v7526_v40, %v5426_v19  ;;  %v7893_v4 = vadd.f32 %v5426_v19, %v7529_v20  ;;  %v7902_v3 = vadd.f32 %v7535_v26, %v5426_v19  ;;  %v7905_v2 = vadd.f32 %v5426_v19, %v7537_v49 }
 0x45d   :  { %5622 = vmatmul.mubr.msk.f32.vlgmr.msra.gmra.mrb[22].mxu0 %vm1561_vm7, %v7554_v52  ;;  %v5424_v52 = vld [vmem:[%s9201_s2 + $0x2] ss:$0 sm:$0xff]  ;;  %9256 = vst [vmem:[#allocation7_spill] sm:$0xff] %v7826_v42  ;;  %v7828_v18 = vld [vmem:[#allocation2 + $0x9] sm:$0xf]  ;;  %v7908_v40 = vadd.f32 %v7539_v50, %v5426_v19  ;;  %v7917_v26 = vadd.f32 %v7543_v17, %v5426_v19  ;;  %v7920_v49 = vadd.f32 %v5426_v19, %v7545_v60 }
 0x45e   :  { %5624 = vmatprep.mubr.msk.f32.mxu0 %vm1561_vm7, %v7649_v8  ;;  %5697 = vmatpush3.bf16.msra.mxu0 %v5696_v9  ;;  %9257 = vst [vmem:[#allocation8_spill] sm:$0xff] %v7828_v18  ;;  %v7832_v13 = vld [vmem:[#allocation2 + $0x248] sm:$0xf]  ;;  %4158 = vst.msk [vmem:[#allocation2 + $0x7] sm:$0xff] %vm1561_vm7, %v9205_v0 }
 0x45f   :  { %5698 = vmatprep.subr.bf16.mxu0 %v9203_v10  ;;  %9259 = vst [vmem:[#allocation10_spill] sm:$0xff] %v7832_v13  ;;  %v7834_v25 = vld [vmem:[#allocation2 + $0x249] sm:$0xf]  ;;  %9264 = vst [vmem:[#allocation15_spill] sm:$0xff] %v7917_v26 }
 0x460   :  { %9260 = vst [vmem:[#allocation11_spill] sm:$0xff] %v7834_v25  ;;  %4538 = vst.msk [vmem:[#allocation2 + $0x247] sm:$0xff] %vm1561_vm7, %v9205_v0  ;;  %v9276_v25 = vmov 0.0  }
 0x461   :  { %5625 = vmatmul.mubr.msk.f32.gmra.mrb[24].mxu0 %vm1561_vm7, %v7647_v16 }
 0x462   :  { %5700 = vmatpush3.bf16.msra.mxu0 %v5699_v43  ;;  %5635 = vmatprep.mubr.msk.f32.mxu0 %vm6243_vm9, %v9205_v0 }
 0x463   :  { %5728 = vmatprep.subr.bf16.mxu0 %v9203_v10 }
 0x52c   :  { %v2305_v16 = vpop.f32.mrb[20].mxu0 }
 0x52d   :  { %v2306_v8 = vadd.f32 %v5424_v52, %v2305_v16  ;;  %v2307_v56 = vpop.f32.mrb[21].mxu0  ;;  %v7898_v52 = vsub.s32 0, %v7659_v11  ;;  %v7911_v16 = vadd.f32 %v5426_v19, %v7541_v38 }
 0x52f   :  { %v2309_v46 = vmax.f32 %v2306_v8, 0.0 }
 0x530   :  { %v5623_v54 = vpop.f32.mrb[22].mxu0 }
 0x531   :  { %v7797_v44 = vpop.f32.mrb[23].mxu0  ;;  %5636 = vmatmul.mubr.msk.f32.vlgmr.msra.gmra.mrb[26].mxu0 %vm1566_vm0, %v2309_v46  ;;  %v2596_v20 = vadd.f32 %v5623_v54, %v5443_v51 }
 0x532   :  { %v2591_v50 = vadd.f32 %v5443_v51, %v7797_v44 }
 0x533   :  { %v3113_v34 = vcombine.high %v2596_v20, %v2596_v20 }
 0x534   :  { %v7800_v59 = vpop.f32.mrb[24].mxu0 }
 0x535   :  { %v7802_v12 = vpop.f32.mrb[25].mxu0  ;;  %v7929_v17 = vadd.f32 %v7800_v59, %v5443_v51 }
 0x536   :  { %v2601_v60 = vadd.f32 %v5443_v51, %v7802_v12 }
 0x604   :  { %v2687_v62 = vpop.f32.mrb[26].mxu0 }
 0x605   :  { %v2688_v32 = vadd.f32 %v5448_v21, %v2687_v62  ;;  %v5637_v31 = vpop.f32.mrb[27].mxu0 }
 0x606   :  { %v3112_v31 = vcombine.high %v2591_v50, %v2591_v50 }
 0x607   :  { %v2698_v9 = vrot.slane %v2688_v32, %v7670_v35  ;;  %v2702_v30 = vcombine.high %v2688_v32, %v2688_v32 }
 0x609   :  { %v2699_v1 = vcombine.high %v2698_v9, %v2698_v9  ;;  %v2709_v36 = vrot.slane %v2702_v30, %v7670_v35  ;;  %v3128_v43 = vrot.slane %v2698_v9, %v7859_v61  ;;  %2721 = vst.msk [vmem:[#allocation2 + $0x28] sm:$0x3] %vm2720_vm8, %v2698_v9 }
 0x60b   :  { %v2710_v8 = vcombine.high %v2709_v36, %v2709_v36  ;;  %2722 = vst.msk [vmem:[#allocation2 + $0x48] sm:$0x3] %vm2720_vm8, %v2699_v1  ;;  %v3129_v11 = vcombine.high %v3128_v43, %v3128_v43  ;;  %v3136_v56 = vrot.slane %v2699_v1, %v7859_v61  ;;  %2868 = vst.msk [vmem:[#allocation2 + $0x268] sm:$0x3] %vm2720_vm8, %v2709_v36 }
 0x60c   :  { %v3182_v46 = vrot.slane %v2709_v36, %v7859_v61  ;;  %v3141_v54 = vrot.slane %v3128_v43, %v7898_v52 }
 0x60d   :  { %v3137_v38 = vcombine.high %v3136_v56, %v3136_v56  ;;  %v3145_v29 = vrot.slane %v3129_v11, %v7898_v52  ;;  %v3190_v41 = vrot.slane %v2710_v8, %v7859_v61  ;;  %2869 = vst.msk [vmem:[#allocation2 + $0x288] sm:$0x3] %vm2720_vm8, %v2710_v8  ;;  %v3149_v44 = vrot.slane %v3136_v56, %v7898_v52 }
 0x60e   :  { %v3183_v21 = vcombine.high %v3182_v46, %v3182_v46  ;;  %v3195_v9 = vrot.slane %v3182_v46, %v7898_v52  ;;  %v3119_v46 = vcombine.high %v7929_v17, %v7929_v17 }
 0x60f   :  { %v3153_v19 = vrot.slane %v3137_v38, %v7898_v52  ;;  %v3154_v62 = vcombine.low %v3141_v54, %v3145_v29  ;;  %v3191_v32 = vcombine.high %v3190_v41, %v3190_v41  ;;  %v3203_v1 = vrot.slane %v3190_v41, %v7898_v52 }
 0x610   :  { %v3199_v30 = vrot.slane %v3183_v21, %v7898_v52  ;;  %v2728_v36 = vld [vmem:[#allocation2 + $0x29] sm:$0x3]  ;;  %v7940_v11 = vld [vmem:[#allocation2 + $0x27] sm:$0x3]  ;;  %v3118_v38 = vcombine.high %v2601_v60, %v2601_v60 }
 0x611   :  { %v2726_v43 = vld [vmem:[#allocation2 + $0x28] sm:$0x3]  ;;  %v3161_v59 = vrot.slane %v3154_v62, %v7670_v35  ;;  %v3162_v8 = vcombine.low %v3149_v44, %v3153_v19  ;;  %v3207_v12 = vrot.slane %v3191_v32, %v7898_v52  ;;  %v2767_v51 = vcombine.low %v7806_v27, %v2728_v36  ;;  %9265 = vst [vmem:[#allocation16_spill] sm:$0xff] %v7940_v11 }
 0x612   :  { %v7942_v56 = vld [vmem:[#allocation2 + $0x27] sm:$0x3]  ;;  %v3208_v54 = vcombine.low %v3195_v9, %v3199_v30  ;;  %v2875_v29 = vld [vmem:[#allocation2 + $0x269] sm:$0x3]  ;;  %v2754_v41 = vcombine.low %v7808_v23, %v2726_v43 }
 0x613   :  { %9266 = vst [vmem:[#allocation17_spill] sm:$0xff] %v7942_v56  ;;  %3232 = vst.msk [vmem:[#allocation2 + $0x27] sm:$0x1] %vm1898_vm4, %v9205_v0  ;;  %v3169_v21 = vrot.slane %v3162_v8, %v7670_v35  ;;  %v3172_v44 = vadd.f32 %v3161_v59, %v2591_v50  ;;  %v3173_v19 = vadd.f32 %v3161_v59, %v3112_v31  ;;  %v7950_v62 = vld [vmem:[#allocation2 + $0x28] sm:$0x3] }
 0x614   :  { %v3216_v27 = vcombine.low %v3203_v1, %v3207_v12  ;;  %v7952_v32 = vld [vmem:[#allocation2 + $0x29] sm:$0x3]  ;;  %v3215_v9 = vrot.slane %v3208_v54, %v7670_v35  ;;  %v7960_v23 = vrot.slane %v2767_v51, %v7670_v35  ;;  %v2914_v30 = vcombine.low %v7814_v15, %v2875_v29  ;;  %v7984_v47 = vld [vmem:[#allocation2 + $0x47] sm:$0x3] }
 0x615   :  { %9267 = vst [vmem:[#allocation18_spill] sm:$0xff] %v7952_v32  ;;  %v7954_v36 = vld [vmem:[#allocation2 + $0x49] sm:$0x3]  ;;  %v7964_v43 = vrot.slane %v2754_v41, %v7670_v35  ;;  %v3174_v8 = vadd.f32 %v3169_v21, %v2596_v20  ;;  %v3175_v12 = vadd.f32 %v3169_v21, %v3113_v34  ;;  %v3680_v51 = vrot.slane %v3172_v44, %v7859_v61  ;;  %v7986_v7 = vld [vmem:[#allocation2 + $0x267] sm:$0x3] }
 0x616   :  { %9268 = vst [vmem:[#allocation19_spill] sm:$0xff] %v7954_v36  ;;  %v7956_v10 = vld [vmem:[#allocation2 + $0x48] sm:$0x3]  ;;  %v3223_v54 = vrot.slane %v3216_v27, %v7670_v35  ;;  %9272 = vst [vmem:[#allocation23_spill] sm:$0xff] %v7984_v47  ;;  %v3226_v20 = vadd.f32 %v3215_v9, %v2601_v60  ;;  %v7991_v34 = vadd.f32 %v3215_v9, %v3118_v38 }
 0x617   :  { %9269 = vst [vmem:[#allocation20_spill] sm:$0xff] %v7956_v10  ;;  %9270 = vst [vmem:[#allocation21_spill] sm:$0xff] %v7964_v43  ;;  %v7966_v50 = vld [vmem:[#allocation2 + $0x68] sm:$0x3]  ;;  %v3704_v21 = vrot.slane %v3173_v19, %v7859_v61  ;;  %v7995_v27 = vrot.slane %v2914_v30, %v7670_v35  ;;  %v3681_v38 = vcombine.high %v3680_v51, %v3680_v51 }
 0x618   :  { %9271 = vst [vmem:[#allocation22_spill] sm:$0xff] %v7966_v50  ;;  %v7968_v31 = vld [vmem:[#allocation2 + $0x49] sm:$0x3]  ;;  %9273 = vst [vmem:[#allocation24_spill] sm:$0xff] %v7986_v7  ;;  %v7988_v55 = vld [vmem:[#allocation2 + $0x267] sm:$0x3]  ;;  %v8006_v11 = vadd.f32 %v3223_v54, %v7929_v17  ;;  %v8008_v60 = vadd.f32 %v3223_v54, %v3119_v46  ;;  %v3752_v63 = vrot.slane %v3175_v12, %v7859_v61 }
 0x619   :  { %v7970_v1 = vld [vmem:[#allocation2 + $0x69] sm:$0x3]  ;;  %9274 = vst [vmem:[#allocation25_spill] sm:$0xff] %v7988_v55  ;;  %3240 = vst.msk [vmem:[#allocation2 + $0x28] sm:$0xf] %vm1907_vm15, %v3172_v44  ;;  %v3688_v44 = vrot.slane %v3680_v51, %v7859_v61  ;;  %v3705_v46 = vcombine.high %v3704_v21, %v3704_v21  ;;  %v3712_v54 = vrot.slane %v3704_v21, %v7859_v61 }
 0x61a   :  { %v7972_v59 = vld [vmem:[#allocation2 + $0x48] sm:$0x3]  ;;  %3394 = vst.msk [vmem:[#allocation2 + $0x267] sm:$0x1] %vm1898_vm4, %v9276_v25  ;;  %v3728_v51 = vrot.slane %v3174_v8, %v7859_v61  ;;  %v3695_v18 = vrot.slane %v3681_v38, %v7859_v61  ;;  %v3753_v38 = vcombine.high %v3752_v63, %v3752_v63 }
 0x61b   :  { %v7976_v0 = vld [vmem:[#allocation2 + $0x268] sm:$0x3]  ;;  %3243 = vst.msk [vmem:[#allocation2 + $0x88] sm:$0xf] %vm1907_vm15, %v3175_v12  ;;  %3242 = vst.msk [vmem:[#allocation2 + $0x68] sm:$0xf] %vm1907_vm15, %v3174_v8  ;;  %v3696_v42 = vcombine.high %v3688_v44, %v3688_v44  ;;  %v3773_v21 = vrot.slane %v3688_v44, %v7898_v52  ;;  %v8037_v8 = vrot.slane %v3226_v20, %v7859_v61 }
 0x61c   :  { %v7978_v15 = vld [vmem:[#allocation2 + $0x289] sm:$0x3]  ;;  %v7997_v6 = vld [vmem:[#allocation2 + $0x287] sm:$0x3]  ;;  %3405 = vst.msk [vmem:[#allocation2 + $0x2c8] sm:$0xf] %vm1907_vm15, %v8008_v60  ;;  %v3719_v12 = vrot.slane %v3705_v46, %v7859_v61  ;;  %v3720_v10 = vcombine.high %v3712_v54, %v3712_v54  ;;  %v3729_v50 = vcombine.high %v3728_v51, %v3728_v51  ;;  %v3777_v44 = vrot.slane %v3695_v18, %v7898_v52 }
 0x61d   :  { %v7980_v29 = vld [vmem:[#allocation2 + $0x268] sm:$0x3]  ;;  %9275 = vst [vmem:[#allocation26_spill] sm:$0xff] %v7997_v6  ;;  %v3781_v36 = vrot.slane %v3696_v42, %v7898_v52 }
 0x61e   :  { %v7982_v41 = vld [vmem:[#allocation2 + $0x288] sm:$0x3]  ;;  %v3797_v55 = vrot.slane %v3720_v10, %v7898_v52  ;;  %v3834_v47 = vcombine.low %v3773_v21, %v3777_v44 }
 0x61f   :  { %v8001_v13 = vld [vmem:[#allocation2 + $0x47] sm:$0x3]  ;;  %v8003_v37 = vld [vmem:[#allocation2 + $0x289] sm:$0x3] }
 0x620   :  { %9277 = vst [vmem:[#allocation27_spill] sm:$0xff] %v8001_v13  ;;  %9278 = vst [vmem:[#allocation28_spill] sm:$0xff] %v8003_v37  ;;  %v8012_v9 = vld [vmem:[#allocation2 + $0x287] sm:$0x3]  ;;  %v8020_v17 = vld [vmem:[#allocation2 + $0x269] sm:$0x3]  ;;  %v3743_v37 = vrot.slane %v3729_v50, %v7859_v61  ;;  %v3789_v13 = vrot.slane %v3712_v54, %v7898_v52 }
 0x621   :  { %9279 = vst [vmem:[#allocation29_spill] sm:$0xff] %v8012_v9  ;;  %v8014_v30 = vld [vmem:[#allocation2 + $0x288] sm:$0x3]  ;;  %3233 = vst.msk [vmem:[#allocation2 + $0x47] sm:$0x1] %vm1898_vm4, %v9276_v25  ;;  %v3767_v9 = vrot.slane %v3753_v38, %v7859_v61 }
 0x622   :  { %9280 = vst [vmem:[#allocation30_spill] sm:$0xff] %v8014_v30  ;;  %3241 = vst.msk [vmem:[#allocation2 + $0x48] sm:$0xf] %vm1907_vm15, %v3173_v19  ;;  %v8025_v7 = vld [vmem:[#allocation2 + $0x2a9] sm:$0x3]  ;;  %v3736_v30 = vrot.slane %v3728_v51, %v7859_v61 }
 0x623   :  { %9281 = vst [vmem:[#allocation31_spill] sm:$0xff] %v8020_v17  ;;  %3395 = vst.msk [vmem:[#allocation2 + $0x287] sm:$0x1] %vm1898_vm4, %v9276_v25  ;;  %v8032_v19 = vld [vmem:[#allocation2 + $0x2a8] sm:$0x3]  ;;  %v3760_v17 = vrot.slane %v3752_v63, %v7859_v61  ;;  %v3745_v63 = vcombine.high %v3743_v37, %v3743_v37  ;;  %v3769_v42 = vcombine.high %v3767_v9, %v3767_v9 }
 0x624   :  { %3403 = vst.msk [vmem:[#allocation2 + $0x288] sm:$0xf] %vm1907_vm15, %v7991_v34  ;;  %3402 = vst.msk [vmem:[#allocation2 + $0x268] sm:$0xf] %vm1907_vm15, %v3226_v20  ;;  %v3721_v20 = vcombine.high %v3719_v12, %v3719_v12  ;;  %v3744_v32 = vcombine.high %v3736_v30, %v3736_v30  ;;  %v8052_v51 = vld [vmem:[#allocation2 + $0x27] sm:$0xf]  ;;  %v3805_v38 = vrot.slane %v3736_v30, %v7898_v52 }
 0x625   :  { %9282 = vst [vmem:[#allocation32_spill] sm:$0xff] %v8032_v19  ;;  %3404 = vst.msk [vmem:[#allocation2 + $0x2a8] sm:$0xf] %vm1907_vm15, %v8006_v11  ;;  %v3697_v19 = vcombine.high %v3695_v18, %v3695_v18  ;;  %v3768_v28 = vcombine.high %v3760_v17, %v3760_v17  ;;  %v8054_v22 = vld [vmem:[#allocation2 + $0x27] sm:$0xf]  ;;  %v3793_v18 = vrot.slane %v3719_v12, %v7898_v52 }
 0x626   :  { %9283 = vst [vmem:[#allocation33_spill] sm:$0xff] %v8052_v51  ;;  %9284 = vst [vmem:[#allocation34_spill] sm:$0xff] %v8054_v22  ;;  %v3801_v50 = vrot.slane %v3721_v20, %v7898_v52  ;;  %v3813_v54 = vrot.slane %v3744_v32, %v7898_v52  ;;  %v3817_v51 = vrot.slane %v3745_v63, %v7898_v52  ;;  %v8068_v6 = vld [vmem:[#allocation2 + $0x67] sm:$0xf] }
 0x627   :  { %v3785_v46 = vrot.slane %v3697_v19, %v7898_v52  ;;  %4162 = vst.msk [vmem:[#allocation2 + $0x27] sm:$0x1] %vm1898_vm4, %v9276_v25  ;;  %v3809_v19 = vrot.slane %v3743_v37, %v7898_v52  ;;  %v3821_v22 = vrot.slane %v3760_v17, %v7898_v52  ;;  %v3825_v12 = vrot.slane %v3767_v9, %v7898_v52  ;;  %v8070_v20 = vld [vmem:[#allocation2 + $0x67] sm:$0xf] }
 0x628   :  { %v3829_v10 = vrot.slane %v3768_v28, %v7898_v52  ;;  %9285 = vst [vmem:[#allocation35_spill] sm:$0xff] %v8068_v6  ;;  %9286 = vst [vmem:[#allocation36_spill] sm:$0xff] %v8070_v20  ;;  %v8072_v56 = vld [vmem:[#allocation2 + $0x67] sm:$0xf]  ;;  %v3833_v30 = vrot.slane %v3769_v42, %v7898_v52  ;;  %v3851_v43 = vcombine.low %v3789_v13, %v3793_v18 }
 0x629   :  { %9287 = vst [vmem:[#allocation37_spill] sm:$0xff] %v8072_v56  ;;  %v3835_v37 = vcombine.low %v3781_v36, %v3785_v46  ;;  %4164 = vst.msk [vmem:[#allocation2 + $0x67] sm:$0x1] %vm1898_vm4, %v9276_v25  ;;  %v3852_v28 = vcombine.low %v3797_v55, %v3801_v50  ;;  %v3868_v9 = vcombine.low %v3805_v38, %v3809_v19  ;;  %v8083_v26 = vld [vmem:[#allocation2 + $0x47] sm:$0xf] }
 0x62a   :  { %v3869_v6 = vcombine.low %v3813_v54, %v3817_v51  ;;  %v3885_v20 = vcombine.low %v3821_v22, %v3825_v12  ;;  %9291 = vst [vmem:[#allocation41_spill] sm:$0xff] %v8083_v26  ;;  %v8085_v56 = vld [vmem:[#allocation2 + $0x47] sm:$0xf]  ;;  %v3842_v13 = vrot.slane %v3834_v47, %v7670_v35  ;;  %v3859_v44 = vrot.slane %v3851_v43, %v7670_v35 }
 0x62b   :  { %v8075_v32 = vld [vmem:[#allocation2 + $0x287] sm:$0xf]  ;;  %v3849_v36 = vrot.slane %v3835_v37, %v7670_v35  ;;  %v3886_v46 = vcombine.low %v3829_v10, %v3833_v30  ;;  %v3866_v22 = vrot.slane %v3852_v28, %v7670_v35  ;;  %v3876_v55 = vrot.slane %v3868_v9, %v7670_v35 }
 0x62c   :  { %9288 = vst [vmem:[#allocation38_spill] sm:$0xff] %v8075_v32  ;;  %v8077_v63 = vld [vmem:[#allocation2 + $0x287] sm:$0xf]  ;;  %v3883_v51 = vrot.slane %v3869_v6, %v7670_v35  ;;  %v3893_v18 = vrot.slane %v3885_v20, %v7670_v35  ;;  %v3925_v43 = vcombine.high %v8037_v8, %v8037_v8  ;;  %v8109_v19 = vrot.slane %v8037_v8, %v7859_v61 }
 0x62d   :  { %9289 = vst [vmem:[#allocation39_spill] sm:$0xff] %v8077_v63  ;;  %v8079_v17 = vld [vmem:[#allocation2 + $0x287] sm:$0xf]  ;;  %v3850_v47 = vcombine.low %v3842_v13, %v3849_v36  ;;  %v3900_v38 = vrot.slane %v3886_v46, %v7670_v35  ;;  %v3867_v6 = vcombine.low %v3859_v44, %v3866_v22  ;;  %v3948_v12 = vrot.slane %v7991_v34, %v7859_v61 }
 0x62e   :  { %9290 = vst [vmem:[#allocation40_spill] sm:$0xff] %v8079_v17  ;;  %v8087_v21 = vld [vmem:[#allocation2 + $0x47] sm:$0xf]  ;;  %4543 = vst.msk [vmem:[#allocation2 + $0x287] sm:$0x1] %vm1898_vm4, %v9276_v25  ;;  %v3884_v54 = vcombine.low %v3876_v55, %v3883_v51  ;;  %v3972_v10 = vrot.slane %v8006_v11, %v7859_v61  ;;  %v8134_v11 = vrot.slane %v3925_v43, %v7859_v61 }
 0x62f   :  { %4163 = vst.msk [vmem:[#allocation2 + $0x47] sm:$0x1] %vm1898_vm4, %v9276_v25  ;;  %v8100_v50 = vld [vmem:[#allocation2 + $0x267] sm:$0xf]  ;;  %v3901_v36 = vcombine.low %v3893_v18, %v3900_v38  ;;  %v3906_v34 = vadd.f32 %v3850_v47, %v7865_v57  ;;  %v3907_v44 = vadd.f32 %v3850_v47, %v7862_v24  ;;  %v3908_v24 = vadd.f32 %v3867_v6, %v7871_v14 }
 0x630   :  { %9292 = vst [vmem:[#allocation42_spill] sm:$0xff] %v8100_v50  ;;  %v8102_v42 = vld [vmem:[#allocation2 + $0x267] sm:$0xf]  ;;  %v3909_v47 = vadd.f32 %v3867_v6, %v7868_v58  ;;  %v3910_v38 = vadd.f32 %v3884_v54, %v7877_v45  ;;  %v3911_v43 = vadd.f32 %v3884_v54, %v7874_v48  ;;  %v3941_v58 = vcombine.high %v8134_v11, %v8134_v11 }
 0x631   :  { %9293 = vst [vmem:[#allocation43_spill] sm:$0xff] %v8102_v42  ;;  %4542 = vst.msk [vmem:[#allocation2 + $0x267] sm:$0x1] %vm1898_vm4, %v9276_v25  ;;  %v8117_v20 = vld [vmem:[#allocation2 + $0x49] sm:$0xf]  ;;  %v3912_v26 = vadd.f32 %v3901_v36, %v7887_v53  ;;  %v3913_v17 = vadd.f32 %v3901_v36, %v7884_v5  ;;  %v3940_v42 = vcombine.high %v8109_v19, %v8109_v19 }
 0x632   :  { %v8119_v30 = vld [vmem:[#allocation2 + $0x28] sm:$0xf]  ;;  %v3949_v6 = vcombine.high %v3948_v12, %v3948_v12  ;;  %v3956_v53 = vrot.slane %v3948_v12, %v7859_v61  ;;  %v3973_v5 = vcombine.high %v3972_v10, %v3972_v10  ;;  %v3980_v54 = vrot.slane %v3972_v10, %v7859_v61  ;;  %4183 = vst.msk [vmem:[#allocation2 + $0xc8] sm:$0xff] %vm1561_vm7, %v3911_v43 }
 0x633   :  { %9294 = vst [vmem:[#allocation44_spill] sm:$0xff] %v8119_v30  ;;  %v8121_v37 = vld [vmem:[#allocation2 + $0x29] sm:$0xf]  ;;  %v3996_v63 = vrot.slane %v8008_v60, %v7859_v61  ;;  %v4017_v12 = vrot.slane %v8109_v19, %v7898_v52  ;;  %v4021_v10 = vrot.slane %v8134_v11, %v7898_v52  ;;  %v4025_v43 = vrot.slane %v3940_v42, %v7898_v52 }
 0x634   :  { %9295 = vst [vmem:[#allocation45_spill] sm:$0xff] %v8121_v37  ;;  %v8123_v28 = vld [vmem:[#allocation2 + $0x28] sm:$0xf]  ;;  %4184 = vst.msk [vmem:[#allocation2 + $0xe8] sm:$0xff] %vm1561_vm7, %v3912_v26  ;;  %v3964_v60 = vcombine.high %v3956_v53, %v3956_v53  ;;  %v3988_v19 = vcombine.high %v3980_v54, %v3980_v54  ;;  %v4029_v42 = vrot.slane %v3941_v58, %v7898_v52 }
 0x635   :  { %v8125_v8 = vld [vmem:[#allocation2 + $0x29] sm:$0xf]  ;;  %4185 = vst.msk [vmem:[#allocation2 + $0x108] sm:$0xff] %vm1561_vm7, %v3913_v17  ;;  %v4004_v11 = vrot.slane %v3996_v63, %v7859_v61  ;;  %v4033_v26 = vrot.slane %v3956_v53, %v7898_v52  ;;  %v4049_v53 = vrot.slane %v3980_v54, %v7898_v52 }
 0x636   :  { %v8127_v9 = vld [vmem:[#allocation2 + $0xa8] sm:$0xf]  ;;  %4178 = vst.msk [vmem:[#allocation2 + $0x28] sm:$0xff] %vm1561_vm7, %v3906_v34 }
 0x637   :  { %9296 = vst [vmem:[#allocation46_spill] sm:$0xff] %v8127_v9  ;;  %v8129_v13 = vld [vmem:[#allocation2 + $0xa9] sm:$0xf]  ;;  %v4012_v58 = vcombine.high %v4004_v11, %v4004_v11 }
 0x638   :  { %9297 = vst [vmem:[#allocation47_spill] sm:$0xff] %v8129_v13  ;;  %v8136_v46 = vld [vmem:[#allocation2 + $0x68] sm:$0xf]  ;;  %4182 = vst.msk [vmem:[#allocation2 + $0xa8] sm:$0xff] %vm1561_vm7, %v3910_v38  ;;  %v3987_v38 = vrot.slane %v3973_v5, %v7859_v61  ;;  %v4041_v5 = vrot.slane %v3964_v60, %v7898_v52 }
 0x639   :  { %v8138_v22 = vld [vmem:[#allocation2 + $0x69] sm:$0xf] }
 0x63a   :  { %v8140_v55 = vld [vmem:[#allocation2 + $0x68] sm:$0xf]  ;;  %v3989_v9 = vcombine.high %v3987_v38, %v3987_v38 }
 0x63b   :  { %9298 = vst [vmem:[#allocation48_spill] sm:$0xff] %v8140_v55  ;;  %v8142_v51 = vld [vmem:[#allocation2 + $0x69] sm:$0xf] }
 0x63c   :  { %9299 = vst [vmem:[#allocation49_spill] sm:$0xff] %v8142_v51  ;;  %v8144_v50 = vld [vmem:[#allocation2 + $0x68] sm:$0xf]  ;;  %v4061_v60 = vrot.slane %v3989_v9, %v7898_v52 }
 0x63d   :  { %9300 = vst [vmem:[#allocation50_spill] sm:$0xff] %v8144_v50  ;;  %v8146_v37 = vld [vmem:[#allocation2 + $0x69] sm:$0xf] }
 0x63e   :  { %v8148_v18 = vld [vmem:[#allocation2 + $0x48] sm:$0xf]  ;;  %4180 = vst.msk [vmem:[#allocation2 + $0x68] sm:$0xff] %vm1561_vm7, %v3908_v24  ;;  %v3963_v24 = vrot.slane %v3949_v6, %v7859_v61 }
 0x63f   :  { %v8150_v57 = vld [vmem:[#allocation2 + $0x49] sm:$0xf] }
 0x640   :  { %v8156_v30 = vld [vmem:[#allocation2 + $0x48] sm:$0xf]  ;;  %v4037_v6 = vrot.slane %v3963_v24, %v7898_v52 }
 0x641   :  { %v8158_v32 = vld [vmem:[#allocation2 + $0x49] sm:$0xf] }
 0x642   :  { %v8160_v13 = vld [vmem:[#allocation2 + $0x48] sm:$0xf]  ;;  %v4095_v55 = vcombine.low %v4033_v26, %v4037_v6 }
 0x643   :  { %9301 = vst [vmem:[#allocation51_spill] sm:$0xff] %v8160_v13  ;;  %4179 = vst.msk [vmem:[#allocation2 + $0x48] sm:$0xff] %vm1561_vm7, %v3907_v44  ;;  %v8170_v14 = vld [vmem:[#allocation2 + $0x87] sm:$0xf] }
 0x644   :  { %v8172_v48 = vld [vmem:[#allocation2 + $0x88] sm:$0xf] }
 0x645   :  { %9302 = vst [vmem:[#allocation52_spill] sm:$0xff] %v8172_v48  ;;  %v8174_v45 = vld [vmem:[#allocation2 + $0x89] sm:$0xf] }
 0x646   :  { %9303 = vst [vmem:[#allocation53_spill] sm:$0xff] %v8174_v45  ;;  %v8180_v36 = vld [vmem:[#allocation2 + $0x87] sm:$0xf]  ;;  %v4065_v45 = vrot.slane %v4004_v11, %v7898_v52 }
 0x647   :  { %9304 = vst [vmem:[#allocation54_spill] sm:$0xff] %v8180_v36  ;;  %v8182_v34 = vld [vmem:[#allocation2 + $0x88] sm:$0xf]  ;;  %4165 = vst.msk [vmem:[#allocation2 + $0x87] sm:$0x1] %vm1898_vm4, %v9276_v25  ;;  %v3997_v36 = vcombine.high %v3996_v63, %v3996_v63 }
 0x648   :  { %9305 = vst [vmem:[#allocation55_spill] sm:$0xff] %v8182_v34  ;;  %v8184_v44 = vld [vmem:[#allocation2 + $0x89] sm:$0xf] }
 0x649   :  { %9306 = vst [vmem:[#allocation56_spill] sm:$0xff] %v8184_v44  ;;  %4181 = vst.msk [vmem:[#allocation2 + $0x88] sm:$0xff] %vm1561_vm7, %v3909_v47  ;;  %v8204_v44 = vld [vmem:[#allocation2 + $0x2a7] sm:$0xf]  ;;  %v3965_v47 = vcombine.high %v3963_v24, %v3963_v24  ;;  %v4011_v63 = vrot.slane %v3997_v36, %v7859_v61  ;;  %v4057_v24 = vrot.slane %v3988_v19, %v7898_v52 }
 0x64a   :  { %9307 = vst [vmem:[#allocation57_spill] sm:$0xff] %v8204_v44  ;;  %v8206_v17 = vld [vmem:[#allocation2 + $0x2a7] sm:$0xf]  ;;  %v4053_v44 = vrot.slane %v3987_v38, %v7898_v52  ;;  %v4073_v36 = vrot.slane %v4012_v58, %v7898_v52  ;;  %v4078_v38 = vcombine.low %v4017_v12, %v4021_v10 }
 0x64b   :  { %9308 = vst [vmem:[#allocation58_spill] sm:$0xff] %v8206_v17  ;;  %v8208_v34 = vld [vmem:[#allocation2 + $0x2a7] sm:$0xf]  ;;  %v4013_v61 = vcombine.high %v4011_v63, %v4011_v63  ;;  %v4069_v54 = vrot.slane %v4011_v63, %v7898_v52  ;;  %v4113_v9 = vcombine.low %v4057_v24, %v4061_v60 }
 0x64c   :  { %9309 = vst [vmem:[#allocation59_spill] sm:$0xff] %v8208_v34  ;;  %4544 = vst.msk [vmem:[#allocation2 + $0x2a7] sm:$0x1] %vm1898_vm4, %v9276_v25  ;;  %v8217_v51 = vld [vmem:[#allocation2 + $0x2c7] sm:$0xf]  ;;  %v4045_v34 = vrot.slane %v3965_v47, %v7898_v52  ;;  %v4112_v48 = vcombine.low %v4049_v53, %v4053_v44  ;;  %v4086_v19 = vrot.slane %v4078_v38, %v7670_v35 }
 0x64d   :  { %9310 = vst [vmem:[#allocation60_spill] sm:$0xff] %v8217_v51  ;;  %v8219_v17 = vld [vmem:[#allocation2 + $0x2c7] sm:$0xf]  ;;  %v4079_v51 = vcombine.low %v4025_v43, %v4029_v42  ;;  %v4077_v47 = vrot.slane %v4013_v61, %v7898_v52  ;;  %v4129_v13 = vcombine.low %v4065_v45, %v4069_v54  ;;  %v4127_v12 = vrot.slane %v4113_v9, %v7670_v35 }
 0x64e   :  { %9311 = vst [vmem:[#allocation61_spill] sm:$0xff] %v8219_v17  ;;  %4545 = vst.msk [vmem:[#allocation2 + $0x2c7] sm:$0x1] %vm1898_vm4, %v9276_v25  ;;  %v4096_v17 = vcombine.low %v4041_v5, %v4045_v34  ;;  %v4103_v25 = vrot.slane %v4095_v55, %v7670_v35  ;;  %v4120_v63 = vrot.slane %v4112_v48, %v7670_v35  ;;  %v8263_v26 = vld [vmem:[#allocation2 + $0x2a9] sm:$0xf]  ;;  %vm5242_vm4 = vcmask 326912  }
 0x64f   :  { %v4093_v11 = vrot.slane %v4079_v51, %v7670_v35  ;;  %v4130_v10 = vcombine.low %v4073_v36, %v4077_v47  ;;  %v4137_v34 = vrot.slane %v4129_v13, %v7670_v35  ;;  %v5841_v52 = vpack.i.bf16 %v7960_v23, %v7995_v27  ;;  %v8249_v23 = vld [vmem:[#allocation2 + $0x268] sm:$0xf] }
 0x650   :  { %v4110_v50 = vrot.slane %v4096_v17, %v7670_v35  ;;  %v2901_v45 = vcombine.low %v7816_v33, %v7976_v0  ;;  %v2845_v55 = vcombine.low %v7968_v31, %v7970_v1  ;;  %v4128_v51 = vcombine.low %v4120_v63, %v4127_v12  ;;  %v8251_v27 = vld [vmem:[#allocation2 + $0x269] sm:$0xf]  ;;  %v9321_v12 = vld [vmem:[#allocation15_spill] sm:$0xff] }
 0x651   :  { %v4094_v44 = vcombine.low %v4086_v19, %v4093_v11  ;;  %v4144_v42 = vrot.slane %v4130_v10, %v7670_v35  ;;  %5842 = vrot.lane.b32.xlu1 %v5841_v52, %s6235_s20  ;;  %v2992_v48 = vcombine.low %v7978_v15, %v8025_v7  ;;  %v2793_v13 = vcombine.low %v7950_v62, %v7972_v59  ;;  %v8255_v0 = vld [vmem:[#allocation2 + $0x269] sm:$0xf] }
 0x652   :  { %v4111_v43 = vcombine.low %v4103_v25, %v4110_v50  ;;  %v8253_v50 = vld [vmem:[#allocation2 + $0x268] sm:$0xf]  ;;  %v4154_v38 = vadd.f32 %v4128_v51, %v7911_v16  ;;  %v4155_v47 = vadd.f32 %v4128_v51, %v7908_v40  ;;  %v2908_v19 = vrot.slane %v2901_v45, %v7670_v35  ;;  %v9326_v51 = vld [vmem:[#allocation25_spill] sm:$0xff] }
 0x653   :  { %9312 = vst [vmem:[#allocation62_spill] sm:$0xff] %v8253_v50  ;;  %v8257_v33 = vld [vmem:[#allocation2 + $0x2a8] sm:$0xf]  ;;  %v4150_v5 = vadd.f32 %v4094_v44, %v7893_v4  ;;  %v4151_v58 = vadd.f32 %v4094_v44, %v7890_v39  ;;  %v4145_v36 = vcombine.low %v4137_v34, %v4144_v42  ;;  %v2852_v11 = vrot.slane %v2845_v55, %v7670_v35  ;;  %v9322_v34 = vld [vmem:[#allocation21_spill] sm:$0xff]  ;;  %v9323_v44 = vld [vmem:[#allocation23_spill] sm:$0xff] }
 0x654   :  { %v8259_v31 = vld [vmem:[#allocation2 + $0x2a9] sm:$0xf]  ;;  %v4152_v53 = vadd.f32 %v4111_v43, %v7905_v2  ;;  %v4153_v24 = vadd.f32 %v4111_v43, %v7902_v3  ;;  %v2999_v25 = vrot.slane %v2992_v48, %v7670_v35  ;;  %v2800_v16 = vrot.slane %v2793_v13, %v7670_v35  ;;  %4563 = vst.msk [vmem:[#allocation2 + $0x308] sm:$0xff] %vm1561_vm7, %v4155_v47  ;;  %v9324_v43 = vld [vmem:[#allocation17_spill] sm:$0xff]  ;;  %v9325_v55 = vld [vmem:[#allocation26_spill] sm:$0xff] }
 0x655   :  { %v8261_v1 = vld [vmem:[#allocation2 + $0x2a8] sm:$0xf]  ;;  %v2940_v40 = vcombine.low %v7980_v29, %v7982_v41  ;;  %4558 = vst.msk [vmem:[#allocation2 + $0x268] sm:$0xff] %vm1561_vm7, %v4150_v5  ;;  %v4156_v63 = vadd.f32 %v4145_v36, %v7920_v49  ;;  %v4157_v10 = vadd.f32 %v4145_v36, %v9321_v12  ;;  %v5836_v52 = vpack.i.bf16 %v9322_v34, %v2908_v19  ;;  %v9327_v48 = vld [vmem:[#allocation5_spill] sm:$0xff]  ;;  %v9328_v13 = vld [vmem:[#allocation27_spill] sm:$0xff] }
 0x656   :  { %v8265_v7 = vld [vmem:[#allocation2 + $0x2a8] sm:$0xf]  ;;  %v2780_v45 = vcombine.low %v9324_v43, %v9323_v44  ;;  %v3009_v29 = vrot.slane %v2999_v25, 4  ;;  %v2927_v42 = vcombine.low %v9326_v51, %v9325_v55  ;;  %v2819_v49 = vcombine.low %v9328_v13, %v9327_v48  ;;  %v9331_v25 = vld [vmem:[#allocation19_spill] sm:$0xff]  ;;  %v9337_v51 = vld [vmem:[#allocation22_spill] sm:$0xff] }
 0x657   :  { %9313 = vst [vmem:[#allocation63_spill] sm:$0xff] %v8265_v7  ;;  %v8267_v15 = vld [vmem:[#allocation2 + $0x2a9] sm:$0xf]  ;;  %v2947_v41 = vrot.slane %v2940_v40, %v7670_v35  ;;  %4564 = vst.msk [vmem:[#allocation2 + $0x328] sm:$0xff] %vm1561_vm7, %v4156_v63  ;;  %5837 = vrot.lane.b32.xlu0 %v5836_v52, %s6232_s18  ;;  %v3376_v36 = vcombine.low %v8117_v20, %v8146_v37  ;;  %v9332_v40 = vld [vmem:[#allocation18_spill] sm:$0xff] }
 0x658   :  { %9314 = vst [vmem:[#allocation64_spill] sm:$0xff] %v8267_v15  ;;  %v8269_v62 = vld [vmem:[#allocation2 + $0x288] sm:$0xf]  ;;  %4560 = vst.msk [vmem:[#allocation2 + $0x2a8] sm:$0xff] %vm1561_vm7, %v4152_v53  ;;  %v2787_v5 = vrot.slane %v2780_v45, %v7670_v35  ;;  %v9330_v53 = vld [vmem:[#allocation29_spill] sm:$0xff]  ;;  %v2934_v19 = vrot.slane %v2927_v42, %v7670_v35  ;;  %v2806_v63 = vcombine.low %v9332_v40, %v9331_v25 }
 0x659   :  { %v8271_v59 = vld [vmem:[#allocation2 + $0x289] sm:$0xf]  ;;  %4565 = vst.msk [vmem:[#allocation2 + $0x348] sm:$0xff] %vm1561_vm7, %v4157_v10  ;;  %v5851_v47 = vpack.i.bf16 %v2800_v16, %v2947_v41  ;;  %5453 = vmatprep.mubr.msk.f32.mxu0 %vm1561_vm7, %v3376_v36  ;;  %v9334_v34 = vld [vmem:[#allocation31_spill] sm:$0xff]  ;;  %v2826_v37 = vrot.slane %v2819_v49, %v7670_v35  ;;  %v9336_v16 = vld [vmem:[#allocation30_spill] sm:$0xff] }
 0x65a   :  { %v8273_v17 = vld [vmem:[#allocation2 + $0x288] sm:$0xf]  ;;  %v5846_v20 = vpack.i.bf16 %v2787_v5, %v2934_v19  ;;  %v2813_v55 = vrot.slane %v2806_v63, %v7670_v35  ;;  %v3015_v36 = vld [vmem:[%s9200_s1 + $0x258] sm:$0xff]  ;;  %v3016_v40 = vld [vmem:[%s9200_s1 + $0x260] sm:$0xff] }
 0x65b   :  { %9315 = vst [vmem:[#allocation65_spill] sm:$0xff] %v8273_v17  ;;  %v8275_v6 = vld [vmem:[#allocation2 + $0x289] sm:$0xf]  ;;  %5852 = vrot.lane.b32.xlu1 %v5851_v47, %s6236_s21 }
 0x65c   :  { %v8281_v60 = vld [vmem:[#allocation2 + $0x288] sm:$0xf]  ;;  %5847 = vrot.lane.b32.xlu0 %v5846_v20, %s6233_s10 }
 0x65d   :  { %9316 = vst [vmem:[#allocation66_spill] sm:$0xff] %v8281_v60  ;;  %v8283_v61 = vld [vmem:[#allocation2 + $0x289] sm:$0xf] }
 0x65e   :  { %9317 = vst [vmem:[#allocation67_spill] sm:$0xff] %v8283_v61  ;;  %v8285_v54 = vld [vmem:[#allocation2 + $0x2c8] sm:$0xf]  ;;  %4559 = vst.msk [vmem:[#allocation2 + $0x288] sm:$0xff] %vm1561_vm7, %v4151_v58 }
 0x65f   :  { %v8290_v4 = vld [vmem:[#allocation2 + $0x2c9] sm:$0xf] }
 0x660   :  { %9318 = vst [vmem:[#allocation68_spill] sm:$0xff] %v8290_v4  ;;  %v8292_v39 = vld [vmem:[#allocation2 + $0x2c8] sm:$0xf] }
 0x661   :  { %v8294_v2 = vld [vmem:[#allocation2 + $0x2c9] sm:$0xf] }
 0x662   :  { %9319 = vst [vmem:[#allocation69_spill] sm:$0xff] %v8294_v2  ;;  %v8296_v3 = vld [vmem:[#allocation2 + $0x2e8] sm:$0xf]  ;;  %4561 = vst.msk [vmem:[#allocation2 + $0x2c8] sm:$0xff] %vm1561_vm7, %v4153_v24 }
 0x663   :  { %v8298_v9 = vld [vmem:[#allocation2 + $0x2e9] sm:$0xf] }
 0x664   :  { %9320 = vst [vmem:[#allocation70_spill] sm:$0xff] %v8298_v9  ;;  %4562 = vst.msk [vmem:[#allocation2 + $0x2e8] sm:$0xff] %vm1561_vm7, %v4154_v38  ;;  %v9329_v58 = vld [vmem:[#allocation12_spill] sm:$0xff]  ;;  %v3013_v38 = vsel %vm2210_vm5, %v2852_v11, %v3009_v29 }
 0x665   :  { %v2966_v24 = vcombine.low %v9330_v53, %v9329_v58  ;;  %5451 = vmatprep.mubr.msk.f32.mxu1 %vm1561_vm7, %v3013_v38  ;;  %v9333_v10 = vld [vmem:[#allocation28_spill] sm:$0xff] }
 0x666   :  { %v2953_v52 = vcombine.low %v9334_v34, %v9333_v10  ;;  %v9335_v11 = vld [vmem:[#allocation32_spill] sm:$0xff] }
 0x667   :  { %v2973_v12 = vrot.slane %v2966_v24, %v7670_v35  ;;  %v2979_v44 = vcombine.low %v9336_v16, %v9335_v11  ;;  %v4194_v45 = vld [vmem:[#allocation2 + $0x8] sm:$0xff]  ;;  %v3014_v24 = vld [vmem:[%s9200_s1 + $0x250] sm:$0xff]  ;;  %v9342_v11 = vmov 0.0|0.0  }
 0x668   :  { %v2960_v43 = vrot.slane %v2953_v52, %v7670_v35  ;;  %v4195_v29 = vld [vmem:[#allocation2 + $0x28] sm:$0xff]  ;;  %v5702_v34 = vpack.c.bf16 %v3015_v36, %v3014_v24  ;;  %v3018_v16 = vld [vmem:[%s9200_s1 + $0x270] sm:$0xff] }
 0x669   :  { %v5861_v41 = vpack.i.bf16 %v2826_v37, %v2973_v12  ;;  %v9338_v42 = vld [vmem:[#allocation20_spill] sm:$0xff]  ;;  %v2986_v49 = vrot.slane %v2979_v44, %v7670_v35  ;;  %v5871_v5 = vpack.i.bf16 %v4195_v29, %v4194_v45  ;;  %v3019_v44 = vld [vmem:[%s9200_s1 + $0x278] sm:$0xff] }
 0x66a   :  { %v2832_v48 = vcombine.low %v9338_v42, %v9337_v51  ;;  %v5856_v13 = vpack.i.bf16 %v2813_v55, %v2960_v43  ;;  %v4202_v53 = vld [vmem:[#allocation2 + $0x9] sm:$0xff]  ;;  %5703 = vmatpush1.bf16.msra.mxu1 %v5702_v34  ;;  %v9343_v43 = vld [vmem:[#allocation34_spill] sm:$0xff] }
 0x66b   :  { %5862 = vrot.lane.b32.xlu1 %v5861_v41, %s6240_s15  ;;  %v4203_v38 = vld [vmem:[#allocation2 + $0x29] sm:$0xff]  ;;  %5704 = vmatprep.subr.bf16.mxu1 %v9342_v11 }
 0x66c   :  { %5857 = vrot.lane.b32.xlu0 %v5856_v13, %s6241_s16  ;;  %v2839_v58 = vrot.slane %v2832_v48, %v7670_v35  ;;  %v8357_v47 = vld [vmem:[#allocation2 + $0x27] sm:$0xff]  ;;  %v5876_v12 = vpack.i.bf16 %v4203_v38, %v4202_v53  ;;  %v9352_v48 = vld [vmem:[#allocation49_spill] sm:$0xff] }
 0x66d   :  { %9339 = vst [vmem:[#allocation15_spill] sm:$0xff] %v8357_v47  ;;  %v8359_v19 = vld [vmem:[#allocation2 + $0x47] sm:$0xff] }
 0x66e   :  { %9340 = vst [vmem:[#allocation21_spill] sm:$0xff] %v8359_v19  ;;  %v5866_v25 = vpack.i.bf16 %v2839_v58, %v2986_v49  ;;  %v3017_v63 = vld [vmem:[%s9200_s1 + $0x268] sm:$0xff]  ;;  %v5881_v10 = vpack.i.bf16 %v8359_v19, %v8357_v47  ;;  %v5708_v49 = vpack.c.bf16 %v3019_v44, %v3018_v16  ;;  %v3020_v58 = vld [vmem:[%s9200_s1 + $0x280] sm:$0xff]  ;;  %v9360_v44 = vld [vmem:[#allocation58_spill] sm:$0xff] }
 0x66f   :  { %5872 = vrot.lane.b32.xlu1 %v5871_v5, %s6232_s18  ;;  %v8371_v52 = vld [vmem:[#allocation2 + $0x49] sm:$0xff]  ;;  %v5705_v20 = vpack.c.bf16 %v3017_v63, %v3016_v40  ;;  %v9347_v63 = vld [vmem:[#allocation50_spill] sm:$0xff] }
 0x670   :  { %5867 = vrot.lane.b32.xlu0 %v5866_v25, %s6242_s17  ;;  %9341 = vst [vmem:[#allocation23_spill] sm:$0xff] %v8371_v52  ;;  %v4219_v37 = vld [vmem:[#allocation2 + $0x48] sm:$0xff]  ;;  %v5891_v41 = vpack.i.bf16 %v8371_v52, %v4203_v38  ;;  %v3027_v40 = vld [vmem:[%s9200_s1 + $0x2b8] sm:$0xff] }
 0x671   :  { %v4243_v51 = vld [vmem:[#allocation2 + $0x68] sm:$0xff]  ;;  %v5886_v13 = vpack.i.bf16 %v4219_v37, %v4195_v29  ;;  %5706 = vmatpush1.bf16.msra.mxu1 %v5705_v20  ;;  %v9345_v29 = vld [vmem:[#allocation37_spill] sm:$0xff] }
 0x672   :  { %v8392_v5 = vld [vmem:[#allocation2 + $0x67] sm:$0xff]  ;;  %5707 = vmatprep.subr.bf16.mxu1 %v9342_v11  ;;  %v5901_v38 = vpack.i.bf16 %v4243_v51, %v4219_v37 }
 0x673   :  { %5882 = vrot.lane.b32.xlu1 %v5881_v10, %s6233_s10  ;;  %9344 = vst [vmem:[#allocation17_spill] sm:$0xff] %v8392_v5  ;;  %v3021_v53 = vld [vmem:[%s9200_s1 + $0x288] sm:$0xff]  ;;  %v5896_v36 = vpack.i.bf16 %v8392_v5, %v8359_v19  ;;  %v3023_v10 = vld [vmem:[%s9200_s1 + $0x298] sm:$0xff] }
 0x674   :  { %5877 = vrot.lane.b32.xlu0 %v5876_v12, %s6235_s20  ;;  %v9346_v25 = vld [vmem:[#allocation36_spill] sm:$0xff]  ;;  %v9348_v12 = vld [vmem:[#allocation51_spill] sm:$0xff]  ;;  %v5711_v37 = vpack.c.bf16 %v3021_v53, %v3020_v58 }
 0x675   :  { %v8410_v34 = vld [vmem:[#allocation2 + $0x69] sm:$0xff]  ;;  %5709 = vmatpush1.bf16.msra.mxu1 %v5708_v49  ;;  %v9355_v58 = vld [vmem:[#allocation39_spill] sm:$0xff] }
 0x676   :  { %v9349_v20 = vld [vmem:[#allocation52_spill] sm:$0xff]  ;;  %5710 = vmatprep.subr.bf16.mxu1 %v9342_v11  ;;  %v5911_v24 = vpack.i.bf16 %v8410_v34, %v8371_v52  ;;  %v9356_v53 = vld [vmem:[#allocation43_spill] sm:$0xff]  ;;  %v3026_v52 = vld [vmem:[%s9200_s1 + $0x2b0] sm:$0xff] }
 0x677   :  { %5892 = vrot.lane.b32.xlu1 %v5891_v41, %s6241_s16  ;;  %v9350_v16 = vld [vmem:[#allocation48_spill] sm:$0xff]  ;;  %v9351_v41 = vld [vmem:[#allocation53_spill] sm:$0xff]  ;;  %v5720_v42 = vpack.c.bf16 %v3027_v40, %v3026_v52  ;;  %v3031_v52 = vld [vmem:[%s9200_s1 + $0x2d8] sm:$0xff] }
 0x678   :  { %5887 = vrot.lane.b32.xlu0 %v5886_v13, %s6236_s21  ;;  %v3022_v13 = vld [vmem:[%s9200_s1 + $0x290] sm:$0xff]  ;;  %v4221_v49 = vld [vmem:[#allocation2 + $0x88] sm:$0xff] }
 0x679   :  { %5712 = vmatpush1.bf16.msra.mxu1 %v5711_v37  ;;  %v5714_v19 = vpack.c.bf16 %v3023_v10, %v3022_v13  ;;  %v8436_v47 = vld [vmem:[#allocation2 + $0x87] sm:$0xff]  ;;  %v5921_v10 = vpack.i.bf16 %v4221_v49, %v4243_v51 }
 0x67a   :  { %5713 = vmatprep.subr.bf16.mxu1 %v9342_v11  ;;  %v3025_v55 = vld [vmem:[%s9200_s1 + $0x2a8] sm:$0xff]  ;;  %v9357_v13 = vld [vmem:[#allocation59_spill] sm:$0xff] }
 0x67b   :  { %5902 = vrot.lane.b32.xlu1 %v5901_v38, %s6242_s17  ;;  %v9358_v45 = vld [vmem:[#allocation40_spill] sm:$0xff] }
 0x67c   :  { %5897 = vrot.lane.b32.xlu0 %v5896_v36, %s6240_s15  ;;  %v3024_v36 = vld [vmem:[%s9200_s1 + $0x2a0] sm:$0xff]  ;;  %v9359_v50 = vld [vmem:[#allocation60_spill] sm:$0xff] }
 0x67d   :  { %v8454_v17 = vld [vmem:[#allocation2 + $0xa7] sm:$0xff]  ;;  %5715 = vmatpush1.bf16.msra.mxu1 %v5714_v19  ;;  %v5717_v51 = vpack.c.bf16 %v3025_v55, %v3024_v36 }
 0x67e   :  { %5716 = vmatprep.subr.bf16.mxu1 %v9342_v11  ;;  %v5931_v19 = vpack.i.bf16 %v8454_v17, %v8436_v47  ;;  %v4245_v36 = vld [vmem:[#allocation2 + $0xa8] sm:$0xff]  ;;  %v3028_v55 = vld [vmem:[%s9200_s1 + $0x2c0] sm:$0xff] }
 0x67f   :  { %5912 = vrot.lane.b32.xlu1 %v5911_v24, %s6235_s20  ;;  %v5916_v24 = vpack.i.bf16 %v8436_v47, %v8392_v5  ;;  %v3029_v7 = vld [vmem:[%s9200_s1 + $0x2c8] sm:$0xff]  ;;  %v5936_v40 = vpack.i.bf16 %v4245_v36, %v4221_v49 }
 0x680   :  { %5907 = vrot.lane.b32.xlu0 %v5901_v38, %s6232_s18  ;;  %v8463_v38 = vld [vmem:[#allocation2 + $0x89] sm:$0xff] }
 0x681   :  { %v5926_v60 = vpack.i.bf16 %v8463_v38, %v8410_v34  ;;  %5718 = vmatpush1.bf16.msra.mxu1 %v5717_v51  ;;  %v8505_v4 = vld [vmem:[#allocation2 + $0xa9] sm:$0xff] }
 0x682   :  { %5719 = vmatprep.subr.bf16.mxu1 %v9342_v11  ;;  %v3030_v51 = vld [vmem:[%s9200_s1 + $0x2d0] sm:$0xff]  ;;  %v4247_v37 = vld [vmem:[#allocation2 + $0xe8] sm:$0xff] }
 0x683   :  { %5922 = vrot.lane.b32.xlu1 %v5921_v10, %s6236_s21  ;;  %v5723_v10 = vpack.c.bf16 %v3029_v7, %v3028_v55  ;;  %v8517_v49 = vld [vmem:[#allocation2 + $0xc9] sm:$0xff]  ;;  %v5946_v7 = vpack.i.bf16 %v8505_v4, %v8463_v38 }
 0x684   :  { %5917 = vrot.lane.b32.xlu0 %v5916_v24, %s6233_s10  ;;  %v8502_v24 = vld [vmem:[#allocation2 + $0xc7] sm:$0xff]  ;;  %9367 = vst [vmem:[#allocation26_spill] sm:$0xff] %v8517_v49 }
 0x685   :  { %5721 = vmatpush1.bf16.msra.mxu1 %v5720_v42  ;;  %v5726_v42 = vpack.c.bf16 %v3031_v52, %v3030_v51  ;;  %v4223_v55 = vld [vmem:[#allocation2 + $0xc8] sm:$0xff] }
 0x686   :  { %5722 = vmatprep.subr.bf16.mxu1 %v9342_v11  ;;  %v5956_v9 = vpack.i.bf16 %v4223_v55, %v4245_v36  ;;  %v8527_v2 = vld [vmem:[#allocation2 + $0xe7] sm:$0xff] }
 0x687   :  { %5932 = vrot.lane.b32.xlu1 %v5931_v19, %s6240_s15  ;;  %9368 = vst [vmem:[#allocation25_spill] sm:$0xff] %v8527_v2  ;;  %v8531_v51 = vld [vmem:[#allocation2 + $0xe9] sm:$0xff]  ;;  %v5966_v52 = vpack.i.bf16 %v8527_v2, %v8502_v24 }
 0x688   :  { %5927 = vrot.lane.b32.xlu0 %v5926_v60, %s6241_s16  ;;  %v5951_v60 = vpack.i.bf16 %v8502_v24, %v8454_v17  ;;  %9369 = vst [vmem:[#allocation5_spill] sm:$0xff] %v8531_v51  ;;  %v5981_v36 = vpack.i.bf16 %v8531_v51, %v8517_v49  ;;  %v4574_v5 = vld [vmem:[#allocation2 + $0x248] sm:$0xff] }
 0x689   :  { %5724 = vmatpush1.bf16.msra.mxu1 %v5723_v10  ;;  %v5971_v10 = vpack.i.bf16 %v4247_v37, %v4223_v55  ;;  %v4575_v19 = vld [vmem:[#allocation2 + $0x268] sm:$0xff] }
 0x68a   :  { %5725 = vmatprep.subr.bf16.mxu1 %v9342_v11  ;;  %v4591_v61 = vld [vmem:[#allocation2 + $0x287] sm:$0xff] }
 0x68b   :  { %5942 = vrot.lane.b32.xlu1 %v5936_v40, %s6232_s18 }
 0x68c   :  { %5937 = vrot.lane.b32.xlu0 %v5936_v40, %s6242_s17  ;;  %v5961_v40 = vpack.i.bf16 %v8517_v49, %v8505_v4 }
 0x68d   :  { %5727 = vmatpush1.bf16.msra.mxu1 %v5726_v42  ;;  %v4241_v42 = vld [vmem:[#allocation2 + $0x127] sm:$0xff] }
 0x68e   :  { %5755 = vmatprep.subr.bf16.mxu1 %v9342_v11 }
 0x68f   :  { %5952 = vrot.lane.b32.xlu1 %v5951_v60, %s6233_s10  ;;  %v4225_v60 = vld [vmem:[#allocation2 + $0x108] sm:$0xff] }
 0x690   :  { %5947 = vrot.lane.b32.xlu0 %v5946_v7, %s6235_s20  ;;  %v4217_v7 = vld [vmem:[#allocation2 + $0x107] sm:$0xff] }
 0x691   :  { %v5986_v55 = vpack.i.bf16 %v4217_v7, %v8527_v2  ;;  %v4582_v2 = vld [vmem:[#allocation2 + $0x249] sm:$0xff] }
 0x693   :  { %5962 = vrot.lane.b32.xlu1 %v5961_v40, %s6241_s16  ;;  %v8543_v40 = vld [vmem:[#allocation2 + $0x109] sm:$0xff] }
 0x694   :  { %5957 = vrot.lane.b32.xlu0 %v5956_v9, %s6236_s21  ;;  %v5991_v9 = vpack.i.bf16 %v4225_v60, %v4247_v37  ;;  %9370 = vst [vmem:[#allocation27_spill] sm:$0xff] %v8543_v40  ;;  %v5996_v15 = vpack.i.bf16 %v8543_v40, %v8531_v51  ;;  %v6011_v37 = vpack.i.bf16 %v4575_v19, %v4574_v5  ;;  %v4623_v5 = vld [vmem:[#allocation2 + $0x2a8] sm:$0xff] }
 0x697   :  { %5972 = vrot.lane.b32.xlu1 %v5971_v10, %s6242_s17 }
 0x698   :  { %5967 = vrot.lane.b32.xlu0 %v5966_v52, %s6240_s15  ;;  %v6001_v52 = vpack.i.bf16 %v4241_v42, %v4217_v7  ;;  %v8555_v42 = vld [vmem:[#allocation2 + $0x289] sm:$0xff] }
 0x699   :  { %9372 = vst [vmem:[#allocation29_spill] sm:$0xff] %v8555_v42 }
 0x69b   :  { %5982 = vrot.lane.b32.xlu1 %v5981_v36, %s6235_s20  ;;  %v4249_v36 = vld [vmem:[#allocation2 + $0x128] sm:$0xff] }
 0x69c   :  { %5977 = vrot.lane.b32.xlu0 %v5971_v10, %s6232_s18  ;;  %v8550_v10 = vld [vmem:[#allocation2 + $0x267] sm:$0xff] }
 0x69d   :  { %9371 = vst [vmem:[#allocation12_spill] sm:$0xff] %v8550_v10  ;;  %v6021_v7 = vpack.i.bf16 %v4591_v61, %v8550_v10  ;;  %v4601_v10 = vld [vmem:[#allocation2 + $0x2c8] sm:$0xff] }
 0x69f   :  { %5992 = vrot.lane.b32.xlu1 %v5991_v9, %s6236_s21  ;;  %v6006_v9 = vpack.i.bf16 %v4249_v36, %v4225_v60  ;;  %v3554_v60 = vld [vmem:[%s9200_s1 + $0x1c0] sm:$0xff]  ;;  %v3555_v36 = vld [vmem:[%s9200_s1 + $0x1c8] sm:$0xff] }
 0x6a0   :  { %5987 = vrot.lane.b32.xlu0 %v5986_v55, %s6233_s10  ;;  %v4583_v55 = vld [vmem:[#allocation2 + $0x269] sm:$0xff] }
 0x6a1   :  { %v6016_v40 = vpack.i.bf16 %v4583_v55, %v4582_v2  ;;  %v5729_v2 = vpack.c.bf16 %v3555_v36, %v3554_v60  ;;  %v3559_v36 = vld [vmem:[%s9200_s1 + $0x1e8] sm:$0xff] }
 0x6a3   :  { %6002 = vrot.lane.b32.xlu1 %v6001_v52, %s6240_s15  ;;  %v4599_v52 = vld [vmem:[#allocation2 + $0x288] sm:$0xff]  ;;  %5730 = vmatpush1.bf16.msra.mxu0 %v5729_v2 }
 0x6a4   :  { %5997 = vrot.lane.b32.xlu0 %v5996_v15, %s6241_s16  ;;  %v6031_v15 = vpack.i.bf16 %v8555_v42, %v4583_v55  ;;  %v4585_v55 = vld [vmem:[#allocation2 + $0x2a9] sm:$0xff]  ;;  %5731 = vmatprep.subr.bf16.mxu0 %v9342_v11 }
 0x6a7   :  { %6012 = vrot.lane.b32.xlu1 %v6011_v37, %s6232_s18  ;;  %v6026_v37 = vpack.i.bf16 %v4599_v52, %v4575_v19  ;;  %v3557_v19 = vld [vmem:[%s9200_s1 + $0x1d8] sm:$0xff] }
 0x6a8   :  { %6007 = vrot.lane.b32.xlu0 %v6006_v9, %s6242_s17  ;;  %v8567_v9 = vld [vmem:[#allocation2 + $0x2a7] sm:$0xff] }
 0x6a9   :  { %9373 = vst [vmem:[#allocation19_spill] sm:$0xff] %v8567_v9 }
 0x6ab   :  { %6022 = vrot.lane.b32.xlu1 %v6021_v7, %s6233_s10  ;;  %v3556_v7 = vld [vmem:[%s9200_s1 + $0x1d0] sm:$0xff] }
 0x6ac   :  { %6017 = vrot.lane.b32.xlu0 %v6016_v40, %s6235_s20  ;;  %v6041_v40 = vpack.i.bf16 %v4623_v5, %v4599_v52  ;;  %v5732_v60 = vpack.c.bf16 %v3557_v19, %v3556_v7  ;;  %v3558_v52 = vld [vmem:[%s9200_s1 + $0x1e0] sm:$0xff]  ;;  %v6061_v7 = vpack.i.bf16 %v4601_v10, %v4623_v5  ;;  %v3560_v19 = vld [vmem:[%s9200_s1 + $0x1f0] sm:$0xff] }
 0x6ad   :  { %v5735_v2 = vpack.c.bf16 %v3559_v36, %v3558_v52  ;;  %v9374_v52 = vld [vmem:[#allocation44_spill] sm:$0xff]  ;;  %v9375_v36 = vld [vmem:[#allocation7_spill] sm:$0xff] }
 0x6ae   :  { %5733 = vmatpush1.bf16.msra.mxu0 %v5732_v60  ;;  %v8601_v5 = vld [vmem:[#allocation2 + $0x2c9] sm:$0xff] }
 0x6af   :  { %6032 = vrot.lane.b32.xlu1 %v6031_v15, %s6241_s16  ;;  %v6036_v15 = vpack.i.bf16 %v8567_v9, %v4591_v61  ;;  %5734 = vmatprep.subr.bf16.mxu0 %v9342_v11  ;;  %v4593_v61 = vld [vmem:[#allocation2 + $0x2c7] sm:$0xff] }
 0x6b0   :  { %6027 = vrot.lane.b32.xlu0 %v6026_v37, %s6236_s21  ;;  %v6051_v37 = vpack.i.bf16 %v4585_v55, %v8555_v42  ;;  %v6056_v60 = vpack.i.bf16 %v4593_v61, %v8567_v9  ;;  %v3563_v42 = vld [vmem:[%s9200_s1 + $0x208] sm:$0xff] }
 0x6b2   :  { %5736 = vmatpush1.bf16.msra.mxu0 %v5735_v2  ;;  %v3562_v2 = vld [vmem:[%s9200_s1 + $0x200] sm:$0xff] }
 0x6b3   :  { %6042 = vrot.lane.b32.xlu1 %v6041_v40, %s6242_s17  ;;  %5737 = vmatprep.subr.bf16.mxu0 %v9342_v11  ;;  %v5741_v9 = vpack.c.bf16 %v3563_v42, %v3562_v2  ;;  %v3564_v42 = vld [vmem:[%s9200_s1 + $0x210] sm:$0xff]  ;;  %v3567_v2 = vld [vmem:[%s9200_s1 + $0x228] sm:$0xff] }
 0x6b4   :  { %6037 = vrot.lane.b32.xlu0 %v6036_v15, %s6240_s15  ;;  %v3561_v15 = vld [vmem:[%s9200_s1 + $0x1f8] sm:$0xff] }
 0x6b7   :  { %6052 = vrot.lane.b32.xlu1 %v6051_v37, %s6235_s20  ;;  %v3292_v37 = vcombine.low %v9375_v36, %v9374_v52  ;;  %v9377_v52 = vld [vmem:[#allocation8_spill] sm:$0xff] }
 0x6b8   :  { %6047 = vrot.lane.b32.xlu0 %v6041_v40, %s6232_s18  ;;  %v5738_v40 = vpack.c.bf16 %v3561_v15, %v3560_v19  ;;  %v6066_v19 = vpack.i.bf16 %v8601_v5, %v4585_v55  ;;  %v9376_v15 = vld [vmem:[#allocation45_spill] sm:$0xff] }
 0x6b9   :  { %v6071_v51 = vpack.i.bf16 %v4601_v10, %v3292_v37  ;;  %v3304_v36 = vcombine.low %v9377_v52, %v9376_v15  ;;  %v4625_v37 = vld [vmem:[#allocation2 + $0x2e8] sm:$0xff] }
 0x6ba   :  { %5739 = vmatpush1.bf16.msra.mxu0 %v5738_v40  ;;  %v3566_v40 = vld [vmem:[%s9200_s1 + $0x220] sm:$0xff] }
 0x6bb   :  { %6062 = vrot.lane.b32.xlu1 %v6061_v7, %s6236_s21  ;;  %v4617_v7 = vld [vmem:[#allocation2 + $0x2e7] sm:$0xff]  ;;  %5740 = vmatprep.subr.bf16.mxu0 %v9342_v11  ;;  %v6076_v55 = vpack.i.bf16 %v8601_v5, %v3304_v36  ;;  %v9380_v36 = vcombine.low %v8123_v28, %v8156_v30 }
 0x6bc   :  { %6057 = vrot.lane.b32.xlu0 %v6056_v60, %s6233_s10  ;;  %v6081_v49 = vpack.i.bf16 %v4617_v7, %v4593_v61  ;;  %v3565_v60 = vld [vmem:[%s9200_s1 + $0x218] sm:$0xff]  ;;  %v4618_v28 = vld [vmem:[#allocation2 + $0x307] sm:$0xff] }
 0x6be   :  { %5742 = vmatpush1.bf16.msra.mxu0 %v5741_v9  ;;  %v9378_v9 = vcombine.low %v9343_v43, %v8085_v56  ;;  %v3568_v56 = vld [vmem:[%s9200_s1 + $0x230] sm:$0xff]  ;;  %v3569_v43 = vld [vmem:[%s9200_s1 + $0x238] sm:$0xff] }
 0x6bf   :  { %6072 = vrot.lane.b32.xlu1 %v6071_v51, %s6232_s18  ;;  %5743 = vmatprep.subr.bf16.mxu0 %v9342_v11  ;;  %v5744_v51 = vpack.c.bf16 %v3565_v60, %v3564_v42  ;;  %v5750_v52 = vpack.c.bf16 %v3569_v43, %v3568_v56  ;;  %v6096_v42 = vpack.i.bf16 %v4625_v37, %v9380_v36  ;;  %v3570_v60 = vld [vmem:[%s9200_s1 + $0x240] sm:$0xff] }
 0x6c0   :  { %6067 = vrot.lane.b32.xlu0 %v6066_v19, %s6241_s16  ;;  %v6091_v61 = vpack.i.bf16 %v4617_v7, %v9378_v9  ;;  %v5747_v19 = vpack.c.bf16 %v3567_v2, %v3566_v40  ;;  %v9379_v7 = vcombine.low %v8148_v18, %v8136_v46  ;;  %v3571_v46 = vld [vmem:[%s9200_s1 + $0x248] sm:$0xff]  ;;  %v9381_v18 = vcombine.low %v8150_v57, %v8138_v22  ;;  %v9389_v43 = vld [vmem:[#allocation3_spill] sm:$0xff] }
 0x6c1   :  { %v5753_v30 = vpack.c.bf16 %v3571_v46, %v3570_v60  ;;  %v9383_v9 = vcombine.low %v9346_v25, %v8170_v14  ;;  %v4626_v57 = vld [vmem:[#allocation2 + $0x308] sm:$0xff]  ;;  %v9384_v40 = vcombine.low %v8087_v21, %v9345_v29  ;;  %v9390_v21 = vcombine.low %v9348_v12, %v9347_v63 }
 0x6c2   :  { %5745 = vmatpush1.bf16.msra.mxu0 %v5744_v51  ;;  %v6101_v15 = vpack.i.bf16 %v4625_v37, %v9379_v7  ;;  %v9382_v51 = vcombine.low %v8125_v8, %v8158_v32  ;;  %v9385_v32 = vld [vmem:[#allocation24_spill] sm:$0xff] }
 0x6c3   :  { %6082 = vrot.lane.b32.xlu1 %v6081_v49, %s6240_s15  ;;  %5746 = vmatprep.subr.bf16.mxu0 %v9342_v11  ;;  %v6086_v49 = vpack.i.bf16 %v4625_v37, %v4601_v10  ;;  %v8647_v10 = vld [vmem:[#allocation2 + $0x2e9] sm:$0xff]  ;;  %v6121_v22 = vpack.i.bf16 %v4618_v28, %v9383_v9  ;;  %v6116_v2 = vpack.i.bf16 %v4618_v28, %v9384_v40 }
 0x6c4   :  { %6077 = vrot.lane.b32.xlu0 %v6076_v55, %s6235_s20  ;;  %v6111_v55 = vpack.i.bf16 %v8647_v10, %v9381_v18  ;;  %v6106_v37 = vpack.i.bf16 %v8647_v10, %v9382_v51  ;;  %v9386_v8 = vld [vmem:[#allocation4_spill] sm:$0xff]  ;;  %v6126_v29 = vpack.i.bf16 %v4626_v57, %v9390_v21  ;;  %v9392_v28 = vcombine.low %v9352_v48, %v9351_v41  ;;  %v9393_v51 = vld [vmem:[#allocation11_spill] sm:$0xff]  ;;  %v9395_v48 = vld [vmem:[#allocation54_spill] sm:$0xff] }
 0x6c5   :  { %v9388_v25 = vld [vmem:[#allocation16_spill] sm:$0xff] }
 0x6c6   :  { %5748 = vmatpush1.bf16.msra.mxu0 %v5747_v19  ;;  %v9387_v19 = vcombine.low %v9350_v16, %v9349_v20  ;;  %v2743_v7 = vcombine.low %v9389_v43, %v9388_v25  ;;  %v8694_v46 = vld [vmem:[#allocation2 + $0x309] sm:$0xff] }
 0x6c7   :  { %6092 = vrot.lane.b32.xlu1 %v6091_v61, %s6233_s10  ;;  %5749 = vmatprep.subr.bf16.mxu0 %v9342_v11  ;;  %v5843_v61 = vpop.permute.xlu1 %5842  ;;  %v4619_v40 = vld [vmem:[#allocation2 + $0x327] sm:$0xff] }
 0x6c8   :  { %6087 = vrot.lane.b32.xlu0 %v6086_v49, %s6242_s17  ;;  %v2890_v49 = vcombine.low %v9386_v8, %v9385_v32  ;;  %v6131_v56 = vpack.i.bf16 %v4626_v57, %v9387_v19  ;;  %v5844_v20 = vunpack.i.l.bf16 %v5843_v61  ;;  %v5845_v12 = vunpack.i.h.bf16 %v5843_v61  ;;  %v9394_v32 = vld [vmem:[#allocation13_spill] sm:$0xff] }
 0x6c9   :  { %v5838_v14 = vpop.permute.xlu0 %5837  ;;  %v3353_v41 = vcombine.low %v9395_v48, %v9394_v32  ;;  %v9401_v48 = vld [vmem:[#allocation62_spill] sm:$0xff] }
 0x6ca   :  { %5751 = vmatpush1.bf16.msra.mxu0 %v5750_v52  ;;  %v9391_v52 = vld [vmem:[#allocation10_spill] sm:$0xff]  ;;  %v5840_v60 = vunpack.i.h.bf16 %v5838_v14 }
 0x6cb   :  { %6102 = vrot.lane.b32.xlu1 %v6101_v15, %s6232_s18  ;;  %5752 = vmatprep.subr.bf16.mxu0 %v9342_v11  ;;  %v5839_v15 = vunpack.i.l.bf16 %v5838_v14  ;;  %v3454_v36 = vcombine.low %v9391_v52, %v8249_v23  ;;  %v6136_v23 = vpack.i.bf16 %v8694_v46, %v9392_v28  ;;  %v6146_v14 = vpack.i.bf16 %v4619_v40, %v3353_v41  ;;  %v9402_v41 = vld [vmem:[#allocation65_spill] sm:$0xff] }
 0x6cc   :  { %6097 = vrot.lane.b32.xlu0 %v6096_v42, %s6236_s21  ;;  %v2897_v42 = vrot.slane %v2890_v49, %v7670_v35 }
 0x6cd   :  { %v5853_v16 = vpop.permute.xlu1 %5852  ;;  %v6141_v18 = vpack.i.bf16 %v4626_v57, %v3454_v36  ;;  %v9396_v36 = vcombine.low %v9356_v53, %v9355_v58  ;;  %v4918_v58 = vld [vmem:[%s9200_s1 + $0x130] sm:$0xff]  ;;  %v4919_v53 = vld [vmem:[%s9200_s1 + $0x138] sm:$0xff] }
 0x6ce   :  { %5754 = vmatpush1.bf16.msra.mxu0 %v5753_v30  ;;  %v3000_v63 = vsel %vm1561_vm7, %v2897_v42, %v5839_v15  ;;  %v5848_v30 = vpop.permute.xlu0 %5847  ;;  %v5855_v19 = vunpack.i.h.bf16 %v5853_v16  ;;  %v4627_v15 = vld [vmem:[#allocation2 + $0x328] sm:$0xff] }
 0x6cf   :  { %6112 = vrot.lane.b32.xlu1 %v6111_v55, %s6235_s20  ;;  %v2750_v55 = vrot.slane %v2743_v7, %v7670_v35  ;;  %v5849_v57 = vunpack.i.l.bf16 %v5848_v30  ;;  %v5854_v35 = vunpack.i.l.bf16 %v5853_v16  ;;  %v6161_v42 = vpack.i.bf16 %v4619_v40, %v9396_v36 }
 0x6d0   :  { %6107 = vrot.lane.b32.xlu0 %v6106_v37, %s6241_s16  ;;  %v3466_v37 = vcombine.low %v9393_v51, %v8251_v27 }
 0x6d1   :  { %v2854_v9 = vsel %vm1561_vm7, %v2750_v55, %v5840_v60  ;;  %v9397_v55 = vld [vmem:[#allocation55_spill] sm:$0xff] }
 0x6d2   :  { %v6151_v8 = vpack.i.bf16 %v8694_v46, %v3466_v37  ;;  %v2855_v27 = vsel %vm1566_vm0, %v2854_v9, %v5845_v12 }
 0x6d3   :  { %6122 = vrot.lane.b32.xlu1 %v6121_v22, %s6233_s10  ;;  %v5850_v22 = vunpack.i.h.bf16 %v5848_v30 }
 0x6d4   :  { %6117 = vrot.lane.b32.xlu0 %v6116_v2, %s6240_s15  ;;  %v3001_v2 = vsel %vm1566_vm0, %v3000_v63, %v5844_v20  ;;  %v9398_v63 = vld [vmem:[#allocation46_spill] sm:$0xff] }
 0x6d5   :  { %v3002_v49 = vsel %vm1572_vm11, %v3001_v2, %v5849_v57  ;;  %v2856_v25 = vsel %vm1572_vm11, %v2855_v27, %v5850_v22  ;;  %v9399_v12 = vcombine.low %v9397_v55, %v9398_v63  ;;  %v9400_v22 = vcombine.low %v8269_v62, %v8257_v33  ;;  %v4920_v33 = vld [vmem:[%s9200_s1 + $0x140] sm:$0xff]  ;;  %v4921_v62 = vld [vmem:[%s9200_s1 + $0x148] sm:$0xff] }
 0x6d6   :  { %v2857_v16 = vsel %vm1578_vm13, %v2856_v25, %v5855_v19  ;;  %v8751_v19 = vld [vmem:[#allocation2 + $0x329] sm:$0xff]  ;;  %v9404_v25 = vcombine.low %v8271_v59, %v8259_v31  ;;  %v4923_v59 = vld [vmem:[%s9200_s1 + $0x158] sm:$0xff] }
 0x6d7   :  { %6132 = vrot.lane.b32.xlu1 %v6131_v56, %s6236_s21  ;;  %v6156_v30 = vpack.i.bf16 %v4627_v15, %v9399_v12  ;;  %v6171_v57 = vpack.i.bf16 %v4627_v15, %v9400_v22  ;;  %v4922_v31 = vld [vmem:[%s9200_s1 + $0x150] sm:$0xff]  ;;  %v4628_v63 = vld [vmem:[#allocation2 + $0x348] sm:$0xff]  ;;  %v4924_v12 = vld [vmem:[%s9200_s1 + $0x160] sm:$0xff] }
 0x6d8   :  { %6127 = vrot.lane.b32.xlu0 %v6126_v29, %s6242_s17  ;;  %v3003_v29 = vsel %vm1578_vm13, %v3002_v49, %v5854_v35 }
 0x6db   :  { %6142 = vrot.lane.b32.xlu1 %v6141_v18, %s6232_s18 }
 0x6dc   :  { %6137 = vrot.lane.b32.xlu0 %v6136_v23, %s6241_s16 }
 0x6dd   :  { %v5863_v61 = vpop.permute.xlu1 %5862 }
 0x6de   :  { %v5858_v56 = vpop.permute.xlu0 %5857  ;;  %v5864_v21 = vunpack.i.l.bf16 %v5863_v61  ;;  %v5865_v20 = vunpack.i.h.bf16 %v5863_v61  ;;  %v5756_v61 = vpack.c.bf16 %v4919_v53, %v4918_v58  ;;  %v9412_v53 = vld [vmem:[#allocation66_spill] sm:$0xff] }
 0x6df   :  { %6152 = vrot.lane.b32.xlu1 %v6151_v8, %s6235_s20  ;;  %v5860_v43 = vunpack.i.h.bf16 %v5858_v56  ;;  %v5859_v7 = vunpack.i.l.bf16 %v5858_v56  ;;  %v9403_v8 = vcombine.low %v9401_v48, %v9402_v41 }
 0x6e0   :  { %6147 = vrot.lane.b32.xlu0 %v6146_v14, %s6240_s15 }
 0x6e1   :  { %v8718_v52 = vpop.permute.xlu1 %5872  ;;  %v3004_v60 = vsel %vm2047_vm1, %v3003_v29, %v5859_v7  ;;  %v2858_v28 = vsel %vm2047_vm1, %v2857_v16, %v5860_v43  ;;  %v6166_v49 = vpack.i.bf16 %v4627_v15, %v9403_v8  ;;  %v6181_v43 = vpack.i.bf16 %v8751_v19, %v9404_v25  ;;  %v9405_v7 = vld [vmem:[#allocation23_spill] sm:$0xff]  ;;  %v9415_v8 = vld [vmem:[#allocation68_spill] sm:$0xff] }
 0x6e2   :  { %v5868_v18 = vpop.permute.xlu0 %5867  ;;  %v3005_v37 = vsel %vm2049_vm2, %v3004_v60, %v5864_v21  ;;  %v2859_v35 = vsel %vm2049_vm2, %v2858_v28, %v5865_v20  ;;  %v5759_v15 = vpack.c.bf16 %v4921_v62, %v4920_v33  ;;  %v9406_v29 = vcombine.low %v8255_v0, %v8275_v6  ;;  %v9411_v28 = vld [vmem:[#allocation61_spill] sm:$0xff]  ;;  %v4928_v33 = vld [vmem:[%s9200_s1 + $0x180] sm:$0xff]  ;;  %v4929_v62 = vld [vmem:[%s9200_s1 + $0x188] sm:$0xff] }
 0x6e3   :  { %6162 = vrot.lane.b32.xlu1 %v6161_v42, %s6233_s10  ;;  %v5870_v23 = vunpack.i.h.bf16 %v5868_v18  ;;  %v5869_v51 = vunpack.i.l.bf16 %v5868_v18  ;;  %v4620_v42 = vld [vmem:[#allocation2 + $0x347] sm:$0xff]  ;;  %v9407_v0 = vcombine.low %v9360_v44, %v9359_v50  ;;  %v5762_v20 = vpack.c.bf16 %v4923_v59, %v4922_v31 }
 0x6e4   :  { %6157 = vrot.lane.b32.xlu0 %v6156_v30, %s6242_s17  ;;  %v6176_v36 = vpack.i.bf16 %v8751_v19, %v9406_v29  ;;  %v9408_v18 = vcombine.low %v9358_v45, %v9357_v13  ;;  %v4925_v50 = vld [vmem:[%s9200_s1 + $0x168] sm:$0xff]  ;;  %v9409_v45 = vcombine.low %v8261_v1, %v8285_v54  ;;  %v9410_v30 = vld [vmem:[#allocation14_spill] sm:$0xff]  ;;  %v4930_v29 = vld [vmem:[%s9200_s1 + $0x190] sm:$0xff] }
 0x6e5   :  { %v8738_v9 = vpop.permute.xlu1 %5882  ;;  %v3006_v40 = vsel %vm2051_vm6, %v3005_v37, %v5869_v51  ;;  %v2860_v27 = vsel %vm2051_vm6, %v2859_v35, %v5870_v23  ;;  %v6191_v6 = vpack.i.bf16 %v4620_v42, %v9407_v0  ;;  %v3515_v23 = vcombine.low %v9411_v28, %v9410_v30  ;;  %v9413_v37 = vld [vmem:[#allocation63_spill] sm:$0xff]  ;;  %v4926_v35 = vld [vmem:[%s9200_s1 + $0x170] sm:$0xff]  ;;  %v4927_v1 = vld [vmem:[%s9200_s1 + $0x178] sm:$0xff] }
 0x6e6   :  { %v3008_v2 = vrot.slane %v3006_v40, 4  ;;  %v8745_v32 = vpop.permute.xlu0 %5877  ;;  %v6186_v55 = vpack.i.bf16 %v4620_v42, %v9408_v18  ;;  %v6201_v13 = vpack.i.bf16 %v4628_v63, %v9409_v45  ;;  %v5765_v51 = vpack.c.bf16 %v4925_v50, %v4924_v12  ;;  %v4621_v40 = vld [vmem:[#allocation2 + $0x367] sm:$0xff] }
 0x6e7   :  { %6172 = vrot.lane.b32.xlu1 %v6171_v57, %s6232_s18  ;;  %v9414_v22 = vcombine.low %v9412_v53, %v9413_v37  ;;  %v8824_v54 = vld [vmem:[#allocation2 + $0x349] sm:$0xff]  ;;  %v5768_v48 = vpack.c.bf16 %v4927_v1, %v4926_v35  ;;  %v5874_v42 = vunpack.i.l.bf16 %v8718_v52  ;;  %v5875_v0 = vunpack.i.h.bf16 %v8718_v52 }
 0x6e8   :  { %v3012_v56 = vsel %vm2210_vm5, %v2860_v27, %v3008_v2  ;;  %6167 = vrot.lane.b32.xlu0 %v6166_v49, %s6236_s21  ;;  %v9416_v49 = vcombine.low %v8263_v26, %v9415_v8  ;;  %v5771_v26 = vpack.c.bf16 %v4929_v62, %v4928_v33  ;;  %v4186_v59 = vld [vmem:[#allocation2 + $0x7] sm:$0xff]  ;;  %v5880_v52 = vunpack.i.h.bf16 %v8745_v32  ;;  %v4934_v53 = vld [vmem:[%s9200_s1 + $0x1b0] sm:$0xff] }
 0x6e9   :  { %v8762_v14 = vpop.permute.xlu1 %5892  ;;  %3105 = vmatmul.mubr.f32.vlgmr.msra.gmra.mrb[16].mxu1 %v3012_v56  ;;  %v6196_v57 = vpack.i.bf16 %v4628_v63, %v9414_v22  ;;  %v4629_v56 = vld [vmem:[#allocation2 + $0x368] sm:$0xff]  ;;  %v5884_v63 = vunpack.i.l.bf16 %v8738_v9 }
 0x6ea   :  { %5757 = vmatpush1.bf16.msra.mxu1 %v5756_v61  ;;  %5458 = vmatprep.mubr.msk.f32.mxu1 %vm1561_vm7, %v9405_v7  ;;  %v8770_v21 = vpop.permute.xlu0 %5887  ;;  %v6206_v61 = vpack.i.bf16 %v4621_v40, %v3515_v23  ;;  %v6211_v27 = vpack.i.bf16 %v8824_v54, %v9416_v49  ;;  %v9417_v7 = vcombine.low %v8292_v39, %v8296_v3  ;;  %v4933_v18 = vld [vmem:[%s9200_s1 + $0x1a8] sm:$0xff]  ;;  %v5885_v23 = vunpack.i.h.bf16 %v8738_v9 }
 0x6eb   :  { %5758 = vmatprep.subr.bf16.mxu1 %v9342_v11  ;;  %6182 = vrot.lane.b32.xlu1 %v6181_v43, %s6235_s20  ;;  %v5894_v22 = vunpack.i.l.bf16 %v8762_v14  ;;  %v5895_v62 = vunpack.i.h.bf16 %v8762_v14 }
 0x6ec   :  { %6177 = vrot.lane.b32.xlu0 %v6176_v36, %s6241_s16  ;;  %v4931_v36 = vld [vmem:[%s9200_s1 + $0x198] sm:$0xff] }
 0x6ed   :  { %v8785_v60 = vpop.permute.xlu1 %5902  ;;  %v5774_v39 = vpack.c.bf16 %v4931_v36, %v4930_v29  ;;  %v9420_v29 = vld [vmem:[#allocation17_spill] sm:$0xff] }
 0x6ee   :  { %5760 = vmatpush1.bf16.msra.mxu1 %v5759_v15  ;;  %v8790_v16 = vpop.permute.xlu0 %5897  ;;  %v6216_v15 = vpack.i.bf16 %v4629_v56, %v9417_v7 }
 0x6ef   :  { %5761 = vmatprep.subr.bf16.mxu1 %v9342_v11  ;;  %6192 = vrot.lane.b32.xlu1 %v6191_v6, %s6233_s10  ;;  %v5879_v6 = vunpack.i.l.bf16 %v8745_v32  ;;  %v4935_v32 = vld [vmem:[%s9200_s1 + $0x1b8] sm:$0xff] }
 0x6f0   :  { %6187 = vrot.lane.b32.xlu0 %v6186_v55, %s6240_s15  ;;  %v4482_v55 = vsel %vm1561_vm7, %v4186_v59, %v5874_v42  ;;  %v5780_v8 = vpack.c.bf16 %v4935_v32, %v4934_v53 }
 0x6f1   :  { %v8804_v44 = vpop.permute.xlu1 %5912  ;;  %v4490_v28 = vsel %vm1566_vm0, %v4482_v55, %v5879_v6 }
 0x6f2   :  { %5763 = vmatpush1.bf16.msra.mxu1 %v5762_v20  ;;  %v8811_v58 = vpop.permute.xlu0 %5907  ;;  %v4932_v20 = vld [vmem:[%s9200_s1 + $0x1a0] sm:$0xff]  ;;  %v4498_v37 = vsel %vm1572_vm11, %v4490_v28, %v5884_v63  ;;  %v5914_v35 = vunpack.i.l.bf16 %v8804_v44 }
 0x6f3   :  { %5764 = vmatprep.subr.bf16.mxu1 %v9342_v11  ;;  %6202 = vrot.lane.b32.xlu1 %v6201_v13, %s6236_s21  ;;  %v5777_v50 = vpack.c.bf16 %v4933_v18, %v4932_v20  ;;  %v9418_v13 = vld [vmem:[#allocation15_spill] sm:$0xff]  ;;  %v5910_v9 = vunpack.i.h.bf16 %v8811_v58  ;;  %v5905_v18 = vunpack.i.h.bf16 %v8785_v60 }
 0x6f4   :  { %6197 = vrot.lane.b32.xlu0 %v6196_v57, %s6242_s17  ;;  %v4483_v30 = vsel %vm1561_vm7, %v9418_v13, %v5875_v0  ;;  %v5909_v57 = vunpack.i.l.bf16 %v8811_v58  ;;  %v5899_v58 = vunpack.i.l.bf16 %v8790_v16 }
 0x6f5   :  { %v8827_v2 = vpop.permute.xlu1 %5922  ;;  %v4491_v1 = vsel %vm1566_vm0, %v4483_v30, %v5880_v52  ;;  %v4485_v36 = vsel %vm1561_vm7, %v9420_v29, %v5910_v9 }
 0x6f6   :  { %5766 = vmatpush1.bf16.msra.mxu1 %v5765_v51  ;;  %v8829_v41 = vpop.permute.xlu0 %5917  ;;  %v5889_v51 = vunpack.i.l.bf16 %v8770_v21  ;;  %v5925_v6 = vunpack.i.h.bf16 %v8827_v2 }
 0x6f7   :  { %5767 = vmatprep.subr.bf16.mxu1 %v9342_v11  ;;  %6207 = vrot.lane.b32.xlu1 %v6206_v61, %s6240_s15  ;;  %v5890_v61 = vunpack.i.h.bf16 %v8770_v21  ;;  %v5904_v21 = vunpack.i.l.bf16 %v8785_v60  ;;  %v5919_v7 = vunpack.i.l.bf16 %v8829_v41  ;;  %v5920_v42 = vunpack.i.h.bf16 %v8829_v41 }
 0x6f8   :  { %6212 = vrot.lane.b32.xlu0 %v6211_v27, %s6241_s16  ;;  %v4499_v27 = vsel %vm1572_vm11, %v4491_v1, %v5885_v23  ;;  %v4506_v33 = vsel %vm1578_vm13, %v4498_v37, %v5889_v51 }
 0x6f9   :  { %v8844_v25 = vpop.permute.xlu1 %5932  ;;  %v4514_v56 = vsel %vm2047_vm1, %v4506_v33, %v5894_v22  ;;  %v4507_v59 = vsel %vm1578_vm13, %v4499_v27, %v5890_v61 }
 0x6fa   :  { %5769 = vmatpush1.bf16.msra.mxu1 %v5768_v48  ;;  %v8846_v43 = vpop.permute.xlu0 %5927  ;;  %v5915_v48 = vunpack.i.h.bf16 %v8804_v44  ;;  %v4522_v55 = vsel %vm2049_vm2, %v4514_v56, %v5899_v58  ;;  %v4515_v63 = vsel %vm2047_vm1, %v4507_v59, %v5895_v62  ;;  %v5934_v28 = vunpack.i.l.bf16 %v8844_v25 }
 0x6fb   :  { %5770 = vmatprep.subr.bf16.mxu1 %v9342_v11  ;;  %v5929_v52 = vunpack.i.l.bf16 %v8846_v43  ;;  %v5930_v60 = vunpack.i.h.bf16 %v8846_v43  ;;  %v5935_v37 = vunpack.i.h.bf16 %v8844_v25 }
 0x6fc   :  { %6217 = vrot.lane.b32.xlu0 %v6216_v15, %s6242_s17  ;;  %v4493_v0 = vsel %vm1566_vm0, %v4485_v36, %v5915_v48 }
 0x6fd   :  { %v8860_v31 = vpop.permute.xlu1 %5942 }
 0x6fe   :  { %5772 = vmatpush1.bf16.msra.mxu1 %v5771_v26  ;;  %v8862_v3 = vpop.permute.xlu0 %5937  ;;  %v9419_v26 = vld [vmem:[#allocation21_spill] sm:$0xff]  ;;  %v5945_v51 = vunpack.i.h.bf16 %v8860_v31 }
 0x6ff   :  { %5773 = vmatprep.subr.bf16.mxu1 %v9342_v11  ;;  %v4484_v44 = vsel %vm1561_vm7, %v9419_v26, %v5909_v57  ;;  %v5939_v43 = vunpack.i.l.bf16 %v8862_v3  ;;  %v5940_v48 = vunpack.i.h.bf16 %v8862_v3 }
 0x700   :  { %v4492_v14 = vsel %vm1566_vm0, %v4484_v44, %v5914_v35 }
 0x701   :  { %v8875_v12 = vpop.permute.xlu1 %5952  ;;  %v4500_v41 = vsel %vm1572_vm11, %v4492_v14, %v5919_v7 }
 0x702   :  { %5775 = vmatpush1.bf16.msra.mxu1 %v5774_v39  ;;  %v8878_v45 = vpop.permute.xlu0 %5947  ;;  %v5900_v39 = vunpack.i.h.bf16 %v8790_v16  ;;  %v4530_v16 = vsel %vm2051_vm6, %v4522_v55, %v5904_v21  ;;  %v5954_v35 = vunpack.i.l.bf16 %v8875_v12 }
 0x703   :  { %5776 = vmatprep.subr.bf16.mxu1 %v9342_v11  ;;  %v5949_v22 = vunpack.i.l.bf16 %v8878_v45 }
 0x704   :  { %v4523_v53 = vsel %vm2049_vm2, %v4515_v63, %v5900_v39 }
 0x705   :  { %v8895_v40 = vpop.permute.xlu1 %5962  ;;  %v4531_v57 = vsel %vm2051_vm6, %v4523_v53, %v5905_v18 }
 0x706   :  { %5778 = vmatpush1.bf16.msra.mxu1 %v5777_v50  ;;  %v8902_v49 = vpop.permute.xlu0 %5957  ;;  %v5944_v50 = vunpack.i.l.bf16 %v8860_v31  ;;  %v5964_v21 = vunpack.i.l.bf16 %v8895_v40  ;;  %v5965_v39 = vunpack.i.h.bf16 %v8895_v40 }
 0x707   :  { %5779 = vmatprep.subr.bf16.mxu1 %v9342_v11  ;;  %v5924_v11 = vunpack.i.l.bf16 %v8827_v2  ;;  %v4501_v2 = vsel %vm1572_vm11, %v4493_v0, %v5920_v42  ;;  %v5960_v26 = vunpack.i.h.bf16 %v8902_v49 }
 0x708   :  { %v4509_v23 = vsel %vm1578_vm13, %v4501_v2, %v5925_v6  ;;  %v4486_v9 = vsel %vm1561_vm7, %v8436_v47, %v5944_v50  ;;  %v5955_v47 = vunpack.i.h.bf16 %v8875_v12 }
 0x709   :  { %v8914_v15 = vpop.permute.xlu1 %5972  ;;  %v4508_v30 = vsel %vm1578_vm13, %v4500_v41, %v5924_v11  ;;  %v4517_v61 = vsel %vm2047_vm1, %v4509_v23, %v5930_v60  ;;  %v4494_v62 = vsel %vm1566_vm0, %v4486_v9, %v5949_v22  ;;  %v9421_v41 = vld [vmem:[#allocation26_spill] sm:$0xff]  ;;  %v9422_v23 = vld [vmem:[#allocation25_spill] sm:$0xff] }
 0x70a   :  { %5781 = vmatpush1.bf16.msra.mxu1 %v5780_v8  ;;  %v8925_v20 = vpop.permute.xlu0 %5967  ;;  %v4516_v31 = vsel %vm2047_vm1, %v4508_v30, %v5929_v52  ;;  %v4487_v8 = vsel %vm1561_vm7, %v8454_v17, %v5945_v51  ;;  %v4525_v58 = vsel %vm2049_vm2, %v4517_v61, %v5935_v37  ;;  %v4502_v3 = vsel %vm1572_vm11, %v4494_v62, %v5954_v35 }
 0x70b   :  { %v4524_v25 = vsel %vm2049_vm2, %v4516_v31, %v5934_v28  ;;  %v4533_v29 = vsel %vm2051_vm6, %v4525_v58, %v5940_v48  ;;  %v5969_v11 = vunpack.i.l.bf16 %v8925_v20  ;;  %v5975_v63 = vunpack.i.h.bf16 %v8914_v15 }
 0x70c   :  { %v4532_v17 = vsel %vm2051_vm6, %v4524_v25, %v5939_v43  ;;  %v5970_v2 = vunpack.i.h.bf16 %v8925_v20 }
 0x70d   :  { %v8934_v13 = vpop.permute.xlu1 %5982  ;;  %5054 = vmatmul.mubr.f32.vlgmr.msra.gmra.mrb[18].mxu1 %v4530_v16 }
 0x70e   :  { %5459 = vmatprep.mubr.msk.f32.mxu1 %vm1561_vm7, %v8410_v34  ;;  %v5978_v32 = vpop.permute.xlu0 %5977  ;;  %v5950_v34 = vunpack.i.h.bf16 %v8878_v45  ;;  %v5959_v45 = vunpack.i.l.bf16 %v8902_v49  ;;  %v5984_v56 = vunpack.i.l.bf16 %v8934_v13  ;;  %v5985_v55 = vunpack.i.h.bf16 %v8934_v13  ;;  %v4566_v13 = vld [vmem:[#allocation2 + $0x247] sm:$0xff] }
 0x70f   :  { %v5979_v27 = vunpack.i.l.bf16 %v5978_v32  ;;  %v5980_v0 = vunpack.i.h.bf16 %v5978_v32 }
 0x710   :  { %v4510_v42 = vsel %vm1578_vm13, %v4502_v3, %v5959_v45 }
 0x711   :  { %v8953_v1 = vpop.permute.xlu1 %5992  ;;  %5059 = vmatmul.mubr.f32.gmra.mrb[20].mxu1 %v4531_v57  ;;  %v4488_v7 = vsel %vm1561_vm7, %v8502_v24, %v5979_v27  ;;  %v4518_v24 = vsel %vm2047_vm1, %v4510_v42, %v5964_v21  ;;  %v9423_v57 = vld [vmem:[#allocation5_spill] sm:$0xff] }
 0x712   :  { %5460 = vmatprep.mubr.msk.f32.mxu1 %vm1561_vm7, %v8463_v38  ;;  %v5988_v33 = vpop.permute.xlu0 %5987  ;;  %v4495_v38 = vsel %vm1566_vm0, %v4487_v8, %v5950_v34  ;;  %v4496_v49 = vsel %vm1566_vm0, %v4488_v7, %v5984_v56  ;;  %v5994_v59 = vunpack.i.l.bf16 %v8953_v1  ;;  %v4526_v30 = vsel %vm2049_vm2, %v4518_v24, %v5969_v11  ;;  %v9424_v56 = vld [vmem:[#allocation27_spill] sm:$0xff]  ;;  %v4257_v7 = vld [vmem:[#allocation2 + $0x129] sm:$0xff] }
 0x713   :  { %v4503_v44 = vsel %vm1572_vm11, %v4495_v38, %v5955_v47  ;;  %v5989_v36 = vunpack.i.l.bf16 %v5988_v33  ;;  %v5990_v51 = vunpack.i.h.bf16 %v5988_v33  ;;  %v5995_v20 = vunpack.i.h.bf16 %v8953_v1 }
 0x714   :  { %v4511_v18 = vsel %vm1578_vm13, %v4503_v44, %v5960_v26 }
 0x715   :  { %v8971_v12 = vpop.permute.xlu1 %6002  ;;  %5064 = vmatmul.mubr.f32.gmra.mrb[22].mxu1 %v4532_v17  ;;  %v4504_v52 = vsel %vm1572_vm11, %v4496_v49, %v5989_v36  ;;  %v4519_v32 = vsel %vm2047_vm1, %v4511_v18, %v5965_v39  ;;  %v9425_v36 = vld [vmem:[#allocation12_spill] sm:$0xff] }
 0x716   :  { %5461 = vmatprep.mubr.msk.f32.mxu1 %vm1561_vm7, %v8505_v4  ;;  %v8981_v14 = vpop.permute.xlu0 %5997  ;;  %v5974_v4 = vunpack.i.l.bf16 %v8914_v15  ;;  %v4512_v60 = vsel %vm1578_vm13, %v4504_v52, %v5994_v59  ;;  %v6004_v28 = vunpack.i.l.bf16 %v8971_v12  ;;  %v4489_v15 = vsel %vm1561_vm7, %v9422_v23, %v5980_v0 }
 0x717   :  { %v5999_v40 = vunpack.i.l.bf16 %v8981_v14  ;;  %v4497_v22 = vsel %vm1566_vm0, %v4489_v15, %v5985_v55  ;;  %v4527_v25 = vsel %vm2049_vm2, %v4519_v32, %v5970_v2  ;;  %v6000_v47 = vunpack.i.h.bf16 %v8981_v14 }
 0x718   :  { %v4534_v53 = vsel %vm2051_vm6, %v4526_v30, %v5974_v4  ;;  %v4505_v8 = vsel %vm1572_vm11, %v4497_v22, %v5990_v51  ;;  %v4535_v1 = vsel %vm2051_vm6, %v4527_v25, %v5975_v63  ;;  %v6005_v45 = vunpack.i.h.bf16 %v8971_v12  ;;  %v4631_v51 = vld [vmem:[#allocation2 + $0x2a9] sm:$0xff] }
 0x719   :  { %v6013_v6 = vpop.permute.xlu1 %6012  ;;  %5069 = vmatmul.mubr.f32.gmra.mrb[24].mxu1 %v4533_v29  ;;  %v4520_v31 = vsel %vm2047_vm1, %v4512_v60, %v5999_v40  ;;  %v4513_v62 = vsel %vm1578_vm13, %v4505_v8, %v5995_v20  ;;  %v4568_v22 = vld [vmem:[#allocation2 + $0x287] sm:$0xff] }
 0x71a   :  { %5462 = vmatprep.mubr.msk.f32.mxu1 %vm1561_vm7, %v9421_v41  ;;  %v6008_v50 = vpop.permute.xlu0 %6007  ;;  %v6014_v16 = vunpack.i.l.bf16 %v6013_v6  ;;  %v4528_v48 = vsel %vm2049_vm2, %v4520_v31, %v6004_v28  ;;  %v6015_v27 = vunpack.i.h.bf16 %v6013_v6  ;;  %v4521_v12 = vsel %vm2047_vm1, %v4513_v62, %v6000_v47  ;;  %v9427_v8 = vld [vmem:[#allocation19_spill] sm:$0xff] }
 0x71b   :  { %v6009_v43 = vunpack.i.l.bf16 %v6008_v50  ;;  %v6010_v29 = vunpack.i.h.bf16 %v6008_v50  ;;  %v4529_v59 = vsel %vm2049_vm2, %v4521_v12, %v6005_v45  ;;  %v9426_v50 = vld [vmem:[#allocation29_spill] sm:$0xff] }
 0x71c   :  { %v4862_v9 = vsel %vm1561_vm7, %v4566_v13, %v6014_v16  ;;  %v4863_v14 = vsel %vm1561_vm7, %v9425_v36, %v6015_v27 }
 0x71d   :  { %v6023_v37 = vpop.permute.xlu1 %6022  ;;  %5074 = vmatmul.mubr.f32.gmra.mrb[26].mxu1 %v4534_v53  ;;  %v4536_v3 = vsel %vm2051_vm6, %v4528_v48, %v6009_v43  ;;  %v4537_v63 = vsel %vm2051_vm6, %v4529_v59, %v6010_v29 }
 0x71e   :  { %5463 = vmatprep.mubr.msk.f32.mxu1 %vm1561_vm7, %v9423_v57  ;;  %v6018_v35 = vpop.permute.xlu0 %6017  ;;  %v6024_v34 = vunpack.i.l.bf16 %v6023_v37  ;;  %v6025_v42 = vunpack.i.h.bf16 %v6023_v37 }
 0x71f   :  { %v6019_v61 = vunpack.i.l.bf16 %v6018_v35  ;;  %v6020_v26 = vunpack.i.h.bf16 %v6018_v35 }
 0x721   :  { %v6033_v33 = vpop.permute.xlu1 %6032  ;;  %5079 = vmatmul.mubr.f32.gmra.mrb[28].mxu1 %v4535_v1  ;;  %v4870_v58 = vsel %vm1566_vm0, %v4862_v9, %v6019_v61  ;;  %v4871_v24 = vsel %vm1566_vm0, %v4863_v14, %v6020_v26 }
 0x722   :  { %5464 = vmatprep.mubr.msk.f32.mxu1 %vm1561_vm7, %v9424_v56  ;;  %v4878_v21 = vsel %vm1572_vm11, %v4870_v58, %v6024_v34  ;;  %v6028_v17 = vpop.permute.xlu0 %6027  ;;  %v6034_v38 = vunpack.i.l.bf16 %v6033_v33  ;;  %v4879_v55 = vsel %vm1572_vm11, %v4871_v24, %v6025_v42  ;;  %v6035_v41 = vunpack.i.h.bf16 %v6033_v33  ;;  %v9428_v24 = vld [vmem:[#allocation33_spill] sm:$0xff] }
 0x723   :  { %v6029_v44 = vunpack.i.l.bf16 %v6028_v17  ;;  %v6030_v6 = vunpack.i.h.bf16 %v6028_v17 }
 0x725   :  { %v6043_v11 = vpop.permute.xlu1 %6042  ;;  %5084 = vmatmul.mubr.f32.gmra.mrb[30].mxu1 %v4536_v3  ;;  %v4886_v49 = vsel %vm1578_vm13, %v4878_v21, %v6029_v44  ;;  %v4887_v30 = vsel %vm1578_vm13, %v4879_v55, %v6030_v6  ;;  %v9429_v6 = vld [vmem:[#allocation6_spill] sm:$0xff] }
 0x726   :  { %5465 = vmatprep.mubr.msk.f32.mxu1 %vm1561_vm7, %v4257_v7  ;;  %v6038_v39 = vpop.permute.xlu0 %6037  ;;  %v6044_v4 = vunpack.i.l.bf16 %v6043_v11  ;;  %v4894_v0 = vsel %vm2047_vm1, %v4886_v49, %v6034_v38  ;;  %v6045_v28 = vunpack.i.h.bf16 %v6043_v11  ;;  %v4895_v23 = vsel %vm2047_vm1, %v4887_v30, %v6035_v41 }
 0x727   :  { %v6039_v18 = vunpack.i.l.bf16 %v6038_v39  ;;  %v6040_v60 = vunpack.i.h.bf16 %v6038_v39 }
 0x729   :  { %v6053_v52 = vpop.permute.xlu1 %6052  ;;  %5089 = vmatmul.mubr.f32.gmra.mrb[32].mxu1 %v4537_v63  ;;  %v4902_v40 = vsel %vm2049_vm2, %v4894_v0, %v6039_v18  ;;  %v4903_v37 = vsel %vm2049_vm2, %v4895_v23, %v6040_v60  ;;  %v3284_v18 = vcombine.low %v9429_v6, %v9428_v24  ;;  %v4570_v63 = vld [vmem:[#allocation2 + $0x2c7] sm:$0xff] }
 0x72a   :  { %5466 = vmatprep.mubr.msk.f32.mxu1 %vm1561_vm7, %v9426_v50  ;;  %v6048_v16 = vpop.permute.xlu0 %6047  ;;  %v4910_v2 = vsel %vm2051_vm6, %v4902_v40, %v6044_v4  ;;  %v6054_v53 = vunpack.i.l.bf16 %v6053_v52  ;;  %v4911_v20 = vsel %vm2051_vm6, %v4903_v37, %v6045_v28  ;;  %v6055_v31 = vunpack.i.h.bf16 %v6053_v52 }
 0x72b   :  { %v6049_v15 = vunpack.i.l.bf16 %v6048_v16  ;;  %v6050_v43 = vunpack.i.h.bf16 %v6048_v16 }
 0x72d   :  { %v6063_v13 = vpop.permute.xlu1 %6062  ;;  %5094 = vmatmul.mubr.f32.gmra.mrb[34].mxu1 %v4910_v2  ;;  %v4864_v9 = vsel %vm1561_vm7, %v4568_v22, %v6049_v15  ;;  %v4865_v47 = vsel %vm1561_vm7, %v9427_v8, %v6050_v43 }
 0x72e   :  { %v6058_v32 = vpop.permute.xlu0 %6057  ;;  %5467 = vmatprep.mubr.msk.f32.mxu1 %vm1561_vm7, %v4631_v51  ;;  %v4872_v34 = vsel %vm1566_vm0, %v4864_v9, %v6054_v53  ;;  %v6064_v25 = vunpack.i.l.bf16 %v6063_v13  ;;  %v4873_v62 = vsel %vm1566_vm0, %v4865_v47, %v6055_v31  ;;  %v6065_v45 = vunpack.i.h.bf16 %v6063_v13 }
 0x72f   :  { %v6059_v35 = vunpack.i.l.bf16 %v6058_v32  ;;  %v6060_v1 = vunpack.i.h.bf16 %v6058_v32 }
 0x731   :  { %v6073_v57 = vpop.permute.xlu1 %6072  ;;  %5099 = vmatmul.mubr.f32.gmra.mrb[36].mxu1 %v4911_v20  ;;  %v4880_v27 = vsel %vm1572_vm11, %v4872_v34, %v6059_v35  ;;  %v4881_v17 = vsel %vm1572_vm11, %v4873_v62, %v6060_v1 }
 0x732   :  { %v6068_v61 = vpop.permute.xlu0 %6067  ;;  %5468 = vmatprep.mubr.msk.f32.mxu1 %vm1561_vm7, %v8601_v5  ;;  %v4888_v58 = vsel %vm1578_vm13, %v4880_v27, %v6064_v25  ;;  %v4889_v26 = vsel %vm1578_vm13, %v4881_v17, %v6065_v45  ;;  %v6075_v39 = vunpack.i.h.bf16 %v6073_v57  ;;  %v6074_v4 = vunpack.i.l.bf16 %v6073_v57  ;;  %v9431_v17 = vld [vmem:[#allocation47_spill] sm:$0xff] }
 0x733   :  { %v6069_v33 = vunpack.i.l.bf16 %v6068_v61  ;;  %v6070_v38 = vunpack.i.h.bf16 %v6068_v61 }
 0x734   :  { %v4866_v50 = vsel %vm1561_vm7, %v4570_v63, %v6075_v39  ;;  %v3378_v16 = vsel %vm1561_vm7, %v3284_v18, %v6074_v4 }
 0x735   :  { %v6083_v48 = vpop.permute.xlu1 %6082  ;;  %v4896_v5 = vsel %vm2047_vm1, %v4888_v58, %v6069_v33  ;;  %v4897_v11 = vsel %vm2047_vm1, %v4889_v26, %v6070_v38 }
 0x736   :  { %v6078_v56 = vpop.permute.xlu0 %6077  ;;  %v6084_v3 = vunpack.i.l.bf16 %v6083_v48  ;;  %v6085_v44 = vunpack.i.h.bf16 %v6083_v48 }
 0x737   :  { %v6080_v41 = vunpack.i.h.bf16 %v6078_v56  ;;  %v6079_v52 = vunpack.i.l.bf16 %v6078_v56 }
 0x738   :  { %v4904_v29 = vsel %vm2049_vm2, %v4896_v5, %v6084_v3  ;;  %v4905_v59 = vsel %vm2049_vm2, %v4897_v11, %v6085_v44  ;;  %v4571_v5 = vld [vmem:[#allocation2 + $0x2e7] sm:$0xff] }
 0x739   :  { %v6093_v21 = vpop.permute.xlu1 %6092  ;;  %v4874_v60 = vsel %vm1566_vm0, %v4866_v50, %v6080_v41  ;;  %v3380_v28 = vsel %vm1566_vm0, %v3378_v16, %v6079_v52 }
 0x73a   :  { %v6088_v7 = vpop.permute.xlu0 %6087  ;;  %v6095_v2 = vunpack.i.h.bf16 %v6093_v21  ;;  %v6094_v30 = vunpack.i.l.bf16 %v6093_v21  ;;  %v9430_v21 = vld [vmem:[#allocation56_spill] sm:$0xff] }
 0x73b   :  { %v6089_v36 = vunpack.i.l.bf16 %v6088_v7  ;;  %v6090_v42 = vunpack.i.h.bf16 %v6088_v7  ;;  %v9432_v38 = vcombine.low %v9430_v21, %v9431_v17  ;;  %v4573_v21 = vld [vmem:[#allocation2 + $0x327] sm:$0xff] }
 0x73c   :  { %v3382_v51 = vsel %vm1572_vm11, %v3380_v28, %v6094_v30  ;;  %v4882_v53 = vsel %vm1572_vm11, %v4874_v60, %v6095_v2 }
 0x73d   :  { %v9055_v14 = vpop.permute.xlu1 %6102  ;;  %v4912_v12 = vsel %vm2051_vm6, %v4904_v29, %v6089_v36  ;;  %v4913_v55 = vsel %vm2051_vm6, %v4905_v59, %v6090_v42  ;;  %v9433_v36 = vld [vmem:[#allocation41_spill] sm:$0xff] }
 0x73e   :  { %v6098_v49 = vpop.permute.xlu0 %6097  ;;  %5104 = vmatmul.mubr.f32.gmra.mrb[38].mxu1 %v4912_v12  ;;  %v6105_v47 = vunpack.i.h.bf16 %v9055_v14  ;;  %v6104_v1 = vunpack.i.l.bf16 %v9055_v14  ;;  %v9434_v14 = vld [vmem:[#allocation35_spill] sm:$0xff] }
 0x73f   :  { %5469 = vmatprep.mubr.msk.f32.mxu1 %vm1561_vm7, %v8647_v10  ;;  %v6100_v13 = vunpack.i.h.bf16 %v6098_v49  ;;  %v6099_v23 = vunpack.i.l.bf16 %v6098_v49  ;;  %v9435_v42 = vcombine.low %v9433_v36, %v9434_v14 }
 0x740   :  { %v4867_v29 = vsel %vm1561_vm7, %v4571_v5, %v6105_v47 }
 0x741   :  { %v6113_v0 = vpop.permute.xlu1 %6112  ;;  %v3384_v43 = vsel %vm1578_vm13, %v3382_v51, %v6099_v23  ;;  %v3379_v12 = vsel %vm1561_vm7, %v9435_v42, %v6104_v1  ;;  %v9436_v23 = vld [vmem:[#allocation67_spill] sm:$0xff] }
 0x742   :  { %v6108_v40 = vpop.permute.xlu0 %6107  ;;  %5109 = vmatmul.mubr.f32.gmra.mrb[40].mxu1 %v4913_v55  ;;  %v6115_v62 = vunpack.i.h.bf16 %v6113_v0  ;;  %v6114_v45 = vunpack.i.l.bf16 %v6113_v0 }
 0x743   :  { %5470 = vmatprep.mubr.msk.f32.mxu1 %vm1561_vm7, %v8694_v46  ;;  %v6110_v32 = vunpack.i.h.bf16 %v6108_v40  ;;  %v6109_v37 = vunpack.i.l.bf16 %v6108_v40  ;;  %v4890_v46 = vsel %vm1578_vm13, %v4882_v53, %v6100_v13 }
 0x744   :  { %v3381_v11 = vsel %vm1566_vm0, %v3379_v12, %v6114_v45  ;;  %v4875_v49 = vsel %vm1566_vm0, %v4867_v29, %v6115_v62  ;;  %v9442_v29 = vld [vmem:[#allocation57_spill] sm:$0xff] }
 0x745   :  { %v6123_v10 = vpop.permute.xlu1 %6122  ;;  %v3386_v35 = vsel %vm2047_vm1, %v3384_v43, %v6109_v37  ;;  %v4898_v25 = vsel %vm2047_vm1, %v4890_v46, %v6110_v32  ;;  %v9439_v43 = vld [vmem:[#allocation42_spill] sm:$0xff]  ;;  %v9440_v46 = vld [vmem:[#allocation9_spill] sm:$0xff] }
 0x746   :  { %v6118_v15 = vpop.permute.xlu0 %6117  ;;  %v6125_v56 = vunpack.i.h.bf16 %v6123_v10  ;;  %v6124_v3 = vunpack.i.l.bf16 %v6123_v10 }
 0x747   :  { %v6120_v22 = vunpack.i.h.bf16 %v6118_v15  ;;  %v6119_v20 = vunpack.i.l.bf16 %v6118_v15  ;;  %v9437_v15 = vld [vmem:[#allocation64_spill] sm:$0xff] }
 0x748   :  { %v3383_v39 = vsel %vm1572_vm11, %v3381_v11, %v6124_v3  ;;  %v9438_v51 = vcombine.low %v9436_v23, %v9437_v15 }
 0x749   :  { %v6133_v57 = vpop.permute.xlu1 %6132  ;;  %v3388_v61 = vsel %vm2049_vm2, %v3386_v35, %v6119_v20  ;;  %v4906_v48 = vsel %vm2049_vm2, %v4898_v25, %v6120_v22 }
 0x74a   :  { %v6128_v9 = vpop.permute.xlu0 %6127  ;;  %v6135_v26 = vunpack.i.h.bf16 %v6133_v57  ;;  %v6134_v44 = vunpack.i.l.bf16 %v6133_v57 }
 0x74b   :  { %v6130_v31 = vunpack.i.h.bf16 %v6128_v9  ;;  %v6129_v34 = vunpack.i.l.bf16 %v6128_v9  ;;  %v3446_v9 = vcombine.low %v9440_v46, %v9439_v43 }
 0x74c   :  { %v3385_v24 = vsel %vm1578_vm13, %v3383_v39, %v6134_v44 }
 0x74d   :  { %v6143_v8 = vpop.permute.xlu1 %6142  ;;  %v3390_v27 = vsel %vm2051_vm6, %v3388_v61, %v6129_v34  ;;  %v4914_v33 = vsel %vm2051_vm6, %v4906_v48, %v6130_v31  ;;  %v4572_v34 = vld [vmem:[#allocation2 + $0x307] sm:$0xff] }
 0x74e   :  { %v6138_v58 = vpop.permute.xlu0 %6137  ;;  %3650 = vmatmul.mubr.f32.vlgmr.msra.gmra.mrb[28].mxu0 %v3390_v27  ;;  %5114 = vmatmul.mubr.f32.gmra.mrb[42].mxu1 %v4914_v33  ;;  %v6145_v53 = vunpack.i.h.bf16 %v6143_v8  ;;  %v6144_v32 = vunpack.i.l.bf16 %v6143_v8 }
 0x74f   :  { %5454 = vmatprep.mubr.msk.f32.mxu0 %vm1561_vm7, %v9432_v38  ;;  %5471 = vmatprep.mubr.msk.f32.mxu1 %vm1561_vm7, %v8751_v19  ;;  %v4883_v19 = vsel %vm1572_vm11, %v4875_v49, %v6125_v56  ;;  %v6140_v4 = vunpack.i.h.bf16 %v6138_v58  ;;  %v6139_v0 = vunpack.i.l.bf16 %v6138_v58 }
 0x750   :  { %v4891_v6 = vsel %vm1578_vm13, %v4883_v19, %v6135_v26  ;;  %v4868_v25 = vsel %vm1561_vm7, %v4572_v34, %v6145_v53  ;;  %v3540_v61 = vsel %vm1561_vm7, %v3446_v9, %v6144_v32  ;;  %v9444_v32 = vld [vmem:[#allocation69_spill] sm:$0xff] }
 0x751   :  { %v6153_v7 = vpop.permute.xlu1 %6152  ;;  %v3387_v50 = vsel %vm2047_vm1, %v3385_v24, %v6139_v0  ;;  %v4899_v16 = vsel %vm2047_vm1, %v4891_v6, %v6140_v4 }
 0x752   :  { %v6148_v59 = vpop.permute.xlu0 %6147  ;;  %v6155_v22 = vunpack.i.h.bf16 %v6153_v7  ;;  %v6154_v20 = vunpack.i.l.bf16 %v6153_v7  ;;  %v9441_v7 = vld [vmem:[#allocation38_spill] sm:$0xff] }
 0x753   :  { %v6150_v18 = vunpack.i.h.bf16 %v6148_v59  ;;  %v6149_v55 = vunpack.i.l.bf16 %v6148_v59  ;;  %v9443_v36 = vcombine.low %v9441_v7, %v9442_v29 }
 0x754   :  { %v4876_v8 = vsel %vm1566_vm0, %v4868_v25, %v6155_v22 }
 0x755   :  { %v6163_v63 = vpop.permute.xlu1 %6162  ;;  %v3389_v2 = vsel %vm2049_vm2, %v3387_v50, %v6149_v55  ;;  %v4907_v30 = vsel %vm2049_vm2, %v4899_v16, %v6150_v18 }
 0x756   :  { %v6158_v41 = vpop.permute.xlu0 %6157  ;;  %v6165_v35 = vunpack.i.h.bf16 %v6163_v63  ;;  %v6164_v31 = vunpack.i.l.bf16 %v6163_v63 }
 0x757   :  { %v6160_v52 = vunpack.i.h.bf16 %v6158_v41  ;;  %v6159_v40 = vunpack.i.l.bf16 %v6158_v41 }
 0x758   :  { %v4884_v58 = vsel %vm1572_vm11, %v4876_v8, %v6165_v35 }
 0x759   :  { %v6173_v10 = vpop.permute.xlu1 %6172  ;;  %v3391_v60 = vsel %vm2051_vm6, %v3389_v2, %v6159_v40  ;;  %v4915_v28 = vsel %vm2051_vm6, %v4907_v30, %v6160_v52  ;;  %v4637_v40 = vld [vmem:[#allocation2 + $0x369] sm:$0xff] }
 0x75a   :  { %v6168_v13 = vpop.permute.xlu0 %6167  ;;  %3655 = vmatmul.mubr.f32.gmra.mrb[30].mxu0 %v3391_v60  ;;  %5119 = vmatmul.mubr.f32.gmra.mrb[44].mxu1 %v4915_v28  ;;  %v6175_v48 = vunpack.i.h.bf16 %v6173_v10  ;;  %v6174_v47 = vunpack.i.l.bf16 %v6173_v10 }
 0x75b   :  { %5455 = vmatprep.mubr.msk.f32.mxu0 %vm1561_vm7, %v9438_v51  ;;  %5472 = vmatprep.mubr.msk.f32.mxu1 %vm1561_vm7, %v8824_v54  ;;  %v3542_v54 = vsel %vm1566_vm0, %v3540_v61, %v6154_v20  ;;  %v6170_v27 = vunpack.i.h.bf16 %v6168_v13  ;;  %v6169_v33 = vunpack.i.l.bf16 %v6168_v13  ;;  %v5450_v61 = vld [vmem:[%s9201_s2 + $0x8] ss:$0 sm:$0xff] }
 0x75c   :  { %v3544_v45 = vsel %vm1572_vm11, %v3542_v54, %v6164_v31  ;;  %v4869_v44 = vsel %vm1561_vm7, %v4573_v21, %v6175_v48  ;;  %v3541_v14 = vsel %vm1561_vm7, %v9443_v36, %v6174_v47  ;;  %v9156_v54 = vld [vmem:[%s9201_s2 + $0x6] ss:$0 sm:$0xff] }
 0x75d   :  { %v6183_v37 = vpop.permute.xlu1 %6182  ;;  %v4892_v49 = vsel %vm1578_vm13, %v4884_v58, %v6170_v27  ;;  %v3546_v59 = vsel %vm1578_vm13, %v3544_v45, %v6169_v33 }
 0x75e   :  { %v6178_v57 = vpop.permute.xlu0 %6177  ;;  %v6185_v17 = vunpack.i.h.bf16 %v6183_v37  ;;  %v6184_v38 = vunpack.i.l.bf16 %v6183_v37  ;;  %v9445_v37 = vld [vmem:[#allocation70_spill] sm:$0xff] }
 0x75f   :  { %v6180_v56 = vunpack.i.h.bf16 %v6178_v57  ;;  %v6179_v3 = vunpack.i.l.bf16 %v6178_v57  ;;  %v9446_v22 = vcombine.low %v9444_v32, %v9445_v37 }
 0x760   :  { %v3543_v55 = vsel %vm1566_vm0, %v3541_v14, %v6184_v38  ;;  %v4877_v63 = vsel %vm1566_vm0, %v4869_v44, %v6185_v17 }
 0x761   :  { %v6193_v1 = vpop.permute.xlu1 %6192  ;;  %v3548_v6 = vsel %vm2047_vm1, %v3546_v59, %v6179_v3  ;;  %v4900_v18 = vsel %vm2047_vm1, %v4892_v49, %v6180_v56 }
 0x762   :  { %v6188_v62 = vpop.permute.xlu0 %6187  ;;  %v6195_v42 = vunpack.i.h.bf16 %v6193_v1  ;;  %v6194_v12 = vunpack.i.l.bf16 %v6193_v1 }
 0x763   :  { %v6190_v5 = vunpack.i.h.bf16 %v6188_v62  ;;  %v6189_v26 = vunpack.i.l.bf16 %v6188_v62 }
 0x764   :  { %v3545_v50 = vsel %vm1572_vm11, %v3543_v55, %v6194_v12  ;;  %v4885_v16 = vsel %vm1572_vm11, %v4877_v63, %v6195_v42 }
 0x765   :  { %v6203_v11 = vpop.permute.xlu1 %6202  ;;  %v3550_v41 = vsel %vm2049_vm2, %v3548_v6, %v6189_v26  ;;  %v4908_v52 = vsel %vm2049_vm2, %v4900_v18, %v6190_v5 }
 0x766   :  { %v6198_v39 = vpop.permute.xlu0 %6197  ;;  %v6205_v19 = vunpack.i.h.bf16 %v6203_v11  ;;  %v6204_v4 = vunpack.i.l.bf16 %v6203_v11 }
 0x767   :  { %v6200_v0 = vunpack.i.h.bf16 %v6198_v39  ;;  %v6199_v24 = vunpack.i.l.bf16 %v6198_v39 }
 0x768   :  { %v3547_v60 = vsel %vm1578_vm13, %v3545_v50, %v6204_v4  ;;  %v4893_v28 = vsel %vm1578_vm13, %v4885_v16, %v6205_v19 }
 0x769   :  { %v3552_v2 = vsel %vm2051_vm6, %v3550_v41, %v6199_v24  ;;  %v4916_v30 = vsel %vm2051_vm6, %v4908_v52, %v6200_v0  ;;  %v6208_v10 = vpop.permute.xlu1 %6207 }
 0x76a   :  { %v6213_v13 = vpop.permute.xlu0 %6212  ;;  %3660 = vmatmul.mubr.f32.gmra.mrb[32].mxu0 %v3552_v2  ;;  %5124 = vmatmul.mubr.f32.gmra.mrb[46].mxu1 %v4916_v30  ;;  %v6210_v23 = vunpack.i.h.bf16 %v6208_v10  ;;  %v6209_v15 = vunpack.i.l.bf16 %v6208_v10 }
 0x76b   :  { %v6215_v51 = vunpack.i.h.bf16 %v6213_v13  ;;  %v6214_v53 = vunpack.i.l.bf16 %v6213_v13  ;;  %5456 = vmatprep.mubr.msk.f32.mxu0 %vm1561_vm7, %v9446_v22  ;;  %5473 = vmatprep.mubr.msk.f32.mxu1 %vm1561_vm7, %v4637_v40 }
 0x76d   :  { %v3549_v20 = vsel %vm2047_vm1, %v3547_v60, %v6214_v53  ;;  %v4901_v57 = vsel %vm2047_vm1, %v4893_v28, %v6215_v51 }
 0x76e   :  { %v6218_v43 = vpop.permute.xlu0 %6217  ;;  %v3551_v46 = vsel %vm2049_vm2, %v3549_v20, %v6209_v15  ;;  %v4909_v9 = vsel %vm2049_vm2, %v4901_v57, %v6210_v23 }
 0x76f   :  { %v6220_v35 = vunpack.i.h.bf16 %v6218_v43  ;;  %v6219_v31 = vunpack.i.l.bf16 %v6218_v43 }
 0x771   :  { %v3553_v34 = vsel %vm2051_vm6, %v3551_v46, %v6219_v31  ;;  %v4917_v25 = vsel %vm2051_vm6, %v4909_v9, %v6220_v35 }
 0x772   :  { %3665 = vmatmul.mubr.f32.gmra.mrb[34].mxu0 %v3553_v34  ;;  %5129 = vmatmul.mubr.f32.gmra.mrb[48].mxu1 %v4917_v25  ;;  %v5452_v25 = vld [vmem:[%s9201_s2 + $0x7] ss:$0 sm:$0xff] }
 0x7bc   :  { %v3106_v48 = vpop.f32.mrb[16].mxu1 }
 0x7bd   :  { %v3107_v47 = vadd.f32 %v5450_v61, %v3106_v48  ;;  %v3108_v1 = vpop.f32.mrb[17].mxu1 }
 0x7bf   :  { %5202 = vxpose.xlu1.b32.start.end [1/1] (short) (narrow) %v3107_v47, 16 }
 0x7e0   :  { %v5055_v8 = vpop.f32.mrb[18].mxu1 }
 0x7e1   :  { %v5056_v27 = vadd.f32 %v9156_v54, %v5055_v8  ;;  %v5057_v33 = vpop.f32.mrb[19].mxu1 }
 0x7e3   :  { %5134 = vxpose.xlu0.b32.start [1/16] (narrow) %v5056_v27, 16 }
 0x7e4   :  { %v5060_v62 = vpop.f32.mrb[20].mxu1 }
 0x7e5   :  { %v5061_v45 = vadd.f32 %v9156_v54, %v5060_v62  ;;  %v5062_v58 = vpop.f32.mrb[21].mxu1 }
 0x7e7   :  { %5135 = vxpose.xlu0.b32.cont [2/16] (narrow) %v5061_v45, 16 }
 0x7e8   :  { %v5065_v56 = vpop.f32.mrb[22].mxu1 }
 0x7e9   :  { %v5066_v3 = vadd.f32 %v9156_v54, %v5065_v56  ;;  %v5067_v21 = vpop.f32.mrb[23].mxu1 }
 0x7eb   :  { %5136 = vxpose.xlu0.b32.cont [3/16] (narrow) %v5066_v3, 16 }
 0x7ec   :  { %v5070_v17 = vpop.f32.mrb[24].mxu1 }
 0x7ed   :  { %v5071_v38 = vadd.f32 %v9156_v54, %v5070_v17  ;;  %v5072_v5 = vpop.f32.mrb[25].mxu1 }
 0x7ef   :  { %5137 = vxpose.xlu0.b32.cont [4/16] (narrow) %v5071_v38, 16 }
 0x7f0   :  { %v5075_v26 = vpop.f32.mrb[26].mxu1 }
 0x7f1   :  { %v5076_v44 = vadd.f32 %v9156_v54, %v5075_v26  ;;  %v5077_v7 = vpop.f32.mrb[27].mxu1 }
 0x7f3   :  { %5138 = vxpose.xlu0.b32.cont [5/16] (narrow) %v5076_v44, 16 }
 0x7f4   :  { %v5080_v29 = vpop.f32.mrb[28].mxu1 }
 0x7f5   :  { %v5081_v36 = vadd.f32 %v9156_v54, %v5080_v29  ;;  %v5082_v14 = vpop.f32.mrb[29].mxu1 }
 0x7f7   :  { %5139 = vxpose.xlu0.b32.cont [6/16] (narrow) %v5081_v36, 16 }
 0x7f8   :  { %v5085_v42 = vpop.f32.mrb[30].mxu1 }
 0x7f9   :  { %v5086_v12 = vadd.f32 %v9156_v54, %v5085_v42  ;;  %v5087_v11 = vpop.f32.mrb[31].mxu1 }
 0x7fb   :  { %5140 = vxpose.xlu0.b32.cont [7/16] (narrow) %v5086_v12, 16 }
 0x7fc   :  { %v5090_v49 = vpop.f32.mrb[32].mxu1 }
 0x7fd   :  { %v5091_v59 = vadd.f32 %v9156_v54, %v5090_v49  ;;  %v5092_v39 = vpop.f32.mrb[33].mxu1 }
 0x7ff   :  { %5141 = vxpose.xlu0.b32.cont [8/16] (narrow) %v5091_v59, 16 }
 0x800   :  { %v5095_v19 = vpop.f32.mrb[34].mxu1 }
 0x801   :  { %v5096_v4 = vadd.f32 %v9156_v54, %v5095_v19  ;;  %v5097_v0 = vpop.f32.mrb[35].mxu1 }
 0x803   :  { %5142 = vxpose.xlu0.b32.cont [9/16] (narrow) %v5096_v4, 16 }
 0x804   :  { %v5100_v24 = vpop.f32.mrb[36].mxu1 }
 0x805   :  { %v5101_v6 = vadd.f32 %v9156_v54, %v5100_v24  ;;  %v5102_v18 = vpop.f32.mrb[37].mxu1 }
 0x807   :  { %5143 = vxpose.xlu0.b32.cont [10/16] (narrow) %v5101_v6, 16 }
 0x811   :  { %v5105_v55 = vpop.f32.mrb[38].mxu1 }
 0x812   :  { %v5106_v63 = vadd.f32 %v9156_v54, %v5105_v55  ;;  %v5107_v41 = vpop.f32.mrb[39].mxu1 }
 0x814   :  { %5144 = vxpose.xlu0.b32.cont [11/16] (narrow) %v5106_v63, 16 }
 0x815   :  { %v5110_v52 = vpop.f32.mrb[40].mxu1 }
 0x816   :  { %v5111_v40 = vadd.f32 %v9156_v54, %v5110_v52  ;;  %v5112_v50 = vpop.f32.mrb[41].mxu1 }
 0x818   :  { %5145 = vxpose.xlu0.b32.cont [12/16] (narrow) %v5111_v40, 16 }
 0x821   :  { %v3651_v16 = vpop.f32.mrb[28].mxu0  ;;  %v5115_v2 = vpop.f32.mrb[42].mxu1 }
 0x822   :  { %v5116_v30 = vadd.f32 %v9156_v54, %v5115_v2  ;;  %v3653_v10 = vpop.f32.mrb[29].mxu0  ;;  %v5117_v60 = vpop.f32.mrb[43].mxu1  ;;  %v3652_v61 = vadd.f32 %v5452_v25, %v3651_v16 }
 0x824   :  { %5146 = vxpose.xlu0.b32.cont [13/16] (narrow) %v5116_v30, 16 }
 0x82d   :  { %v3656_v28 = vpop.f32.mrb[30].mxu0  ;;  %v5120_v13 = vpop.f32.mrb[44].mxu1 }
 0x82e   :  { %v5121_v23 = vadd.f32 %v9156_v54, %v5120_v13  ;;  %v3658_v15 = vpop.f32.mrb[31].mxu0  ;;  %v5122_v51 = vpop.f32.mrb[45].mxu1  ;;  %v3657_v48 = vadd.f32 %v5452_v25, %v3656_v28 }
 0x830   :  { %5147 = vxpose.xlu0.b32.cont [14/16] (narrow) %v5121_v23, 16 }
 0x83d   :  { %v3661_v53 = vpop.f32.mrb[32].mxu0  ;;  %v5125_v32 = vpop.f32.mrb[46].mxu1 }
 0x83e   :  { %v5126_v37 = vadd.f32 %v9156_v54, %v5125_v32  ;;  %v3663_v22 = vpop.f32.mrb[33].mxu0  ;;  %v5127_v20 = vpop.f32.mrb[47].mxu1  ;;  %v3662_v47 = vadd.f32 %v5452_v25, %v3661_v53 }
 0x83f   :  { %v5218_v57 = vpop.trf.xlu1 }
 0x840   :  { %5236 = vrot.lane.b32.xlu1 %v5218_v57, %s6235_s20  ;;  %5148 = vxpose.xlu0.b32.cont [15/16] (narrow) %v5126_v37, 16 }
 0x843   :  { %v5219_v43 = vpop.trf.xlu1 }
 0x844   :  { %5238 = vrot.lane.b32.xlu1 %v5219_v43, %s6235_s20 }
 0x845   :  { %v3666_v46 = vpop.f32.mrb[34].mxu0  ;;  %v5130_v9 = vpop.f32.mrb[48].mxu1 }
 0x846   :  { %v5131_v35 = vadd.f32 %v9156_v54, %v5130_v9  ;;  %v3668_v31 = vpop.f32.mrb[35].mxu0  ;;  %v5132_v34 = vpop.f32.mrb[49].mxu1  ;;  %v3667_v1 = vadd.f32 %v5452_v25, %v3666_v46 }
 0x848   :  { %5149 = vxpose.xlu0.b32.end [16/16] (narrow) %v5131_v35, 16 }
 0x86d   :  { %5168 = vxpose.xlu1.b32.start [1/4] (short) (narrow) %v3652_v61, 16 }
 0x871   :  { %5169 = vxpose.xlu1.b32.cont [2/4] (short) (narrow) %v3657_v48, 16 }
 0x875   :  { %5170 = vxpose.xlu1.b32.cont [3/4] (short) (narrow) %v3662_v47, 16 }
 0x879   :  { %5171 = vxpose.xlu1.b32.end [4/4] (short) (narrow) %v3667_v1, 16 }
 0x88c   :  { %v5150_v8 = vpop.trf.xlu0 }
 0x88d   :  { %5166 = vst [vmem:[%s9202_s3] sm:$0xff] %v5150_v8 }
 0x890   :  { %v5151_v54 = vpop.trf.xlu0 }
 0x891   :  { %5167 = vst [vmem:[%s9202_s3 + $0x10] sm:$0xff] %v5151_v54 }
 0x8b2   :  { %v5237_v27 = vpop.permute.xlu1 %5236 }
 0x8b6   :  { %v5239_v33 = vpop.permute.xlu1 %5238 }
 0x8ed   :  { %v5184_v62 = vpop.trf.xlu1 }
 0x8ee   :  { %5200 = vst.msk [vmem:[%s9202_s3 + $0x8] sm:$0xff] %vm1566_vm0, %v5184_v62 }
 0x8ef   :  { %5243 = vst.msk [vmem:[%s9202_s3 + $0x8] sm:$0xff] %vm5242_vm4, %v5237_v27 }
 0x8f1   :  { %v5185_v45 = vpop.trf.xlu1 }
 0x8f2   :  { %5201 = vst.msk [vmem:[%s9202_s3 + $0x18] sm:$0xff] %vm1566_vm0, %v5185_v45 }
 0x8f3   :  { %5244 = vst.msk [vmem:[%s9202_s3 + $0x18] sm:$0xff] %vm5242_vm4, %v5239_v33 }

</bundles_post_ra>
